<compile_context>
chip_gen: v6e
topology: v6e:2x2x1
jax: 0.10.0
libtpu: 0.0.40
codegen_flags: <defaults>
</compile_context>

<pallas_src>
import jax
import jax.numpy as jnp
from jax import lax
from jax.experimental import pallas as pl
from jax.experimental.pallas import tpu as pltpu

LANE = 128
SUBLANE = 8


# ----------------------------- small helpers -------------------------------

def _round_up(x, m):
    return ((x + m - 1) // m) * m


def _pad_axis(a, axis, new_size):
    pad = new_size - a.shape[axis]
    if pad <= 0:
        return a
    widths = [(0, 0)] * a.ndim
    widths[axis] = (0, pad)
    return jnp.pad(a, widths)


def _pad_gate_cols(w, h, hp):
    """(..., 4*h) -> (..., 4*hp): zero-pad each [i,f,g,o] gate block to lane-aligned width."""
    parts = [w[..., k * h:(k + 1) * h] for k in range(4)]
    return jnp.concatenate([_pad_axis(p, -1, hp) for p in parts], axis=-1)


def _sigmoid(x):
    # tanh form: single EUP op instead of exp + full-precision divide on the VPU.
    return 0.5 * (jnp.tanh(0.5 * x) + 1.0)


def _lstm_cell(z, h, c, whh, hn):
    """One LSTM step given precomputed input projection z_in (bias folded in)."""
    z = z + jnp.dot(h, whh, preferred_element_type=jnp.float32)
    i = _sigmoid(z[:, 0 * hn:1 * hn])       # lane-aligned slices (hn % 128 == 0)
    f = _sigmoid(z[:, 1 * hn:2 * hn])
    g = jnp.tanh(z[:, 2 * hn:3 * hn])
    o = _sigmoid(z[:, 3 * hn:4 * hn])
    c_new = f * c + i * g
    h_new = o * jnp.tanh(c_new)
    return h_new, c_new


# ------------------------------ Pallas kernels ------------------------------

def encoder_kernel(x_ref, len_ref, w_in_ref, b_in_ref, whf_ref, whb_ref,
                   hfin_ref, cfin_ref, zf_ref, zb_ref):
    """Bidirectional single-layer LSTM (packed-sequence semantics via length mask).

    Only the final (h, c) of each direction leave the kernel; per-step outputs are
    not materialized because the no-attention decoder never reads them.
    """
    S, B, G = zf_ref.shape                       # G = 4 * H2p
    H2p = whf_ref.shape[0]

    # One fused (fwd | bwd) MXU-shaped input projection for all timesteps, bias folded.
    zin = (jnp.dot(x_ref[...], w_in_ref[...], preferred_element_type=jnp.float32)
           + b_in_ref[...])                      # (S*B, 2*G)
    zf_ref[...] = zin[:, :G].reshape(S, B, G)
    zb_ref[...] = zin[:, G:].reshape(S, B, G)

    lens = len_ref[...]                          # (B, 1) int32
    whf = whf_ref[...]
    whb = whb_ref[...]
    zero = jnp.zeros((B, H2p), jnp.float32)

    def masked_step(z_t, h, c, wh, t):
        h_new, c_new = _lstm_cell(z_t, h, c, wh, H2p)
        valid = lens > t                         # (B, 1) bool, broadcasts over lanes
        return jnp.where(valid, h_new, h), jnp.where(valid, c_new, c)

    def fwd_body(t, carry):
        h, c = carry
        return masked_step(zf_ref[t], h, c, whf, t)

    def bwd_body(s, carry):
        h, c = carry
        t = S - 1 - s
        return masked_step(zb_ref[t], h, c, whb, t)

    unroll = S <= 16
    h_f, c_f = lax.fori_loop(0, S, fwd_body, (zero, zero), unroll=unroll)
    h_b, c_b = lax.fori_loop(0, S, bwd_body, (zero, zero), unroll=unroll)

    hfin_ref[0] = h_f
    hfin_ref[1] = h_b
    cfin_ref[0] = c_f
    cfin_ref[1] = c_b


def decoder_kernel(y_ref, h0_ref, c0_ref, wih_ref, b_ref, whh_ref,
                   out_ref, hout_ref, cout_ref, zin_ref):
    """Unidirectional single-layer LSTM decoder (no attention)."""
    # TODO(synk): attention-variant decoder (attn flag in skeleton) not implemented.
    T, B, Hp = out_ref.shape

    # Hoisted input projection (one matmul for all T steps), bias folded in.
    zin = (jnp.dot(y_ref[...], wih_ref[...], preferred_element_type=jnp.float32)
           + b_ref[...])                         # (T*B, 4*Hp)
    zin_ref[...] = zin.reshape(T, B, 4 * Hp)

    whh = whh_ref[...]

    def body(t, carry):
        h, c = carry
        h, c = _lstm_cell(zin_ref[t], h, c, whh, Hp)
        out_ref[t] = h                           # lane-dense (B, Hp) store
        return h, c

    h, c = lax.fori_loop(0, T, body, (h0_ref[...], c0_ref[...]), unroll=T <= 16)
    hout_ref[...] = h
    cout_ref[...] = c


def generator_kernel(x_ref, w_ref, b_ref, o_ref):
    """Tied-weight output projection: logits = x @ E^T + b, weight consumed untransposed."""
    o_ref[...] = (lax.dot_general(
        x_ref[...], w_ref[...],
        dimension_numbers=(((1,), (1,)), ((), ())),
        preferred_element_type=jnp.float32) + b_ref[...])


# ------------------------------ pallas wrappers -----------------------------

_VMEM = pl.BlockSpec(memory_space=pltpu.MemorySpace.VMEM)


def run_encoder(x_tbe, lens_col, p):
    S, B, E = x_tbe.shape
    H2p = p["w_hh_f"].shape[0]
    G = 4 * H2p
    out_shape = (jax.ShapeDtypeStruct((2, B, H2p), jnp.float32),
                 jax.ShapeDtypeStruct((2, B, H2p), jnp.float32))
    return pl.pallas_call(
        encoder_kernel,
        out_shape=out_shape,
        in_specs=[_VMEM] * 6,
        out_specs=(_VMEM, _VMEM),
        scratch_shapes=[pltpu.VMEM((S, B, G), jnp.float32),
                        pltpu.VMEM((S, B, G), jnp.float32)],
    )(x_tbe.reshape(S * B, E), lens_col,
      p["w_in_enc"], p["b_in_enc"], p["w_hh_f"], p["w_hh_b"])


def run_decoder(y_tbe, h0, c0, p):
    T, B, E = y_tbe.shape
    Hp = p["w_hh_d"].shape[0]
    out_shape = (jax.ShapeDtypeStruct((T, B, Hp), jnp.float32),
                 jax.ShapeDtypeStruct((B, Hp), jnp.float32),
                 jax.ShapeDtypeStruct((B, Hp), jnp.float32))
    return pl.pallas_call(
        decoder_kernel,
        out_shape=out_shape,
        in_specs=[_VMEM] * 6,
        out_specs=(_VMEM, _VMEM, _VMEM),
        scratch_shapes=[pltpu.VMEM((T, B, 4 * Hp), jnp.float32)],
    )(y_tbe.reshape(T * B, E), h0, c0, p["w_ih_d"], p["b_d"], p["w_hh_d"])


def _pick_vocab_tile(v):
    for t in (2048, 1024, 512, 256, 128):
        if v % t == 0:
            return t
    return v  # small / ragged vocab: single full-width tile


def run_generator(x_flat, emb, bias):
    N, H = x_flat.shape
    V = emb.shape[0]
    tv = _pick_vocab_tile(V)
    return pl.pallas_call(
        generator_kernel,
        out_shape=jax.ShapeDtypeStruct((N, V), jnp.float32),
        grid=(V // tv,),
        in_specs=[pl.BlockSpec((N, H), lambda j: (0, 0)),
                  pl.BlockSpec((tv, H), lambda j: (j, 0)),
                  pl.BlockSpec((1, tv), lambda j: (0, j))],
        out_specs=pl.BlockSpec((N, tv), lambda j: (0, j)),
        compiler_params=pltpu.CompilerParams(
            dimension_semantics=("parallel",)),
    )(x_flat, emb, bias)


# ------------------------------ Seq2Seq forward -----------------------------

def seq2seq_forward(params, src, src_lengths, tgt, dec_hidden=None):
    p = params
    H = p["hidden"]
    H2 = H // 2
    Hp = p["Hp"]
    B, S = src.shape
    T = tgt.shape[1]
    Bp = _round_up(max(B, SUBLANE), SUBLANE)      # sublane-aligned batch

    # Embedding gathers in the wrapper, produced time-major; pad batch to Bp.
    src_emb = _pad_axis(p["enc_embedding"][src.T], 1, Bp)         # (S, Bp, H)
    tgt_emb = _pad_axis(p["dec_embedding"][tgt.T], 1, Bp)         # (T, Bp, H)
    lens = _pad_axis(src_lengths.reshape(-1, 1).astype(jnp.int32), 0, Bp)

    hfin, cfin = run_encoder(src_emb, lens, p)                    # (2, Bp, H2p) each

    if dec_hidden is None:
        h0 = jnp.concatenate([hfin[0, :, :H2], hfin[1, :, :H2]], axis=-1)  # (Bp, H)
        c0 = jnp.concatenate([cfin[0, :, :H2], cfin[1, :, :H2]], axis=-1)
    else:
        h0 = _pad_axis(dec_hidden[0], 0, Bp)
        c0 = _pad_axis(dec_hidden[1], 0, Bp)
    h0 = _pad_axis(h0, 1, Hp)
    c0 = _pad_axis(c0, 1, Hp)

    dec_out, h_dec, c_dec = run_decoder(tgt_emb, h0, c0, p)       # (T, Bp, Hp)

    # Drop batch/hidden padding, flatten to (B*T, H) for the tied generator.
    x = jnp.transpose(dec_out, (1, 0, 2))[:B, :, :H].reshape(B * T, H)
    logits = run_generator(x, p["dec_embedding"], p["gen_b"])     # weight untransposed
    logits = logits.reshape(B, T, -1)
    return logits, (h_dec[:B, :H], c_dec[:B, :H])


# --------------------------------- params -----------------------------------

def init_params(key, src_vocab, tgt_vocab, hidden, pad_idx=0):
    H = hidden
    H2 = H // 2
    H2p = _round_up(H2, LANE)        # per-direction encoder gate width (lane-aligned)
    Hp = _round_up(H, LANE)          # decoder gate width (lane-aligned)
    ks = jax.random.split(key, 12)

    def nrm(k, shape, scale=0.1):
        return (scale * jax.random.normal(k, shape)).astype(jnp.float32)

    # Raw parameters in the "PyTorch transposed" layout: (in, 4*h), gate order [i,f,g,o].
    w_ih_f = nrm(ks[2], (H, 4 * H2))
    w_hh_f = nrm(ks[3], (H2, 4 * H2))
    b_f = nrm(ks[4], (1, 4 * H2))
    w_ih_b = nrm(ks[5], (H, 4 * H2))
    w_hh_b = nrm(ks[6], (H2, 4 * H2))
    b_b = nrm(ks[7], (1, 4 * H2))
    w_ih_d = nrm(ks[8], (H, 4 * H))
    w_hh_d = nrm(ks[9], (H, 4 * H))
    b_d = nrm(ks[10], (1, 4 * H))

    enc_emb = nrm(ks[0], (src_vocab, H)).at[pad_idx].set(0.0)
    dec_emb = nrm(ks[1], (tgt_vocab, H)).at[pad_idx].set(0.0)

    params = {
        "hidden": H, "H2p": H2p, "Hp": Hp,
        "enc_embedding": enc_emb,
        "dec_embedding": dec_emb,
        # Encoder: fused fwd|bwd input projection, gates zero-padded to H2p lanes.
        "w_in_enc": jnp.concatenate([_pad_gate_cols(w_ih_f, H2, H2p),
                                     _pad_gate_cols(w_ih_b, H2, H2p)], axis=1),
        "b_in_enc": jnp.concatenate([_pad_gate_cols(b_f, H2, H2p),
                                     _pad_gate_cols(b_b, H2, H2p)], axis=1),
        "w_hh_f": _pad_axis(_pad_gate_cols(w_hh_f, H2, H2p), 0, H2p),
        "w_hh_b": _pad_axis(_pad_gate_cols(w_hh_b, H2, H2p), 0, H2p),
        # Decoder (hidden = H, input = H since embedding dim == hidden).
        "w_ih_d": _pad_gate_cols(w_ih_d, H, Hp),
        "w_hh_d": _pad_axis(_pad_gate_cols(w_hh_d, H, Hp), 0, Hp),
        "b_d": _pad_gate_cols(b_d, H, Hp),
        # Generator bias (weight is tied to dec_embedding, consumed untransposed).
        "gen_b": nrm(ks[11], (1, tgt_vocab)),
    }
    return params


# --------------------------------- main --------------------------------------

if __name__ == "__main__":
    B, S, T = 2, 8, 8
    HIDDEN = 32
    SRC_VOCAB, TGT_VOCAB = 20, 24
    PAD = 0

    key = jax.random.PRNGKey(0)
    k_par, k_src, k_tgt = jax.random.split(key, 3)
    params = init_params(k_par, SRC_VOCAB, TGT_VOCAB, HIDDEN, pad_idx=PAD)

    src = jax.random.randint(k_src, (B, S), 1, SRC_VOCAB, dtype=jnp.int32)
    src_lengths = jnp.array([8, 5], dtype=jnp.int32)
    valid = jnp.arange(S)[None, :] < src_lengths[:, None]
    src = jnp.where(valid, src, PAD)                         # pad tail positions
    tgt = jax.random.randint(k_tgt, (B, T), 1, TGT_VOCAB, dtype=jnp.int32)

    fwd = jax.jit(lambda s, sl, t: seq2seq_forward(params, s, sl, t))
    logits, (h_dec, c_dec) = fwd(src, src_lengths, tgt)
    jax.block_until_ready((logits, h_dec, c_dec))

    assert logits.shape == (B, T, TGT_VOCAB)
    assert h_dec.shape == (B, HIDDEN) and c_dec.shape == (B, HIDDEN)
    assert bool(jnp.all(jnp.isfinite(logits)))
    print("KERNEL_OK")
</pallas_src>

<mosaic_0001>
module attributes {stable_mosaic.version = 11 : i64} {
  func.func @decoder_kernel(%arg0: memref<64x32xf32, #tpu.memory_space<vmem>>, %arg1: memref<8x128xf32, #tpu.memory_space<vmem>>, %arg2: memref<8x128xf32, #tpu.memory_space<vmem>>, %arg3: memref<32x512xf32, #tpu.memory_space<vmem>>, %arg4: memref<1x512xf32, #tpu.memory_space<vmem>>, %arg5: memref<128x512xf32, #tpu.memory_space<vmem>>, %arg6: memref<8x8x128xf32, #tpu.memory_space<vmem>>, %arg7: memref<8x128xf32, #tpu.memory_space<vmem>>, %arg8: memref<8x128xf32, #tpu.memory_space<vmem>>, %arg9: memref<8x8x512xf32, #tpu.memory_space<vmem>>) attributes {dimension_semantics = [], scalar_prefetch = 0 : i64, scratch_operands = 1 : i64, tpu.core_type = #tpu.core_type<tc>} {
    %c0 = arith.constant 0 : index
    %c0_0 = arith.constant 0 : index
    %0 = vector.load %arg0[%c0, %c0_0] : memref<64x32xf32, #tpu.memory_space<vmem>>, vector<64x32xf32>
    %c0_1 = arith.constant 0 : index
    %c0_2 = arith.constant 0 : index
    %1 = vector.load %arg3[%c0_1, %c0_2] : memref<32x512xf32, #tpu.memory_space<vmem>>, vector<32x512xf32>
    %cst = arith.constant dense<0.000000e+00> : vector<64x512xf32>
    %2 = tpu.matmul %0, %1, %cst {dimension_numbers = #tpu.dot_dimension_numbers<[1], [0], [0], [1], [0, 0, 1, 1], [], []>} : vector<64x32xf32>, vector<32x512xf32>, vector<64x512xf32> -> vector<64x512xf32>
    %c0_3 = arith.constant 0 : index
    %c0_4 = arith.constant 0 : index
    %3 = vector.load %arg4[%c0_3, %c0_4] : memref<1x512xf32, #tpu.memory_space<vmem>>, vector<1x512xf32>
    %4 = vector.broadcast %3 : vector<1x512xf32> to vector<64x512xf32>
    %5 = arith.addf %2, %4 : vector<64x512xf32>
    %6 = vector.shape_cast %5 : vector<64x512xf32> to vector<8x8x512xf32>
    %c0_5 = arith.constant 0 : index
    %c0_6 = arith.constant 0 : index
    %c0_7 = arith.constant 0 : index
    %7 = vector.load %arg9[%c0_5, %c0_6, %c0_7] : memref<8x8x512xf32, #tpu.memory_space<vmem>>, vector<8x8x512xf32>
    tpu.vector_store %arg9[%c0_5, %c0_6, %c0_7], %6 {strides = array<i32>} : memref<8x8x512xf32, #tpu.memory_space<vmem>>, vector<8x8x512xf32>,
    %c0_8 = arith.constant 0 : index
    %c0_9 = arith.constant 0 : index
    %8 = vector.load %arg5[%c0_8, %c0_9] : memref<128x512xf32, #tpu.memory_space<vmem>>, vector<128x512xf32>
    %c0_10 = arith.constant 0 : index
    %c0_11 = arith.constant 0 : index
    %9 = vector.load %arg1[%c0_10, %c0_11] : memref<8x128xf32, #tpu.memory_space<vmem>>, vector<8x128xf32>
    %c0_12 = arith.constant 0 : index
    %c0_13 = arith.constant 0 : index
    %10 = vector.load %arg2[%c0_12, %c0_13] : memref<8x128xf32, #tpu.memory_space<vmem>>, vector<8x128xf32>
    %c0_i32 = arith.constant 0 : i32
    %11 = arith.index_cast %c0_i32 : i32 to index
    %c0_14 = arith.constant 0 : index
    %c0_15 = arith.constant 0 : index
    %12 = vector.load %arg9[%11, %c0_14, %c0_15] : memref<8x8x512xf32, #tpu.memory_space<vmem>>, vector<1x8x512xf32>
    %13 = vector.shape_cast %12 : vector<1x8x512xf32> to vector<8x512xf32>
    %cst_16 = arith.constant dense<0.000000e+00> : vector<8x512xf32>
    %14 = tpu.matmul %9, %8, %cst_16 {dimension_numbers = #tpu.dot_dimension_numbers<[1], [0], [0], [1], [0, 0, 1, 1], [], []>} : vector<8x128xf32>, vector<128x512xf32>, vector<8x512xf32> -> vector<8x512xf32>
    %15 = arith.addf %13, %14 : vector<8x512xf32>
    %16 = vector.extract_strided_slice %15 {offsets = [0, 0], sizes = [8, 128], strides = [1, 1]} : vector<8x512xf32> to vector<8x128xf32>
    %cst_17 = arith.constant 5.000000e-01 : f32
    %17 = vector.broadcast %cst_17 : f32 to vector<8x128xf32>
    %18 = arith.mulf %17, %16 : vector<8x128xf32>
    %19 = math.tanh %18 : vector<8x128xf32>
    %cst_18 = arith.constant 1.000000e+00 : f32
    %20 = vector.broadcast %cst_18 : f32 to vector<8x128xf32>
    %21 = arith.addf %19, %20 : vector<8x128xf32>
    %cst_19 = arith.constant 5.000000e-01 : f32
    %22 = vector.broadcast %cst_19 : f32 to vector<8x128xf32>
    %23 = arith.mulf %22, %21 : vector<8x128xf32>
    %24 = vector.extract_strided_slice %15 {offsets = [0, 128], sizes = [8, 128], strides = [1, 1]} : vector<8x512xf32> to vector<8x128xf32>
    %cst_20 = arith.constant 5.000000e-01 : f32
    %25 = vector.broadcast %cst_20 : f32 to vector<8x128xf32>
    %26 = arith.mulf %25, %24 : vector<8x128xf32>
    %27 = math.tanh %26 : vector<8x128xf32>
    %cst_21 = arith.constant 1.000000e+00 : f32
    %28 = vector.broadcast %cst_21 : f32 to vector<8x128xf32>
    %29 = arith.addf %27, %28 : vector<8x128xf32>
    %cst_22 = arith.constant 5.000000e-01 : f32
    %30 = vector.broadcast %cst_22 : f32 to vector<8x128xf32>
    %31 = arith.mulf %30, %29 : vector<8x128xf32>
    %32 = vector.extract_strided_slice %15 {offsets = [0, 256], sizes = [8, 128], strides = [1, 1]} : vector<8x512xf32> to vector<8x128xf32>
    %33 = math.tanh %32 : vector<8x128xf32>
    %34 = vector.extract_strided_slice %15 {offsets = [0, 384], sizes = [8, 128], strides = [1, 1]} : vector<8x512xf32> to vector<8x128xf32>
    %cst_23 = arith.constant 5.000000e-01 : f32
    %35 = vector.broadcast %cst_23 : f32 to vector<8x128xf32>
    %36 = arith.mulf %35, %34 : vector<8x128xf32>
    %37 = math.tanh %36 : vector<8x128xf32>
    %cst_24 = arith.constant 1.000000e+00 : f32
    %38 = vector.broadcast %cst_24 : f32 to vector<8x128xf32>
    %39 = arith.addf %37, %38 : vector<8x128xf32>
    %cst_25 = arith.constant 5.000000e-01 : f32
    %40 = vector.broadcast %cst_25 : f32 to vector<8x128xf32>
    %41 = arith.mulf %40, %39 : vector<8x128xf32>
    %42 = arith.mulf %31, %10 : vector<8x128xf32>
    %43 = arith.mulf %23, %33 : vector<8x128xf32>
    %44 = arith.addf %42, %43 : vector<8x128xf32>
    %45 = math.tanh %44 : vector<8x128xf32>
    %46 = arith.mulf %41, %45 : vector<8x128xf32>
    %47 = arith.index_cast %c0_i32 : i32 to index
    %c0_26 = arith.constant 0 : index
    %c0_27 = arith.constant 0 : index
    %48 = vector.load %arg6[%47, %c0_26, %c0_27] : memref<8x8x128xf32, #tpu.memory_space<vmem>>, vector<1x8x128xf32>
    %49 = vector.shape_cast %48 : vector<1x8x128xf32> to vector<8x128xf32>
    %50 = vector.shape_cast %46 : vector<8x128xf32> to vector<1x8x128xf32>
    tpu.vector_store %arg6[%47, %c0_26, %c0_27], %50 {strides = array<i32>} : memref<8x8x128xf32, #tpu.memory_space<vmem>>, vector<1x8x128xf32>,
    %c1_i32 = arith.constant 1 : i32
    %51 = arith.index_cast %c1_i32 : i32 to index
    %c0_28 = arith.constant 0 : index
    %c0_29 = arith.constant 0 : index
    %52 = vector.load %arg9[%51, %c0_28, %c0_29] : memref<8x8x512xf32, #tpu.memory_space<vmem>>, vector<1x8x512xf32>
    %53 = vector.shape_cast %52 : vector<1x8x512xf32> to vector<8x512xf32>
    %cst_30 = arith.constant dense<0.000000e+00> : vector<8x512xf32>
    %54 = tpu.matmul %46, %8, %cst_30 {dimension_numbers = #tpu.dot_dimension_numbers<[1], [0], [0], [1], [0, 0, 1, 1], [], []>} : vector<8x128xf32>, vector<128x512xf32>, vector<8x512xf32> -> vector<8x512xf32>
    %55 = arith.addf %53, %54 : vector<8x512xf32>
    %56 = vector.extract_strided_slice %55 {offsets = [0, 0], sizes = [8, 128], strides = [1, 1]} : vector<8x512xf32> to vector<8x128xf32>
    %cst_31 = arith.constant 5.000000e-01 : f32
    %57 = vector.broadcast %cst_31 : f32 to vector<8x128xf32>
    %58 = arith.mulf %57, %56 : vector<8x128xf32>
    %59 = math.tanh %58 : vector<8x128xf32>
    %cst_32 = arith.constant 1.000000e+00 : f32
    %60 = vector.broadcast %cst_32 : f32 to vector<8x128xf32>
    %61 = arith.addf %59, %60 : vector<8x128xf32>
    %cst_33 = arith.constant 5.000000e-01 : f32
    %62 = vector.broadcast %cst_33 : f32 to vector<8x128xf32>
    %63 = arith.mulf %62, %61 : vector<8x128xf32>
    %64 = vector.extract_strided_slice %55 {offsets = [0, 128], sizes = [8, 128], strides = [1, 1]} : vector<8x512xf32> to vector<8x128xf32>
    %cst_34 = arith.constant 5.000000e-01 : f32
    %65 = vector.broadcast %cst_34 : f32 to vector<8x128xf32>
    %66 = arith.mulf %65, %64 : vector<8x128xf32>
    %67 = math.tanh %66 : vector<8x128xf32>
    %cst_35 = arith.constant 1.000000e+00 : f32
    %68 = vector.broadcast %cst_35 : f32 to vector<8x128xf32>
    %69 = arith.addf %67, %68 : vector<8x128xf32>
    %cst_36 = arith.constant 5.000000e-01 : f32
    %70 = vector.broadcast %cst_36 : f32 to vector<8x128xf32>
    %71 = arith.mulf %70, %69 : vector<8x128xf32>
    %72 = vector.extract_strided_slice %55 {offsets = [0, 256], sizes = [8, 128], strides = [1, 1]} : vector<8x512xf32> to vector<8x128xf32>
    %73 = math.tanh %72 : vector<8x128xf32>
    %74 = vector.extract_strided_slice %55 {offsets = [0, 384], sizes = [8, 128], strides = [1, 1]} : vector<8x512xf32> to vector<8x128xf32>
    %cst_37 = arith.constant 5.000000e-01 : f32
    %75 = vector.broadcast %cst_37 : f32 to vector<8x128xf32>
    %76 = arith.mulf %75, %74 : vector<8x128xf32>
    %77 = math.tanh %76 : vector<8x128xf32>
    %cst_38 = arith.constant 1.000000e+00 : f32
    %78 = vector.broadcast %cst_38 : f32 to vector<8x128xf32>
    %79 = arith.addf %77, %78 : vector<8x128xf32>
    %cst_39 = arith.constant 5.000000e-01 : f32
    %80 = vector.broadcast %cst_39 : f32 to vector<8x128xf32>
    %81 = arith.mulf %80, %79 : vector<8x128xf32>
    %82 = arith.mulf %71, %44 : vector<8x128xf32>
    %83 = arith.mulf %63, %73 : vector<8x128xf32>
    %84 = arith.addf %82, %83 : vector<8x128xf32>
    %85 = math.tanh %84 : vector<8x128xf32>
    %86 = arith.mulf %81, %85 : vector<8x128xf32>
    %87 = arith.index_cast %c1_i32 : i32 to index
    %c0_40 = arith.constant 0 : index
    %c0_41 = arith.constant 0 : index
    %88 = vector.load %arg6[%87, %c0_40, %c0_41] : memref<8x8x128xf32, #tpu.memory_space<vmem>>, vector<1x8x128xf32>
    %89 = vector.shape_cast %88 : vector<1x8x128xf32> to vector<8x128xf32>
    %90 = vector.shape_cast %86 : vector<8x128xf32> to vector<1x8x128xf32>
    tpu.vector_store %arg6[%87, %c0_40, %c0_41], %90 {strides = array<i32>} : memref<8x8x128xf32, #tpu.memory_space<vmem>>, vector<1x8x128xf32>,
    %c2_i32 = arith.constant 2 : i32
    %91 = arith.index_cast %c2_i32 : i32 to index
    %c0_42 = arith.constant 0 : index
    %c0_43 = arith.constant 0 : index
    %92 = vector.load %arg9[%91, %c0_42, %c0_43] : memref<8x8x512xf32, #tpu.memory_space<vmem>>, vector<1x8x512xf32>
    %93 = vector.shape_cast %92 : vector<1x8x512xf32> to vector<8x512xf32>
    %cst_44 = arith.constant dense<0.000000e+00> : vector<8x512xf32>
    %94 = tpu.matmul %86, %8, %cst_44 {dimension_numbers = #tpu.dot_dimension_numbers<[1], [0], [0], [1], [0, 0, 1, 1], [], []>} : vector<8x128xf32>, vector<128x512xf32>, vector<8x512xf32> -> vector<8x512xf32>
    %95 = arith.addf %93, %94 : vector<8x512xf32>
    %96 = vector.extract_strided_slice %95 {offsets = [0, 0], sizes = [8, 128], strides = [1, 1]} : vector<8x512xf32> to vector<8x128xf32>
    %cst_45 = arith.constant 5.000000e-01 : f32
    %97 = vector.broadcast %cst_45 : f32 to vector<8x128xf32>
    %98 = arith.mulf %97, %96 : vector<8x128xf32>
    %99 = math.tanh %98 : vector<8x128xf32>
    %cst_46 = arith.constant 1.000000e+00 : f32
    %100 = vector.broadcast %cst_46 : f32 to vector<8x128xf32>
    %101 = arith.addf %99, %100 : vector<8x128xf32>
    %cst_47 = arith.constant 5.000000e-01 : f32
    %102 = vector.broadcast %cst_47 : f32 to vector<8x128xf32>
    %103 = arith.mulf %102, %101 : vector<8x128xf32>
    %104 = vector.extract_strided_slice %95 {offsets = [0, 128], sizes = [8, 128], strides = [1, 1]} : vector<8x512xf32> to vector<8x128xf32>
    %cst_48 = arith.constant 5.000000e-01 : f32
    %105 = vector.broadcast %cst_48 : f32 to vector<8x128xf32>
    %106 = arith.mulf %105, %104 : vector<8x128xf32>
    %107 = math.tanh %106 : vector<8x128xf32>
    %cst_49 = arith.constant 1.000000e+00 : f32
    %108 = vector.broadcast %cst_49 : f32 to vector<8x128xf32>
    %109 = arith.addf %107, %108 : vector<8x128xf32>
    %cst_50 = arith.constant 5.000000e-01 : f32
    %110 = vector.broadcast %cst_50 : f32 to vector<8x128xf32>
    %111 = arith.mulf %110, %109 : vector<8x128xf32>
    %112 = vector.extract_strided_slice %95 {offsets = [0, 256], sizes = [8, 128], strides = [1, 1]} : vector<8x512xf32> to vector<8x128xf32>
    %113 = math.tanh %112 : vector<8x128xf32>
    %114 = vector.extract_strided_slice %95 {offsets = [0, 384], sizes = [8, 128], strides = [1, 1]} : vector<8x512xf32> to vector<8x128xf32>
    %cst_51 = arith.constant 5.000000e-01 : f32
    %115 = vector.broadcast %cst_51 : f32 to vector<8x128xf32>
    %116 = arith.mulf %115, %114 : vector<8x128xf32>
    %117 = math.tanh %116 : vector<8x128xf32>
    %cst_52 = arith.constant 1.000000e+00 : f32
    %118 = vector.broadcast %cst_52 : f32 to vector<8x128xf32>
    %119 = arith.addf %117, %118 : vector<8x128xf32>
    %cst_53 = arith.constant 5.000000e-01 : f32
    %120 = vector.broadcast %cst_53 : f32 to vector<8x128xf32>
    %121 = arith.mulf %120, %119 : vector<8x128xf32>
    %122 = arith.mulf %111, %84 : vector<8x128xf32>
    %123 = arith.mulf %103, %113 : vector<8x128xf32>
    %124 = arith.addf %122, %123 : vector<8x128xf32>
    %125 = math.tanh %124 : vector<8x128xf32>
    %126 = arith.mulf %121, %125 : vector<8x128xf32>
    %127 = arith.index_cast %c2_i32 : i32 to index
    %c0_54 = arith.constant 0 : index
    %c0_55 = arith.constant 0 : index
    %128 = vector.load %arg6[%127, %c0_54, %c0_55] : memref<8x8x128xf32, #tpu.memory_space<vmem>>, vector<1x8x128xf32>
    %129 = vector.shape_cast %128 : vector<1x8x128xf32> to vector<8x128xf32>
    %130 = vector.shape_cast %126 : vector<8x128xf32> to vector<1x8x128xf32>
    tpu.vector_store %arg6[%127, %c0_54, %c0_55], %130 {strides = array<i32>} : memref<8x8x128xf32, #tpu.memory_space<vmem>>, vector<1x8x128xf32>,
    %c3_i32 = arith.constant 3 : i32
    %131 = arith.index_cast %c3_i32 : i32 to index
    %c0_56 = arith.constant 0 : index
    %c0_57 = arith.constant 0 : index
    %132 = vector.load %arg9[%131, %c0_56, %c0_57] : memref<8x8x512xf32, #tpu.memory_space<vmem>>, vector<1x8x512xf32>
    %133 = vector.shape_cast %132 : vector<1x8x512xf32> to vector<8x512xf32>
    %cst_58 = arith.constant dense<0.000000e+00> : vector<8x512xf32>
    %134 = tpu.matmul %126, %8, %cst_58 {dimension_numbers = #tpu.dot_dimension_numbers<[1], [0], [0], [1], [0, 0, 1, 1], [], []>} : vector<8x128xf32>, vector<128x512xf32>, vector<8x512xf32> -> vector<8x512xf32>
    %135 = arith.addf %133, %134 : vector<8x512xf32>
    %136 = vector.extract_strided_slice %135 {offsets = [0, 0], sizes = [8, 128], strides = [1, 1]} : vector<8x512xf32> to vector<8x128xf32>
    %cst_59 = arith.constant 5.000000e-01 : f32
    %137 = vector.broadcast %cst_59 : f32 to vector<8x128xf32>
    %138 = arith.mulf %137, %136 : vector<8x128xf32>
    %139 = math.tanh %138 : vector<8x128xf32>
    %cst_60 = arith.constant 1.000000e+00 : f32
    %140 = vector.broadcast %cst_60 : f32 to vector<8x128xf32>
    %141 = arith.addf %139, %140 : vector<8x128xf32>
    %cst_61 = arith.constant 5.000000e-01 : f32
    %142 = vector.broadcast %cst_61 : f32 to vector<8x128xf32>
    %143 = arith.mulf %142, %141 : vector<8x128xf32>
    %144 = vector.extract_strided_slice %135 {offsets = [0, 128], sizes = [8, 128], strides = [1, 1]} : vector<8x512xf32> to vector<8x128xf32>
    %cst_62 = arith.constant 5.000000e-01 : f32
    %145 = vector.broadcast %cst_62 : f32 to vector<8x128xf32>
    %146 = arith.mulf %145, %144 : vector<8x128xf32>
    %147 = math.tanh %146 : vector<8x128xf32>
    %cst_63 = arith.constant 1.000000e+00 : f32
    %148 = vector.broadcast %cst_63 : f32 to vector<8x128xf32>
    %149 = arith.addf %147, %148 : vector<8x128xf32>
    %cst_64 = arith.constant 5.000000e-01 : f32
    %150 = vector.broadcast %cst_64 : f32 to vector<8x128xf32>
    %151 = arith.mulf %150, %149 : vector<8x128xf32>
    %152 = vector.extract_strided_slice %135 {offsets = [0, 256], sizes = [8, 128], strides = [1, 1]} : vector<8x512xf32> to vector<8x128xf32>
    %153 = math.tanh %152 : vector<8x128xf32>
    %154 = vector.extract_strided_slice %135 {offsets = [0, 384], sizes = [8, 128], strides = [1, 1]} : vector<8x512xf32> to vector<8x128xf32>
    %cst_65 = arith.constant 5.000000e-01 : f32
    %155 = vector.broadcast %cst_65 : f32 to vector<8x128xf32>
    %156 = arith.mulf %155, %154 : vector<8x128xf32>
    %157 = math.tanh %156 : vector<8x128xf32>
    %cst_66 = arith.constant 1.000000e+00 : f32
    %158 = vector.broadcast %cst_66 : f32 to vector<8x128xf32>
    %159 = arith.addf %157, %158 : vector<8x128xf32>
    %cst_67 = arith.constant 5.000000e-01 : f32
    %160 = vector.broadcast %cst_67 : f32 to vector<8x128xf32>
    %161 = arith.mulf %160, %159 : vector<8x128xf32>
    %162 = arith.mulf %151, %124 : vector<8x128xf32>
    %163 = arith.mulf %143, %153 : vector<8x128xf32>
    %164 = arith.addf %162, %163 : vector<8x128xf32>
    %165 = math.tanh %164 : vector<8x128xf32>
    %166 = arith.mulf %161, %165 : vector<8x128xf32>
    %167 = arith.index_cast %c3_i32 : i32 to index
    %c0_68 = arith.constant 0 : index
    %c0_69 = arith.constant 0 : index
    %168 = vector.load %arg6[%167, %c0_68, %c0_69] : memref<8x8x128xf32, #tpu.memory_space<vmem>>, vector<1x8x128xf32>
    %169 = vector.shape_cast %168 : vector<1x8x128xf32> to vector<8x128xf32>
    %170 = vector.shape_cast %166 : vector<8x128xf32> to vector<1x8x128xf32>
    tpu.vector_store %arg6[%167, %c0_68, %c0_69], %170 {strides = array<i32>} : memref<8x8x128xf32, #tpu.memory_space<vmem>>, vector<1x8x128xf32>,
    %c4_i32 = arith.constant 4 : i32
    %171 = arith.index_cast %c4_i32 : i32 to index
    %c0_70 = arith.constant 0 : index
    %c0_71 = arith.constant 0 : index
    %172 = vector.load %arg9[%171, %c0_70, %c0_71] : memref<8x8x512xf32, #tpu.memory_space<vmem>>, vector<1x8x512xf32>
    %173 = vector.shape_cast %172 : vector<1x8x512xf32> to vector<8x512xf32>
    %cst_72 = arith.constant dense<0.000000e+00> : vector<8x512xf32>
    %174 = tpu.matmul %166, %8, %cst_72 {dimension_numbers = #tpu.dot_dimension_numbers<[1], [0], [0], [1], [0, 0, 1, 1], [], []>} : vector<8x128xf32>, vector<128x512xf32>, vector<8x512xf32> -> vector<8x512xf32>
    %175 = arith.addf %173, %174 : vector<8x512xf32>
    %176 = vector.extract_strided_slice %175 {offsets = [0, 0], sizes = [8, 128], strides = [1, 1]} : vector<8x512xf32> to vector<8x128xf32>
    %cst_73 = arith.constant 5.000000e-01 : f32
    %177 = vector.broadcast %cst_73 : f32 to vector<8x128xf32>
    %178 = arith.mulf %177, %176 : vector<8x128xf32>
    %179 = math.tanh %178 : vector<8x128xf32>
    %cst_74 = arith.constant 1.000000e+00 : f32
    %180 = vector.broadcast %cst_74 : f32 to vector<8x128xf32>
    %181 = arith.addf %179, %180 : vector<8x128xf32>
    %cst_75 = arith.constant 5.000000e-01 : f32
    %182 = vector.broadcast %cst_75 : f32 to vector<8x128xf32>
    %183 = arith.mulf %182, %181 : vector<8x128xf32>
    %184 = vector.extract_strided_slice %175 {offsets = [0, 128], sizes = [8, 128], strides = [1, 1]} : vector<8x512xf32> to vector<8x128xf32>
    %cst_76 = arith.constant 5.000000e-01 : f32
    %185 = vector.broadcast %cst_76 : f32 to vector<8x128xf32>
    %186 = arith.mulf %185, %184 : vector<8x128xf32>
    %187 = math.tanh %186 : vector<8x128xf32>
    %cst_77 = arith.constant 1.000000e+00 : f32
    %188 = vector.broadcast %cst_77 : f32 to vector<8x128xf32>
    %189 = arith.addf %187, %188 : vector<8x128xf32>
    %cst_78 = arith.constant 5.000000e-01 : f32
    %190 = vector.broadcast %cst_78 : f32 to vector<8x128xf32>
    %191 = arith.mulf %190, %189 : vector<8x128xf32>
    %192 = vector.extract_strided_slice %175 {offsets = [0, 256], sizes = [8, 128], strides = [1, 1]} : vector<8x512xf32> to vector<8x128xf32>
    %193 = math.tanh %192 : vector<8x128xf32>
    %194 = vector.extract_strided_slice %175 {offsets = [0, 384], sizes = [8, 128], strides = [1, 1]} : vector<8x512xf32> to vector<8x128xf32>
    %cst_79 = arith.constant 5.000000e-01 : f32
    %195 = vector.broadcast %cst_79 : f32 to vector<8x128xf32>
    %196 = arith.mulf %195, %194 : vector<8x128xf32>
    %197 = math.tanh %196 : vector<8x128xf32>
    %cst_80 = arith.constant 1.000000e+00 : f32
    %198 = vector.broadcast %cst_80 : f32 to vector<8x128xf32>
    %199 = arith.addf %197, %198 : vector<8x128xf32>
    %cst_81 = arith.constant 5.000000e-01 : f32
    %200 = vector.broadcast %cst_81 : f32 to vector<8x128xf32>
    %201 = arith.mulf %200, %199 : vector<8x128xf32>
    %202 = arith.mulf %191, %164 : vector<8x128xf32>
    %203 = arith.mulf %183, %193 : vector<8x128xf32>
    %204 = arith.addf %202, %203 : vector<8x128xf32>
    %205 = math.tanh %204 : vector<8x128xf32>
    %206 = arith.mulf %201, %205 : vector<8x128xf32>
    %207 = arith.index_cast %c4_i32 : i32 to index
    %c0_82 = arith.constant 0 : index
    %c0_83 = arith.constant 0 : index
    %208 = vector.load %arg6[%207, %c0_82, %c0_83] : memref<8x8x128xf32, #tpu.memory_space<vmem>>, vector<1x8x128xf32>
    %209 = vector.shape_cast %208 : vector<1x8x128xf32> to vector<8x128xf32>
    %210 = vector.shape_cast %206 : vector<8x128xf32> to vector<1x8x128xf32>
    tpu.vector_store %arg6[%207, %c0_82, %c0_83], %210 {strides = array<i32>} : memref<8x8x128xf32, #tpu.memory_space<vmem>>, vector<1x8x128xf32>,
    %c5_i32 = arith.constant 5 : i32
    %211 = arith.index_cast %c5_i32 : i32 to index
    %c0_84 = arith.constant 0 : index
    %c0_85 = arith.constant 0 : index
    %212 = vector.load %arg9[%211, %c0_84, %c0_85] : memref<8x8x512xf32, #tpu.memory_space<vmem>>, vector<1x8x512xf32>
    %213 = vector.shape_cast %212 : vector<1x8x512xf32> to vector<8x512xf32>
    %cst_86 = arith.constant dense<0.000000e+00> : vector<8x512xf32>
    %214 = tpu.matmul %206, %8, %cst_86 {dimension_numbers = #tpu.dot_dimension_numbers<[1], [0], [0], [1], [0, 0, 1, 1], [], []>} : vector<8x128xf32>, vector<128x512xf32>, vector<8x512xf32> -> vector<8x512xf32>
    %215 = arith.addf %213, %214 : vector<8x512xf32>
    %216 = vector.extract_strided_slice %215 {offsets = [0, 0], sizes = [8, 128], strides = [1, 1]} : vector<8x512xf32> to vector<8x128xf32>
    %cst_87 = arith.constant 5.000000e-01 : f32
    %217 = vector.broadcast %cst_87 : f32 to vector<8x128xf32>
    %218 = arith.mulf %217, %216 : vector<8x128xf32>
    %219 = math.tanh %218 : vector<8x128xf32>
    %cst_88 = arith.constant 1.000000e+00 : f32
    %220 = vector.broadcast %cst_88 : f32 to vector<8x128xf32>
    %221 = arith.addf %219, %220 : vector<8x128xf32>
    %cst_89 = arith.constant 5.000000e-01 : f32
    %222 = vector.broadcast %cst_89 : f32 to vector<8x128xf32>
    %223 = arith.mulf %222, %221 : vector<8x128xf32>
    %224 = vector.extract_strided_slice %215 {offsets = [0, 128], sizes = [8, 128], strides = [1, 1]} : vector<8x512xf32> to vector<8x128xf32>
    %cst_90 = arith.constant 5.000000e-01 : f32
    %225 = vector.broadcast %cst_90 : f32 to vector<8x128xf32>
    %226 = arith.mulf %225, %224 : vector<8x128xf32>
    %227 = math.tanh %226 : vector<8x128xf32>
    %cst_91 = arith.constant 1.000000e+00 : f32
    %228 = vector.broadcast %cst_91 : f32 to vector<8x128xf32>
    %229 = arith.addf %227, %228 : vector<8x128xf32>
    %cst_92 = arith.constant 5.000000e-01 : f32
    %230 = vector.broadcast %cst_92 : f32 to vector<8x128xf32>
    %231 = arith.mulf %230, %229 : vector<8x128xf32>
    %232 = vector.extract_strided_slice %215 {offsets = [0, 256], sizes = [8, 128], strides = [1, 1]} : vector<8x512xf32> to vector<8x128xf32>
    %233 = math.tanh %232 : vector<8x128xf32>
    %234 = vector.extract_strided_slice %215 {offsets = [0, 384], sizes = [8, 128], strides = [1, 1]} : vector<8x512xf32> to vector<8x128xf32>
    %cst_93 = arith.constant 5.000000e-01 : f32
    %235 = vector.broadcast %cst_93 : f32 to vector<8x128xf32>
    %236 = arith.mulf %235, %234 : vector<8x128xf32>
    %237 = math.tanh %236 : vector<8x128xf32>
    %cst_94 = arith.constant 1.000000e+00 : f32
    %238 = vector.broadcast %cst_94 : f32 to vector<8x128xf32>
    %239 = arith.addf %237, %238 : vector<8x128xf32>
    %cst_95 = arith.constant 5.000000e-01 : f32
    %240 = vector.broadcast %cst_95 : f32 to vector<8x128xf32>
    %241 = arith.mulf %240, %239 : vector<8x128xf32>
    %242 = arith.mulf %231, %204 : vector<8x128xf32>
    %243 = arith.mulf %223, %233 : vector<8x128xf32>
    %244 = arith.addf %242, %243 : vector<8x128xf32>
    %245 = math.tanh %244 : vector<8x128xf32>
    %246 = arith.mulf %241, %245 : vector<8x128xf32>
    %247 = arith.index_cast %c5_i32 : i32 to index
    %c0_96 = arith.constant 0 : index
    %c0_97 = arith.constant 0 : index
    %248 = vector.load %arg6[%247, %c0_96, %c0_97] : memref<8x8x128xf32, #tpu.memory_space<vmem>>, vector<1x8x128xf32>
    %249 = vector.shape_cast %248 : vector<1x8x128xf32> to vector<8x128xf32>
    %250 = vector.shape_cast %246 : vector<8x128xf32> to vector<1x8x128xf32>
    tpu.vector_store %arg6[%247, %c0_96, %c0_97], %250 {strides = array<i32>} : memref<8x8x128xf32, #tpu.memory_space<vmem>>, vector<1x8x128xf32>,
    %c6_i32 = arith.constant 6 : i32
    %251 = arith.index_cast %c6_i32 : i32 to index
    %c0_98 = arith.constant 0 : index
    %c0_99 = arith.constant 0 : index
    %252 = vector.load %arg9[%251, %c0_98, %c0_99] : memref<8x8x512xf32, #tpu.memory_space<vmem>>, vector<1x8x512xf32>
    %253 = vector.shape_cast %252 : vector<1x8x512xf32> to vector<8x512xf32>
    %cst_100 = arith.constant dense<0.000000e+00> : vector<8x512xf32>
    %254 = tpu.matmul %246, %8, %cst_100 {dimension_numbers = #tpu.dot_dimension_numbers<[1], [0], [0], [1], [0, 0, 1, 1], [], []>} : vector<8x128xf32>, vector<128x512xf32>, vector<8x512xf32> -> vector<8x512xf32>
    %255 = arith.addf %253, %254 : vector<8x512xf32>
    %256 = vector.extract_strided_slice %255 {offsets = [0, 0], sizes = [8, 128], strides = [1, 1]} : vector<8x512xf32> to vector<8x128xf32>
    %cst_101 = arith.constant 5.000000e-01 : f32
    %257 = vector.broadcast %cst_101 : f32 to vector<8x128xf32>
    %258 = arith.mulf %257, %256 : vector<8x128xf32>
    %259 = math.tanh %258 : vector<8x128xf32>
    %cst_102 = arith.constant 1.000000e+00 : f32
    %260 = vector.broadcast %cst_102 : f32 to vector<8x128xf32>
    %261 = arith.addf %259, %260 : vector<8x128xf32>
    %cst_103 = arith.constant 5.000000e-01 : f32
    %262 = vector.broadcast %cst_103 : f32 to vector<8x128xf32>
    %263 = arith.mulf %262, %261 : vector<8x128xf32>
    %264 = vector.extract_strided_slice %255 {offsets = [0, 128], sizes = [8, 128], strides = [1, 1]} : vector<8x512xf32> to vector<8x128xf32>
    %cst_104 = arith.constant 5.000000e-01 : f32
    %265 = vector.broadcast %cst_104 : f32 to vector<8x128xf32>
    %266 = arith.mulf %265, %264 : vector<8x128xf32>
    %267 = math.tanh %266 : vector<8x128xf32>
    %cst_105 = arith.constant 1.000000e+00 : f32
    %268 = vector.broadcast %cst_105 : f32 to vector<8x128xf32>
    %269 = arith.addf %267, %268 : vector<8x128xf32>
    %cst_106 = arith.constant 5.000000e-01 : f32
    %270 = vector.broadcast %cst_106 : f32 to vector<8x128xf32>
    %271 = arith.mulf %270, %269 : vector<8x128xf32>
    %272 = vector.extract_strided_slice %255 {offsets = [0, 256], sizes = [8, 128], strides = [1, 1]} : vector<8x512xf32> to vector<8x128xf32>
    %273 = math.tanh %272 : vector<8x128xf32>
    %274 = vector.extract_strided_slice %255 {offsets = [0, 384], sizes = [8, 128], strides = [1, 1]} : vector<8x512xf32> to vector<8x128xf32>
    %cst_107 = arith.constant 5.000000e-01 : f32
    %275 = vector.broadcast %cst_107 : f32 to vector<8x128xf32>
    %276 = arith.mulf %275, %274 : vector<8x128xf32>
    %277 = math.tanh %276 : vector<8x128xf32>
    %cst_108 = arith.constant 1.000000e+00 : f32
    %278 = vector.broadcast %cst_108 : f32 to vector<8x128xf32>
    %279 = arith.addf %277, %278 : vector<8x128xf32>
    %cst_109 = arith.constant 5.000000e-01 : f32
    %280 = vector.broadcast %cst_109 : f32 to vector<8x128xf32>
    %281 = arith.mulf %280, %279 : vector<8x128xf32>
    %282 = arith.mulf %271, %244 : vector<8x128xf32>
    %283 = arith.mulf %263, %273 : vector<8x128xf32>
    %284 = arith.addf %282, %283 : vector<8x128xf32>
    %285 = math.tanh %284 : vector<8x128xf32>
    %286 = arith.mulf %281, %285 : vector<8x128xf32>
    %287 = arith.index_cast %c6_i32 : i32 to index
    %c0_110 = arith.constant 0 : index
    %c0_111 = arith.constant 0 : index
    %288 = vector.load %arg6[%287, %c0_110, %c0_111] : memref<8x8x128xf32, #tpu.memory_space<vmem>>, vector<1x8x128xf32>
    %289 = vector.shape_cast %288 : vector<1x8x128xf32> to vector<8x128xf32>
    %290 = vector.shape_cast %286 : vector<8x128xf32> to vector<1x8x128xf32>
    tpu.vector_store %arg6[%287, %c0_110, %c0_111], %290 {strides = array<i32>} : memref<8x8x128xf32, #tpu.memory_space<vmem>>, vector<1x8x128xf32>,
    %c7_i32 = arith.constant 7 : i32
    %291 = arith.index_cast %c7_i32 : i32 to index
    %c0_112 = arith.constant 0 : index
    %c0_113 = arith.constant 0 : index
    %292 = vector.load %arg9[%291, %c0_112, %c0_113] : memref<8x8x512xf32, #tpu.memory_space<vmem>>, vector<1x8x512xf32>
    %293 = vector.shape_cast %292 : vector<1x8x512xf32> to vector<8x512xf32>
    %cst_114 = arith.constant dense<0.000000e+00> : vector<8x512xf32>
    %294 = tpu.matmul %286, %8, %cst_114 {dimension_numbers = #tpu.dot_dimension_numbers<[1], [0], [0], [1], [0, 0, 1, 1], [], []>} : vector<8x128xf32>, vector<128x512xf32>, vector<8x512xf32> -> vector<8x512xf32>
    %295 = arith.addf %293, %294 : vector<8x512xf32>
    %296 = vector.extract_strided_slice %295 {offsets = [0, 0], sizes = [8, 128], strides = [1, 1]} : vector<8x512xf32> to vector<8x128xf32>
    %cst_115 = arith.constant 5.000000e-01 : f32
    %297 = vector.broadcast %cst_115 : f32 to vector<8x128xf32>
    %298 = arith.mulf %297, %296 : vector<8x128xf32>
    %299 = math.tanh %298 : vector<8x128xf32>
    %cst_116 = arith.constant 1.000000e+00 : f32
    %300 = vector.broadcast %cst_116 : f32 to vector<8x128xf32>
    %301 = arith.addf %299, %300 : vector<8x128xf32>
    %cst_117 = arith.constant 5.000000e-01 : f32
    %302 = vector.broadcast %cst_117 : f32 to vector<8x128xf32>
    %303 = arith.mulf %302, %301 : vector<8x128xf32>
    %304 = vector.extract_strided_slice %295 {offsets = [0, 128], sizes = [8, 128], strides = [1, 1]} : vector<8x512xf32> to vector<8x128xf32>
    %cst_118 = arith.constant 5.000000e-01 : f32
    %305 = vector.broadcast %cst_118 : f32 to vector<8x128xf32>
    %306 = arith.mulf %305, %304 : vector<8x128xf32>
    %307 = math.tanh %306 : vector<8x128xf32>
    %cst_119 = arith.constant 1.000000e+00 : f32
    %308 = vector.broadcast %cst_119 : f32 to vector<8x128xf32>
    %309 = arith.addf %307, %308 : vector<8x128xf32>
    %cst_120 = arith.constant 5.000000e-01 : f32
    %310 = vector.broadcast %cst_120 : f32 to vector<8x128xf32>
    %311 = arith.mulf %310, %309 : vector<8x128xf32>
    %312 = vector.extract_strided_slice %295 {offsets = [0, 256], sizes = [8, 128], strides = [1, 1]} : vector<8x512xf32> to vector<8x128xf32>
    %313 = math.tanh %312 : vector<8x128xf32>
    %314 = vector.extract_strided_slice %295 {offsets = [0, 384], sizes = [8, 128], strides = [1, 1]} : vector<8x512xf32> to vector<8x128xf32>
    %cst_121 = arith.constant 5.000000e-01 : f32
    %315 = vector.broadcast %cst_121 : f32 to vector<8x128xf32>
    %316 = arith.mulf %315, %314 : vector<8x128xf32>
    %317 = math.tanh %316 : vector<8x128xf32>
    %cst_122 = arith.constant 1.000000e+00 : f32
    %318 = vector.broadcast %cst_122 : f32 to vector<8x128xf32>
    %319 = arith.addf %317, %318 : vector<8x128xf32>
    %cst_123 = arith.constant 5.000000e-01 : f32
    %320 = vector.broadcast %cst_123 : f32 to vector<8x128xf32>
    %321 = arith.mulf %320, %319 : vector<8x128xf32>
    %322 = arith.mulf %311, %284 : vector<8x128xf32>
    %323 = arith.mulf %303, %313 : vector<8x128xf32>
    %324 = arith.addf %322, %323 : vector<8x128xf32>
    %325 = math.tanh %324 : vector<8x128xf32>
    %326 = arith.mulf %321, %325 : vector<8x128xf32>
    %327 = arith.index_cast %c7_i32 : i32 to index
    %c0_124 = arith.constant 0 : index
    %c0_125 = arith.constant 0 : index
    %328 = vector.load %arg6[%327, %c0_124, %c0_125] : memref<8x8x128xf32, #tpu.memory_space<vmem>>, vector<1x8x128xf32>
    %329 = vector.shape_cast %328 : vector<1x8x128xf32> to vector<8x128xf32>
    %330 = vector.shape_cast %326 : vector<8x128xf32> to vector<1x8x128xf32>
    tpu.vector_store %arg6[%327, %c0_124, %c0_125], %330 {strides = array<i32>} : memref<8x8x128xf32, #tpu.memory_space<vmem>>, vector<1x8x128xf32>,
    %c8_i32 = arith.constant 8 : i32
    %c0_126 = arith.constant 0 : index
    %c0_127 = arith.constant 0 : index
    %331 = vector.load %arg7[%c0_126, %c0_127] : memref<8x128xf32, #tpu.memory_space<vmem>>, vector<8x128xf32>
    tpu.vector_store %arg7[%c0_126, %c0_127], %326 {strides = array<i32>} : memref<8x128xf32, #tpu.memory_space<vmem>>, vector<8x128xf32>,
    %c0_128 = arith.constant 0 : index
    %c0_129 = arith.constant 0 : index
    %332 = vector.load %arg8[%c0_128, %c0_129] : memref<8x128xf32, #tpu.memory_space<vmem>>, vector<8x128xf32>
    tpu.vector_store %arg8[%c0_128, %c0_129], %324 {strides = array<i32>} : memref<8x128xf32, #tpu.memory_space<vmem>>, vector<8x128xf32>,
    return
  }
}

module attributes {stable_mosaic.version = 11 : i64} {
  func.func @generator_kernel(%arg0: i32, %arg1: memref<16x32xf32, #tpu.memory_space<vmem>>, %arg2: memref<24x32xf32, #tpu.memory_space<vmem>>, %arg3: memref<1x24xf32, #tpu.memory_space<vmem>>, %arg4: memref<16x24xf32, #tpu.memory_space<vmem>>) attributes {dimension_semantics = [#tpu.dimension_semantics<parallel>], iteration_bounds = array<i64: 1>, scalar_prefetch = 0 : i64, scratch_operands = 0 : i64, tpu.core_type = #tpu.core_type<tc>, window_params = [{pipeline_mode = #tpu.pipeline_mode<synchronous>, transform_indices = @transform_0, window_bounds = array<i64: 16, 32>}, {transform_indices = @transform_1, window_bounds = array<i64: 24, 32>}, {transform_indices = @transform_2, window_bounds = array<i64: 1, 24>}, {transform_indices = @transform_3, window_bounds = array<i64: 16, 24>}]} {
    %c0 = arith.constant 0 : index
    %c0_0 = arith.constant 0 : index
    %0 = vector.load %arg1[%c0, %c0_0] : memref<16x32xf32, #tpu.memory_space<vmem>>, vector<16x32xf32>
    %c0_1 = arith.constant 0 : index
    %c0_2 = arith.constant 0 : index
    %1 = vector.load %arg2[%c0_1, %c0_2] : memref<24x32xf32, #tpu.memory_space<vmem>>, vector<24x32xf32>
    %cst = arith.constant dense<0.000000e+00> : vector<16x24xf32>
    %2 = tpu.matmul %0, %1, %cst {dimension_numbers = #tpu.dot_dimension_numbers<[1], [1], [0], [0], [0, 0, 1, 0], [], []>} : vector<16x32xf32>, vector<24x32xf32>, vector<16x24xf32> -> vector<16x24xf32>
    %c0_3 = arith.constant 0 : index
    %c0_4 = arith.constant 0 : index
    %3 = vector.load %arg3[%c0_3, %c0_4] : memref<1x24xf32, #tpu.memory_space<vmem>>, vector<1x24xf32>
    %4 = vector.broadcast %3 : vector<1x24xf32> to vector<16x24xf32>
    %5 = arith.addf %2, %4 : vector<16x24xf32>
    %c0_5 = arith.constant 0 : index
    %c0_6 = arith.constant 0 : index
    %6 = vector.load %arg4[%c0_5, %c0_6] : memref<16x24xf32, #tpu.memory_space<vmem>>, vector<16x24xf32>
    tpu.vector_store %arg4[%c0_5, %c0_6], %5 {strides = array<i32>} : memref<16x24xf32, #tpu.memory_space<vmem>>, vector<16x24xf32>,
    return
  }
  func.func @transform_0(%arg0: i32) -> (i32, i32) {
    %c0_i32 = arith.constant 0 : i32
    %c0_i32_0 = arith.constant 0 : i32
    %c0_i32_1 = arith.constant 0 : i32
    return %c0_i32, %c0_i32_0 : i32, i32
  }
  func.func @transform_1(%arg0: i32) -> (i32, i32) {
    %c0_i32 = arith.constant 0 : i32
    %c0_i32_0 = arith.constant 0 : i32
    return %arg0, %c0_i32 : i32, i32
  }
  func.func @transform_2(%arg0: i32) -> (i32, i32) {
    %c0_i32 = arith.constant 0 : i32
    %c0_i32_0 = arith.constant 0 : i32
    return %c0_i32, %arg0 : i32, i32
  }
  func.func @transform_3(%arg0: i32) -> (i32, i32) {
    %c0_i32 = arith.constant 0 : i32
    %c0_i32_0 = arith.constant 0 : i32
    return %c0_i32, %arg0 : i32, i32
  }
}

module attributes {stable_mosaic.version = 11 : i64} {
  func.func @encoder_kernel(%arg0: memref<64x32xf32, #tpu.memory_space<vmem>>, %arg1: memref<8x1xi32, #tpu.memory_space<vmem>>, %arg2: memref<32x1024xf32, #tpu.memory_space<vmem>>, %arg3: memref<1x1024xf32, #tpu.memory_space<vmem>>, %arg4: memref<128x512xf32, #tpu.memory_space<vmem>>, %arg5: memref<128x512xf32, #tpu.memory_space<vmem>>, %arg6: memref<2x8x128xf32, #tpu.memory_space<vmem>>, %arg7: memref<2x8x128xf32, #tpu.memory_space<vmem>>, %arg8: memref<8x8x512xf32, #tpu.memory_space<vmem>>, %arg9: memref<8x8x512xf32, #tpu.memory_space<vmem>>) attributes {dimension_semantics = [], scalar_prefetch = 0 : i64, scratch_operands = 2 : i64, tpu.core_type = #tpu.core_type<tc>} {
    %c0 = arith.constant 0 : index
    %c0_0 = arith.constant 0 : index
    %0 = vector.load %arg0[%c0, %c0_0] : memref<64x32xf32, #tpu.memory_space<vmem>>, vector<64x32xf32>
    %c0_1 = arith.constant 0 : index
    %c0_2 = arith.constant 0 : index
    %1 = vector.load %arg2[%c0_1, %c0_2] : memref<32x1024xf32, #tpu.memory_space<vmem>>, vector<32x1024xf32>
    %cst = arith.constant dense<0.000000e+00> : vector<64x1024xf32>
    %2 = tpu.matmul %0, %1, %cst {dimension_numbers = #tpu.dot_dimension_numbers<[1], [0], [0], [1], [0, 0, 1, 1], [], []>} : vector<64x32xf32>, vector<32x1024xf32>, vector<64x1024xf32> -> vector<64x1024xf32>
    %c0_3 = arith.constant 0 : index
    %c0_4 = arith.constant 0 : index
    %3 = vector.load %arg3[%c0_3, %c0_4] : memref<1x1024xf32, #tpu.memory_space<vmem>>, vector<1x1024xf32>
    %4 = vector.broadcast %3 : vector<1x1024xf32> to vector<64x1024xf32>
    %5 = arith.addf %2, %4 : vector<64x1024xf32>
    %6 = vector.extract_strided_slice %5 {offsets = [0, 0], sizes = [64, 512], strides = [1, 1]} : vector<64x1024xf32> to vector<64x512xf32>
    %7 = vector.shape_cast %6 : vector<64x512xf32> to vector<8x8x512xf32>
    %c0_5 = arith.constant 0 : index
    %c0_6 = arith.constant 0 : index
    %c0_7 = arith.constant 0 : index
    %8 = vector.load %arg8[%c0_5, %c0_6, %c0_7] : memref<8x8x512xf32, #tpu.memory_space<vmem>>, vector<8x8x512xf32>
    tpu.vector_store %arg8[%c0_5, %c0_6, %c0_7], %7 {strides = array<i32>} : memref<8x8x512xf32, #tpu.memory_space<vmem>>, vector<8x8x512xf32>,
    %9 = vector.extract_strided_slice %5 {offsets = [0, 512], sizes = [64, 512], strides = [1, 1]} : vector<64x1024xf32> to vector<64x512xf32>
    %10 = vector.shape_cast %9 : vector<64x512xf32> to vector<8x8x512xf32>
    %c0_8 = arith.constant 0 : index
    %c0_9 = arith.constant 0 : index
    %c0_10 = arith.constant 0 : index
    %11 = vector.load %arg9[%c0_8, %c0_9, %c0_10] : memref<8x8x512xf32, #tpu.memory_space<vmem>>, vector<8x8x512xf32>
    tpu.vector_store %arg9[%c0_8, %c0_9, %c0_10], %10 {strides = array<i32>} : memref<8x8x512xf32, #tpu.memory_space<vmem>>, vector<8x8x512xf32>,
    %c0_11 = arith.constant 0 : index
    %c0_12 = arith.constant 0 : index
    %12 = vector.load %arg1[%c0_11, %c0_12] : memref<8x1xi32, #tpu.memory_space<vmem>>, vector<8x1xi32>
    %c0_13 = arith.constant 0 : index
    %c0_14 = arith.constant 0 : index
    %13 = vector.load %arg4[%c0_13, %c0_14] : memref<128x512xf32, #tpu.memory_space<vmem>>, vector<128x512xf32>
    %c0_15 = arith.constant 0 : index
    %c0_16 = arith.constant 0 : index
    %14 = vector.load %arg5[%c0_15, %c0_16] : memref<128x512xf32, #tpu.memory_space<vmem>>, vector<128x512xf32>
    %cst_17 = arith.constant 0.000000e+00 : f32
    %15 = vector.broadcast %cst_17 : f32 to vector<8x128xf32>
    %c0_i32 = arith.constant 0 : i32
    %16 = arith.index_cast %c0_i32 : i32 to index
    %c0_18 = arith.constant 0 : index
    %c0_19 = arith.constant 0 : index
    %17 = vector.load %arg8[%16, %c0_18, %c0_19] : memref<8x8x512xf32, #tpu.memory_space<vmem>>, vector<1x8x512xf32>
    %18 = vector.shape_cast %17 : vector<1x8x512xf32> to vector<8x512xf32>
    %cst_20 = arith.constant dense<0.000000e+00> : vector<8x512xf32>
    %19 = tpu.matmul %15, %13, %cst_20 {dimension_numbers = #tpu.dot_dimension_numbers<[1], [0], [0], [1], [0, 0, 1, 1], [], []>} : vector<8x128xf32>, vector<128x512xf32>, vector<8x512xf32> -> vector<8x512xf32>
    %20 = arith.addf %18, %19 : vector<8x512xf32>
    %21 = vector.extract_strided_slice %20 {offsets = [0, 0], sizes = [8, 128], strides = [1, 1]} : vector<8x512xf32> to vector<8x128xf32>
    %cst_21 = arith.constant 5.000000e-01 : f32
    %22 = vector.broadcast %cst_21 : f32 to vector<8x128xf32>
    %23 = arith.mulf %22, %21 : vector<8x128xf32>
    %24 = math.tanh %23 : vector<8x128xf32>
    %cst_22 = arith.constant 1.000000e+00 : f32
    %25 = vector.broadcast %cst_22 : f32 to vector<8x128xf32>
    %26 = arith.addf %24, %25 : vector<8x128xf32>
    %cst_23 = arith.constant 5.000000e-01 : f32
    %27 = vector.broadcast %cst_23 : f32 to vector<8x128xf32>
    %28 = arith.mulf %27, %26 : vector<8x128xf32>
    %29 = vector.extract_strided_slice %20 {offsets = [0, 128], sizes = [8, 128], strides = [1, 1]} : vector<8x512xf32> to vector<8x128xf32>
    %cst_24 = arith.constant 5.000000e-01 : f32
    %30 = vector.broadcast %cst_24 : f32 to vector<8x128xf32>
    %31 = arith.mulf %30, %29 : vector<8x128xf32>
    %32 = math.tanh %31 : vector<8x128xf32>
    %cst_25 = arith.constant 1.000000e+00 : f32
    %33 = vector.broadcast %cst_25 : f32 to vector<8x128xf32>
    %34 = arith.addf %32, %33 : vector<8x128xf32>
    %cst_26 = arith.constant 5.000000e-01 : f32
    %35 = vector.broadcast %cst_26 : f32 to vector<8x128xf32>
    %36 = arith.mulf %35, %34 : vector<8x128xf32>
    %37 = vector.extract_strided_slice %20 {offsets = [0, 256], sizes = [8, 128], strides = [1, 1]} : vector<8x512xf32> to vector<8x128xf32>
    %38 = math.tanh %37 : vector<8x128xf32>
    %39 = vector.extract_strided_slice %20 {offsets = [0, 384], sizes = [8, 128], strides = [1, 1]} : vector<8x512xf32> to vector<8x128xf32>
    %cst_27 = arith.constant 5.000000e-01 : f32
    %40 = vector.broadcast %cst_27 : f32 to vector<8x128xf32>
    %41 = arith.mulf %40, %39 : vector<8x128xf32>
    %42 = math.tanh %41 : vector<8x128xf32>
    %cst_28 = arith.constant 1.000000e+00 : f32
    %43 = vector.broadcast %cst_28 : f32 to vector<8x128xf32>
    %44 = arith.addf %42, %43 : vector<8x128xf32>
    %cst_29 = arith.constant 5.000000e-01 : f32
    %45 = vector.broadcast %cst_29 : f32 to vector<8x128xf32>
    %46 = arith.mulf %45, %44 : vector<8x128xf32>
    %47 = arith.mulf %36, %15 : vector<8x128xf32>
    %48 = arith.mulf %28, %38 : vector<8x128xf32>
    %49 = arith.addf %47, %48 : vector<8x128xf32>
    %50 = math.tanh %49 : vector<8x128xf32>
    %51 = arith.mulf %46, %50 : vector<8x128xf32>
    %52 = vector.broadcast %c0_i32 : i32 to vector<8x1xi32>
    %53 = arith.cmpi sgt, %12, %52 : vector<8x1xi32>
    %54 = vector.shape_cast %53 : vector<8x1xi1> to vector<8x1xi1>
    %55 = vector.broadcast %54 : vector<8x1xi1> to vector<8x128xi1>
    %56 = arith.select %55, %51, %15 : vector<8x128xi1>, vector<8x128xf32>
    %57 = vector.shape_cast %53 : vector<8x1xi1> to vector<8x1xi1>
    %58 = vector.broadcast %57 : vector<8x1xi1> to vector<8x128xi1>
    %59 = arith.select %58, %49, %15 : vector<8x128xi1>, vector<8x128xf32>
    %c1_i32 = arith.constant 1 : i32
    %60 = arith.index_cast %c1_i32 : i32 to index
    %c0_30 = arith.constant 0 : index
    %c0_31 = arith.constant 0 : index
    %61 = vector.load %arg8[%60, %c0_30, %c0_31] : memref<8x8x512xf32, #tpu.memory_space<vmem>>, vector<1x8x512xf32>
    %62 = vector.shape_cast %61 : vector<1x8x512xf32> to vector<8x512xf32>
    %cst_32 = arith.constant dense<0.000000e+00> : vector<8x512xf32>
    %63 = tpu.matmul %56, %13, %cst_32 {dimension_numbers = #tpu.dot_dimension_numbers<[1], [0], [0], [1], [0, 0, 1, 1], [], []>} : vector<8x128xf32>, vector<128x512xf32>, vector<8x512xf32> -> vector<8x512xf32>
    %64 = arith.addf %62, %63 : vector<8x512xf32>
    %65 = vector.extract_strided_slice %64 {offsets = [0, 0], sizes = [8, 128], strides = [1, 1]} : vector<8x512xf32> to vector<8x128xf32>
    %cst_33 = arith.constant 5.000000e-01 : f32
    %66 = vector.broadcast %cst_33 : f32 to vector<8x128xf32>
    %67 = arith.mulf %66, %65 : vector<8x128xf32>
    %68 = math.tanh %67 : vector<8x128xf32>
    %cst_34 = arith.constant 1.000000e+00 : f32
    %69 = vector.broadcast %cst_34 : f32 to vector<8x128xf32>
    %70 = arith.addf %68, %69 : vector<8x128xf32>
    %cst_35 = arith.constant 5.000000e-01 : f32
    %71 = vector.broadcast %cst_35 : f32 to vector<8x128xf32>
    %72 = arith.mulf %71, %70 : vector<8x128xf32>
    %73 = vector.extract_strided_slice %64 {offsets = [0, 128], sizes = [8, 128], strides = [1, 1]} : vector<8x512xf32> to vector<8x128xf32>
    %cst_36 = arith.constant 5.000000e-01 : f32
    %74 = vector.broadcast %cst_36 : f32 to vector<8x128xf32>
    %75 = arith.mulf %74, %73 : vector<8x128xf32>
    %76 = math.tanh %75 : vector<8x128xf32>
    %cst_37 = arith.constant 1.000000e+00 : f32
    %77 = vector.broadcast %cst_37 : f32 to vector<8x128xf32>
    %78 = arith.addf %76, %77 : vector<8x128xf32>
    %cst_38 = arith.constant 5.000000e-01 : f32
    %79 = vector.broadcast %cst_38 : f32 to vector<8x128xf32>
    %80 = arith.mulf %79, %78 : vector<8x128xf32>
    %81 = vector.extract_strided_slice %64 {offsets = [0, 256], sizes = [8, 128], strides = [1, 1]} : vector<8x512xf32> to vector<8x128xf32>
    %82 = math.tanh %81 : vector<8x128xf32>
    %83 = vector.extract_strided_slice %64 {offsets = [0, 384], sizes = [8, 128], strides = [1, 1]} : vector<8x512xf32> to vector<8x128xf32>
    %cst_39 = arith.constant 5.000000e-01 : f32
    %84 = vector.broadcast %cst_39 : f32 to vector<8x128xf32>
    %85 = arith.mulf %84, %83 : vector<8x128xf32>
    %86 = math.tanh %85 : vector<8x128xf32>
    %cst_40 = arith.constant 1.000000e+00 : f32
    %87 = vector.broadcast %cst_40 : f32 to vector<8x128xf32>
    %88 = arith.addf %86, %87 : vector<8x128xf32>
    %cst_41 = arith.constant 5.000000e-01 : f32
    %89 = vector.broadcast %cst_41 : f32 to vector<8x128xf32>
    %90 = arith.mulf %89, %88 : vector<8x128xf32>
    %91 = arith.mulf %80, %59 : vector<8x128xf32>
    %92 = arith.mulf %72, %82 : vector<8x128xf32>
    %93 = arith.addf %91, %92 : vector<8x128xf32>
    %94 = math.tanh %93 : vector<8x128xf32>
    %95 = arith.mulf %90, %94 : vector<8x128xf32>
    %96 = vector.broadcast %c1_i32 : i32 to vector<8x1xi32>
    %97 = arith.cmpi sgt, %12, %96 : vector<8x1xi32>
    %98 = vector.shape_cast %97 : vector<8x1xi1> to vector<8x1xi1>
    %99 = vector.broadcast %98 : vector<8x1xi1> to vector<8x128xi1>
    %100 = arith.select %99, %95, %56 : vector<8x128xi1>, vector<8x128xf32>
    %101 = vector.shape_cast %97 : vector<8x1xi1> to vector<8x1xi1>
    %102 = vector.broadcast %101 : vector<8x1xi1> to vector<8x128xi1>
    %103 = arith.select %102, %93, %59 : vector<8x128xi1>, vector<8x128xf32>
    %c2_i32 = arith.constant 2 : i32
    %104 = arith.index_cast %c2_i32 : i32 to index
    %c0_42 = arith.constant 0 : index
    %c0_43 = arith.constant 0 : index
    %105 = vector.load %arg8[%104, %c0_42, %c0_43] : memref<8x8x512xf32, #tpu.memory_space<vmem>>, vector<1x8x512xf32>
    %106 = vector.shape_cast %105 : vector<1x8x512xf32> to vector<8x512xf32>
    %cst_44 = arith.constant dense<0.000000e+00> : vector<8x512xf32>
    %107 = tpu.matmul %100, %13, %cst_44 {dimension_numbers = #tpu.dot_dimension_numbers<[1], [0], [0], [1], [0, 0, 1, 1], [], []>} : vector<8x128xf32>, vector<128x512xf32>, vector<8x512xf32> -> vector<8x512xf32>
    %108 = arith.addf %106, %107 : vector<8x512xf32>
    %109 = vector.extract_strided_slice %108 {offsets = [0, 0], sizes = [8, 128], strides = [1, 1]} : vector<8x512xf32> to vector<8x128xf32>
    %cst_45 = arith.constant 5.000000e-01 : f32
    %110 = vector.broadcast %cst_45 : f32 to vector<8x128xf32>
    %111 = arith.mulf %110, %109 : vector<8x128xf32>
    %112 = math.tanh %111 : vector<8x128xf32>
    %cst_46 = arith.constant 1.000000e+00 : f32
    %113 = vector.broadcast %cst_46 : f32 to vector<8x128xf32>
    %114 = arith.addf %112, %113 : vector<8x128xf32>
    %cst_47 = arith.constant 5.000000e-01 : f32
    %115 = vector.broadcast %cst_47 : f32 to vector<8x128xf32>
    %116 = arith.mulf %115, %114 : vector<8x128xf32>
    %117 = vector.extract_strided_slice %108 {offsets = [0, 128], sizes = [8, 128], strides = [1, 1]} : vector<8x512xf32> to vector<8x128xf32>
    %cst_48 = arith.constant 5.000000e-01 : f32
    %118 = vector.broadcast %cst_48 : f32 to vector<8x128xf32>
    %119 = arith.mulf %118, %117 : vector<8x128xf32>
    %120 = math.tanh %119 : vector<8x128xf32>
    %cst_49 = arith.constant 1.000000e+00 : f32
    %121 = vector.broadcast %cst_49 : f32 to vector<8x128xf32>
    %122 = arith.addf %120, %121 : vector<8x128xf32>
    %cst_50 = arith.constant 5.000000e-01 : f32
    %123 = vector.broadcast %cst_50 : f32 to vector<8x128xf32>
    %124 = arith.mulf %123, %122 : vector<8x128xf32>
    %125 = vector.extract_strided_slice %108 {offsets = [0, 256], sizes = [8, 128], strides = [1, 1]} : vector<8x512xf32> to vector<8x128xf32>
    %126 = math.tanh %125 : vector<8x128xf32>
    %127 = vector.extract_strided_slice %108 {offsets = [0, 384], sizes = [8, 128], strides = [1, 1]} : vector<8x512xf32> to vector<8x128xf32>
    %cst_51 = arith.constant 5.000000e-01 : f32
    %128 = vector.broadcast %cst_51 : f32 to vector<8x128xf32>
    %129 = arith.mulf %128, %127 : vector<8x128xf32>
    %130 = math.tanh %129 : vector<8x128xf32>
    %cst_52 = arith.constant 1.000000e+00 : f32
    %131 = vector.broadcast %cst_52 : f32 to vector<8x128xf32>
    %132 = arith.addf %130, %131 : vector<8x128xf32>
    %cst_53 = arith.constant 5.000000e-01 : f32
    %133 = vector.broadcast %cst_53 : f32 to vector<8x128xf32>
    %134 = arith.mulf %133, %132 : vector<8x128xf32>
    %135 = arith.mulf %124, %103 : vector<8x128xf32>
    %136 = arith.mulf %116, %126 : vector<8x128xf32>
    %137 = arith.addf %135, %136 : vector<8x128xf32>
    %138 = math.tanh %137 : vector<8x128xf32>
    %139 = arith.mulf %134, %138 : vector<8x128xf32>
    %140 = vector.broadcast %c2_i32 : i32 to vector<8x1xi32>
    %141 = arith.cmpi sgt, %12, %140 : vector<8x1xi32>
    %142 = vector.shape_cast %141 : vector<8x1xi1> to vector<8x1xi1>
    %143 = vector.broadcast %142 : vector<8x1xi1> to vector<8x128xi1>
    %144 = arith.select %143, %139, %100 : vector<8x128xi1>, vector<8x128xf32>
    %145 = vector.shape_cast %141 : vector<8x1xi1> to vector<8x1xi1>
    %146 = vector.broadcast %145 : vector<8x1xi1> to vector<8x128xi1>
    %147 = arith.select %146, %137, %103 : vector<8x128xi1>, vector<8x128xf32>
    %c3_i32 = arith.constant 3 : i32
    %148 = arith.index_cast %c3_i32 : i32 to index
    %c0_54 = arith.constant 0 : index
    %c0_55 = arith.constant 0 : index
    %149 = vector.load %arg8[%148, %c0_54, %c0_55] : memref<8x8x512xf32, #tpu.memory_space<vmem>>, vector<1x8x512xf32>
    %150 = vector.shape_cast %149 : vector<1x8x512xf32> to vector<8x512xf32>
    %cst_56 = arith.constant dense<0.000000e+00> : vector<8x512xf32>
    %151 = tpu.matmul %144, %13, %cst_56 {dimension_numbers = #tpu.dot_dimension_numbers<[1], [0], [0], [1], [0, 0, 1, 1], [], []>} : vector<8x128xf32>, vector<128x512xf32>, vector<8x512xf32> -> vector<8x512xf32>
    %152 = arith.addf %150, %151 : vector<8x512xf32>
    %153 = vector.extract_strided_slice %152 {offsets = [0, 0], sizes = [8, 128], strides = [1, 1]} : vector<8x512xf32> to vector<8x128xf32>
    %cst_57 = arith.constant 5.000000e-01 : f32
    %154 = vector.broadcast %cst_57 : f32 to vector<8x128xf32>
    %155 = arith.mulf %154, %153 : vector<8x128xf32>
    %156 = math.tanh %155 : vector<8x128xf32>
    %cst_58 = arith.constant 1.000000e+00 : f32
    %157 = vector.broadcast %cst_58 : f32 to vector<8x128xf32>
    %158 = arith.addf %156, %157 : vector<8x128xf32>
    %cst_59 = arith.constant 5.000000e-01 : f32
    %159 = vector.broadcast %cst_59 : f32 to vector<8x128xf32>
    %160 = arith.mulf %159, %158 : vector<8x128xf32>
    %161 = vector.extract_strided_slice %152 {offsets = [0, 128], sizes = [8, 128], strides = [1, 1]} : vector<8x512xf32> to vector<8x128xf32>
    %cst_60 = arith.constant 5.000000e-01 : f32
    %162 = vector.broadcast %cst_60 : f32 to vector<8x128xf32>
    %163 = arith.mulf %162, %161 : vector<8x128xf32>
    %164 = math.tanh %163 : vector<8x128xf32>
    %cst_61 = arith.constant 1.000000e+00 : f32
    %165 = vector.broadcast %cst_61 : f32 to vector<8x128xf32>
    %166 = arith.addf %164, %165 : vector<8x128xf32>
    %cst_62 = arith.constant 5.000000e-01 : f32
    %167 = vector.broadcast %cst_62 : f32 to vector<8x128xf32>
    %168 = arith.mulf %167, %166 : vector<8x128xf32>
    %169 = vector.extract_strided_slice %152 {offsets = [0, 256], sizes = [8, 128], strides = [1, 1]} : vector<8x512xf32> to vector<8x128xf32>
    %170 = math.tanh %169 : vector<8x128xf32>
    %171 = vector.extract_strided_slice %152 {offsets = [0, 384], sizes = [8, 128], strides = [1, 1]} : vector<8x512xf32> to vector<8x128xf32>
    %cst_63 = arith.constant 5.000000e-01 : f32
    %172 = vector.broadcast %cst_63 : f32 to vector<8x128xf32>
    %173 = arith.mulf %172, %171 : vector<8x128xf32>
    %174 = math.tanh %173 : vector<8x128xf32>
    %cst_64 = arith.constant 1.000000e+00 : f32
    %175 = vector.broadcast %cst_64 : f32 to vector<8x128xf32>
    %176 = arith.addf %174, %175 : vector<8x128xf32>
    %cst_65 = arith.constant 5.000000e-01 : f32
    %177 = vector.broadcast %cst_65 : f32 to vector<8x128xf32>
    %178 = arith.mulf %177, %176 : vector<8x128xf32>
    %179 = arith.mulf %168, %147 : vector<8x128xf32>
    %180 = arith.mulf %160, %170 : vector<8x128xf32>
    %181 = arith.addf %179, %180 : vector<8x128xf32>
    %182 = math.tanh %181 : vector<8x128xf32>
    %183 = arith.mulf %178, %182 : vector<8x128xf32>
    %184 = vector.broadcast %c3_i32 : i32 to vector<8x1xi32>
    %185 = arith.cmpi sgt, %12, %184 : vector<8x1xi32>
    %186 = vector.shape_cast %185 : vector<8x1xi1> to vector<8x1xi1>
    %187 = vector.broadcast %186 : vector<8x1xi1> to vector<8x128xi1>
    %188 = arith.select %187, %183, %144 : vector<8x128xi1>, vector<8x128xf32>
    %189 = vector.shape_cast %185 : vector<8x1xi1> to vector<8x1xi1>
    %190 = vector.broadcast %189 : vector<8x1xi1> to vector<8x128xi1>
    %191 = arith.select %190, %181, %147 : vector<8x128xi1>, vector<8x128xf32>
    %c4_i32 = arith.constant 4 : i32
    %192 = arith.index_cast %c4_i32 : i32 to index
    %c0_66 = arith.constant 0 : index
    %c0_67 = arith.constant 0 : index
    %193 = vector.load %arg8[%192, %c0_66, %c0_67] : memref<8x8x512xf32, #tpu.memory_space<vmem>>, vector<1x8x512xf32>
    %194 = vector.shape_cast %193 : vector<1x8x512xf32> to vector<8x512xf32>
    %cst_68 = arith.constant dense<0.000000e+00> : vector<8x512xf32>
    %195 = tpu.matmul %188, %13, %cst_68 {dimension_numbers = #tpu.dot_dimension_numbers<[1], [0], [0], [1], [0, 0, 1, 1], [], []>} : vector<8x128xf32>, vector<128x512xf32>, vector<8x512xf32> -> vector<8x512xf32>
    %196 = arith.addf %194, %195 : vector<8x512xf32>
    %197 = vector.extract_strided_slice %196 {offsets = [0, 0], sizes = [8, 128], strides = [1, 1]} : vector<8x512xf32> to vector<8x128xf32>
    %cst_69 = arith.constant 5.000000e-01 : f32
    %198 = vector.broadcast %cst_69 : f32 to vector<8x128xf32>
    %199 = arith.mulf %198, %197 : vector<8x128xf32>
    %200 = math.tanh %199 : vector<8x128xf32>
    %cst_70 = arith.constant 1.000000e+00 : f32
    %201 = vector.broadcast %cst_70 : f32 to vector<8x128xf32>
    %202 = arith.addf %200, %201 : vector<8x128xf32>
    %cst_71 = arith.constant 5.000000e-01 : f32
    %203 = vector.broadcast %cst_71 : f32 to vector<8x128xf32>
    %204 = arith.mulf %203, %202 : vector<8x128xf32>
    %205 = vector.extract_strided_slice %196 {offsets = [0, 128], sizes = [8, 128], strides = [1, 1]} : vector<8x512xf32> to vector<8x128xf32>
    %cst_72 = arith.constant 5.000000e-01 : f32
    %206 = vector.broadcast %cst_72 : f32 to vector<8x128xf32>
    %207 = arith.mulf %206, %205 : vector<8x128xf32>
    %208 = math.tanh %207 : vector<8x128xf32>
    %cst_73 = arith.constant 1.000000e+00 : f32
    %209 = vector.broadcast %cst_73 : f32 to vector<8x128xf32>
    %210 = arith.addf %208, %209 : vector<8x128xf32>
    %cst_74 = arith.constant 5.000000e-01 : f32
    %211 = vector.broadcast %cst_74 : f32 to vector<8x128xf32>
    %212 = arith.mulf %211, %210 : vector<8x128xf32>
    %213 = vector.extract_strided_slice %196 {offsets = [0, 256], sizes = [8, 128], strides = [1, 1]} : vector<8x512xf32> to vector<8x128xf32>
    %214 = math.tanh %213 : vector<8x128xf32>
    %215 = vector.extract_strided_slice %196 {offsets = [0, 384], sizes = [8, 128], strides = [1, 1]} : vector<8x512xf32> to vector<8x128xf32>
    %cst_75 = arith.constant 5.000000e-01 : f32
    %216 = vector.broadcast %cst_75 : f32 to vector<8x128xf32>
    %217 = arith.mulf %216, %215 : vector<8x128xf32>
    %218 = math.tanh %217 : vector<8x128xf32>
    %cst_76 = arith.constant 1.000000e+00 : f32
    %219 = vector.broadcast %cst_76 : f32 to vector<8x128xf32>
    %220 = arith.addf %218, %219 : vector<8x128xf32>
    %cst_77 = arith.constant 5.000000e-01 : f32
    %221 = vector.broadcast %cst_77 : f32 to vector<8x128xf32>
    %222 = arith.mulf %221, %220 : vector<8x128xf32>
    %223 = arith.mulf %212, %191 : vector<8x128xf32>
    %224 = arith.mulf %204, %214 : vector<8x128xf32>
    %225 = arith.addf %223, %224 : vector<8x128xf32>
    %226 = math.tanh %225 : vector<8x128xf32>
    %227 = arith.mulf %222, %226 : vector<8x128xf32>
    %228 = vector.broadcast %c4_i32 : i32 to vector<8x1xi32>
    %229 = arith.cmpi sgt, %12, %228 : vector<8x1xi32>
    %230 = vector.shape_cast %229 : vector<8x1xi1> to vector<8x1xi1>
    %231 = vector.broadcast %230 : vector<8x1xi1> to vector<8x128xi1>
    %232 = arith.select %231, %227, %188 : vector<8x128xi1>, vector<8x128xf32>
    %233 = vector.shape_cast %229 : vector<8x1xi1> to vector<8x1xi1>
    %234 = vector.broadcast %233 : vector<8x1xi1> to vector<8x128xi1>
    %235 = arith.select %234, %225, %191 : vector<8x128xi1>, vector<8x128xf32>
    %c5_i32 = arith.constant 5 : i32
    %236 = arith.index_cast %c5_i32 : i32 to index
    %c0_78 = arith.constant 0 : index
    %c0_79 = arith.constant 0 : index
    %237 = vector.load %arg8[%236, %c0_78, %c0_79] : memref<8x8x512xf32, #tpu.memory_space<vmem>>, vector<1x8x512xf32>
    %238 = vector.shape_cast %237 : vector<1x8x512xf32> to vector<8x512xf32>
    %cst_80 = arith.constant dense<0.000000e+00> : vector<8x512xf32>
    %239 = tpu.matmul %232, %13, %cst_80 {dimension_numbers = #tpu.dot_dimension_numbers<[1], [0], [0], [1], [0, 0, 1, 1], [], []>} : vector<8x128xf32>, vector<128x512xf32>, vector<8x512xf32> -> vector<8x512xf32>
    %240 = arith.addf %238, %239 : vector<8x512xf32>
    %241 = vector.extract_strided_slice %240 {offsets = [0, 0], sizes = [8, 128], strides = [1, 1]} : vector<8x512xf32> to vector<8x128xf32>
    %cst_81 = arith.constant 5.000000e-01 : f32
    %242 = vector.broadcast %cst_81 : f32 to vector<8x128xf32>
    %243 = arith.mulf %242, %241 : vector<8x128xf32>
    %244 = math.tanh %243 : vector<8x128xf32>
    %cst_82 = arith.constant 1.000000e+00 : f32
    %245 = vector.broadcast %cst_82 : f32 to vector<8x128xf32>
    %246 = arith.addf %244, %245 : vector<8x128xf32>
    %cst_83 = arith.constant 5.000000e-01 : f32
    %247 = vector.broadcast %cst_83 : f32 to vector<8x128xf32>
    %248 = arith.mulf %247, %246 : vector<8x128xf32>
    %249 = vector.extract_strided_slice %240 {offsets = [0, 128], sizes = [8, 128], strides = [1, 1]} : vector<8x512xf32> to vector<8x128xf32>
    %cst_84 = arith.constant 5.000000e-01 : f32
    %250 = vector.broadcast %cst_84 : f32 to vector<8x128xf32>
    %251 = arith.mulf %250, %249 : vector<8x128xf32>
    %252 = math.tanh %251 : vector<8x128xf32>
    %cst_85 = arith.constant 1.000000e+00 : f32
    %253 = vector.broadcast %cst_85 : f32 to vector<8x128xf32>
    %254 = arith.addf %252, %253 : vector<8x128xf32>
    %cst_86 = arith.constant 5.000000e-01 : f32
    %255 = vector.broadcast %cst_86 : f32 to vector<8x128xf32>
    %256 = arith.mulf %255, %254 : vector<8x128xf32>
    %257 = vector.extract_strided_slice %240 {offsets = [0, 256], sizes = [8, 128], strides = [1, 1]} : vector<8x512xf32> to vector<8x128xf32>
    %258 = math.tanh %257 : vector<8x128xf32>
    %259 = vector.extract_strided_slice %240 {offsets = [0, 384], sizes = [8, 128], strides = [1, 1]} : vector<8x512xf32> to vector<8x128xf32>
    %cst_87 = arith.constant 5.000000e-01 : f32
    %260 = vector.broadcast %cst_87 : f32 to vector<8x128xf32>
    %261 = arith.mulf %260, %259 : vector<8x128xf32>
    %262 = math.tanh %261 : vector<8x128xf32>
    %cst_88 = arith.constant 1.000000e+00 : f32
    %263 = vector.broadcast %cst_88 : f32 to vector<8x128xf32>
    %264 = arith.addf %262, %263 : vector<8x128xf32>
    %cst_89 = arith.constant 5.000000e-01 : f32
    %265 = vector.broadcast %cst_89 : f32 to vector<8x128xf32>
    %266 = arith.mulf %265, %264 : vector<8x128xf32>
    %267 = arith.mulf %256, %235 : vector<8x128xf32>
    %268 = arith.mulf %248, %258 : vector<8x128xf32>
    %269 = arith.addf %267, %268 : vector<8x128xf32>
    %270 = math.tanh %269 : vector<8x128xf32>
    %271 = arith.mulf %266, %270 : vector<8x128xf32>
    %272 = vector.broadcast %c5_i32 : i32 to vector<8x1xi32>
    %273 = arith.cmpi sgt, %12, %272 : vector<8x1xi32>
    %274 = vector.shape_cast %273 : vector<8x1xi1> to vector<8x1xi1>
    %275 = vector.broadcast %274 : vector<8x1xi1> to vector<8x128xi1>
    %276 = arith.select %275, %271, %232 : vector<8x128xi1>, vector<8x128xf32>
    %277 = vector.shape_cast %273 : vector<8x1xi1> to vector<8x1xi1>
    %278 = vector.broadcast %277 : vector<8x1xi1> to vector<8x128xi1>
    %279 = arith.select %278, %269, %235 : vector<8x128xi1>, vector<8x128xf32>
    %c6_i32 = arith.constant 6 : i32
    %280 = arith.index_cast %c6_i32 : i32 to index
    %c0_90 = arith.constant 0 : index
    %c0_91 = arith.constant 0 : index
    %281 = vector.load %arg8[%280, %c0_90, %c0_91] : memref<8x8x512xf32, #tpu.memory_space<vmem>>, vector<1x8x512xf32>
    %282 = vector.shape_cast %281 : vector<1x8x512xf32> to vector<8x512xf32>
    %cst_92 = arith.constant dense<0.000000e+00> : vector<8x512xf32>
    %283 = tpu.matmul %276, %13, %cst_92 {dimension_numbers = #tpu.dot_dimension_numbers<[1], [0], [0], [1], [0, 0, 1, 1], [], []>} : vector<8x128xf32>, vector<128x512xf32>, vector<8x512xf32> -> vector<8x512xf32>
    %284 = arith.addf %282, %283 : vector<8x512xf32>
    %285 = vector.extract_strided_slice %284 {offsets = [0, 0], sizes = [8, 128], strides = [1, 1]} : vector<8x512xf32> to vector<8x128xf32>
    %cst_93 = arith.constant 5.000000e-01 : f32
    %286 = vector.broadcast %cst_93 : f32 to vector<8x128xf32>
    %287 = arith.mulf %286, %285 : vector<8x128xf32>
    %288 = math.tanh %287 : vector<8x128xf32>
    %cst_94 = arith.constant 1.000000e+00 : f32
    %289 = vector.broadcast %cst_94 : f32 to vector<8x128xf32>
    %290 = arith.addf %288, %289 : vector<8x128xf32>
    %cst_95 = arith.constant 5.000000e-01 : f32
    %291 = vector.broadcast %cst_95 : f32 to vector<8x128xf32>
    %292 = arith.mulf %291, %290 : vector<8x128xf32>
    %293 = vector.extract_strided_slice %284 {offsets = [0, 128], sizes = [8, 128], strides = [1, 1]} : vector<8x512xf32> to vector<8x128xf32>
    %cst_96 = arith.constant 5.000000e-01 : f32
    %294 = vector.broadcast %cst_96 : f32 to vector<8x128xf32>
    %295 = arith.mulf %294, %293 : vector<8x128xf32>
    %296 = math.tanh %295 : vector<8x128xf32>
    %cst_97 = arith.constant 1.000000e+00 : f32
    %297 = vector.broadcast %cst_97 : f32 to vector<8x128xf32>
    %298 = arith.addf %296, %297 : vector<8x128xf32>
    %cst_98 = arith.constant 5.000000e-01 : f32
    %299 = vector.broadcast %cst_98 : f32 to vector<8x128xf32>
    %300 = arith.mulf %299, %298 : vector<8x128xf32>
    %301 = vector.extract_strided_slice %284 {offsets = [0, 256], sizes = [8, 128], strides = [1, 1]} : vector<8x512xf32> to vector<8x128xf32>
    %302 = math.tanh %301 : vector<8x128xf32>
    %303 = vector.extract_strided_slice %284 {offsets = [0, 384], sizes = [8, 128], strides = [1, 1]} : vector<8x512xf32> to vector<8x128xf32>
    %cst_99 = arith.constant 5.000000e-01 : f32
    %304 = vector.broadcast %cst_99 : f32 to vector<8x128xf32>
    %305 = arith.mulf %304, %303 : vector<8x128xf32>
    %306 = math.tanh %305 : vector<8x128xf32>
    %cst_100 = arith.constant 1.000000e+00 : f32
    %307 = vector.broadcast %cst_100 : f32 to vector<8x128xf32>
    %308 = arith.addf %306, %307 : vector<8x128xf32>
    %cst_101 = arith.constant 5.000000e-01 : f32
    %309 = vector.broadcast %cst_101 : f32 to vector<8x128xf32>
    %310 = arith.mulf %309, %308 : vector<8x128xf32>
    %311 = arith.mulf %300, %279 : vector<8x128xf32>
    %312 = arith.mulf %292, %302 : vector<8x128xf32>
    %313 = arith.addf %311, %312 : vector<8x128xf32>
    %314 = math.tanh %313 : vector<8x128xf32>
    %315 = arith.mulf %310, %314 : vector<8x128xf32>
    %316 = vector.broadcast %c6_i32 : i32 to vector<8x1xi32>
    %317 = arith.cmpi sgt, %12, %316 : vector<8x1xi32>
    %318 = vector.shape_cast %317 : vector<8x1xi1> to vector<8x1xi1>
    %319 = vector.broadcast %318 : vector<8x1xi1> to vector<8x128xi1>
    %320 = arith.select %319, %315, %276 : vector<8x128xi1>, vector<8x128xf32>
    %321 = vector.shape_cast %317 : vector<8x1xi1> to vector<8x1xi1>
    %322 = vector.broadcast %321 : vector<8x1xi1> to vector<8x128xi1>
    %323 = arith.select %322, %313, %279 : vector<8x128xi1>, vector<8x128xf32>
    %c7_i32 = arith.constant 7 : i32
    %324 = arith.index_cast %c7_i32 : i32 to index
    %c0_102 = arith.constant 0 : index
    %c0_103 = arith.constant 0 : index
    %325 = vector.load %arg8[%324, %c0_102, %c0_103] : memref<8x8x512xf32, #tpu.memory_space<vmem>>, vector<1x8x512xf32>
    %326 = vector.shape_cast %325 : vector<1x8x512xf32> to vector<8x512xf32>
    %cst_104 = arith.constant dense<0.000000e+00> : vector<8x512xf32>
    %327 = tpu.matmul %320, %13, %cst_104 {dimension_numbers = #tpu.dot_dimension_numbers<[1], [0], [0], [1], [0, 0, 1, 1], [], []>} : vector<8x128xf32>, vector<128x512xf32>, vector<8x512xf32> -> vector<8x512xf32>
    %328 = arith.addf %326, %327 : vector<8x512xf32>
    %329 = vector.extract_strided_slice %328 {offsets = [0, 0], sizes = [8, 128], strides = [1, 1]} : vector<8x512xf32> to vector<8x128xf32>
    %cst_105 = arith.constant 5.000000e-01 : f32
    %330 = vector.broadcast %cst_105 : f32 to vector<8x128xf32>
    %331 = arith.mulf %330, %329 : vector<8x128xf32>
    %332 = math.tanh %331 : vector<8x128xf32>
    %cst_106 = arith.constant 1.000000e+00 : f32
    %333 = vector.broadcast %cst_106 : f32 to vector<8x128xf32>
    %334 = arith.addf %332, %333 : vector<8x128xf32>
    %cst_107 = arith.constant 5.000000e-01 : f32
    %335 = vector.broadcast %cst_107 : f32 to vector<8x128xf32>
    %336 = arith.mulf %335, %334 : vector<8x128xf32>
    %337 = vector.extract_strided_slice %328 {offsets = [0, 128], sizes = [8, 128], strides = [1, 1]} : vector<8x512xf32> to vector<8x128xf32>
    %cst_108 = arith.constant 5.000000e-01 : f32
    %338 = vector.broadcast %cst_108 : f32 to vector<8x128xf32>
    %339 = arith.mulf %338, %337 : vector<8x128xf32>
    %340 = math.tanh %339 : vector<8x128xf32>
    %cst_109 = arith.constant 1.000000e+00 : f32
    %341 = vector.broadcast %cst_109 : f32 to vector<8x128xf32>
    %342 = arith.addf %340, %341 : vector<8x128xf32>
    %cst_110 = arith.constant 5.000000e-01 : f32
    %343 = vector.broadcast %cst_110 : f32 to vector<8x128xf32>
    %344 = arith.mulf %343, %342 : vector<8x128xf32>
    %345 = vector.extract_strided_slice %328 {offsets = [0, 256], sizes = [8, 128], strides = [1, 1]} : vector<8x512xf32> to vector<8x128xf32>
    %346 = math.tanh %345 : vector<8x128xf32>
    %347 = vector.extract_strided_slice %328 {offsets = [0, 384], sizes = [8, 128], strides = [1, 1]} : vector<8x512xf32> to vector<8x128xf32>
    %cst_111 = arith.constant 5.000000e-01 : f32
    %348 = vector.broadcast %cst_111 : f32 to vector<8x128xf32>
    %349 = arith.mulf %348, %347 : vector<8x128xf32>
    %350 = math.tanh %349 : vector<8x128xf32>
    %cst_112 = arith.constant 1.000000e+00 : f32
    %351 = vector.broadcast %cst_112 : f32 to vector<8x128xf32>
    %352 = arith.addf %350, %351 : vector<8x128xf32>
    %cst_113 = arith.constant 5.000000e-01 : f32
    %353 = vector.broadcast %cst_113 : f32 to vector<8x128xf32>
    %354 = arith.mulf %353, %352 : vector<8x128xf32>
    %355 = arith.mulf %344, %323 : vector<8x128xf32>
    %356 = arith.mulf %336, %346 : vector<8x128xf32>
    %357 = arith.addf %355, %356 : vector<8x128xf32>
    %358 = math.tanh %357 : vector<8x128xf32>
    %359 = arith.mulf %354, %358 : vector<8x128xf32>
    %360 = vector.broadcast %c7_i32 : i32 to vector<8x1xi32>
    %361 = arith.cmpi sgt, %12, %360 : vector<8x1xi32>
    %362 = vector.shape_cast %361 : vector<8x1xi1> to vector<8x1xi1>
    %363 = vector.broadcast %362 : vector<8x1xi1> to vector<8x128xi1>
    %364 = arith.select %363, %359, %320 : vector<8x128xi1>, vector<8x128xf32>
    %365 = vector.shape_cast %361 : vector<8x1xi1> to vector<8x1xi1>
    %366 = vector.broadcast %365 : vector<8x1xi1> to vector<8x128xi1>
    %367 = arith.select %366, %357, %323 : vector<8x128xi1>, vector<8x128xf32>
    %c8_i32 = arith.constant 8 : i32
    %c0_i32_114 = arith.constant 0 : i32
    %c7_i32_115 = arith.constant 7 : i32
    %368 = arith.subi %c7_i32_115, %c0_i32_114 : i32
    %369 = arith.index_cast %368 : i32 to index
    %c0_116 = arith.constant 0 : index
    %c0_117 = arith.constant 0 : index
    %370 = vector.load %arg9[%369, %c0_116, %c0_117] : memref<8x8x512xf32, #tpu.memory_space<vmem>>, vector<1x8x512xf32>
    %371 = vector.shape_cast %370 : vector<1x8x512xf32> to vector<8x512xf32>
    %cst_118 = arith.constant dense<0.000000e+00> : vector<8x512xf32>
    %372 = tpu.matmul %15, %14, %cst_118 {dimension_numbers = #tpu.dot_dimension_numbers<[1], [0], [0], [1], [0, 0, 1, 1], [], []>} : vector<8x128xf32>, vector<128x512xf32>, vector<8x512xf32> -> vector<8x512xf32>
    %373 = arith.addf %371, %372 : vector<8x512xf32>
    %374 = vector.extract_strided_slice %373 {offsets = [0, 0], sizes = [8, 128], strides = [1, 1]} : vector<8x512xf32> to vector<8x128xf32>
    %cst_119 = arith.constant 5.000000e-01 : f32
    %375 = vector.broadcast %cst_119 : f32 to vector<8x128xf32>
    %376 = arith.mulf %375, %374 : vector<8x128xf32>
    %377 = math.tanh %376 : vector<8x128xf32>
    %cst_120 = arith.constant 1.000000e+00 : f32
    %378 = vector.broadcast %cst_120 : f32 to vector<8x128xf32>
    %379 = arith.addf %377, %378 : vector<8x128xf32>
    %cst_121 = arith.constant 5.000000e-01 : f32
    %380 = vector.broadcast %cst_121 : f32 to vector<8x128xf32>
    %381 = arith.mulf %380, %379 : vector<8x128xf32>
    %382 = vector.extract_strided_slice %373 {offsets = [0, 128], sizes = [8, 128], strides = [1, 1]} : vector<8x512xf32> to vector<8x128xf32>
    %cst_122 = arith.constant 5.000000e-01 : f32
    %383 = vector.broadcast %cst_122 : f32 to vector<8x128xf32>
    %384 = arith.mulf %383, %382 : vector<8x128xf32>
    %385 = math.tanh %384 : vector<8x128xf32>
    %cst_123 = arith.constant 1.000000e+00 : f32
    %386 = vector.broadcast %cst_123 : f32 to vector<8x128xf32>
    %387 = arith.addf %385, %386 : vector<8x128xf32>
    %cst_124 = arith.constant 5.000000e-01 : f32
    %388 = vector.broadcast %cst_124 : f32 to vector<8x128xf32>
    %389 = arith.mulf %388, %387 : vector<8x128xf32>
    %390 = vector.extract_strided_slice %373 {offsets = [0, 256], sizes = [8, 128], strides = [1, 1]} : vector<8x512xf32> to vector<8x128xf32>
    %391 = math.tanh %390 : vector<8x128xf32>
    %392 = vector.extract_strided_slice %373 {offsets = [0, 384], sizes = [8, 128], strides = [1, 1]} : vector<8x512xf32> to vector<8x128xf32>
    %cst_125 = arith.constant 5.000000e-01 : f32
    %393 = vector.broadcast %cst_125 : f32 to vector<8x128xf32>
    %394 = arith.mulf %393, %392 : vector<8x128xf32>
    %395 = math.tanh %394 : vector<8x128xf32>
    %cst_126 = arith.constant 1.000000e+00 : f32
    %396 = vector.broadcast %cst_126 : f32 to vector<8x128xf32>
    %397 = arith.addf %395, %396 : vector<8x128xf32>
    %cst_127 = arith.constant 5.000000e-01 : f32
    %398 = vector.broadcast %cst_127 : f32 to vector<8x128xf32>
    %399 = arith.mulf %398, %397 : vector<8x128xf32>
    %400 = arith.mulf %389, %15 : vector<8x128xf32>
    %401 = arith.mulf %381, %391 : vector<8x128xf32>
    %402 = arith.addf %400, %401 : vector<8x128xf32>
    %403 = math.tanh %402 : vector<8x128xf32>
    %404 = arith.mulf %399, %403 : vector<8x128xf32>
    %405 = vector.broadcast %368 : i32 to vector<8x1xi32>
    %406 = arith.cmpi sgt, %12, %405 : vector<8x1xi32>
    %407 = vector.shape_cast %406 : vector<8x1xi1> to vector<8x1xi1>
    %408 = vector.broadcast %407 : vector<8x1xi1> to vector<8x128xi1>
    %409 = arith.select %408, %404, %15 : vector<8x128xi1>, vector<8x128xf32>
    %410 = vector.shape_cast %406 : vector<8x1xi1> to vector<8x1xi1>
    %411 = vector.broadcast %410 : vector<8x1xi1> to vector<8x128xi1>
    %412 = arith.select %411, %402, %15 : vector<8x128xi1>, vector<8x128xf32>
    %c1_i32_128 = arith.constant 1 : i32
    %c7_i32_129 = arith.constant 7 : i32
    %413 = arith.subi %c7_i32_129, %c1_i32_128 : i32
    %414 = arith.index_cast %413 : i32 to index
    %c0_130 = arith.constant 0 : index
    %c0_131 = arith.constant 0 : index
    %415 = vector.load %arg9[%414, %c0_130, %c0_131] : memref<8x8x512xf32, #tpu.memory_space<vmem>>, vector<1x8x512xf32>
    %416 = vector.shape_cast %415 : vector<1x8x512xf32> to vector<8x512xf32>
    %cst_132 = arith.constant dense<0.000000e+00> : vector<8x512xf32>
    %417 = tpu.matmul %409, %14, %cst_132 {dimension_numbers = #tpu.dot_dimension_numbers<[1], [0], [0], [1], [0, 0, 1, 1], [], []>} : vector<8x128xf32>, vector<128x512xf32>, vector<8x512xf32> -> vector<8x512xf32>
    %418 = arith.addf %416, %417 : vector<8x512xf32>
    %419 = vector.extract_strided_slice %418 {offsets = [0, 0], sizes = [8, 128], strides = [1, 1]} : vector<8x512xf32> to vector<8x128xf32>
    %cst_133 = arith.constant 5.000000e-01 : f32
    %420 = vector.broadcast %cst_133 : f32 to vector<8x128xf32>
    %421 = arith.mulf %420, %419 : vector<8x128xf32>
    %422 = math.tanh %421 : vector<8x128xf32>
    %cst_134 = arith.constant 1.000000e+00 : f32
    %423 = vector.broadcast %cst_134 : f32 to vector<8x128xf32>
    %424 = arith.addf %422, %423 : vector<8x128xf32>
    %cst_135 = arith.constant 5.000000e-01 : f32
    %425 = vector.broadcast %cst_135 : f32 to vector<8x128xf32>
    %426 = arith.mulf %425, %424 : vector<8x128xf32>
    %427 = vector.extract_strided_slice %418 {offsets = [0, 128], sizes = [8, 128], strides = [1, 1]} : vector<8x512xf32> to vector<8x128xf32>
    %cst_136 = arith.constant 5.000000e-01 : f32
    %428 = vector.broadcast %cst_136 : f32 to vector<8x128xf32>
    %429 = arith.mulf %428, %427 : vector<8x128xf32>
    %430 = math.tanh %429 : vector<8x128xf32>
    %cst_137 = arith.constant 1.000000e+00 : f32
    %431 = vector.broadcast %cst_137 : f32 to vector<8x128xf32>
    %432 = arith.addf %430, %431 : vector<8x128xf32>
    %cst_138 = arith.constant 5.000000e-01 : f32
    %433 = vector.broadcast %cst_138 : f32 to vector<8x128xf32>
    %434 = arith.mulf %433, %432 : vector<8x128xf32>
    %435 = vector.extract_strided_slice %418 {offsets = [0, 256], sizes = [8, 128], strides = [1, 1]} : vector<8x512xf32> to vector<8x128xf32>
    %436 = math.tanh %435 : vector<8x128xf32>
    %437 = vector.extract_strided_slice %418 {offsets = [0, 384], sizes = [8, 128], strides = [1, 1]} : vector<8x512xf32> to vector<8x128xf32>
    %cst_139 = arith.constant 5.000000e-01 : f32
    %438 = vector.broadcast %cst_139 : f32 to vector<8x128xf32>
    %439 = arith.mulf %438, %437 : vector<8x128xf32>
    %440 = math.tanh %439 : vector<8x128xf32>
    %cst_140 = arith.constant 1.000000e+00 : f32
    %441 = vector.broadcast %cst_140 : f32 to vector<8x128xf32>
    %442 = arith.addf %440, %441 : vector<8x128xf32>
    %cst_141 = arith.constant 5.000000e-01 : f32
    %443 = vector.broadcast %cst_141 : f32 to vector<8x128xf32>
    %444 = arith.mulf %443, %442 : vector<8x128xf32>
    %445 = arith.mulf %434, %412 : vector<8x128xf32>
    %446 = arith.mulf %426, %436 : vector<8x128xf32>
    %447 = arith.addf %445, %446 : vector<8x128xf32>
    %448 = math.tanh %447 : vector<8x128xf32>
    %449 = arith.mulf %444, %448 : vector<8x128xf32>
    %450 = vector.broadcast %413 : i32 to vector<8x1xi32>
    %451 = arith.cmpi sgt, %12, %450 : vector<8x1xi32>
    %452 = vector.shape_cast %451 : vector<8x1xi1> to vector<8x1xi1>
    %453 = vector.broadcast %452 : vector<8x1xi1> to vector<8x128xi1>
    %454 = arith.select %453, %449, %409 : vector<8x128xi1>, vector<8x128xf32>
    %455 = vector.shape_cast %451 : vector<8x1xi1> to vector<8x1xi1>
    %456 = vector.broadcast %455 : vector<8x1xi1> to vector<8x128xi1>
    %457 = arith.select %456, %447, %412 : vector<8x128xi1>, vector<8x128xf32>
    %c2_i32_142 = arith.constant 2 : i32
    %c7_i32_143 = arith.constant 7 : i32
    %458 = arith.subi %c7_i32_143, %c2_i32_142 : i32
    %459 = arith.index_cast %458 : i32 to index
    %c0_144 = arith.constant 0 : index
    %c0_145 = arith.constant 0 : index
    %460 = vector.load %arg9[%459, %c0_144, %c0_145] : memref<8x8x512xf32, #tpu.memory_space<vmem>>, vector<1x8x512xf32>
    %461 = vector.shape_cast %460 : vector<1x8x512xf32> to vector<8x512xf32>
    %cst_146 = arith.constant dense<0.000000e+00> : vector<8x512xf32>
    %462 = tpu.matmul %454, %14, %cst_146 {dimension_numbers = #tpu.dot_dimension_numbers<[1], [0], [0], [1], [0, 0, 1, 1], [], []>} : vector<8x128xf32>, vector<128x512xf32>, vector<8x512xf32> -> vector<8x512xf32>
    %463 = arith.addf %461, %462 : vector<8x512xf32>
    %464 = vector.extract_strided_slice %463 {offsets = [0, 0], sizes = [8, 128], strides = [1, 1]} : vector<8x512xf32> to vector<8x128xf32>
    %cst_147 = arith.constant 5.000000e-01 : f32
    %465 = vector.broadcast %cst_147 : f32 to vector<8x128xf32>
    %466 = arith.mulf %465, %464 : vector<8x128xf32>
    %467 = math.tanh %466 : vector<8x128xf32>
    %cst_148 = arith.constant 1.000000e+00 : f32
    %468 = vector.broadcast %cst_148 : f32 to vector<8x128xf32>
    %469 = arith.addf %467, %468 : vector<8x128xf32>
    %cst_149 = arith.constant 5.000000e-01 : f32
    %470 = vector.broadcast %cst_149 : f32 to vector<8x128xf32>
    %471 = arith.mulf %470, %469 : vector<8x128xf32>
    %472 = vector.extract_strided_slice %463 {offsets = [0, 128], sizes = [8, 128], strides = [1, 1]} : vector<8x512xf32> to vector<8x128xf32>
    %cst_150 = arith.constant 5.000000e-01 : f32
    %473 = vector.broadcast %cst_150 : f32 to vector<8x128xf32>
    %474 = arith.mulf %473, %472 : vector<8x128xf32>
    %475 = math.tanh %474 : vector<8x128xf32>
    %cst_151 = arith.constant 1.000000e+00 : f32
    %476 = vector.broadcast %cst_151 : f32 to vector<8x128xf32>
    %477 = arith.addf %475, %476 : vector<8x128xf32>
    %cst_152 = arith.constant 5.000000e-01 : f32
    %478 = vector.broadcast %cst_152 : f32 to vector<8x128xf32>
    %479 = arith.mulf %478, %477 : vector<8x128xf32>
    %480 = vector.extract_strided_slice %463 {offsets = [0, 256], sizes = [8, 128], strides = [1, 1]} : vector<8x512xf32> to vector<8x128xf32>
    %481 = math.tanh %480 : vector<8x128xf32>
    %482 = vector.extract_strided_slice %463 {offsets = [0, 384], sizes = [8, 128], strides = [1, 1]} : vector<8x512xf32> to vector<8x128xf32>
    %cst_153 = arith.constant 5.000000e-01 : f32
    %483 = vector.broadcast %cst_153 : f32 to vector<8x128xf32>
    %484 = arith.mulf %483, %482 : vector<8x128xf32>
    %485 = math.tanh %484 : vector<8x128xf32>
    %cst_154 = arith.constant 1.000000e+00 : f32
    %486 = vector.broadcast %cst_154 : f32 to vector<8x128xf32>
    %487 = arith.addf %485, %486 : vector<8x128xf32>
    %cst_155 = arith.constant 5.000000e-01 : f32
    %488 = vector.broadcast %cst_155 : f32 to vector<8x128xf32>
    %489 = arith.mulf %488, %487 : vector<8x128xf32>
    %490 = arith.mulf %479, %457 : vector<8x128xf32>
    %491 = arith.mulf %471, %481 : vector<8x128xf32>
    %492 = arith.addf %490, %491 : vector<8x128xf32>
    %493 = math.tanh %492 : vector<8x128xf32>
    %494 = arith.mulf %489, %493 : vector<8x128xf32>
    %495 = vector.broadcast %458 : i32 to vector<8x1xi32>
    %496 = arith.cmpi sgt, %12, %495 : vector<8x1xi32>
    %497 = vector.shape_cast %496 : vector<8x1xi1> to vector<8x1xi1>
    %498 = vector.broadcast %497 : vector<8x1xi1> to vector<8x128xi1>
    %499 = arith.select %498, %494, %454 : vector<8x128xi1>, vector<8x128xf32>
    %500 = vector.shape_cast %496 : vector<8x1xi1> to vector<8x1xi1>
    %501 = vector.broadcast %500 : vector<8x1xi1> to vector<8x128xi1>
    %502 = arith.select %501, %492, %457 : vector<8x128xi1>, vector<8x128xf32>
    %c3_i32_156 = arith.constant 3 : i32
    %c7_i32_157 = arith.constant 7 : i32
    %503 = arith.subi %c7_i32_157, %c3_i32_156 : i32
    %504 = arith.index_cast %503 : i32 to index
    %c0_158 = arith.constant 0 : index
    %c0_159 = arith.constant 0 : index
    %505 = vector.load %arg9[%504, %c0_158, %c0_159] : memref<8x8x512xf32, #tpu.memory_space<vmem>>, vector<1x8x512xf32>
    %506 = vector.shape_cast %505 : vector<1x8x512xf32> to vector<8x512xf32>
    %cst_160 = arith.constant dense<0.000000e+00> : vector<8x512xf32>
    %507 = tpu.matmul %499, %14, %cst_160 {dimension_numbers = #tpu.dot_dimension_numbers<[1], [0], [0], [1], [0, 0, 1, 1], [], []>} : vector<8x128xf32>, vector<128x512xf32>, vector<8x512xf32> -> vector<8x512xf32>
    %508 = arith.addf %506, %507 : vector<8x512xf32>
    %509 = vector.extract_strided_slice %508 {offsets = [0, 0], sizes = [8, 128], strides = [1, 1]} : vector<8x512xf32> to vector<8x128xf32>
    %cst_161 = arith.constant 5.000000e-01 : f32
    %510 = vector.broadcast %cst_161 : f32 to vector<8x128xf32>
    %511 = arith.mulf %510, %509 : vector<8x128xf32>
    %512 = math.tanh %511 : vector<8x128xf32>
    %cst_162 = arith.constant 1.000000e+00 : f32
    %513 = vector.broadcast %cst_162 : f32 to vector<8x128xf32>
    %514 = arith.addf %512, %513 : vector<8x128xf32>
    %cst_163 = arith.constant 5.000000e-01 : f32
    %515 = vector.broadcast %cst_163 : f32 to vector<8x128xf32>
    %516 = arith.mulf %515, %514 : vector<8x128xf32>
    %517 = vector.extract_strided_slice %508 {offsets = [0, 128], sizes = [8, 128], strides = [1, 1]} : vector<8x512xf32> to vector<8x128xf32>
    %cst_164 = arith.constant 5.000000e-01 : f32
    %518 = vector.broadcast %cst_164 : f32 to vector<8x128xf32>
    %519 = arith.mulf %518, %517 : vector<8x128xf32>
    %520 = math.tanh %519 : vector<8x128xf32>
    %cst_165 = arith.constant 1.000000e+00 : f32
    %521 = vector.broadcast %cst_165 : f32 to vector<8x128xf32>
    %522 = arith.addf %520, %521 : vector<8x128xf32>
    %cst_166 = arith.constant 5.000000e-01 : f32
    %523 = vector.broadcast %cst_166 : f32 to vector<8x128xf32>
    %524 = arith.mulf %523, %522 : vector<8x128xf32>
    %525 = vector.extract_strided_slice %508 {offsets = [0, 256], sizes = [8, 128], strides = [1, 1]} : vector<8x512xf32> to vector<8x128xf32>
    %526 = math.tanh %525 : vector<8x128xf32>
    %527 = vector.extract_strided_slice %508 {offsets = [0, 384], sizes = [8, 128], strides = [1, 1]} : vector<8x512xf32> to vector<8x128xf32>
    %cst_167 = arith.constant 5.000000e-01 : f32
    %528 = vector.broadcast %cst_167 : f32 to vector<8x128xf32>
    %529 = arith.mulf %528, %527 : vector<8x128xf32>
    %530 = math.tanh %529 : vector<8x128xf32>
    %cst_168 = arith.constant 1.000000e+00 : f32
    %531 = vector.broadcast %cst_168 : f32 to vector<8x128xf32>
    %532 = arith.addf %530, %531 : vector<8x128xf32>
    %cst_169 = arith.constant 5.000000e-01 : f32
    %533 = vector.broadcast %cst_169 : f32 to vector<8x128xf32>
    %534 = arith.mulf %533, %532 : vector<8x128xf32>
    %535 = arith.mulf %524, %502 : vector<8x128xf32>
    %536 = arith.mulf %516, %526 : vector<8x128xf32>
    %537 = arith.addf %535, %536 : vector<8x128xf32>
    %538 = math.tanh %537 : vector<8x128xf32>
    %539 = arith.mulf %534, %538 : vector<8x128xf32>
    %540 = vector.broadcast %503 : i32 to vector<8x1xi32>
    %541 = arith.cmpi sgt, %12, %540 : vector<8x1xi32>
    %542 = vector.shape_cast %541 : vector<8x1xi1> to vector<8x1xi1>
    %543 = vector.broadcast %542 : vector<8x1xi1> to vector<8x128xi1>
    %544 = arith.select %543, %539, %499 : vector<8x128xi1>, vector<8x128xf32>
    %545 = vector.shape_cast %541 : vector<8x1xi1> to vector<8x1xi1>
    %546 = vector.broadcast %545 : vector<8x1xi1> to vector<8x128xi1>
    %547 = arith.select %546, %537, %502 : vector<8x128xi1>, vector<8x128xf32>
    %c4_i32_170 = arith.constant 4 : i32
    %c7_i32_171 = arith.constant 7 : i32
    %548 = arith.subi %c7_i32_171, %c4_i32_170 : i32
    %549 = arith.index_cast %548 : i32 to index
    %c0_172 = arith.constant 0 : index
    %c0_173 = arith.constant 0 : index
    %550 = vector.load %arg9[%549, %c0_172, %c0_173] : memref<8x8x512xf32, #tpu.memory_space<vmem>>, vector<1x8x512xf32>
    %551 = vector.shape_cast %550 : vector<1x8x512xf32> to vector<8x512xf32>
    %cst_174 = arith.constant dense<0.000000e+00> : vector<8x512xf32>
    %552 = tpu.matmul %544, %14, %cst_174 {dimension_numbers = #tpu.dot_dimension_numbers<[1], [0], [0], [1], [0, 0, 1, 1], [], []>} : vector<8x128xf32>, vector<128x512xf32>, vector<8x512xf32> -> vector<8x512xf32>
    %553 = arith.addf %551, %552 : vector<8x512xf32>
    %554 = vector.extract_strided_slice %553 {offsets = [0, 0], sizes = [8, 128], strides = [1, 1]} : vector<8x512xf32> to vector<8x128xf32>
    %cst_175 = arith.constant 5.000000e-01 : f32
    %555 = vector.broadcast %cst_175 : f32 to vector<8x128xf32>
    %556 = arith.mulf %555, %554 : vector<8x128xf32>
    %557 = math.tanh %556 : vector<8x128xf32>
    %cst_176 = arith.constant 1.000000e+00 : f32
    %558 = vector.broadcast %cst_176 : f32 to vector<8x128xf32>
    %559 = arith.addf %557, %558 : vector<8x128xf32>
    %cst_177 = arith.constant 5.000000e-01 : f32
    %560 = vector.broadcast %cst_177 : f32 to vector<8x128xf32>
    %561 = arith.mulf %560, %559 : vector<8x128xf32>
    %562 = vector.extract_strided_slice %553 {offsets = [0, 128], sizes = [8, 128], strides = [1, 1]} : vector<8x512xf32> to vector<8x128xf32>
    %cst_178 = arith.constant 5.000000e-01 : f32
    %563 = vector.broadcast %cst_178 : f32 to vector<8x128xf32>
    %564 = arith.mulf %563, %562 : vector<8x128xf32>
    %565 = math.tanh %564 : vector<8x128xf32>
    %cst_179 = arith.constant 1.000000e+00 : f32
    %566 = vector.broadcast %cst_179 : f32 to vector<8x128xf32>
    %567 = arith.addf %565, %566 : vector<8x128xf32>
    %cst_180 = arith.constant 5.000000e-01 : f32
    %568 = vector.broadcast %cst_180 : f32 to vector<8x128xf32>
    %569 = arith.mulf %568, %567 : vector<8x128xf32>
    %570 = vector.extract_strided_slice %553 {offsets = [0, 256], sizes = [8, 128], strides = [1, 1]} : vector<8x512xf32> to vector<8x128xf32>
    %571 = math.tanh %570 : vector<8x128xf32>
    %572 = vector.extract_strided_slice %553 {offsets = [0, 384], sizes = [8, 128], strides = [1, 1]} : vector<8x512xf32> to vector<8x128xf32>
    %cst_181 = arith.constant 5.000000e-01 : f32
    %573 = vector.broadcast %cst_181 : f32 to vector<8x128xf32>
    %574 = arith.mulf %573, %572 : vector<8x128xf32>
    %575 = math.tanh %574 : vector<8x128xf32>
    %cst_182 = arith.constant 1.000000e+00 : f32
    %576 = vector.broadcast %cst_182 : f32 to vector<8x128xf32>
    %577 = arith.addf %575, %576 : vector<8x128xf32>
    %cst_183 = arith.constant 5.000000e-01 : f32
    %578 = vector.broadcast %cst_183 : f32 to vector<8x128xf32>
    %579 = arith.mulf %578, %577 : vector<8x128xf32>
    %580 = arith.mulf %569, %547 : vector<8x128xf32>
    %581 = arith.mulf %561, %571 : vector<8x128xf32>
    %582 = arith.addf %580, %581 : vector<8x128xf32>
    %583 = math.tanh %582 : vector<8x128xf32>
    %584 = arith.mulf %579, %583 : vector<8x128xf32>
    %585 = vector.broadcast %548 : i32 to vector<8x1xi32>
    %586 = arith.cmpi sgt, %12, %585 : vector<8x1xi32>
    %587 = vector.shape_cast %586 : vector<8x1xi1> to vector<8x1xi1>
    %588 = vector.broadcast %587 : vector<8x1xi1> to vector<8x128xi1>
    %589 = arith.select %588, %584, %544 : vector<8x128xi1>, vector<8x128xf32>
    %590 = vector.shape_cast %586 : vector<8x1xi1> to vector<8x1xi1>
    %591 = vector.broadcast %590 : vector<8x1xi1> to vector<8x128xi1>
    %592 = arith.select %591, %582, %547 : vector<8x128xi1>, vector<8x128xf32>
    %c5_i32_184 = arith.constant 5 : i32
    %c7_i32_185 = arith.constant 7 : i32
    %593 = arith.subi %c7_i32_185, %c5_i32_184 : i32
    %594 = arith.index_cast %593 : i32 to index
    %c0_186 = arith.constant 0 : index
    %c0_187 = arith.constant 0 : index
    %595 = vector.load %arg9[%594, %c0_186, %c0_187] : memref<8x8x512xf32, #tpu.memory_space<vmem>>, vector<1x8x512xf32>
    %596 = vector.shape_cast %595 : vector<1x8x512xf32> to vector<8x512xf32>
    %cst_188 = arith.constant dense<0.000000e+00> : vector<8x512xf32>
    %597 = tpu.matmul %589, %14, %cst_188 {dimension_numbers = #tpu.dot_dimension_numbers<[1], [0], [0], [1], [0, 0, 1, 1], [], []>} : vector<8x128xf32>, vector<128x512xf32>, vector<8x512xf32> -> vector<8x512xf32>
    %598 = arith.addf %596, %597 : vector<8x512xf32>
    %599 = vector.extract_strided_slice %598 {offsets = [0, 0], sizes = [8, 128], strides = [1, 1]} : vector<8x512xf32> to vector<8x128xf32>
    %cst_189 = arith.constant 5.000000e-01 : f32
    %600 = vector.broadcast %cst_189 : f32 to vector<8x128xf32>
    %601 = arith.mulf %600, %599 : vector<8x128xf32>
    %602 = math.tanh %601 : vector<8x128xf32>
    %cst_190 = arith.constant 1.000000e+00 : f32
    %603 = vector.broadcast %cst_190 : f32 to vector<8x128xf32>
    %604 = arith.addf %602, %603 : vector<8x128xf32>
    %cst_191 = arith.constant 5.000000e-01 : f32
    %605 = vector.broadcast %cst_191 : f32 to vector<8x128xf32>
    %606 = arith.mulf %605, %604 : vector<8x128xf32>
    %607 = vector.extract_strided_slice %598 {offsets = [0, 128], sizes = [8, 128], strides = [1, 1]} : vector<8x512xf32> to vector<8x128xf32>
    %cst_192 = arith.constant 5.000000e-01 : f32
    %608 = vector.broadcast %cst_192 : f32 to vector<8x128xf32>
    %609 = arith.mulf %608, %607 : vector<8x128xf32>
    %610 = math.tanh %609 : vector<8x128xf32>
    %cst_193 = arith.constant 1.000000e+00 : f32
    %611 = vector.broadcast %cst_193 : f32 to vector<8x128xf32>
    %612 = arith.addf %610, %611 : vector<8x128xf32>
    %cst_194 = arith.constant 5.000000e-01 : f32
    %613 = vector.broadcast %cst_194 : f32 to vector<8x128xf32>
    %614 = arith.mulf %613, %612 : vector<8x128xf32>
    %615 = vector.extract_strided_slice %598 {offsets = [0, 256], sizes = [8, 128], strides = [1, 1]} : vector<8x512xf32> to vector<8x128xf32>
    %616 = math.tanh %615 : vector<8x128xf32>
    %617 = vector.extract_strided_slice %598 {offsets = [0, 384], sizes = [8, 128], strides = [1, 1]} : vector<8x512xf32> to vector<8x128xf32>
    %cst_195 = arith.constant 5.000000e-01 : f32
    %618 = vector.broadcast %cst_195 : f32 to vector<8x128xf32>
    %619 = arith.mulf %618, %617 : vector<8x128xf32>
    %620 = math.tanh %619 : vector<8x128xf32>
    %cst_196 = arith.constant 1.000000e+00 : f32
    %621 = vector.broadcast %cst_196 : f32 to vector<8x128xf32>
    %622 = arith.addf %620, %621 : vector<8x128xf32>
    %cst_197 = arith.constant 5.000000e-01 : f32
    %623 = vector.broadcast %cst_197 : f32 to vector<8x128xf32>
    %624 = arith.mulf %623, %622 : vector<8x128xf32>
    %625 = arith.mulf %614, %592 : vector<8x128xf32>
    %626 = arith.mulf %606, %616 : vector<8x128xf32>
    %627 = arith.addf %625, %626 : vector<8x128xf32>
    %628 = math.tanh %627 : vector<8x128xf32>
    %629 = arith.mulf %624, %628 : vector<8x128xf32>
    %630 = vector.broadcast %593 : i32 to vector<8x1xi32>
    %631 = arith.cmpi sgt, %12, %630 : vector<8x1xi32>
    %632 = vector.shape_cast %631 : vector<8x1xi1> to vector<8x1xi1>
    %633 = vector.broadcast %632 : vector<8x1xi1> to vector<8x128xi1>
    %634 = arith.select %633, %629, %589 : vector<8x128xi1>, vector<8x128xf32>
    %635 = vector.shape_cast %631 : vector<8x1xi1> to vector<8x1xi1>
    %636 = vector.broadcast %635 : vector<8x1xi1> to vector<8x128xi1>
    %637 = arith.select %636, %627, %592 : vector<8x128xi1>, vector<8x128xf32>
    %c6_i32_198 = arith.constant 6 : i32
    %c7_i32_199 = arith.constant 7 : i32
    %638 = arith.subi %c7_i32_199, %c6_i32_198 : i32
    %639 = arith.index_cast %638 : i32 to index
    %c0_200 = arith.constant 0 : index
    %c0_201 = arith.constant 0 : index
    %640 = vector.load %arg9[%639, %c0_200, %c0_201] : memref<8x8x512xf32, #tpu.memory_space<vmem>>, vector<1x8x512xf32>
    %641 = vector.shape_cast %640 : vector<1x8x512xf32> to vector<8x512xf32>
    %cst_202 = arith.constant dense<0.000000e+00> : vector<8x512xf32>
    %642 = tpu.matmul %634, %14, %cst_202 {dimension_numbers = #tpu.dot_dimension_numbers<[1], [0], [0], [1], [0, 0, 1, 1], [], []>} : vector<8x128xf32>, vector<128x512xf32>, vector<8x512xf32> -> vector<8x512xf32>
    %643 = arith.addf %641, %642 : vector<8x512xf32>
    %644 = vector.extract_strided_slice %643 {offsets = [0, 0], sizes = [8, 128], strides = [1, 1]} : vector<8x512xf32> to vector<8x128xf32>
    %cst_203 = arith.constant 5.000000e-01 : f32
    %645 = vector.broadcast %cst_203 : f32 to vector<8x128xf32>
    %646 = arith.mulf %645, %644 : vector<8x128xf32>
    %647 = math.tanh %646 : vector<8x128xf32>
    %cst_204 = arith.constant 1.000000e+00 : f32
    %648 = vector.broadcast %cst_204 : f32 to vector<8x128xf32>
    %649 = arith.addf %647, %648 : vector<8x128xf32>
    %cst_205 = arith.constant 5.000000e-01 : f32
    %650 = vector.broadcast %cst_205 : f32 to vector<8x128xf32>
    %651 = arith.mulf %650, %649 : vector<8x128xf32>
    %652 = vector.extract_strided_slice %643 {offsets = [0, 128], sizes = [8, 128], strides = [1, 1]} : vector<8x512xf32> to vector<8x128xf32>
    %cst_206 = arith.constant 5.000000e-01 : f32
    %653 = vector.broadcast %cst_206 : f32 to vector<8x128xf32>
    %654 = arith.mulf %653, %652 : vector<8x128xf32>
    %655 = math.tanh %654 : vector<8x128xf32>
    %cst_207 = arith.constant 1.000000e+00 : f32
    %656 = vector.broadcast %cst_207 : f32 to vector<8x128xf32>
    %657 = arith.addf %655, %656 : vector<8x128xf32>
    %cst_208 = arith.constant 5.000000e-01 : f32
    %658 = vector.broadcast %cst_208 : f32 to vector<8x128xf32>
    %659 = arith.mulf %658, %657 : vector<8x128xf32>
    %660 = vector.extract_strided_slice %643 {offsets = [0, 256], sizes = [8, 128], strides = [1, 1]} : vector<8x512xf32> to vector<8x128xf32>
    %661 = math.tanh %660 : vector<8x128xf32>
    %662 = vector.extract_strided_slice %643 {offsets = [0, 384], sizes = [8, 128], strides = [1, 1]} : vector<8x512xf32> to vector<8x128xf32>
    %cst_209 = arith.constant 5.000000e-01 : f32
    %663 = vector.broadcast %cst_209 : f32 to vector<8x128xf32>
    %664 = arith.mulf %663, %662 : vector<8x128xf32>
    %665 = math.tanh %664 : vector<8x128xf32>
    %cst_210 = arith.constant 1.000000e+00 : f32
    %666 = vector.broadcast %cst_210 : f32 to vector<8x128xf32>
    %667 = arith.addf %665, %666 : vector<8x128xf32>
    %cst_211 = arith.constant 5.000000e-01 : f32
    %668 = vector.broadcast %cst_211 : f32 to vector<8x128xf32>
    %669 = arith.mulf %668, %667 : vector<8x128xf32>
    %670 = arith.mulf %659, %637 : vector<8x128xf32>
    %671 = arith.mulf %651, %661 : vector<8x128xf32>
    %672 = arith.addf %670, %671 : vector<8x128xf32>
    %673 = math.tanh %672 : vector<8x128xf32>
    %674 = arith.mulf %669, %673 : vector<8x128xf32>
    %675 = vector.broadcast %638 : i32 to vector<8x1xi32>
    %676 = arith.cmpi sgt, %12, %675 : vector<8x1xi32>
    %677 = vector.shape_cast %676 : vector<8x1xi1> to vector<8x1xi1>
    %678 = vector.broadcast %677 : vector<8x1xi1> to vector<8x128xi1>
    %679 = arith.select %678, %674, %634 : vector<8x128xi1>, vector<8x128xf32>
    %680 = vector.shape_cast %676 : vector<8x1xi1> to vector<8x1xi1>
    %681 = vector.broadcast %680 : vector<8x1xi1> to vector<8x128xi1>
    %682 = arith.select %681, %672, %637 : vector<8x128xi1>, vector<8x128xf32>
    %c7_i32_212 = arith.constant 7 : i32
    %c7_i32_213 = arith.constant 7 : i32
    %683 = arith.subi %c7_i32_213, %c7_i32_212 : i32
    %684 = arith.index_cast %683 : i32 to index
    %c0_214 = arith.constant 0 : index
    %c0_215 = arith.constant 0 : index
    %685 = vector.load %arg9[%684, %c0_214, %c0_215] : memref<8x8x512xf32, #tpu.memory_space<vmem>>, vector<1x8x512xf32>
    %686 = vector.shape_cast %685 : vector<1x8x512xf32> to vector<8x512xf32>
    %cst_216 = arith.constant dense<0.000000e+00> : vector<8x512xf32>
    %687 = tpu.matmul %679, %14, %cst_216 {dimension_numbers = #tpu.dot_dimension_numbers<[1], [0], [0], [1], [0, 0, 1, 1], [], []>} : vector<8x128xf32>, vector<128x512xf32>, vector<8x512xf32> -> vector<8x512xf32>
    %688 = arith.addf %686, %687 : vector<8x512xf32>
    %689 = vector.extract_strided_slice %688 {offsets = [0, 0], sizes = [8, 128], strides = [1, 1]} : vector<8x512xf32> to vector<8x128xf32>
    %cst_217 = arith.constant 5.000000e-01 : f32
    %690 = vector.broadcast %cst_217 : f32 to vector<8x128xf32>
    %691 = arith.mulf %690, %689 : vector<8x128xf32>
    %692 = math.tanh %691 : vector<8x128xf32>
    %cst_218 = arith.constant 1.000000e+00 : f32
    %693 = vector.broadcast %cst_218 : f32 to vector<8x128xf32>
    %694 = arith.addf %692, %693 : vector<8x128xf32>
    %cst_219 = arith.constant 5.000000e-01 : f32
    %695 = vector.broadcast %cst_219 : f32 to vector<8x128xf32>
    %696 = arith.mulf %695, %694 : vector<8x128xf32>
    %697 = vector.extract_strided_slice %688 {offsets = [0, 128], sizes = [8, 128], strides = [1, 1]} : vector<8x512xf32> to vector<8x128xf32>
    %cst_220 = arith.constant 5.000000e-01 : f32
    %698 = vector.broadcast %cst_220 : f32 to vector<8x128xf32>
    %699 = arith.mulf %698, %697 : vector<8x128xf32>
    %700 = math.tanh %699 : vector<8x128xf32>
    %cst_221 = arith.constant 1.000000e+00 : f32
    %701 = vector.broadcast %cst_221 : f32 to vector<8x128xf32>
    %702 = arith.addf %700, %701 : vector<8x128xf32>
    %cst_222 = arith.constant 5.000000e-01 : f32
    %703 = vector.broadcast %cst_222 : f32 to vector<8x128xf32>
    %704 = arith.mulf %703, %702 : vector<8x128xf32>
    %705 = vector.extract_strided_slice %688 {offsets = [0, 256], sizes = [8, 128], strides = [1, 1]} : vector<8x512xf32> to vector<8x128xf32>
    %706 = math.tanh %705 : vector<8x128xf32>
    %707 = vector.extract_strided_slice %688 {offsets = [0, 384], sizes = [8, 128], strides = [1, 1]} : vector<8x512xf32> to vector<8x128xf32>
    %cst_223 = arith.constant 5.000000e-01 : f32
    %708 = vector.broadcast %cst_223 : f32 to vector<8x128xf32>
    %709 = arith.mulf %708, %707 : vector<8x128xf32>
    %710 = math.tanh %709 : vector<8x128xf32>
    %cst_224 = arith.constant 1.000000e+00 : f32
    %711 = vector.broadcast %cst_224 : f32 to vector<8x128xf32>
    %712 = arith.addf %710, %711 : vector<8x128xf32>
    %cst_225 = arith.constant 5.000000e-01 : f32
    %713 = vector.broadcast %cst_225 : f32 to vector<8x128xf32>
    %714 = arith.mulf %713, %712 : vector<8x128xf32>
    %715 = arith.mulf %704, %682 : vector<8x128xf32>
    %716 = arith.mulf %696, %706 : vector<8x128xf32>
    %717 = arith.addf %715, %716 : vector<8x128xf32>
    %718 = math.tanh %717 : vector<8x128xf32>
    %719 = arith.mulf %714, %718 : vector<8x128xf32>
    %720 = vector.broadcast %683 : i32 to vector<8x1xi32>
    %721 = arith.cmpi sgt, %12, %720 : vector<8x1xi32>
    %722 = vector.shape_cast %721 : vector<8x1xi1> to vector<8x1xi1>
    %723 = vector.broadcast %722 : vector<8x1xi1> to vector<8x128xi1>
    %724 = arith.select %723, %719, %679 : vector<8x128xi1>, vector<8x128xf32>
    %725 = vector.shape_cast %721 : vector<8x1xi1> to vector<8x1xi1>
    %726 = vector.broadcast %725 : vector<8x1xi1> to vector<8x128xi1>
    %727 = arith.select %726, %717, %682 : vector<8x128xi1>, vector<8x128xf32>
    %c8_i32_226 = arith.constant 8 : i32
    %c0_227 = arith.constant 0 : index
    %c0_228 = arith.constant 0 : index
    %c0_229 = arith.constant 0 : index
    %728 = vector.load %arg6[%c0_227, %c0_228, %c0_229] : memref<2x8x128xf32, #tpu.memory_space<vmem>>, vector<1x8x128xf32>
    %729 = vector.shape_cast %728 : vector<1x8x128xf32> to vector<8x128xf32>
    %730 = vector.shape_cast %364 : vector<8x128xf32> to vector<1x8x128xf32>
    tpu.vector_store %arg6[%c0_227, %c0_228, %c0_229], %730 {strides = array<i32>} : memref<2x8x128xf32, #tpu.memory_space<vmem>>, vector<1x8x128xf32>,
    %c1 = arith.constant 1 : index
    %c0_230 = arith.constant 0 : index
    %c0_231 = arith.constant 0 : index
    %731 = vector.load %arg6[%c1, %c0_230, %c0_231] : memref<2x8x128xf32, #tpu.memory_space<vmem>>, vector<1x8x128xf32>
    %732 = vector.shape_cast %731 : vector<1x8x128xf32> to vector<8x128xf32>
    %733 = vector.shape_cast %724 : vector<8x128xf32> to vector<1x8x128xf32>
    tpu.vector_store %arg6[%c1, %c0_230, %c0_231], %733 {strides = array<i32>} : memref<2x8x128xf32, #tpu.memory_space<vmem>>, vector<1x8x128xf32>,
    %c0_232 = arith.constant 0 : index
    %c0_233 = arith.constant 0 : index
    %c0_234 = arith.constant 0 : index
    %734 = vector.load %arg7[%c0_232, %c0_233, %c0_234] : memref<2x8x128xf32, #tpu.memory_space<vmem>>, vector<1x8x128xf32>
    %735 = vector.shape_cast %734 : vector<1x8x128xf32> to vector<8x128xf32>
    %736 = vector.shape_cast %367 : vector<8x128xf32> to vector<1x8x128xf32>
    tpu.vector_store %arg7[%c0_232, %c0_233, %c0_234], %736 {strides = array<i32>} : memref<2x8x128xf32, #tpu.memory_space<vmem>>, vector<1x8x128xf32>,
    %c1_235 = arith.constant 1 : index
    %c0_236 = arith.constant 0 : index
    %c0_237 = arith.constant 0 : index
    %737 = vector.load %arg7[%c1_235, %c0_236, %c0_237] : memref<2x8x128xf32, #tpu.memory_space<vmem>>, vector<1x8x128xf32>
    %738 = vector.shape_cast %737 : vector<1x8x128xf32> to vector<8x128xf32>
    %739 = vector.shape_cast %727 : vector<8x128xf32> to vector<1x8x128xf32>
    tpu.vector_store %arg7[%c1_235, %c0_236, %c0_237], %739 {strides = array<i32>} : memref<2x8x128xf32, #tpu.memory_space<vmem>>, vector<1x8x128xf32>,
    return
  }
}

</mosaic_0001>

<bundles_post_ra>
// kernel: _lambda_.5
= control target key start
LH: loop header
LB: loop body
LE: loop exit
PB: predicated region body
PF: predicated region fallthrough
CT: control target
= control target key end

     0   :  { %vm27_vm0 = vcmask 261120   ;;  %s226_s0 = inlined_call_operand.vmem [shape: f32[16,32], index: 0, kind: input, shape index: {}]   ;;  %s227_s1 = inlined_call_operand.vmem [shape: f32[24,32], index: 1, kind: input, shape index: {}]   ;;  %s228_s2 = inlined_call_operand.vmem [shape: f32[1,24], index: 2, kind: input, shape index: {}]   ;;  %s229_s3 = inlined_call_operand.hbm [shape: f32[16,24], index: 3, kind: output, shape index: {}]  }
   0x1   :  { %v19_v0 = vld [vmem:[%s227_s1 + $0x10] sm:$0xff]  ;;  %v18_v1 = vld [vmem:[%s227_s1 + $0x8] sm:$0xff]  ;;  %v15_v2 = vld [vmem:[%s226_s0] sm:$0xff] }
   0x2   :  { %148 = vmatprep.subr.msk.mxu0 %vm27_vm0, %v19_v0 }
   0x3   :  { %8 = vsyncpa [#allocation3], 0  ;;  %149 = vmatpush3.xpose.msk.msra.mxu0 %vm27_vm0, %v19_v0  ;;  %154 = vmatprep.mubr.msk.f32.mxu0 %vm27_vm0, %v15_v2  ;;  %v17_v3 = vld [vmem:[%s227_s1] sm:$0xff]  ;;  %v16_v4 = vld [vmem:[%s226_s0 + $0x8] sm:$0xff]  ;;  %s182_s24 = smov [#allocation2]   ;;  %vm118_vm1 = vcmask 195584  }
   0x4   :  { %150 = vmatprep.subr.msk.mxu0 %vm27_vm0, %v18_v1  ;;  %v137_v5 = vld [vmem:[%s228_s2] ss:$0 sm:$0xff]  ;;  %s126_s25 = sshll.u32 %s182_s24, 4  ;;  %s127_s25 = int_to_ptr.vmem [resolvable:$true] %s126_s25 }
   0x5   :  { %s160_s1 = scalar_lea.vmem %s127_s25, 256  ;;  %p165_p1 = scmp.lt.s32.totalorder %s127_s25, %s127_s25 }
   0x6   :  { %p161_p0 = scmp.ne.s32.totalorder %s127_s25, %s160_s1  ;;  %p166_p2 = scmp.lt.s32.totalorder %s160_s1, %s160_s1 }
   0x7   :  { %151 = vmatpush3.xpose.msk.msra.mxu0 %vm27_vm0, %v18_v1 }
   0x8   :  { %152 = vmatprep.subr.msk.mxu0 %vm27_vm0, %v17_v3  ;;  %p167_p3 = por %p166_p2, %p165_p1 }
   0xa   :  { %p168_p4 = pnand %p167_p3, %p161_p0 }
   0xb   :  { %153 = vmatpush3.xpose.msk.msra.mxu0 %vm27_vm0, %v17_v3 }
   0xe   :  { %155 = vmatmul.mubr.msk.f32.vlgmr.msra.gmra.mxu0 %vm27_vm0, %v16_v4 }
  0xce   :  { %v156_v6 = vpop.f32.mrf.mxu0 }
  0xcf   :  { %v115_v7 = vadd.f32 %v156_v6, %v137_v5 }
  0xd0   :  { %v109_v8 = vpop.f32.mrf.mxu0 }
  0xd1   :  { %120 = vst.msk [vmem:[#allocation2 + $0x8] sm:$0xff] %vm118_vm1, %v115_v7  ;;  %v110_v9 = vadd.f32 %v137_v5, %v109_v8 }
  0xd3   :  { %119 = vst.msk [vmem:[#allocation2] sm:$0xff] %vm118_vm1, %v110_v9 }
  0xd4   :  { %171 = shalt.err (!%p168_p4)
}
  0xd5   :  { %s183_s0 = smov 128   ;;  %s184_s26 = smov 8  }
  0xd6   :  { %132 = dma.vmem_to_hbm [thread:$0]  %s127_s25, 256, %s229_s3, [#allocation3], %s183_s0, %s183_s0, %s184_s26  }
  0xd7   :  { %180 = dma.done.wait [#allocation3], 256  }
  0xd8   :  { %181 = vsyncadd [#allocation3], 4294967040 }
  0xd9   :  { %136 = vsyncpa [#allocation3], 1 }

// kernel: _lambda_.4
= control target key start
LH: loop header
LB: loop body
LE: loop exit
PB: predicated region body
PF: predicated region fallthrough
CT: control target
= control target key end

     0   :  { %v3475_v3 = vmov 0.0   ;;  %vm72_vm0 = vcmask 261120   ;;  %s3466_s3 = inlined_call_operand.vmem [shape: f32[32,512], index: 3, kind: input, shape index: {}]   ;;  %s3467_s0 = inlined_call_operand.vmem [shape: f32[64,32], index: 0, kind: input, shape index: {}]   ;;  %s3468_s5 = inlined_call_operand.vmem [shape: f32[128,512], index: 5, kind: input, shape index: {}]   ;;  %s3469_s1 = inlined_call_operand.vmem [shape: f32[8,128], index: 1, kind: input, shape index: {}]   ;;  %s3470_s4 = inlined_call_operand.vmem [shape: f32[1,512], index: 4, kind: input, shape index: {}]   ;;  %s3471_s2 = inlined_call_operand.vmem [shape: f32[8,128], index: 2, kind: input, shape index: {}]   ;;  %s3472_s6 = inlined_call_operand.vmem [shape: f32[8,8,128], index: 6, kind: output, shape index: {0}]   ;;  %s3473_s8 = inlined_call_operand.vmem [shape: f32[8,128], index: 8, kind: output, shape index: {2}]   ;;  %s3474_s7 = inlined_call_operand.vmem [shape: f32[8,128], index: 7, kind: output, shape index: {1}]  }
   0x1   :  { %v47_v0 = vld [vmem:[%s3466_s3 + $0x68] sm:$0xff]  ;;  %v49_v1 = vld [vmem:[%s3466_s3 + $0x78] sm:$0xff]  ;;  %v46_v2 = vld [vmem:[%s3466_s3 + $0x60] sm:$0xff]  ;;  %161 = vmatprep.mubr.f32.mxu0 %v3475_v3  ;;  %274 = vmatprep.mubr.f32.mxu1 %v3475_v3 }
   0x2   :  { %121 = vmatprep.subr.mxu0 %v47_v0  ;;  %234 = vmatprep.subr.mxu1 %v49_v1  ;;  %v48_v4 = vld [vmem:[%s3466_s3 + $0x70] sm:$0xff]  ;;  %v43_v5 = vld [vmem:[%s3466_s3 + $0x48] sm:$0xff]  ;;  %v45_v6 = vld [vmem:[%s3466_s3 + $0x58] sm:$0xff] }
   0x3   :  { %122 = vmatpush1.msra.mxu0 %v46_v2  ;;  %235 = vmatpush1.msra.mxu1 %v48_v4  ;;  %v42_v7 = vld [vmem:[%s3466_s3 + $0x40] sm:$0xff]  ;;  %v44_v8 = vld [vmem:[%s3466_s3 + $0x50] sm:$0xff]  ;;  %v39_v9 = vld [vmem:[%s3466_s3 + $0x28] sm:$0xff] }
   0x4   :  { %123 = vmatprep.subr.mxu0 %v43_v5  ;;  %236 = vmatprep.subr.mxu1 %v45_v6  ;;  %v41_v10 = vld [vmem:[%s3466_s3 + $0x38] sm:$0xff]  ;;  %v38_v11 = vld [vmem:[%s3466_s3 + $0x20] sm:$0xff]  ;;  %v40_v12 = vld [vmem:[%s3466_s3 + $0x30] sm:$0xff] }
   0x5   :  { %124 = vmatpush1.msra.mxu0 %v42_v7  ;;  %237 = vmatpush1.msra.mxu1 %v44_v8  ;;  %v35_v13 = vld [vmem:[%s3466_s3 + $0x8] sm:$0xff]  ;;  %v37_v14 = vld [vmem:[%s3466_s3 + $0x18] sm:$0xff]  ;;  %v34_v15 = vld [vmem:[%s3466_s3] sm:$0xff] }
   0x6   :  { %125 = vmatprep.subr.mxu0 %v39_v9  ;;  %238 = vmatprep.subr.mxu1 %v41_v10  ;;  %v36_v16 = vld [vmem:[%s3466_s3 + $0x10] sm:$0xff]  ;;  %v26_v17 = vld [vmem:[%s3467_s0] sm:$0xff]  ;;  %v2071_v18 = vld [vmem:[%s3468_s5 + $0x1e8] sm:$0xff] }
   0x7   :  { %126 = vmatpush1.msra.mxu0 %v38_v11  ;;  %239 = vmatpush1.msra.mxu1 %v40_v12  ;;  %3567 = vst [vmem:[#allocation3_spill] sm:$0xff] %v2071_v18  ;;  %v2076_v19 = vld [vmem:[%s3468_s5 + $0x1f8] sm:$0xff]  ;;  %v2081_v20 = vld [vmem:[%s3468_s5 + $0x1e0] sm:$0xff]  ;;  %v2086_v21 = vld [vmem:[%s3468_s5 + $0x1f0] sm:$0xff] }
   0x8   :  { %127 = vmatprep.subr.mxu0 %v35_v13  ;;  %240 = vmatprep.subr.mxu1 %v37_v14  ;;  %3568 = vst [vmem:[#allocation4_spill] sm:$0xff] %v2076_v19  ;;  %v2093_v22 = vld [vmem:[%s3468_s5 + $0x1c8] sm:$0xff]  ;;  %v2098_v23 = vld [vmem:[%s3468_s5 + $0x1d8] sm:$0xff]  ;;  %v2107_v24 = vld [vmem:[%s3468_s5 + $0x1c0] sm:$0xff] }
   0x9   :  { %128 = vmatpush1.msra.mxu0 %v34_v15  ;;  %241 = vmatpush1.msra.mxu1 %v36_v16  ;;  %v2112_v25 = vld [vmem:[%s3468_s5 + $0x1d0] sm:$0xff]  ;;  %v27_v26 = vld [vmem:[%s3467_s0 + $0x8] sm:$0xff]  ;;  %v2129_v28 = vld [vmem:[%s3468_s5 + $0x1b8] sm:$0xff] }
   0xa   :  { %1801 = vmatmul.mubr.msk.f32.vlgmr.msra.gmra.mxu0 %vm72_vm0, %v26_v17  ;;  %1809 = vmatmul.mubr.msk.f32.vlgmr.msra.gmra.mxu1 %vm72_vm0, %v26_v17  ;;  %v2124_v27 = vld [vmem:[%s3468_s5 + $0x1a8] sm:$0xff]  ;;  %v2136_v29 = vld [vmem:[%s3468_s5 + $0x1a0] sm:$0xff]  ;;  %v2141_v30 = vld [vmem:[%s3468_s5 + $0x1b0] sm:$0xff] }
   0xb   :  { %425 = vmatprep.subr.mxu0 %v2071_v18  ;;  %496 = vmatprep.subr.mxu1 %v2076_v19  ;;  %v2148_v31 = vld [vmem:[%s3468_s5 + $0x188] sm:$0xff]  ;;  %v2153_v32 = vld [vmem:[%s3468_s5 + $0x198] sm:$0xff]  ;;  %v2162_v33 = vld [vmem:[%s3468_s5 + $0x180] sm:$0xff] }
   0xc   :  { %426 = vmatpush1.msra.mxu0 %v2081_v20  ;;  %497 = vmatpush1.msra.mxu1 %v2086_v21  ;;  %v2167_v34 = vld [vmem:[%s3468_s5 + $0x190] sm:$0xff]  ;;  %v2179_v36 = vld [vmem:[%s3468_s5 + $0x168] sm:$0xff]  ;;  %v2184_v37 = vld [vmem:[%s3468_s5 + $0x178] sm:$0xff] }
   0xd   :  { %427 = vmatprep.subr.mxu0 %v2093_v22  ;;  %498 = vmatprep.subr.mxu1 %v2098_v23  ;;  %v28_v35 = vld [vmem:[%s3467_s0 + $0x10] sm:$0xff]  ;;  %v2191_v38 = vld [vmem:[%s3468_s5 + $0x160] sm:$0xff]  ;;  %v2203_v40 = vld [vmem:[%s3468_s5 + $0x148] sm:$0xff] }
   0xe   :  { %167 = vmatprep.mubr.f32.mxu0 %v3475_v3  ;;  %280 = vmatprep.mubr.f32.mxu1 %v3475_v3  ;;  %v2196_v39 = vld [vmem:[%s3468_s5 + $0x170] sm:$0xff]  ;;  %v2208_v41 = vld [vmem:[%s3468_s5 + $0x158] sm:$0xff]  ;;  %v2217_v42 = vld [vmem:[%s3468_s5 + $0x140] sm:$0xff] }
   0xf   :  { %428 = vmatpush1.msra.mxu0 %v2107_v24  ;;  %499 = vmatpush1.msra.mxu1 %v2112_v25  ;;  %v2222_v43 = vld [vmem:[%s3468_s5 + $0x150] sm:$0xff]  ;;  %v29_v44 = vld [vmem:[%s3467_s0 + $0x18] sm:$0xff]  ;;  %v2234_v45 = vld [vmem:[%s3468_s5 + $0x128] sm:$0xff] }
  0x10   :  { %1802 = vmatmul.mubr.msk.f32.gmra.mxu0 %vm72_vm0, %v27_v26  ;;  %1810 = vmatmul.mubr.msk.f32.gmra.mxu1 %vm72_vm0, %v27_v26  ;;  %v2239_v46 = vld [vmem:[%s3468_s5 + $0x138] sm:$0xff]  ;;  %v2246_v47 = vld [vmem:[%s3468_s5 + $0x120] sm:$0xff]  ;;  %v2251_v48 = vld [vmem:[%s3468_s5 + $0x130] sm:$0xff] }
  0x11   :  { %429 = vmatprep.subr.mxu0 %v2124_v27  ;;  %500 = vmatprep.subr.mxu1 %v2129_v28  ;;  %v2258_v49 = vld [vmem:[%s3468_s5 + $0x108] sm:$0xff]  ;;  %v2263_v50 = vld [vmem:[%s3468_s5 + $0x118] sm:$0xff]  ;;  %v2272_v51 = vld [vmem:[%s3468_s5 + $0x100] sm:$0xff] }
  0x12   :  { %430 = vmatpush1.msra.mxu0 %v2136_v29  ;;  %501 = vmatpush1.msra.mxu1 %v2141_v30  ;;  %v2277_v52 = vld [vmem:[%s3468_s5 + $0x110] sm:$0xff]  ;;  %v30_v53 = vld [vmem:[%s3467_s0 + $0x20] sm:$0xff]  ;;  %v2289_v54 = vld [vmem:[%s3468_s5 + $0xe8] sm:$0xff] }
  0x13   :  { %431 = vmatprep.subr.mxu0 %v2148_v31  ;;  %502 = vmatprep.subr.mxu1 %v2153_v32  ;;  %v2294_v55 = vld [vmem:[%s3468_s5 + $0xf8] sm:$0xff]  ;;  %v2301_v56 = vld [vmem:[%s3468_s5 + $0xe0] sm:$0xff]  ;;  %v2306_v57 = vld [vmem:[%s3468_s5 + $0xf0] sm:$0xff] }
  0x14   :  { %173 = vmatprep.mubr.f32.mxu0 %v3475_v3  ;;  %286 = vmatprep.mubr.f32.mxu1 %v3475_v3  ;;  %v2313_v58 = vld [vmem:[%s3468_s5 + $0xc8] sm:$0xff]  ;;  %v2318_v59 = vld [vmem:[%s3468_s5 + $0xd8] sm:$0xff]  ;;  %v2327_v60 = vld [vmem:[%s3468_s5 + $0xc0] sm:$0xff] }
  0x15   :  { %432 = vmatpush1.msra.mxu0 %v2162_v33  ;;  %503 = vmatpush1.msra.mxu1 %v2167_v34  ;;  %v2332_v61 = vld [vmem:[%s3468_s5 + $0xd0] sm:$0xff]  ;;  %v31_v62 = vld [vmem:[%s3467_s0 + $0x28] sm:$0xff]  ;;  %v2349_v0 = vld [vmem:[%s3468_s5 + $0xb8] sm:$0xff] }
  0x16   :  { %1803 = vmatmul.mubr.msk.f32.gmra.mxu0 %vm72_vm0, %v28_v35  ;;  %1811 = vmatmul.mubr.msk.f32.gmra.mxu1 %vm72_vm0, %v28_v35  ;;  %v2344_v63 = vld [vmem:[%s3468_s5 + $0xa8] sm:$0xff]  ;;  %v2356_v1 = vld [vmem:[%s3468_s5 + $0xa0] sm:$0xff]  ;;  %v2361_v2 = vld [vmem:[%s3468_s5 + $0xb0] sm:$0xff] }
  0x17   :  { %433 = vmatprep.subr.mxu0 %v2179_v36  ;;  %504 = vmatprep.subr.mxu1 %v2184_v37  ;;  %v2368_v4 = vld [vmem:[%s3468_s5 + $0x88] sm:$0xff]  ;;  %v2373_v5 = vld [vmem:[%s3468_s5 + $0x98] sm:$0xff]  ;;  %v2382_v6 = vld [vmem:[%s3468_s5 + $0x80] sm:$0xff] }
  0x18   :  { %434 = vmatpush1.msra.mxu0 %v2191_v38  ;;  %505 = vmatpush1.msra.mxu1 %v2196_v39  ;;  %3569 = vst [vmem:[#allocation5_spill] sm:$0xff] %v2368_v4  ;;  %3570 = vst [vmem:[#allocation6_spill] sm:$0xff] %v2373_v5  ;;  %v2387_v7 = vld [vmem:[%s3468_s5 + $0x90] sm:$0xff]  ;;  %v2399_v9 = vld [vmem:[%s3468_s5 + $0x68] sm:$0xff] }
  0x19   :  { %435 = vmatprep.subr.mxu0 %v2203_v40  ;;  %506 = vmatprep.subr.mxu1 %v2208_v41  ;;  %3571 = vst [vmem:[#allocation7_spill] sm:$0xff] %v2382_v6  ;;  %3572 = vst [vmem:[#allocation8_spill] sm:$0xff] %v2387_v7  ;;  %v32_v8 = vld [vmem:[%s3467_s0 + $0x30] sm:$0xff]  ;;  %v2404_v10 = vld [vmem:[%s3468_s5 + $0x78] sm:$0xff] }
  0x1a   :  { %179 = vmatprep.mubr.f32.mxu0 %v3475_v3  ;;  %292 = vmatprep.mubr.f32.mxu1 %v3475_v3  ;;  %3573 = vst [vmem:[#allocation9_spill] sm:$0xff] %v2399_v9  ;;  %3574 = vst [vmem:[#allocation10_spill] sm:$0xff] %v2404_v10  ;;  %v2411_v11 = vld [vmem:[%s3468_s5 + $0x60] sm:$0xff]  ;;  %v2416_v12 = vld [vmem:[%s3468_s5 + $0x70] sm:$0xff] }
  0x1b   :  { %436 = vmatpush1.msra.mxu0 %v2217_v42  ;;  %507 = vmatpush1.msra.mxu1 %v2222_v43  ;;  %3575 = vst [vmem:[#allocation11_spill] sm:$0xff] %v2411_v11  ;;  %3576 = vst [vmem:[#allocation12_spill] sm:$0xff] %v2416_v12  ;;  %v2423_v13 = vld [vmem:[%s3468_s5 + $0x48] sm:$0xff]  ;;  %v2428_v14 = vld [vmem:[%s3468_s5 + $0x58] sm:$0xff] }
  0x1c   :  { %1804 = vmatmul.mubr.msk.f32.gmra.mxu0 %vm72_vm0, %v29_v44  ;;  %1812 = vmatmul.mubr.msk.f32.gmra.mxu1 %vm72_vm0, %v29_v44  ;;  %3577 = vst [vmem:[#allocation13_spill] sm:$0xff] %v2423_v13  ;;  %3578 = vst [vmem:[#allocation14_spill] sm:$0xff] %v2428_v14  ;;  %v2437_v15 = vld [vmem:[%s3468_s5 + $0x40] sm:$0xff]  ;;  %v2442_v16 = vld [vmem:[%s3468_s5 + $0x50] sm:$0xff] }
  0x1d   :  { %437 = vmatprep.subr.mxu0 %v2234_v45  ;;  %508 = vmatprep.subr.mxu1 %v2239_v46  ;;  %3579 = vst [vmem:[#allocation15_spill] sm:$0xff] %v2437_v15  ;;  %3580 = vst [vmem:[#allocation16_spill] sm:$0xff] %v2442_v16  ;;  %v33_v17 = vld [vmem:[%s3467_s0 + $0x38] sm:$0xff]  ;;  %v2454_v26 = vld [vmem:[%s3468_s5 + $0x28] sm:$0xff] }
  0x1e   :  { %438 = vmatpush1.msra.mxu0 %v2246_v47  ;;  %509 = vmatpush1.msra.mxu1 %v2251_v48  ;;  %3581 = vst [vmem:[#allocation17_spill] sm:$0xff] %v2454_v26  ;;  %v2459_v35 = vld [vmem:[%s3468_s5 + $0x38] sm:$0xff]  ;;  %v2466_v44 = vld [vmem:[%s3468_s5 + $0x20] sm:$0xff] }
  0x1f   :  { %439 = vmatprep.subr.mxu0 %v2258_v49  ;;  %510 = vmatprep.subr.mxu1 %v2263_v50  ;;  %3582 = vst [vmem:[#allocation18_spill] sm:$0xff] %v2459_v35  ;;  %3583 = vst [vmem:[#allocation19_spill] sm:$0xff] %v2466_v44 }
  0x20   :  { %185 = vmatprep.mubr.f32.mxu0 %v3475_v3  ;;  %298 = vmatprep.mubr.f32.mxu1 %v3475_v3 }
  0x21   :  { %440 = vmatpush1.msra.mxu0 %v2272_v51  ;;  %511 = vmatpush1.msra.mxu1 %v2277_v52 }
  0x22   :  { %1805 = vmatmul.mubr.msk.f32.gmra.mxu0 %vm72_vm0, %v30_v53  ;;  %1813 = vmatmul.mubr.msk.f32.gmra.mxu1 %vm72_vm0, %v30_v53  ;;  %v2471_v53 = vld [vmem:[%s3468_s5 + $0x30] sm:$0xff] }
  0x23   :  { %441 = vmatprep.subr.mxu0 %v2289_v54  ;;  %512 = vmatprep.subr.mxu1 %v2294_v55  ;;  %3584 = vst [vmem:[#allocation20_spill] sm:$0xff] %v2471_v53 }
  0x24   :  { %442 = vmatpush1.msra.mxu0 %v2301_v56  ;;  %513 = vmatpush1.msra.mxu1 %v2306_v57 }
  0x25   :  { %443 = vmatprep.subr.mxu0 %v2313_v58  ;;  %514 = vmatprep.subr.mxu1 %v2318_v59 }
  0x26   :  { %191 = vmatprep.mubr.f32.mxu0 %v3475_v3  ;;  %304 = vmatprep.mubr.f32.mxu1 %v3475_v3 }
  0x27   :  { %444 = vmatpush1.msra.mxu0 %v2327_v60  ;;  %515 = vmatpush1.msra.mxu1 %v2332_v61 }
  0x28   :  { %1806 = vmatmul.mubr.msk.f32.gmra.mxu0 %vm72_vm0, %v31_v62  ;;  %1814 = vmatmul.mubr.msk.f32.gmra.mxu1 %vm72_vm0, %v31_v62  ;;  %v2478_v62 = vld [vmem:[%s3468_s5 + $0x8] sm:$0xff] }
  0x29   :  { %445 = vmatprep.subr.mxu0 %v2344_v63  ;;  %516 = vmatprep.subr.mxu1 %v2349_v0  ;;  %3585 = vst [vmem:[#allocation21_spill] sm:$0xff] %v2478_v62 }
  0x2a   :  { %446 = vmatpush1.msra.mxu0 %v2356_v1  ;;  %517 = vmatpush1.msra.mxu1 %v2361_v2 }
  0x2b   :  { %447 = vmatprep.subr.mxu0 %v2368_v4  ;;  %518 = vmatprep.subr.mxu1 %v2373_v5 }
  0x2c   :  { %197 = vmatprep.mubr.f32.mxu0 %v3475_v3  ;;  %310 = vmatprep.mubr.f32.mxu1 %v3475_v3 }
  0x2d   :  { %448 = vmatpush1.msra.mxu0 %v2382_v6  ;;  %519 = vmatpush1.msra.mxu1 %v2387_v7 }
  0x2e   :  { %1807 = vmatmul.mubr.msk.f32.gmra.mxu0 %vm72_vm0, %v32_v8  ;;  %1815 = vmatmul.mubr.msk.f32.gmra.mxu1 %vm72_vm0, %v32_v8  ;;  %v2483_v8 = vld [vmem:[%s3468_s5 + $0x18] sm:$0xff] }
  0x2f   :  { %449 = vmatprep.subr.mxu0 %v2399_v9  ;;  %520 = vmatprep.subr.mxu1 %v2404_v10  ;;  %3586 = vst [vmem:[#allocation22_spill] sm:$0xff] %v2483_v8 }
  0x30   :  { %450 = vmatpush1.msra.mxu0 %v2411_v11  ;;  %521 = vmatpush1.msra.mxu1 %v2416_v12 }
  0x31   :  { %451 = vmatprep.subr.mxu0 %v2423_v13  ;;  %522 = vmatprep.subr.mxu1 %v2428_v14 }
  0x32   :  { %203 = vmatprep.mubr.f32.mxu0 %v3475_v3  ;;  %316 = vmatprep.mubr.f32.mxu1 %v3475_v3  ;;  %v2490_v3 = vld [vmem:[%s3468_s5] sm:$0xff] }
  0x33   :  { %452 = vmatpush1.msra.mxu0 %v2437_v15  ;;  %523 = vmatpush1.msra.mxu1 %v2442_v16  ;;  %3587 = vst [vmem:[#allocation23_spill] sm:$0xff] %v2490_v3 }
  0x34   :  { %1808 = vmatmul.mubr.msk.f32.gmra.mxu0 %vm72_vm0, %v33_v17  ;;  %1816 = vmatmul.mubr.msk.f32.gmra.mxu1 %vm72_vm0, %v33_v17  ;;  %v2497_v17 = vld [vmem:[%s3468_s5 + $0x10] sm:$0xff] }
  0x35   :  { %453 = vmatprep.subr.mxu0 %v2454_v26  ;;  %524 = vmatprep.subr.mxu1 %v2459_v35  ;;  %3588 = vst [vmem:[#allocation24_spill] sm:$0xff] %v2497_v17  ;;  %v419_v35 = vld [vmem:[%s3469_s1] sm:$0xff]  ;;  %v3589_v26 = vmov 0.0  }
  0x36   :  { %454 = vmatpush1.msra.mxu0 %v2466_v44  ;;  %525 = vmatpush1.msra.mxu1 %v2471_v53 }
  0x37   :  { %455 = vmatprep.subr.mxu0 %v2478_v62  ;;  %526 = vmatprep.subr.mxu1 %v2483_v8 }
  0x38   :  { %456 = vmatpush1.msra.mxu0 %v2490_v3  ;;  %489 = vmatprep.mubr.f32.mxu0 %v3589_v26 }
  0x39   :  { %527 = vmatpush1.msra.mxu1 %v2497_v17  ;;  %560 = vmatprep.mubr.f32.mxu1 %v3589_v26 }
  0x3a   :  { %490 = vmatmul.mubr.f32.vlgmr.msra.gmra.mxu0 %v419_v35  ;;  %561 = vmatmul.mubr.f32.vlgmr.msra.gmra.mxu1 %v419_v35  ;;  %v3590_v35 = vld [vmem:[#allocation17_spill] sm:$0xff] }
  0x3b   :  { %595 = vmatprep.subr.mxu0 %v2071_v18  ;;  %666 = vmatprep.subr.mxu1 %v2076_v19 }
  0x3c   :  { %596 = vmatpush1.msra.mxu0 %v2081_v20  ;;  %667 = vmatpush1.msra.mxu1 %v2086_v21 }
  0x3d   :  { %597 = vmatprep.subr.mxu0 %v2093_v22  ;;  %668 = vmatprep.subr.mxu1 %v2098_v23 }
  0x3e   :  { %598 = vmatpush1.msra.mxu0 %v2107_v24  ;;  %669 = vmatpush1.msra.mxu1 %v2112_v25 }
  0x3f   :  { %599 = vmatprep.subr.mxu0 %v2124_v27  ;;  %670 = vmatprep.subr.mxu1 %v2129_v28 }
  0x40   :  { %600 = vmatpush1.msra.mxu0 %v2136_v29  ;;  %671 = vmatpush1.msra.mxu1 %v2141_v30 }
  0x41   :  { %601 = vmatprep.subr.mxu0 %v2148_v31  ;;  %672 = vmatprep.subr.mxu1 %v2153_v32 }
  0x42   :  { %602 = vmatpush1.msra.mxu0 %v2162_v33  ;;  %673 = vmatpush1.msra.mxu1 %v2167_v34 }
  0x43   :  { %603 = vmatprep.subr.mxu0 %v2179_v36  ;;  %674 = vmatprep.subr.mxu1 %v2184_v37 }
  0x44   :  { %604 = vmatpush1.msra.mxu0 %v2191_v38  ;;  %675 = vmatpush1.msra.mxu1 %v2196_v39 }
  0x45   :  { %605 = vmatprep.subr.mxu0 %v2203_v40  ;;  %676 = vmatprep.subr.mxu1 %v2208_v41 }
  0x46   :  { %606 = vmatpush1.msra.mxu0 %v2217_v42  ;;  %677 = vmatpush1.msra.mxu1 %v2222_v43 }
  0x47   :  { %607 = vmatprep.subr.mxu0 %v2234_v45  ;;  %678 = vmatprep.subr.mxu1 %v2239_v46 }
  0x48   :  { %608 = vmatpush1.msra.mxu0 %v2246_v47  ;;  %679 = vmatpush1.msra.mxu1 %v2251_v48 }
  0x49   :  { %609 = vmatprep.subr.mxu0 %v2258_v49  ;;  %680 = vmatprep.subr.mxu1 %v2263_v50 }
  0x4a   :  { %610 = vmatpush1.msra.mxu0 %v2272_v51  ;;  %681 = vmatpush1.msra.mxu1 %v2277_v52 }
  0x4b   :  { %611 = vmatprep.subr.mxu0 %v2289_v54  ;;  %682 = vmatprep.subr.mxu1 %v2294_v55 }
  0x4c   :  { %612 = vmatpush1.msra.mxu0 %v2301_v56  ;;  %683 = vmatpush1.msra.mxu1 %v2306_v57 }
  0x4d   :  { %613 = vmatprep.subr.mxu0 %v2313_v58  ;;  %684 = vmatprep.subr.mxu1 %v2318_v59 }
  0x4e   :  { %614 = vmatpush1.msra.mxu0 %v2327_v60  ;;  %685 = vmatpush1.msra.mxu1 %v2332_v61 }
  0x4f   :  { %615 = vmatprep.subr.mxu0 %v2344_v63  ;;  %686 = vmatprep.subr.mxu1 %v2349_v0 }
  0x50   :  { %616 = vmatpush1.msra.mxu0 %v2356_v1  ;;  %687 = vmatpush1.msra.mxu1 %v2361_v2 }
  0x51   :  { %617 = vmatprep.subr.mxu0 %v2368_v4  ;;  %688 = vmatprep.subr.mxu1 %v2373_v5 }
  0x52   :  { %618 = vmatpush1.msra.mxu0 %v2382_v6  ;;  %689 = vmatpush1.msra.mxu1 %v2387_v7  ;;  %v3591_v6 = vld [vmem:[#allocation18_spill] sm:$0xff] }
  0x53   :  { %619 = vmatprep.subr.mxu0 %v2399_v9  ;;  %690 = vmatprep.subr.mxu1 %v2404_v10 }
  0x54   :  { %620 = vmatpush1.msra.mxu0 %v2411_v11  ;;  %691 = vmatpush1.msra.mxu1 %v2416_v12 }
  0x55   :  { %621 = vmatprep.subr.mxu0 %v2423_v13  ;;  %692 = vmatprep.subr.mxu1 %v2428_v14 }
  0x56   :  { %622 = vmatpush1.msra.mxu0 %v2437_v15  ;;  %693 = vmatpush1.msra.mxu1 %v2442_v16 }
  0x57   :  { %623 = vmatprep.subr.mxu0 %v3590_v35  ;;  %694 = vmatprep.subr.mxu1 %v3591_v6  ;;  %v52_v6 = vlaneseq }
  0x58   :  { %624 = vmatpush1.msra.mxu0 %v2466_v44  ;;  %695 = vmatpush1.msra.mxu1 %v2471_v53 }
  0x59   :  { %625 = vmatprep.subr.mxu0 %v2478_v62  ;;  %696 = vmatprep.subr.mxu1 %v2483_v8  ;;  %v53_v44 = vshrl.u32 %v52_v6, 7 }
  0x5a   :  { %626 = vmatpush1.msra.mxu0 %v2490_v3  ;;  %659 = vmatprep.mubr.f32.mxu0 %v3589_v26  ;;  %v50_v3 = vld [vmem:[%s3470_s4] sm:$0xf] }
  0x5b   :  { %697 = vmatpush1.msra.mxu1 %v2497_v17  ;;  %730 = vmatprep.mubr.f32.mxu1 %v3589_v26  ;;  %v54_v62 = vsub.s32 0, %v53_v44  ;;  %v62_v8 = vsub.s32 2, %v53_v44  ;;  %v58_v26 = vsub.s32 1, %v53_v44 }
  0x5c   :  { %766 = vmatprep.subr.mxu0 %v2071_v18  ;;  %837 = vmatprep.subr.mxu1 %v2076_v19  ;;  %v66_v18 = vsub.s32 3, %v53_v44 }
  0x5d   :  { %v55_v15 = vrot.slane %v50_v3, %v54_v62  ;;  %v2587_v19 = vrot.slane %v50_v3, %v62_v8  ;;  %v59_v13 = vrot.slane %v50_v3, %v58_v26 }
  0x5e   :  { %v2589_v12 = vrot.slane %v50_v3, %v66_v18 }
  0xca   :  { %v2576_v35 = vpop.f32.mrf.mxu0  ;;  %v2578_v53 = vpop.f32.mrf.mxu1 }
  0xcc   :  { %v2583_v16 = vpop.f32.mrf.mxu0  ;;  %v2585_v17 = vpop.f32.mrf.mxu1 }
  0xd0   :  { %v169_v6 = vpop.f32.mrf.mxu0  ;;  %v282_v14 = vpop.f32.mrf.mxu1 }
  0xd1   :  { %v2591_v11 = vadd.f32 %v169_v6, %v55_v15  ;;  %v2594_v10 = vadd.f32 %v282_v14, %v2587_v19 }
  0xd2   :  { %v171_v9 = vpop.f32.mrf.mxu0  ;;  %v284_v7 = vpop.f32.mrf.mxu1 }
  0xd3   :  { %3592 = vst [vmem:[#allocation25_spill] sm:$0xff] %v2591_v11  ;;  %3593 = vst [vmem:[#allocation26_spill] sm:$0xff] %v2594_v10  ;;  %v2596_v5 = vadd.f32 %v171_v9, %v59_v13  ;;  %v2599_v4 = vadd.f32 %v284_v7, %v2589_v12 }
  0xd5   :  { %3594 = vst [vmem:[#allocation27_spill] sm:$0xff] %v2596_v5  ;;  %3595 = vst [vmem:[#allocation28_spill] sm:$0xff] %v2599_v4 }
  0xd6   :  { %v175_v44 = vpop.f32.mrf.mxu0  ;;  %v288_v62 = vpop.f32.mrf.mxu1 }
  0xd7   :  { %v2601_v8 = vadd.f32 %v175_v44, %v55_v15  ;;  %v2604_v26 = vadd.f32 %v288_v62, %v2587_v19 }
  0xd8   :  { %v177_v3 = vpop.f32.mrf.mxu0  ;;  %v290_v18 = vpop.f32.mrf.mxu1 }
  0xd9   :  { %3596 = vst [vmem:[#allocation29_spill] sm:$0xff] %v2601_v8  ;;  %3597 = vst [vmem:[#allocation30_spill] sm:$0xff] %v2604_v26  ;;  %v2606_v6 = vadd.f32 %v177_v3, %v59_v13  ;;  %v2609_v14 = vadd.f32 %v290_v18, %v2589_v12 }
  0xdb   :  { %3598 = vst [vmem:[#allocation31_spill] sm:$0xff] %v2606_v6  ;;  %3599 = vst [vmem:[#allocation32_spill] sm:$0xff] %v2609_v14 }
  0xdc   :  { %v181_v10 = vpop.f32.mrf.mxu0  ;;  %v294_v9 = vpop.f32.mrf.mxu1 }
  0xdd   :  { %v2611_v5 = vadd.f32 %v181_v10, %v55_v15  ;;  %v2614_v7 = vadd.f32 %v294_v9, %v2587_v19 }
  0xde   :  { %v183_v4 = vpop.f32.mrf.mxu0  ;;  %v296_v44 = vpop.f32.mrf.mxu1 }
  0xdf   :  { %3600 = vst [vmem:[#allocation33_spill] sm:$0xff] %v2611_v5  ;;  %3601 = vst [vmem:[#allocation34_spill] sm:$0xff] %v2614_v7  ;;  %v2616_v8 = vadd.f32 %v183_v4, %v59_v13  ;;  %v2619_v62 = vadd.f32 %v296_v44, %v2589_v12 }
  0xe1   :  { %3602 = vst [vmem:[#allocation35_spill] sm:$0xff] %v2616_v8  ;;  %3603 = vst [vmem:[#allocation36_spill] sm:$0xff] %v2619_v62 }
  0xe2   :  { %v187_v26 = vpop.f32.mrf.mxu0  ;;  %v300_v3 = vpop.f32.mrf.mxu1 }
  0xe3   :  { %v2621_v6 = vadd.f32 %v187_v26, %v55_v15  ;;  %v2624_v18 = vadd.f32 %v300_v3, %v2587_v19 }
  0xe4   :  { %v189_v14 = vpop.f32.mrf.mxu0  ;;  %v302_v10 = vpop.f32.mrf.mxu1 }
  0xe5   :  { %3604 = vst [vmem:[#allocation37_spill] sm:$0xff] %v2621_v6  ;;  %3605 = vst [vmem:[#allocation38_spill] sm:$0xff] %v2624_v18  ;;  %v2626_v5 = vadd.f32 %v189_v14, %v59_v13  ;;  %v2629_v9 = vadd.f32 %v302_v10, %v2589_v12 }
  0xe7   :  { %3606 = vst [vmem:[#allocation39_spill] sm:$0xff] %v2626_v5  ;;  %3607 = vst [vmem:[#allocation40_spill] sm:$0xff] %v2629_v9 }
  0xe8   :  { %v193_v7 = vpop.f32.mrf.mxu0  ;;  %v306_v4 = vpop.f32.mrf.mxu1 }
  0xe9   :  { %v2631_v8 = vadd.f32 %v193_v7, %v55_v15  ;;  %v2634_v44 = vadd.f32 %v306_v4, %v2587_v19 }
  0xea   :  { %v195_v62 = vpop.f32.mrf.mxu0  ;;  %v308_v26 = vpop.f32.mrf.mxu1 }
  0xeb   :  { %3608 = vst [vmem:[#allocation41_spill] sm:$0xff] %v2631_v8  ;;  %3609 = vst [vmem:[#allocation42_spill] sm:$0xff] %v2634_v44  ;;  %v2636_v6 = vadd.f32 %v195_v62, %v59_v13  ;;  %v2639_v3 = vadd.f32 %v308_v26, %v2589_v12 }
  0xed   :  { %3610 = vst [vmem:[#allocation43_spill] sm:$0xff] %v2636_v6  ;;  %3611 = vst [vmem:[#allocation44_spill] sm:$0xff] %v2639_v3 }
  0xee   :  { %v199_v18 = vpop.f32.mrf.mxu0  ;;  %v312_v14 = vpop.f32.mrf.mxu1 }
  0xef   :  { %v2641_v5 = vadd.f32 %v199_v18, %v55_v15  ;;  %v2644_v10 = vadd.f32 %v312_v14, %v2587_v19 }
  0xf0   :  { %v201_v9 = vpop.f32.mrf.mxu0  ;;  %v314_v7 = vpop.f32.mrf.mxu1 }
  0xf1   :  { %3612 = vst [vmem:[#allocation45_spill] sm:$0xff] %v2641_v5  ;;  %3613 = vst [vmem:[#allocation46_spill] sm:$0xff] %v2644_v10  ;;  %v2646_v8 = vadd.f32 %v201_v9, %v59_v13  ;;  %v2649_v4 = vadd.f32 %v314_v7, %v2589_v12  ;;  %v164_v9 = vadd.f32 %v2576_v35, %v55_v15 }
  0xf2   :  { %v166_v7 = vadd.f32 %v2583_v16, %v59_v13 }
  0xf3   :  { %3614 = vst [vmem:[#allocation47_spill] sm:$0xff] %v2646_v8  ;;  %3615 = vst [vmem:[#allocation48_spill] sm:$0xff] %v2649_v4 }
  0xf4   :  { %v205_v44 = vpop.f32.mrf.mxu0  ;;  %v318_v62 = vpop.f32.mrf.mxu1 }
  0xf5   :  { %v2651_v6 = vadd.f32 %v205_v44, %v55_v15  ;;  %v2654_v26 = vadd.f32 %v318_v62, %v2587_v19  ;;  %v277_v62 = vadd.f32 %v2578_v53, %v2587_v19  ;;  %v420_v19 = vld [vmem:[%s3471_s2] sm:$0xff] }
  0xf6   :  { %v207_v3 = vpop.f32.mrf.mxu0  ;;  %v320_v18 = vpop.f32.mrf.mxu1 }
  0xf7   :  { %3616 = vst [vmem:[#allocation49_spill] sm:$0xff] %v2651_v6  ;;  %3617 = vst [vmem:[#allocation50_spill] sm:$0xff] %v2654_v26  ;;  %v2656_v5 = vadd.f32 %v207_v3, %v59_v13  ;;  %v2659_v14 = vadd.f32 %v320_v18, %v2589_v12  ;;  %v279_v18 = vadd.f32 %v2585_v17, %v2589_v12 }
  0xf9   :  { %3618 = vst [vmem:[#allocation51_spill] sm:$0xff] %v2656_v5  ;;  %3619 = vst [vmem:[#allocation52_spill] sm:$0xff] %v2659_v14  ;;  %v3640_v14 = vld [vmem:[#allocation24_spill] sm:$0xff] }
  0xfa   :  { %v491_v10 = vpop.f32.mrf.mxu0  ;;  %v562_v6 = vpop.f32.mrf.mxu1 }
  0xfb   :  { %v567_v4 = vadd.f32 %v491_v10, %v164_v9  ;;  %v569_v3 = vadd.f32 %v562_v6, %v277_v62  ;;  %v3620_v62 = vld [vmem:[#allocation5_spill] sm:$0xff] }
  0xfc   :  { %v493_v8 = vpop.f32.mrf.mxu0  ;;  %v564_v5 = vpop.f32.mrf.mxu1 }
  0xfd   :  { %v571_v11 = vmul.f32 0.5, %v567_v4  ;;  %v568_v44 = vadd.f32 %v493_v8, %v166_v7  ;;  %v570_v15 = vadd.f32 %v564_v5, %v279_v18  ;;  %v3622_v18 = vld [vmem:[#allocation7_spill] sm:$0xff] }
  0xff   :  { %1825 = vtanh.f32 %v571_v11  ;;  %v575_v26 = vmul.f32 0.5, %v568_v44  ;;  %v580_v35 = vmul.f32 0.5, %v570_v15  ;;  %v3623_v15 = vld [vmem:[#allocation8_spill] sm:$0xff] }
 0x101   :  { %1827 = vtanh.f32 %v575_v26 }
 0x102   :  { %1829 = vtanh.f32 %v569_v3  ;;  %v3621_v3 = vld [vmem:[#allocation6_spill] sm:$0xff] }
 0x103   :  { %1831 = vtanh.f32 %v580_v35  ;;  %v3624_v35 = vld [vmem:[#allocation9_spill] sm:$0xff] }
 0x10c   :  { %v1826_v13 = vpop.eup %1825 }
 0x10d   :  { %v573_v16 = vadd.f32 1.0, %v1826_v13  ;;  %v3625_v13 = vld [vmem:[#allocation10_spill] sm:$0xff] }
 0x10e   :  { %v1828_v10 = vpop.eup %1827 }
 0x10f   :  { %v574_v4 = vmul.f32 0.5, %v573_v16  ;;  %v577_v8 = vadd.f32 1.0, %v1828_v10  ;;  %v1830_v53 = vpop.eup %1829  ;;  %v3626_v16 = vld [vmem:[#allocation11_spill] sm:$0xff]  ;;  %v3627_v10 = vld [vmem:[#allocation12_spill] sm:$0xff] }
 0x110   :  { %v1832_v5 = vpop.eup %1831 }
 0x111   :  { %v578_v11 = vmul.f32 0.5, %v577_v8  ;;  %v585_v26 = vmul.f32 %v1830_v53, %v574_v4  ;;  %v582_v12 = vadd.f32 1.0, %v1832_v5  ;;  %v3628_v4 = vld [vmem:[#allocation13_spill] sm:$0xff]  ;;  %v3629_v8 = vld [vmem:[#allocation14_spill] sm:$0xff]  ;;  %v3635_v5 = vld [vmem:[#allocation20_spill] sm:$0xff] }
 0x112   :  { %v3632_v53 = vld [vmem:[#allocation17_spill] sm:$0xff] }
 0x113   :  { %v584_v6 = vmul.f32 %v578_v11, %v420_v19  ;;  %v583_v17 = vmul.f32 0.5, %v582_v12  ;;  %v3630_v19 = vld [vmem:[#allocation15_spill] sm:$0xff]  ;;  %v3631_v11 = vld [vmem:[#allocation16_spill] sm:$0xff]  ;;  %v3636_v12 = vld [vmem:[#allocation21_spill] sm:$0xff] }
 0x115   :  { %v2670_v9 = vadd.f32 %v585_v26, %v584_v6  ;;  %v3633_v6 = vld [vmem:[#allocation18_spill] sm:$0xff]  ;;  %v3634_v26 = vld [vmem:[#allocation19_spill] sm:$0xff] }
 0x117   :  { %1833 = vtanh.f32 %v2670_v9 }
 0x124   :  { %v1834_v7 = vpop.eup %1833 }
 0x125   :  { %v588_v44 = vmul.f32 %v1834_v7, %v583_v17  ;;  %v3637_v17 = vld [vmem:[#allocation22_spill] sm:$0xff]  ;;  %v3638_v7 = vld [vmem:[#allocation23_spill] sm:$0xff] }
 0x127   :  { %589 = vst [vmem:[%s3472_s6] sm:$0xff] %v588_v44  ;;  %660 = vmatmul.mubr.f32.vlgmr.msra.gmra.mxu0 %v588_v44  ;;  %731 = vmatmul.mubr.f32.vlgmr.msra.gmra.mxu1 %v588_v44  ;;  %v3639_v44 = vmov 0.0  }
 0x128   :  { %767 = vmatpush1.msra.mxu0 %v2081_v20  ;;  %838 = vmatpush1.msra.mxu1 %v2086_v21 }
 0x129   :  { %768 = vmatprep.subr.mxu0 %v2093_v22  ;;  %839 = vmatprep.subr.mxu1 %v2098_v23 }
 0x12a   :  { %769 = vmatpush1.msra.mxu0 %v2107_v24  ;;  %840 = vmatpush1.msra.mxu1 %v2112_v25 }
 0x12b   :  { %770 = vmatprep.subr.mxu0 %v2124_v27  ;;  %841 = vmatprep.subr.mxu1 %v2129_v28 }
 0x12c   :  { %771 = vmatpush1.msra.mxu0 %v2136_v29  ;;  %842 = vmatpush1.msra.mxu1 %v2141_v30 }
 0x12d   :  { %772 = vmatprep.subr.mxu0 %v2148_v31  ;;  %843 = vmatprep.subr.mxu1 %v2153_v32 }
 0x12e   :  { %773 = vmatpush1.msra.mxu0 %v2162_v33  ;;  %844 = vmatpush1.msra.mxu1 %v2167_v34 }
 0x12f   :  { %774 = vmatprep.subr.mxu0 %v2179_v36  ;;  %845 = vmatprep.subr.mxu1 %v2184_v37 }
 0x130   :  { %775 = vmatpush1.msra.mxu0 %v2191_v38  ;;  %846 = vmatpush1.msra.mxu1 %v2196_v39 }
 0x131   :  { %776 = vmatprep.subr.mxu0 %v2203_v40  ;;  %847 = vmatprep.subr.mxu1 %v2208_v41 }
 0x132   :  { %777 = vmatpush1.msra.mxu0 %v2217_v42  ;;  %848 = vmatpush1.msra.mxu1 %v2222_v43 }
 0x133   :  { %778 = vmatprep.subr.mxu0 %v2234_v45  ;;  %849 = vmatprep.subr.mxu1 %v2239_v46 }
 0x134   :  { %779 = vmatpush1.msra.mxu0 %v2246_v47  ;;  %850 = vmatpush1.msra.mxu1 %v2251_v48 }
 0x135   :  { %780 = vmatprep.subr.mxu0 %v2258_v49  ;;  %851 = vmatprep.subr.mxu1 %v2263_v50 }
 0x136   :  { %781 = vmatpush1.msra.mxu0 %v2272_v51  ;;  %852 = vmatpush1.msra.mxu1 %v2277_v52 }
 0x137   :  { %782 = vmatprep.subr.mxu0 %v2289_v54  ;;  %853 = vmatprep.subr.mxu1 %v2294_v55 }
 0x138   :  { %783 = vmatpush1.msra.mxu0 %v2301_v56  ;;  %854 = vmatpush1.msra.mxu1 %v2306_v57 }
 0x139   :  { %784 = vmatprep.subr.mxu0 %v2313_v58  ;;  %855 = vmatprep.subr.mxu1 %v2318_v59 }
 0x13a   :  { %785 = vmatpush1.msra.mxu0 %v2327_v60  ;;  %856 = vmatpush1.msra.mxu1 %v2332_v61 }
 0x13b   :  { %786 = vmatprep.subr.mxu0 %v2344_v63  ;;  %857 = vmatprep.subr.mxu1 %v2349_v0 }
 0x13c   :  { %787 = vmatpush1.msra.mxu0 %v2356_v1  ;;  %858 = vmatpush1.msra.mxu1 %v2361_v2 }
 0x13d   :  { %788 = vmatprep.subr.mxu0 %v3620_v62  ;;  %859 = vmatprep.subr.mxu1 %v3621_v3 }
 0x13e   :  { %789 = vmatpush1.msra.mxu0 %v3622_v18  ;;  %860 = vmatpush1.msra.mxu1 %v3623_v15 }
 0x13f   :  { %790 = vmatprep.subr.mxu0 %v3624_v35  ;;  %861 = vmatprep.subr.mxu1 %v3625_v13 }
 0x140   :  { %791 = vmatpush1.msra.mxu0 %v3626_v16  ;;  %862 = vmatpush1.msra.mxu1 %v3627_v10 }
 0x141   :  { %792 = vmatprep.subr.mxu0 %v3628_v4  ;;  %863 = vmatprep.subr.mxu1 %v3629_v8  ;;  %v3644_v4 = vld [vmem:[#allocation27_spill] sm:$0xff] }
 0x142   :  { %793 = vmatpush1.msra.mxu0 %v3630_v19  ;;  %864 = vmatpush1.msra.mxu1 %v3631_v11  ;;  %v3641_v11 = vld [vmem:[#allocation3_spill] sm:$0xff] }
 0x143   :  { %794 = vmatprep.subr.mxu0 %v3632_v53  ;;  %865 = vmatprep.subr.mxu1 %v3633_v6  ;;  %v3642_v53 = vld [vmem:[#allocation4_spill] sm:$0xff] }
 0x144   :  { %795 = vmatpush1.msra.mxu0 %v3634_v26  ;;  %866 = vmatpush1.msra.mxu1 %v3635_v5  ;;  %v3643_v26 = vld [vmem:[#allocation25_spill] sm:$0xff] }
 0x145   :  { %796 = vmatprep.subr.mxu0 %v3636_v12  ;;  %867 = vmatprep.subr.mxu1 %v3637_v17 }
 0x146   :  { %797 = vmatpush1.msra.mxu0 %v3638_v7  ;;  %830 = vmatprep.mubr.f32.mxu0 %v3639_v44  ;;  %v3645_v7 = vld [vmem:[#allocation26_spill] sm:$0xff] }
 0x147   :  { %868 = vmatpush1.msra.mxu1 %v3640_v14  ;;  %901 = vmatprep.mubr.f32.mxu1 %v3639_v44  ;;  %v3646_v44 = vld [vmem:[#allocation28_spill] sm:$0xff] }
 0x148   :  { %937 = vmatprep.subr.mxu0 %v3641_v11  ;;  %1008 = vmatprep.subr.mxu1 %v3642_v53 }
 0x1e7   :  { %v661_v6 = vpop.f32.mrf.mxu0  ;;  %v732_v5 = vpop.f32.mrf.mxu1 }
 0x1e8   :  { %v737_v19 = vadd.f32 %v661_v6, %v3643_v26  ;;  %v739_v10 = vadd.f32 %v732_v5, %v3645_v7 }
 0x1e9   :  { %v663_v8 = vpop.f32.mrf.mxu0  ;;  %v734_v14 = vpop.f32.mrf.mxu1 }
 0x1ea   :  { %v741_v12 = vmul.f32 0.5, %v737_v19  ;;  %v738_v17 = vadd.f32 %v663_v8, %v3644_v4  ;;  %v740_v13 = vadd.f32 %v734_v14, %v3646_v44 }
 0x1ec   :  { %1835 = vtanh.f32 %v741_v12  ;;  %v745_v16 = vmul.f32 0.5, %v738_v17  ;;  %v750_v11 = vmul.f32 0.5, %v740_v13  ;;  %v3671_v17 = vld [vmem:[#allocation30_spill] sm:$0xff] }
 0x1ee   :  { %1837 = vtanh.f32 %v745_v16 }
 0x1ef   :  { %1839 = vtanh.f32 %v739_v10 }
 0x1f0   :  { %1841 = vtanh.f32 %v750_v11 }
 0x1f9   :  { %v1836_v35 = vpop.eup %1835 }
 0x1fa   :  { %v743_v53 = vadd.f32 1.0, %v1836_v35  ;;  %v3670_v35 = vld [vmem:[#allocation31_spill] sm:$0xff] }
 0x1fb   :  { %v1838_v15 = vpop.eup %1837 }
 0x1fc   :  { %v744_v18 = vmul.f32 0.5, %v743_v53  ;;  %v747_v6 = vadd.f32 1.0, %v1838_v15  ;;  %v1840_v26 = vpop.eup %1839  ;;  %v3672_v53 = vld [vmem:[#allocation32_spill] sm:$0xff] }
 0x1fd   :  { %v1842_v16 = vpop.eup %1841 }
 0x1fe   :  { %v748_v19 = vmul.f32 0.5, %v747_v6  ;;  %v755_v3 = vmul.f32 %v1840_v26, %v744_v18  ;;  %v752_v10 = vadd.f32 1.0, %v1842_v16 }
 0x200   :  { %v754_v4 = vmul.f32 %v748_v19, %v2670_v9  ;;  %v753_v5 = vmul.f32 0.5, %v752_v10 }
 0x202   :  { %v2747_v8 = vadd.f32 %v755_v3, %v754_v4 }
 0x204   :  { %1843 = vtanh.f32 %v2747_v8 }
 0x211   :  { %v1844_v14 = vpop.eup %1843 }
 0x212   :  { %v758_v13 = vmul.f32 %v1844_v14, %v753_v5 }
 0x214   :  { %1817 = vst [vmem:[%s3472_s6 + $0x8] sm:$0xff] %v758_v13  ;;  %831 = vmatmul.mubr.f32.vlgmr.msra.gmra.mxu0 %v758_v13  ;;  %902 = vmatmul.mubr.f32.vlgmr.msra.gmra.mxu1 %v758_v13 }
 0x215   :  { %938 = vmatpush1.msra.mxu0 %v2081_v20  ;;  %1009 = vmatpush1.msra.mxu1 %v2086_v21  ;;  %v3647_v20 = vld [vmem:[#allocation6_spill] sm:$0xff]  ;;  %v3648_v21 = vld [vmem:[#allocation7_spill] sm:$0xff] }
 0x216   :  { %939 = vmatprep.subr.mxu0 %v2093_v22  ;;  %1010 = vmatprep.subr.mxu1 %v2098_v23  ;;  %v3649_v22 = vld [vmem:[#allocation8_spill] sm:$0xff]  ;;  %v3650_v23 = vld [vmem:[#allocation9_spill] sm:$0xff] }
 0x217   :  { %940 = vmatpush1.msra.mxu0 %v2107_v24  ;;  %1011 = vmatpush1.msra.mxu1 %v2112_v25  ;;  %v3651_v24 = vld [vmem:[#allocation10_spill] sm:$0xff]  ;;  %v3652_v25 = vld [vmem:[#allocation11_spill] sm:$0xff] }
 0x218   :  { %941 = vmatprep.subr.mxu0 %v2124_v27  ;;  %1012 = vmatprep.subr.mxu1 %v2129_v28  ;;  %v3653_v27 = vld [vmem:[#allocation12_spill] sm:$0xff]  ;;  %v3654_v28 = vld [vmem:[#allocation13_spill] sm:$0xff] }
 0x219   :  { %942 = vmatpush1.msra.mxu0 %v2136_v29  ;;  %1013 = vmatpush1.msra.mxu1 %v2141_v30  ;;  %v3655_v29 = vld [vmem:[#allocation14_spill] sm:$0xff]  ;;  %v3656_v30 = vld [vmem:[#allocation15_spill] sm:$0xff] }
 0x21a   :  { %943 = vmatprep.subr.mxu0 %v2148_v31  ;;  %1014 = vmatprep.subr.mxu1 %v2153_v32  ;;  %v3657_v31 = vld [vmem:[#allocation16_spill] sm:$0xff]  ;;  %v3658_v32 = vld [vmem:[#allocation17_spill] sm:$0xff] }
 0x21b   :  { %944 = vmatpush1.msra.mxu0 %v2162_v33  ;;  %1015 = vmatpush1.msra.mxu1 %v2167_v34  ;;  %v3659_v33 = vld [vmem:[#allocation18_spill] sm:$0xff]  ;;  %v3660_v34 = vld [vmem:[#allocation19_spill] sm:$0xff] }
 0x21c   :  { %945 = vmatprep.subr.mxu0 %v2179_v36  ;;  %1016 = vmatprep.subr.mxu1 %v2184_v37  ;;  %v3661_v36 = vld [vmem:[#allocation20_spill] sm:$0xff]  ;;  %v3662_v37 = vld [vmem:[#allocation21_spill] sm:$0xff] }
 0x21d   :  { %946 = vmatpush1.msra.mxu0 %v2191_v38  ;;  %1017 = vmatpush1.msra.mxu1 %v2196_v39  ;;  %v3663_v38 = vld [vmem:[#allocation22_spill] sm:$0xff]  ;;  %v3664_v39 = vld [vmem:[#allocation23_spill] sm:$0xff] }
 0x21e   :  { %947 = vmatprep.subr.mxu0 %v2203_v40  ;;  %1018 = vmatprep.subr.mxu1 %v2208_v41  ;;  %v3665_v40 = vmov 0.0   ;;  %v3666_v41 = vld [vmem:[#allocation24_spill] sm:$0xff] }
 0x21f   :  { %948 = vmatpush1.msra.mxu0 %v2217_v42  ;;  %1019 = vmatpush1.msra.mxu1 %v2222_v43  ;;  %v2820_v42 = vld [vmem:[%s3468_s5 + $0x1e8] sm:$0xff]  ;;  %v2826_v43 = vld [vmem:[%s3468_s5 + $0x1f8] sm:$0xff] }
 0x220   :  { %949 = vmatprep.subr.mxu0 %v2234_v45  ;;  %1020 = vmatprep.subr.mxu1 %v2239_v46  ;;  %3667 = vst [vmem:[#allocation5_spill] sm:$0xff] %v2820_v42  ;;  %3668 = vst [vmem:[#allocation3_spill] sm:$0xff] %v2826_v43  ;;  %v3669_v46 = vld [vmem:[#allocation29_spill] sm:$0xff] }
 0x221   :  { %950 = vmatpush1.msra.mxu0 %v2246_v47  ;;  %1021 = vmatpush1.msra.mxu1 %v2251_v48 }
 0x222   :  { %951 = vmatprep.subr.mxu0 %v2258_v49  ;;  %1022 = vmatprep.subr.mxu1 %v2263_v50 }
 0x223   :  { %952 = vmatpush1.msra.mxu0 %v2272_v51  ;;  %1023 = vmatpush1.msra.mxu1 %v2277_v52 }
 0x224   :  { %953 = vmatprep.subr.mxu0 %v2289_v54  ;;  %1024 = vmatprep.subr.mxu1 %v2294_v55 }
 0x225   :  { %954 = vmatpush1.msra.mxu0 %v2301_v56  ;;  %1025 = vmatpush1.msra.mxu1 %v2306_v57 }
 0x226   :  { %955 = vmatprep.subr.mxu0 %v2313_v58  ;;  %1026 = vmatprep.subr.mxu1 %v2318_v59 }
 0x227   :  { %956 = vmatpush1.msra.mxu0 %v2327_v60  ;;  %1027 = vmatpush1.msra.mxu1 %v2332_v61 }
 0x228   :  { %957 = vmatprep.subr.mxu0 %v2344_v63  ;;  %1028 = vmatprep.subr.mxu1 %v2349_v0 }
 0x229   :  { %958 = vmatpush1.msra.mxu0 %v2356_v1  ;;  %1029 = vmatpush1.msra.mxu1 %v2361_v2 }
 0x22a   :  { %959 = vmatprep.subr.mxu0 %v3620_v62  ;;  %1030 = vmatprep.subr.mxu1 %v3647_v20 }
 0x22b   :  { %960 = vmatpush1.msra.mxu0 %v3648_v21  ;;  %1031 = vmatpush1.msra.mxu1 %v3649_v22 }
 0x22c   :  { %961 = vmatprep.subr.mxu0 %v3650_v23  ;;  %1032 = vmatprep.subr.mxu1 %v3651_v24 }
 0x22d   :  { %962 = vmatpush1.msra.mxu0 %v3652_v25  ;;  %1033 = vmatpush1.msra.mxu1 %v3653_v27 }
 0x22e   :  { %963 = vmatprep.subr.mxu0 %v3654_v28  ;;  %1034 = vmatprep.subr.mxu1 %v3655_v29 }
 0x22f   :  { %964 = vmatpush1.msra.mxu0 %v3656_v30  ;;  %1035 = vmatpush1.msra.mxu1 %v3657_v31 }
 0x230   :  { %965 = vmatprep.subr.mxu0 %v3658_v32  ;;  %1036 = vmatprep.subr.mxu1 %v3659_v33 }
 0x231   :  { %966 = vmatpush1.msra.mxu0 %v3660_v34  ;;  %1037 = vmatpush1.msra.mxu1 %v3661_v36 }
 0x232   :  { %967 = vmatprep.subr.mxu0 %v3662_v37  ;;  %1038 = vmatprep.subr.mxu1 %v3663_v38 }
 0x233   :  { %968 = vmatpush1.msra.mxu0 %v3664_v39  ;;  %1001 = vmatprep.mubr.f32.mxu0 %v3665_v40 }
 0x234   :  { %1039 = vmatpush1.msra.mxu1 %v3666_v41  ;;  %1072 = vmatprep.mubr.f32.mxu1 %v3665_v40 }
 0x235   :  { %1108 = vmatprep.subr.mxu0 %v2820_v42  ;;  %1179 = vmatprep.subr.mxu1 %v2826_v43 }
 0x2d4   :  { %v832_v45 = vpop.f32.mrf.mxu0  ;;  %v903_v3 = vpop.f32.mrf.mxu1 }
 0x2d5   :  { %v908_v9 = vadd.f32 %v832_v45, %v3669_v46  ;;  %v910_v7 = vadd.f32 %v903_v3, %v3671_v17  ;;  %v2843_v17 = vld [vmem:[%s3468_s5 + $0x1e0] sm:$0xff] }
 0x2d6   :  { %v834_v18 = vpop.f32.mrf.mxu0  ;;  %v905_v11 = vpop.f32.mrf.mxu1 }
 0x2d7   :  { %v912_v15 = vmul.f32 0.5, %v908_v9  ;;  %v909_v12 = vadd.f32 %v834_v18, %v3670_v35  ;;  %v911_v6 = vadd.f32 %v905_v11, %v3672_v53  ;;  %v2867_v11 = vld [vmem:[%s3468_s5 + $0x1c0] sm:$0xff]  ;;  %v2873_v53 = vld [vmem:[%s3468_s5 + $0x1d0] sm:$0xff] }
 0x2d9   :  { %1845 = vtanh.f32 %v912_v15  ;;  %v916_v44 = vmul.f32 0.5, %v909_v12  ;;  %v921_v26 = vmul.f32 0.5, %v911_v6  ;;  %v2879_v6 = vld [vmem:[%s3468_s5 + $0x1a8] sm:$0xff] }
 0x2db   :  { %1847 = vtanh.f32 %v916_v44  ;;  %v2861_v44 = vld [vmem:[%s3468_s5 + $0x1d8] sm:$0xff] }
 0x2dc   :  { %1849 = vtanh.f32 %v910_v7  ;;  %v2855_v7 = vld [vmem:[%s3468_s5 + $0x1c8] sm:$0xff] }
 0x2dd   :  { %1851 = vtanh.f32 %v921_v26  ;;  %v2885_v26 = vld [vmem:[%s3468_s5 + $0x1b8] sm:$0xff] }
 0x2e6   :  { %v1846_v19 = vpop.eup %1845 }
 0x2e7   :  { %v914_v4 = vadd.f32 1.0, %v1846_v19  ;;  %v2891_v19 = vld [vmem:[%s3468_s5 + $0x1a0] sm:$0xff] }
 0x2e8   :  { %v1848_v16 = vpop.eup %1847 }
 0x2e9   :  { %v915_v10 = vmul.f32 0.5, %v914_v4  ;;  %v918_v5 = vadd.f32 1.0, %v1848_v16  ;;  %v1850_v14 = vpop.eup %1849  ;;  %v2897_v4 = vld [vmem:[%s3468_s5 + $0x1b0] sm:$0xff]  ;;  %v2903_v16 = vld [vmem:[%s3468_s5 + $0x188] sm:$0xff] }
 0x2ea   :  { %v1852_v3 = vpop.eup %1851 }
 0x2eb   :  { %v919_v13 = vmul.f32 0.5, %v918_v5  ;;  %v926_v45 = vmul.f32 %v1850_v14, %v915_v10  ;;  %v923_v18 = vadd.f32 1.0, %v1852_v3  ;;  %v2909_v10 = vld [vmem:[%s3468_s5 + $0x198] sm:$0xff]  ;;  %v2915_v5 = vld [vmem:[%s3468_s5 + $0x180] sm:$0xff]  ;;  %v2921_v14 = vld [vmem:[%s3468_s5 + $0x190] sm:$0xff] }
 0x2ec   :  { %v2945_v3 = vld [vmem:[%s3468_s5 + $0x170] sm:$0xff] }
 0x2ed   :  { %v925_v46 = vmul.f32 %v919_v13, %v2747_v8  ;;  %v924_v15 = vmul.f32 0.5, %v923_v18  ;;  %v2849_v8 = vld [vmem:[%s3468_s5 + $0x1f0] sm:$0xff]  ;;  %v2927_v13 = vld [vmem:[%s3468_s5 + $0x168] sm:$0xff] }
 0x2ee   :  { %v2951_v18 = vld [vmem:[%s3468_s5 + $0x148] sm:$0xff] }
 0x2ef   :  { %v2834_v9 = vadd.f32 %v926_v45, %v925_v46  ;;  %v2933_v45 = vld [vmem:[%s3468_s5 + $0x178] sm:$0xff]  ;;  %v2939_v46 = vld [vmem:[%s3468_s5 + $0x160] sm:$0xff]  ;;  %3673 = vst [vmem:[#allocation4_spill] sm:$0xff] %v2951_v18 }
 0x2f1   :  { %1853 = vtanh.f32 %v2834_v9 }
 0x2fe   :  { %v1854_v35 = vpop.eup %1853 }
 0x2ff   :  { %v929_v12 = vmul.f32 %v1854_v35, %v924_v15  ;;  %v2957_v15 = vld [vmem:[%s3468_s5 + $0x158] sm:$0xff]  ;;  %v2963_v35 = vld [vmem:[%s3468_s5 + $0x140] sm:$0xff] }
 0x300   :  { %3674 = vst [vmem:[#allocation25_spill] sm:$0xff] %v2957_v15 }
 0x301   :  { %1818 = vst [vmem:[%s3472_s6 + $0x10] sm:$0xff] %v929_v12  ;;  %1002 = vmatmul.mubr.f32.vlgmr.msra.gmra.mxu0 %v929_v12  ;;  %1073 = vmatmul.mubr.f32.vlgmr.msra.gmra.mxu1 %v929_v12  ;;  %v2969_v12 = vld [vmem:[%s3468_s5 + $0x150] sm:$0xff] }
 0x302   :  { %1109 = vmatpush1.msra.mxu0 %v2843_v17  ;;  %1180 = vmatpush1.msra.mxu1 %v2849_v8 }
 0x303   :  { %1110 = vmatprep.subr.mxu0 %v2855_v7  ;;  %1181 = vmatprep.subr.mxu1 %v2861_v44 }
 0x304   :  { %1111 = vmatpush1.msra.mxu0 %v2867_v11  ;;  %1182 = vmatpush1.msra.mxu1 %v2873_v53 }
 0x305   :  { %1112 = vmatprep.subr.mxu0 %v2879_v6  ;;  %1183 = vmatprep.subr.mxu1 %v2885_v26 }
 0x306   :  { %1113 = vmatpush1.msra.mxu0 %v2891_v19  ;;  %1184 = vmatpush1.msra.mxu1 %v2897_v4 }
 0x307   :  { %1114 = vmatprep.subr.mxu0 %v2903_v16  ;;  %1185 = vmatprep.subr.mxu1 %v2909_v10 }
 0x308   :  { %1115 = vmatpush1.msra.mxu0 %v2915_v5  ;;  %1186 = vmatpush1.msra.mxu1 %v2921_v14 }
 0x309   :  { %1116 = vmatprep.subr.mxu0 %v2927_v13  ;;  %1187 = vmatprep.subr.mxu1 %v2933_v45 }
 0x30a   :  { %1117 = vmatpush1.msra.mxu0 %v2939_v46  ;;  %1188 = vmatpush1.msra.mxu1 %v2945_v3 }
 0x30b   :  { %1118 = vmatprep.subr.mxu0 %v2951_v18  ;;  %1189 = vmatprep.subr.mxu1 %v2957_v15  ;;  %v2975_v18 = vld [vmem:[%s3468_s5 + $0x128] sm:$0xff]  ;;  %v2981_v15 = vld [vmem:[%s3468_s5 + $0x138] sm:$0xff] }
 0x30c   :  { %1119 = vmatpush1.msra.mxu0 %v2963_v35  ;;  %1190 = vmatpush1.msra.mxu1 %v2969_v12 }
 0x30d   :  { %1120 = vmatprep.subr.mxu0 %v2975_v18  ;;  %1191 = vmatprep.subr.mxu1 %v2981_v15 }
 0x30e   :  { %1121 = vmatpush1.msra.mxu0 %v2246_v47  ;;  %1192 = vmatpush1.msra.mxu1 %v2251_v48  ;;  %v3675_v48 = vld [vmem:[#allocation33_spill] sm:$0xff] }
 0x30f   :  { %1122 = vmatprep.subr.mxu0 %v2258_v49  ;;  %1193 = vmatprep.subr.mxu1 %v2263_v50 }
 0x310   :  { %1123 = vmatpush1.msra.mxu0 %v2272_v51  ;;  %1194 = vmatpush1.msra.mxu1 %v2277_v52 }
 0x311   :  { %1124 = vmatprep.subr.mxu0 %v2289_v54  ;;  %1195 = vmatprep.subr.mxu1 %v2294_v55  ;;  %v3676_v54 = vld [vmem:[#allocation35_spill] sm:$0xff] }
 0x312   :  { %1125 = vmatpush1.msra.mxu0 %v2301_v56  ;;  %1196 = vmatpush1.msra.mxu1 %v2306_v57  ;;  %v3677_v56 = vld [vmem:[#allocation34_spill] sm:$0xff] }
 0x313   :  { %1126 = vmatprep.subr.mxu0 %v2313_v58  ;;  %1197 = vmatprep.subr.mxu1 %v2318_v59 }
 0x314   :  { %1127 = vmatpush1.msra.mxu0 %v2327_v60  ;;  %1198 = vmatpush1.msra.mxu1 %v2332_v61  ;;  %v3678_v60 = vld [vmem:[#allocation36_spill] sm:$0xff] }
 0x315   :  { %1128 = vmatprep.subr.mxu0 %v2344_v63  ;;  %1199 = vmatprep.subr.mxu1 %v2349_v0 }
 0x316   :  { %1129 = vmatpush1.msra.mxu0 %v2356_v1  ;;  %1200 = vmatpush1.msra.mxu1 %v2361_v2 }
 0x317   :  { %1130 = vmatprep.subr.mxu0 %v3620_v62  ;;  %1201 = vmatprep.subr.mxu1 %v3647_v20 }
 0x318   :  { %1131 = vmatpush1.msra.mxu0 %v3648_v21  ;;  %1202 = vmatpush1.msra.mxu1 %v3649_v22 }
 0x319   :  { %1132 = vmatprep.subr.mxu0 %v3650_v23  ;;  %1203 = vmatprep.subr.mxu1 %v3651_v24 }
 0x31a   :  { %1133 = vmatpush1.msra.mxu0 %v3652_v25  ;;  %1204 = vmatpush1.msra.mxu1 %v3653_v27 }
 0x31b   :  { %1134 = vmatprep.subr.mxu0 %v3654_v28  ;;  %1205 = vmatprep.subr.mxu1 %v3655_v29 }
 0x31c   :  { %1135 = vmatpush1.msra.mxu0 %v3656_v30  ;;  %1206 = vmatpush1.msra.mxu1 %v3657_v31 }
 0x31d   :  { %1136 = vmatprep.subr.mxu0 %v3658_v32  ;;  %1207 = vmatprep.subr.mxu1 %v3659_v33  ;;  %v3679_v32 = vld [vmem:[#allocation4_spill] sm:$0xff]  ;;  %v3680_v33 = vld [vmem:[#allocation25_spill] sm:$0xff] }
 0x31e   :  { %1137 = vmatpush1.msra.mxu0 %v3660_v34  ;;  %1208 = vmatpush1.msra.mxu1 %v3661_v36  ;;  %v3064_v34 = vld [vmem:[%s3468_s5 + $0x120] sm:$0xff]  ;;  %v3070_v36 = vld [vmem:[%s3468_s5 + $0x130] sm:$0xff] }
 0x31f   :  { %1138 = vmatprep.subr.mxu0 %v3662_v37  ;;  %1209 = vmatprep.subr.mxu1 %v3663_v38  ;;  %v3076_v37 = vld [vmem:[%s3468_s5 + $0x108] sm:$0xff]  ;;  %v3082_v38 = vld [vmem:[%s3468_s5 + $0x118] sm:$0xff] }
 0x320   :  { %1139 = vmatpush1.msra.mxu0 %v3664_v39  ;;  %1172 = vmatprep.mubr.f32.mxu0 %v3665_v40  ;;  %v3088_v39 = vld [vmem:[%s3468_s5 + $0x100] sm:$0xff] }
 0x321   :  { %1210 = vmatpush1.msra.mxu1 %v3666_v41  ;;  %1243 = vmatprep.mubr.f32.mxu1 %v3665_v40  ;;  %v3094_v41 = vld [vmem:[%s3468_s5 + $0x110] sm:$0xff] }
 0x322   :  { %1279 = vmatprep.subr.mxu0 %v2820_v42  ;;  %1350 = vmatprep.subr.mxu1 %v2826_v43 }
 0x3c1   :  { %v1003_v47 = vpop.f32.mrf.mxu0  ;;  %v1074_v50 = vpop.f32.mrf.mxu1 }
 0x3c2   :  { %v1079_v49 = vadd.f32 %v1003_v47, %v3675_v48  ;;  %v1081_v57 = vadd.f32 %v1074_v50, %v3677_v56  ;;  %v3106_v47 = vld [vmem:[%s3468_s5 + $0xf8] sm:$0xff]  ;;  %v3112_v48 = vld [vmem:[%s3468_s5 + $0xe0] sm:$0xff]  ;;  %v3124_v50 = vld [vmem:[%s3468_s5 + $0xc8] sm:$0xff] }
 0x3c3   :  { %v1005_v51 = vpop.f32.mrf.mxu0  ;;  %v1076_v59 = vpop.f32.mrf.mxu1  ;;  %v3154_v56 = vld [vmem:[%s3468_s5 + $0xb8] sm:$0xff] }
 0x3c4   :  { %v1083_v52 = vmul.f32 0.5, %v1079_v49  ;;  %v1080_v55 = vadd.f32 %v1005_v51, %v3676_v54  ;;  %v1082_v61 = vadd.f32 %v1076_v59, %v3678_v60  ;;  %v3118_v49 = vld [vmem:[%s3468_s5 + $0xf0] sm:$0xff]  ;;  %v3130_v51 = vld [vmem:[%s3468_s5 + $0xd8] sm:$0xff]  ;;  %v3172_v59 = vld [vmem:[%s3468_s5 + $0x88] sm:$0xff] }
 0x3c5   :  { %v3142_v54 = vld [vmem:[%s3468_s5 + $0xd0] sm:$0xff]  ;;  %v3178_v60 = vld [vmem:[%s3468_s5 + $0x98] sm:$0xff] }
 0x3c6   :  { %1855 = vtanh.f32 %v1083_v52  ;;  %v1087_v58 = vmul.f32 0.5, %v1080_v55  ;;  %v1092_v63 = vmul.f32 0.5, %v1082_v61  ;;  %v3136_v52 = vld [vmem:[%s3468_s5 + $0xc0] sm:$0xff]  ;;  %v3148_v55 = vld [vmem:[%s3468_s5 + $0xa8] sm:$0xff]  ;;  %3681 = vst [vmem:[#allocation27_spill] sm:$0xff] %v3178_v60 }
 0x3c7   :  { %v3184_v61 = vld [vmem:[%s3468_s5 + $0x80] sm:$0xff] }
 0x3c8   :  { %1857 = vtanh.f32 %v1087_v58  ;;  %v3166_v58 = vld [vmem:[%s3468_s5 + $0xb0] sm:$0xff]  ;;  %3682 = vst [vmem:[#allocation26_spill] sm:$0xff] %v3184_v61 }
 0x3c9   :  { %1859 = vtanh.f32 %v1081_v57  ;;  %v3160_v57 = vld [vmem:[%s3468_s5 + $0xa0] sm:$0xff] }
 0x3ca   :  { %1861 = vtanh.f32 %v1092_v63  ;;  %v3190_v63 = vld [vmem:[%s3468_s5 + $0x90] sm:$0xff] }
 0x3cb   :  { %3683 = vst [vmem:[#allocation28_spill] sm:$0xff] %v3190_v63 }
 0x3d3   :  { %v1856_v0 = vpop.eup %1855 }
 0x3d4   :  { %v1085_v1 = vadd.f32 1.0, %v1856_v0  ;;  %v3196_v0 = vld [vmem:[%s3468_s5 + $0x68] sm:$0xff] }
 0x3d5   :  { %v1858_v2 = vpop.eup %1857  ;;  %3684 = vst [vmem:[#allocation6_spill] sm:$0xff] %v3196_v0 }
 0x3d6   :  { %v1086_v62 = vmul.f32 0.5, %v1085_v1  ;;  %v1089_v20 = vadd.f32 1.0, %v1858_v2  ;;  %v1860_v21 = vpop.eup %1859  ;;  %v3202_v1 = vld [vmem:[%s3468_s5 + $0x78] sm:$0xff]  ;;  %v3208_v2 = vld [vmem:[%s3468_s5 + $0x60] sm:$0xff] }
 0x3d7   :  { %v1862_v27 = vpop.eup %1861  ;;  %3685 = vst [vmem:[#allocation7_spill] sm:$0xff] %v3202_v1  ;;  %3686 = vst [vmem:[#allocation8_spill] sm:$0xff] %v3208_v2 }
 0x3d8   :  { %v1090_v22 = vmul.f32 0.5, %v1089_v20  ;;  %v1097_v23 = vmul.f32 %v1860_v21, %v1086_v62  ;;  %v1094_v28 = vadd.f32 1.0, %v1862_v27  ;;  %v3214_v62 = vld [vmem:[%s3468_s5 + $0x70] sm:$0xff]  ;;  %v3220_v20 = vld [vmem:[%s3468_s5 + $0x48] sm:$0xff]  ;;  %v3226_v21 = vld [vmem:[%s3468_s5 + $0x58] sm:$0xff] }
 0x3d9   :  { %3687 = vst [vmem:[#allocation9_spill] sm:$0xff] %v3214_v62  ;;  %3688 = vst [vmem:[#allocation10_spill] sm:$0xff] %v3220_v20  ;;  %v3250_v27 = vld [vmem:[%s3468_s5 + $0x38] sm:$0xff] }
 0x3da   :  { %v1096_v24 = vmul.f32 %v1090_v22, %v2834_v9  ;;  %v1095_v29 = vmul.f32 0.5, %v1094_v28  ;;  %v3100_v9 = vld [vmem:[%s3468_s5 + $0xe8] sm:$0xff]  ;;  %3689 = vst [vmem:[#allocation11_spill] sm:$0xff] %v3226_v21  ;;  %v3232_v22 = vld [vmem:[%s3468_s5 + $0x40] sm:$0xff]  ;;  %3693 = vst [vmem:[#allocation15_spill] sm:$0xff] %v3250_v27 }
 0x3db   :  { %3690 = vst [vmem:[#allocation12_spill] sm:$0xff] %v3232_v22  ;;  %v3256_v28 = vld [vmem:[%s3468_s5 + $0x20] sm:$0xff] }
 0x3dc   :  { %v3031_v25 = vadd.f32 %v1097_v23, %v1096_v24  ;;  %v3238_v23 = vld [vmem:[%s3468_s5 + $0x50] sm:$0xff]  ;;  %v3244_v24 = vld [vmem:[%s3468_s5 + $0x28] sm:$0xff]  ;;  %3694 = vst [vmem:[#allocation16_spill] sm:$0xff] %v3256_v28 }
 0x3dd   :  { %3691 = vst [vmem:[#allocation13_spill] sm:$0xff] %v3238_v23  ;;  %3692 = vst [vmem:[#allocation14_spill] sm:$0xff] %v3244_v24 }
 0x3de   :  { %1863 = vtanh.f32 %v3031_v25 }
 0x3eb   :  { %v1864_v30 = vpop.eup %1863 }
 0x3ec   :  { %v1100_v31 = vmul.f32 %v1864_v30, %v1095_v29  ;;  %v3262_v29 = vld [vmem:[%s3468_s5 + $0x30] sm:$0xff]  ;;  %v3268_v30 = vld [vmem:[%s3468_s5 + $0x8] sm:$0xff] }
 0x3ed   :  { %3695 = vst [vmem:[#allocation17_spill] sm:$0xff] %v3262_v29  ;;  %3696 = vst [vmem:[#allocation18_spill] sm:$0xff] %v3268_v30 }
 0x3ee   :  { %1819 = vst [vmem:[%s3472_s6 + $0x18] sm:$0xff] %v1100_v31  ;;  %1173 = vmatmul.mubr.f32.vlgmr.msra.gmra.mxu0 %v1100_v31  ;;  %1244 = vmatmul.mubr.f32.vlgmr.msra.gmra.mxu1 %v1100_v31  ;;  %v3274_v31 = vld [vmem:[%s3468_s5 + $0x18] sm:$0xff] }
 0x3ef   :  { %1280 = vmatpush1.msra.mxu0 %v2843_v17  ;;  %1351 = vmatpush1.msra.mxu1 %v2849_v8  ;;  %3697 = vst [vmem:[#allocation19_spill] sm:$0xff] %v3274_v31 }
 0x3f0   :  { %1281 = vmatprep.subr.mxu0 %v2855_v7  ;;  %1352 = vmatprep.subr.mxu1 %v2861_v44 }
 0x3f1   :  { %1282 = vmatpush1.msra.mxu0 %v2867_v11  ;;  %1353 = vmatpush1.msra.mxu1 %v2873_v53 }
 0x3f2   :  { %1283 = vmatprep.subr.mxu0 %v2879_v6  ;;  %1354 = vmatprep.subr.mxu1 %v2885_v26 }
 0x3f3   :  { %1284 = vmatpush1.msra.mxu0 %v2891_v19  ;;  %1355 = vmatpush1.msra.mxu1 %v2897_v4 }
 0x3f4   :  { %1285 = vmatprep.subr.mxu0 %v2903_v16  ;;  %1356 = vmatprep.subr.mxu1 %v2909_v10 }
 0x3f5   :  { %1286 = vmatpush1.msra.mxu0 %v2915_v5  ;;  %1357 = vmatpush1.msra.mxu1 %v2921_v14 }
 0x3f6   :  { %1287 = vmatprep.subr.mxu0 %v2927_v13  ;;  %1358 = vmatprep.subr.mxu1 %v2933_v45 }
 0x3f7   :  { %1288 = vmatpush1.msra.mxu0 %v2939_v46  ;;  %1359 = vmatpush1.msra.mxu1 %v2945_v3 }
 0x3f8   :  { %1289 = vmatprep.subr.mxu0 %v3679_v32  ;;  %1360 = vmatprep.subr.mxu1 %v3680_v33 }
 0x3f9   :  { %1290 = vmatpush1.msra.mxu0 %v2963_v35  ;;  %1361 = vmatpush1.msra.mxu1 %v2969_v12 }
 0x3fa   :  { %1291 = vmatprep.subr.mxu0 %v2975_v18  ;;  %1362 = vmatprep.subr.mxu1 %v2981_v15 }
 0x3fb   :  { %1292 = vmatpush1.msra.mxu0 %v3064_v34  ;;  %1363 = vmatpush1.msra.mxu1 %v3070_v36 }
 0x3fc   :  { %1293 = vmatprep.subr.mxu0 %v3076_v37  ;;  %1364 = vmatprep.subr.mxu1 %v3082_v38 }
 0x3fd   :  { %1294 = vmatpush1.msra.mxu0 %v3088_v39  ;;  %1365 = vmatpush1.msra.mxu1 %v3094_v41 }
 0x3fe   :  { %1295 = vmatprep.subr.mxu0 %v3100_v9  ;;  %1366 = vmatprep.subr.mxu1 %v3106_v47 }
 0x3ff   :  { %1296 = vmatpush1.msra.mxu0 %v3112_v48  ;;  %1367 = vmatpush1.msra.mxu1 %v3118_v49 }
 0x400   :  { %1297 = vmatprep.subr.mxu0 %v3124_v50  ;;  %1368 = vmatprep.subr.mxu1 %v3130_v51 }
 0x401   :  { %1298 = vmatpush1.msra.mxu0 %v3136_v52  ;;  %1369 = vmatpush1.msra.mxu1 %v3142_v54 }
 0x402   :  { %1299 = vmatprep.subr.mxu0 %v3148_v55  ;;  %1370 = vmatprep.subr.mxu1 %v3154_v56 }
 0x403   :  { %1300 = vmatpush1.msra.mxu0 %v3160_v57  ;;  %1371 = vmatpush1.msra.mxu1 %v3166_v58 }
 0x404   :  { %1301 = vmatprep.subr.mxu0 %v3172_v59  ;;  %1372 = vmatprep.subr.mxu1 %v3178_v60 }
 0x405   :  { %1302 = vmatpush1.msra.mxu0 %v3184_v61  ;;  %1373 = vmatpush1.msra.mxu1 %v3190_v63 }
 0x406   :  { %1303 = vmatprep.subr.mxu0 %v3196_v0  ;;  %1374 = vmatprep.subr.mxu1 %v3202_v1 }
 0x407   :  { %1304 = vmatpush1.msra.mxu0 %v3208_v2  ;;  %1375 = vmatpush1.msra.mxu1 %v3214_v62 }
 0x408   :  { %1305 = vmatprep.subr.mxu0 %v3220_v20  ;;  %1376 = vmatprep.subr.mxu1 %v3226_v21  ;;  %v3702_v20 = vld [vmem:[#allocation38_spill] sm:$0xff] }
 0x409   :  { %1306 = vmatpush1.msra.mxu0 %v3232_v22  ;;  %1377 = vmatpush1.msra.mxu1 %v3238_v23  ;;  %v3701_v22 = vld [vmem:[#allocation39_spill] sm:$0xff] }
 0x40a   :  { %1307 = vmatprep.subr.mxu0 %v3244_v24  ;;  %1378 = vmatprep.subr.mxu1 %v3250_v27 }
 0x40b   :  { %1308 = vmatpush1.msra.mxu0 %v3256_v28  ;;  %1379 = vmatpush1.msra.mxu1 %v3262_v29  ;;  %v3280_v28 = vld [vmem:[%s3468_s5] sm:$0xff]  ;;  %v3700_v29 = vld [vmem:[#allocation37_spill] sm:$0xff] }
 0x40c   :  { %1309 = vmatprep.subr.mxu0 %v3268_v30  ;;  %1380 = vmatprep.subr.mxu1 %v3274_v31  ;;  %3698 = vst [vmem:[#allocation20_spill] sm:$0xff] %v3280_v28  ;;  %v3287_v30 = vld [vmem:[%s3468_s5 + $0x10] sm:$0xff] }
 0x40d   :  { %1310 = vmatpush1.msra.mxu0 %v3280_v28  ;;  %1343 = vmatprep.mubr.f32.mxu0 %v3665_v40  ;;  %3699 = vst [vmem:[#allocation21_spill] sm:$0xff] %v3287_v30 }
 0x40e   :  { %1381 = vmatpush1.msra.mxu1 %v3287_v30  ;;  %1414 = vmatprep.mubr.f32.mxu1 %v3665_v40  ;;  %v3703_v40 = vld [vmem:[#allocation40_spill] sm:$0xff] }
 0x40f   :  { %1450 = vmatprep.subr.mxu0 %v2820_v42  ;;  %1521 = vmatprep.subr.mxu1 %v2826_v43 }
 0x4ae   :  { %v1174_v31 = vpop.f32.mrf.mxu0  ;;  %v1245_v24 = vpop.f32.mrf.mxu1 }
 0x4af   :  { %v1250_v27 = vadd.f32 %v1174_v31, %v3700_v29  ;;  %v1252_v62 = vadd.f32 %v1245_v24, %v3702_v20  ;;  %v3712_v24 = vld [vmem:[#allocation11_spill] sm:$0xff] }
 0x4b0   :  { %v1176_v28 = vpop.f32.mrf.mxu0  ;;  %v1247_v30 = vpop.f32.mrf.mxu1 }
 0x4b1   :  { %v1254_v23 = vmul.f32 0.5, %v1250_v27  ;;  %v1251_v21 = vadd.f32 %v1176_v28, %v3701_v22  ;;  %v1253_v1 = vadd.f32 %v1247_v30, %v3703_v40  ;;  %v3713_v28 = vld [vmem:[#allocation12_spill] sm:$0xff]  ;;  %v3714_v30 = vld [vmem:[#allocation13_spill] sm:$0xff] }
 0x4b3   :  { %1865 = vtanh.f32 %v1254_v23  ;;  %v1258_v2 = vmul.f32 0.5, %v1251_v21  ;;  %v1263_v42 = vmul.f32 0.5, %v1253_v1  ;;  %v3711_v21 = vld [vmem:[#allocation10_spill] sm:$0xff] }
 0x4b5   :  { %1867 = vtanh.f32 %v1258_v2 }
 0x4b6   :  { %1869 = vtanh.f32 %v1252_v62 }
 0x4b7   :  { %1871 = vtanh.f32 %v1263_v42  ;;  %v3704_v42 = vld [vmem:[#allocation27_spill] sm:$0xff] }
 0x4c0   :  { %v1866_v0 = vpop.eup %1865 }
 0x4c1   :  { %v1256_v43 = vadd.f32 1.0, %v1866_v0  ;;  %v3710_v0 = vld [vmem:[#allocation9_spill] sm:$0xff] }
 0x4c2   :  { %v1868_v63 = vpop.eup %1867 }
 0x4c3   :  { %v1257_v61 = vmul.f32 0.5, %v1256_v43  ;;  %v1260_v29 = vadd.f32 1.0, %v1868_v63  ;;  %v1870_v31 = vpop.eup %1869  ;;  %v3705_v43 = vld [vmem:[#allocation26_spill] sm:$0xff]  ;;  %v3709_v63 = vld [vmem:[#allocation8_spill] sm:$0xff] }
 0x4c4   :  { %v1872_v2 = vpop.eup %1871 }
 0x4c5   :  { %v1261_v27 = vmul.f32 0.5, %v1260_v29  ;;  %v1268_v60 = vmul.f32 %v1870_v31, %v1257_v61  ;;  %v1265_v62 = vadd.f32 1.0, %v1872_v2  ;;  %v3708_v61 = vld [vmem:[#allocation7_spill] sm:$0xff]  ;;  %v3715_v29 = vld [vmem:[#allocation14_spill] sm:$0xff] }
 0x4c6   :  { %v3716_v31 = vld [vmem:[#allocation15_spill] sm:$0xff]  ;;  %v3719_v2 = vld [vmem:[#allocation18_spill] sm:$0xff] }
 0x4c7   :  { %v1267_v22 = vmul.f32 %v1261_v27, %v3031_v25  ;;  %v1266_v20 = vmul.f32 0.5, %v1265_v62  ;;  %v3706_v25 = vld [vmem:[#allocation28_spill] sm:$0xff]  ;;  %v3720_v62 = vld [vmem:[#allocation19_spill] sm:$0xff] }
 0x4c8   :  { %v3717_v27 = vld [vmem:[#allocation16_spill] sm:$0xff] }
 0x4c9   :  { %v3298_v23 = vadd.f32 %v1268_v60, %v1267_v22  ;;  %v3707_v60 = vld [vmem:[#allocation6_spill] sm:$0xff]  ;;  %v3718_v22 = vld [vmem:[#allocation17_spill] sm:$0xff] }
 0x4cb   :  { %1873 = vtanh.f32 %v3298_v23 }
 0x4d8   :  { %v1874_v40 = vpop.eup %1873 }
 0x4d9   :  { %v1271_v1 = vmul.f32 %v1874_v40, %v1266_v20  ;;  %v3721_v20 = vld [vmem:[#allocation20_spill] sm:$0xff]  ;;  %v3722_v40 = vmov 0.0  }
 0x4db   :  { %1820 = vst [vmem:[%s3472_s6 + $0x20] sm:$0xff] %v1271_v1  ;;  %1344 = vmatmul.mubr.f32.vlgmr.msra.gmra.mxu0 %v1271_v1  ;;  %1415 = vmatmul.mubr.f32.vlgmr.msra.gmra.mxu1 %v1271_v1  ;;  %v3723_v1 = vld [vmem:[#allocation21_spill] sm:$0xff] }
 0x4dc   :  { %1451 = vmatpush1.msra.mxu0 %v2843_v17  ;;  %1522 = vmatpush1.msra.mxu1 %v2849_v8 }
 0x4dd   :  { %1452 = vmatprep.subr.mxu0 %v2855_v7  ;;  %1523 = vmatprep.subr.mxu1 %v2861_v44 }
 0x4de   :  { %1453 = vmatpush1.msra.mxu0 %v2867_v11  ;;  %1524 = vmatpush1.msra.mxu1 %v2873_v53 }
 0x4df   :  { %1454 = vmatprep.subr.mxu0 %v2879_v6  ;;  %1525 = vmatprep.subr.mxu1 %v2885_v26 }
 0x4e0   :  { %1455 = vmatpush1.msra.mxu0 %v2891_v19  ;;  %1526 = vmatpush1.msra.mxu1 %v2897_v4 }
 0x4e1   :  { %1456 = vmatprep.subr.mxu0 %v2903_v16  ;;  %1527 = vmatprep.subr.mxu1 %v2909_v10 }
 0x4e2   :  { %1457 = vmatpush1.msra.mxu0 %v2915_v5  ;;  %1528 = vmatpush1.msra.mxu1 %v2921_v14 }
 0x4e3   :  { %1458 = vmatprep.subr.mxu0 %v2927_v13  ;;  %1529 = vmatprep.subr.mxu1 %v2933_v45 }
 0x4e4   :  { %1459 = vmatpush1.msra.mxu0 %v2939_v46  ;;  %1530 = vmatpush1.msra.mxu1 %v2945_v3 }
 0x4e5   :  { %1460 = vmatprep.subr.mxu0 %v3679_v32  ;;  %1531 = vmatprep.subr.mxu1 %v3680_v33 }
 0x4e6   :  { %1461 = vmatpush1.msra.mxu0 %v2963_v35  ;;  %1532 = vmatpush1.msra.mxu1 %v2969_v12 }
 0x4e7   :  { %1462 = vmatprep.subr.mxu0 %v2975_v18  ;;  %1533 = vmatprep.subr.mxu1 %v2981_v15 }
 0x4e8   :  { %1463 = vmatpush1.msra.mxu0 %v3064_v34  ;;  %1534 = vmatpush1.msra.mxu1 %v3070_v36 }
 0x4e9   :  { %1464 = vmatprep.subr.mxu0 %v3076_v37  ;;  %1535 = vmatprep.subr.mxu1 %v3082_v38 }
 0x4ea   :  { %1465 = vmatpush1.msra.mxu0 %v3088_v39  ;;  %1536 = vmatpush1.msra.mxu1 %v3094_v41 }
 0x4eb   :  { %1466 = vmatprep.subr.mxu0 %v3100_v9  ;;  %1537 = vmatprep.subr.mxu1 %v3106_v47 }
 0x4ec   :  { %1467 = vmatpush1.msra.mxu0 %v3112_v48  ;;  %1538 = vmatpush1.msra.mxu1 %v3118_v49 }
 0x4ed   :  { %1468 = vmatprep.subr.mxu0 %v3124_v50  ;;  %1539 = vmatprep.subr.mxu1 %v3130_v51 }
 0x4ee   :  { %1469 = vmatpush1.msra.mxu0 %v3136_v52  ;;  %1540 = vmatpush1.msra.mxu1 %v3142_v54 }
 0x4ef   :  { %1470 = vmatprep.subr.mxu0 %v3148_v55  ;;  %1541 = vmatprep.subr.mxu1 %v3154_v56 }
 0x4f0   :  { %1471 = vmatpush1.msra.mxu0 %v3160_v57  ;;  %1542 = vmatpush1.msra.mxu1 %v3166_v58 }
 0x4f1   :  { %1472 = vmatprep.subr.mxu0 %v3172_v59  ;;  %1543 = vmatprep.subr.mxu1 %v3704_v42 }
 0x4f2   :  { %1473 = vmatpush1.msra.mxu0 %v3705_v43  ;;  %1544 = vmatpush1.msra.mxu1 %v3706_v25 }
 0x4f3   :  { %1474 = vmatprep.subr.mxu0 %v3707_v60  ;;  %1545 = vmatprep.subr.mxu1 %v3708_v61 }
 0x4f4   :  { %1475 = vmatpush1.msra.mxu0 %v3709_v63  ;;  %1546 = vmatpush1.msra.mxu1 %v3710_v0 }
 0x4f5   :  { %1476 = vmatprep.subr.mxu0 %v3711_v21  ;;  %1547 = vmatprep.subr.mxu1 %v3712_v24  ;;  %v3727_v21 = vld [vmem:[#allocation43_spill] sm:$0xff] }
 0x4f6   :  { %1477 = vmatpush1.msra.mxu0 %v3713_v28  ;;  %1548 = vmatpush1.msra.mxu1 %v3714_v30  ;;  %v3724_v30 = vld [vmem:[#allocation5_spill] sm:$0xff] }
 0x4f7   :  { %1478 = vmatprep.subr.mxu0 %v3715_v29  ;;  %1549 = vmatprep.subr.mxu1 %v3716_v31  ;;  %v3725_v29 = vld [vmem:[#allocation3_spill] sm:$0xff] }
 0x4f8   :  { %1479 = vmatpush1.msra.mxu0 %v3717_v27  ;;  %1550 = vmatpush1.msra.mxu1 %v3718_v22  ;;  %v3726_v27 = vld [vmem:[#allocation41_spill] sm:$0xff] }
 0x4f9   :  { %1480 = vmatprep.subr.mxu0 %v3719_v2  ;;  %1551 = vmatprep.subr.mxu1 %v3720_v62 }
 0x4fa   :  { %1481 = vmatpush1.msra.mxu0 %v3721_v20  ;;  %1514 = vmatprep.mubr.f32.mxu0 %v3722_v40  ;;  %v3728_v20 = vld [vmem:[#allocation42_spill] sm:$0xff] }
 0x4fb   :  { %1552 = vmatpush1.msra.mxu1 %v3723_v1  ;;  %1585 = vmatprep.mubr.f32.mxu1 %v3722_v40  ;;  %v3729_v40 = vld [vmem:[#allocation44_spill] sm:$0xff] }
 0x4fc   :  { %1621 = vmatprep.subr.mxu0 %v3724_v30  ;;  %1692 = vmatprep.subr.mxu1 %v3725_v29 }
 0x59b   :  { %v1345_v31 = vpop.f32.mrf.mxu0  ;;  %v1416_v22 = vpop.f32.mrf.mxu1 }
 0x59c   :  { %v1421_v28 = vadd.f32 %v1345_v31, %v3726_v27  ;;  %v1423_v0 = vadd.f32 %v1416_v22, %v3728_v20 }
 0x59d   :  { %v1347_v24 = vpop.f32.mrf.mxu0  ;;  %v1418_v1 = vpop.f32.mrf.mxu1 }
 0x59e   :  { %v1425_v2 = vmul.f32 0.5, %v1421_v28  ;;  %v1422_v62 = vadd.f32 %v1347_v24, %v3727_v21  ;;  %v1424_v61 = vadd.f32 %v1418_v1, %v3729_v40  ;;  %v3754_v1 = vld [vmem:[#allocation49_spill] sm:$0xff] }
 0x5a0   :  { %1875 = vtanh.f32 %v1425_v2  ;;  %v1429_v63 = vmul.f32 0.5, %v1422_v62  ;;  %v1434_v30 = vmul.f32 0.5, %v1424_v61 }
 0x5a2   :  { %1877 = vtanh.f32 %v1429_v63 }
 0x5a3   :  { %1879 = vtanh.f32 %v1423_v0 }
 0x5a4   :  { %1881 = vtanh.f32 %v1434_v30 }
 0x5ad   :  { %v1876_v60 = vpop.eup %1875 }
 0x5ae   :  { %v1427_v29 = vadd.f32 1.0, %v1876_v60 }
 0x5af   :  { %v1878_v25 = vpop.eup %1877 }
 0x5b0   :  { %v1428_v43 = vmul.f32 0.5, %v1427_v29  ;;  %v1431_v31 = vadd.f32 1.0, %v1878_v25  ;;  %v1880_v27 = vpop.eup %1879 }
 0x5b1   :  { %v1882_v63 = vpop.eup %1881 }
 0x5b2   :  { %v1432_v28 = vmul.f32 0.5, %v1431_v31  ;;  %v1439_v42 = vmul.f32 %v1880_v27, %v1428_v43  ;;  %v1436_v0 = vadd.f32 1.0, %v1882_v63 }
 0x5b4   :  { %v1438_v21 = vmul.f32 %v1432_v28, %v3298_v23  ;;  %v1437_v22 = vmul.f32 0.5, %v1436_v0  ;;  %v3755_v28 = vld [vmem:[#allocation51_spill] sm:$0xff] }
 0x5b6   :  { %v3375_v24 = vadd.f32 %v1439_v42, %v1438_v21 }
 0x5b8   :  { %1883 = vtanh.f32 %v3375_v24 }
 0x5c5   :  { %v1884_v2 = vpop.eup %1883 }
 0x5c6   :  { %v1442_v61 = vmul.f32 %v1884_v2, %v1437_v22  ;;  %v3757_v2 = vld [vmem:[#allocation52_spill] sm:$0xff] }
 0x5c8   :  { %1821 = vst [vmem:[%s3472_s6 + $0x28] sm:$0xff] %v1442_v61  ;;  %1515 = vmatmul.mubr.f32.vlgmr.msra.gmra.mxu0 %v1442_v61  ;;  %1586 = vmatmul.mubr.f32.vlgmr.msra.gmra.mxu1 %v1442_v61 }
 0x5c9   :  { %1622 = vmatpush1.msra.mxu0 %v2843_v17  ;;  %1693 = vmatpush1.msra.mxu1 %v2849_v8  ;;  %v3730_v17 = vld [vmem:[#allocation27_spill] sm:$0xff]  ;;  %v3731_v8 = vld [vmem:[#allocation26_spill] sm:$0xff] }
 0x5ca   :  { %1623 = vmatprep.subr.mxu0 %v2855_v7  ;;  %1694 = vmatprep.subr.mxu1 %v2861_v44  ;;  %v3732_v7 = vld [vmem:[#allocation28_spill] sm:$0xff]  ;;  %v3733_v44 = vld [vmem:[#allocation6_spill] sm:$0xff] }
 0x5cb   :  { %1624 = vmatpush1.msra.mxu0 %v2867_v11  ;;  %1695 = vmatpush1.msra.mxu1 %v2873_v53  ;;  %v3734_v11 = vld [vmem:[#allocation7_spill] sm:$0xff]  ;;  %v3735_v53 = vld [vmem:[#allocation8_spill] sm:$0xff] }
 0x5cc   :  { %1625 = vmatprep.subr.mxu0 %v2879_v6  ;;  %1696 = vmatprep.subr.mxu1 %v2885_v26  ;;  %v3736_v6 = vld [vmem:[#allocation9_spill] sm:$0xff]  ;;  %v3737_v26 = vld [vmem:[#allocation10_spill] sm:$0xff] }
 0x5cd   :  { %1626 = vmatpush1.msra.mxu0 %v2891_v19  ;;  %1697 = vmatpush1.msra.mxu1 %v2897_v4  ;;  %v3738_v19 = vld [vmem:[#allocation11_spill] sm:$0xff]  ;;  %v3739_v4 = vld [vmem:[#allocation12_spill] sm:$0xff] }
 0x5ce   :  { %1627 = vmatprep.subr.mxu0 %v2903_v16  ;;  %1698 = vmatprep.subr.mxu1 %v2909_v10  ;;  %v3740_v16 = vld [vmem:[#allocation13_spill] sm:$0xff]  ;;  %v3741_v10 = vld [vmem:[#allocation14_spill] sm:$0xff] }
 0x5cf   :  { %1628 = vmatpush1.msra.mxu0 %v2915_v5  ;;  %1699 = vmatpush1.msra.mxu1 %v2921_v14  ;;  %v3742_v5 = vld [vmem:[#allocation15_spill] sm:$0xff]  ;;  %v3743_v14 = vld [vmem:[#allocation16_spill] sm:$0xff] }
 0x5d0   :  { %1629 = vmatprep.subr.mxu0 %v2927_v13  ;;  %1700 = vmatprep.subr.mxu1 %v2933_v45  ;;  %v3744_v13 = vld [vmem:[#allocation17_spill] sm:$0xff]  ;;  %v3745_v45 = vld [vmem:[#allocation18_spill] sm:$0xff] }
 0x5d1   :  { %1630 = vmatpush1.msra.mxu0 %v2939_v46  ;;  %1701 = vmatpush1.msra.mxu1 %v2945_v3  ;;  %v3746_v46 = vld [vmem:[#allocation19_spill] sm:$0xff]  ;;  %v3747_v3 = vld [vmem:[#allocation20_spill] sm:$0xff] }
 0x5d2   :  { %1631 = vmatprep.subr.mxu0 %v3679_v32  ;;  %1702 = vmatprep.subr.mxu1 %v3680_v33 }
 0x5d3   :  { %1632 = vmatpush1.msra.mxu0 %v2963_v35  ;;  %1703 = vmatpush1.msra.mxu1 %v2969_v12  ;;  %v3750_v12 = vld [vmem:[#allocation45_spill] sm:$0xff] }
 0x5d4   :  { %1633 = vmatprep.subr.mxu0 %v2975_v18  ;;  %1704 = vmatprep.subr.mxu1 %v2981_v15  ;;  %v3748_v18 = vmov 0.0   ;;  %v3749_v15 = vld [vmem:[#allocation21_spill] sm:$0xff] }
 0x5d5   :  { %1634 = vmatpush1.msra.mxu0 %v3064_v34  ;;  %1705 = vmatpush1.msra.mxu1 %v3070_v36 }
 0x5d6   :  { %1635 = vmatprep.subr.mxu0 %v3076_v37  ;;  %1706 = vmatprep.subr.mxu1 %v3082_v38  ;;  %v3751_v37 = vld [vmem:[#allocation47_spill] sm:$0xff] }
 0x5d7   :  { %1636 = vmatpush1.msra.mxu0 %v3088_v39  ;;  %1707 = vmatpush1.msra.mxu1 %v3094_v41  ;;  %v3752_v39 = vld [vmem:[#allocation46_spill] sm:$0xff] }
 0x5d8   :  { %1637 = vmatprep.subr.mxu0 %v3100_v9  ;;  %1708 = vmatprep.subr.mxu1 %v3106_v47 }
 0x5d9   :  { %1638 = vmatpush1.msra.mxu0 %v3112_v48  ;;  %1709 = vmatpush1.msra.mxu1 %v3118_v49  ;;  %v3753_v48 = vld [vmem:[#allocation48_spill] sm:$0xff] }
 0x5da   :  { %1639 = vmatprep.subr.mxu0 %v3124_v50  ;;  %1710 = vmatprep.subr.mxu1 %v3130_v51 }
 0x5db   :  { %1640 = vmatpush1.msra.mxu0 %v3136_v52  ;;  %1711 = vmatpush1.msra.mxu1 %v3142_v54 }
 0x5dc   :  { %1641 = vmatprep.subr.mxu0 %v3148_v55  ;;  %1712 = vmatprep.subr.mxu1 %v3154_v56 }
 0x5dd   :  { %1642 = vmatpush1.msra.mxu0 %v3160_v57  ;;  %1713 = vmatpush1.msra.mxu1 %v3166_v58 }
 0x5de   :  { %1643 = vmatprep.subr.mxu0 %v3172_v59  ;;  %1714 = vmatprep.subr.mxu1 %v3730_v17 }
 0x5df   :  { %1644 = vmatpush1.msra.mxu0 %v3731_v8  ;;  %1715 = vmatpush1.msra.mxu1 %v3732_v7 }
 0x5e0   :  { %1645 = vmatprep.subr.mxu0 %v3733_v44  ;;  %1716 = vmatprep.subr.mxu1 %v3734_v11 }
 0x5e1   :  { %1646 = vmatpush1.msra.mxu0 %v3735_v53  ;;  %1717 = vmatpush1.msra.mxu1 %v3736_v6 }
 0x5e2   :  { %1647 = vmatprep.subr.mxu0 %v3737_v26  ;;  %1718 = vmatprep.subr.mxu1 %v3738_v19 }
 0x5e3   :  { %1648 = vmatpush1.msra.mxu0 %v3739_v4  ;;  %1719 = vmatpush1.msra.mxu1 %v3740_v16 }
 0x5e4   :  { %1649 = vmatprep.subr.mxu0 %v3741_v10  ;;  %1720 = vmatprep.subr.mxu1 %v3742_v5 }
 0x5e5   :  { %1650 = vmatpush1.msra.mxu0 %v3743_v14  ;;  %1721 = vmatpush1.msra.mxu1 %v3744_v13 }
 0x5e6   :  { %1651 = vmatprep.subr.mxu0 %v3745_v45  ;;  %1722 = vmatprep.subr.mxu1 %v3746_v46 }
 0x5e7   :  { %1652 = vmatpush1.msra.mxu0 %v3747_v3  ;;  %1685 = vmatprep.mubr.f32.mxu0 %v3748_v18 }
 0x5e8   :  { %1723 = vmatpush1.msra.mxu1 %v3749_v15  ;;  %1756 = vmatprep.mubr.f32.mxu1 %v3748_v18 }
 0x688   :  { %v1516_v35 = vpop.f32.mrf.mxu0  ;;  %v1587_v33 = vpop.f32.mrf.mxu1 }
 0x689   :  { %v1592_v32 = vadd.f32 %v1516_v35, %v3750_v12  ;;  %v1594_v41 = vadd.f32 %v1587_v33, %v3752_v39 }
 0x68a   :  { %v1518_v34 = vpop.f32.mrf.mxu0  ;;  %v1589_v47 = vpop.f32.mrf.mxu1 }
 0x68b   :  { %v1596_v36 = vmul.f32 0.5, %v1592_v32  ;;  %v1593_v38 = vadd.f32 %v1518_v34, %v3751_v37  ;;  %v1595_v49 = vadd.f32 %v1589_v47, %v3753_v48 }
 0x68d   :  { %1885 = vtanh.f32 %v1596_v36  ;;  %v1600_v9 = vmul.f32 0.5, %v1593_v38  ;;  %v1605_v50 = vmul.f32 0.5, %v1595_v49 }
 0x68f   :  { %1887 = vtanh.f32 %v1600_v9 }
 0x690   :  { %1889 = vtanh.f32 %v1594_v41 }
 0x691   :  { %1891 = vtanh.f32 %v1605_v50 }
 0x69a   :  { %v1886_v51 = vpop.eup %1885 }
 0x69b   :  { %v1598_v52 = vadd.f32 1.0, %v1886_v51 }
 0x69c   :  { %v1888_v54 = vpop.eup %1887 }
 0x69d   :  { %v1599_v55 = vmul.f32 0.5, %v1598_v52  ;;  %v1602_v56 = vadd.f32 1.0, %v1888_v54  ;;  %v1890_v57 = vpop.eup %1889 }
 0x69e   :  { %v1892_v43 = vpop.eup %1891 }
 0x69f   :  { %v1603_v58 = vmul.f32 0.5, %v1602_v56  ;;  %v1610_v59 = vmul.f32 %v1890_v57, %v1599_v55  ;;  %v1607_v25 = vadd.f32 1.0, %v1892_v43 }
 0x6a1   :  { %v1609_v23 = vmul.f32 %v1603_v58, %v3375_v24  ;;  %v1608_v60 = vmul.f32 0.5, %v1607_v25  ;;  %v3756_v24 = vld [vmem:[#allocation50_spill] sm:$0xff] }
 0x6a3   :  { %v1611_v42 = vadd.f32 %v1610_v59, %v1609_v23 }
 0x6a5   :  { %1893 = vtanh.f32 %v1611_v42 }
 0x6b2   :  { %v1894_v62 = vpop.eup %1893 }
 0x6b3   :  { %v1613_v20 = vmul.f32 %v1894_v62, %v1608_v60 }
 0x6b5   :  { %1822 = vst [vmem:[%s3472_s6 + $0x30] sm:$0xff] %v1613_v20  ;;  %1686 = vmatmul.mubr.f32.vlgmr.msra.gmra.mxu0 %v1613_v20  ;;  %1757 = vmatmul.mubr.f32.vlgmr.msra.gmra.mxu1 %v1613_v20 }
 0x775   :  { %v1687_v40 = vpop.f32.mrf.mxu0  ;;  %v1758_v29 = vpop.f32.mrf.mxu1 }
 0x776   :  { %v1763_v30 = vadd.f32 %v1687_v40, %v3754_v1  ;;  %v1765_v63 = vadd.f32 %v1758_v29, %v3756_v24 }
 0x777   :  { %v1689_v31 = vpop.f32.mrf.mxu0  ;;  %v1760_v22 = vpop.f32.mrf.mxu1 }
 0x778   :  { %v1767_v27 = vmul.f32 0.5, %v1763_v30  ;;  %v1764_v21 = vadd.f32 %v1689_v31, %v3755_v28  ;;  %v1766_v61 = vadd.f32 %v1760_v22, %v3757_v2 }
 0x77a   :  { %1895 = vtanh.f32 %v1767_v27  ;;  %v1771_v0 = vmul.f32 0.5, %v1764_v21  ;;  %v1776_v17 = vmul.f32 0.5, %v1766_v61 }
 0x77c   :  { %1897 = vtanh.f32 %v1771_v0 }
 0x77d   :  { %1899 = vtanh.f32 %v1765_v63 }
 0x77e   :  { %1901 = vtanh.f32 %v1776_v17 }
 0x787   :  { %v1896_v8 = vpop.eup %1895 }
 0x788   :  { %v1769_v7 = vadd.f32 1.0, %v1896_v8 }
 0x789   :  { %v1898_v44 = vpop.eup %1897 }
 0x78a   :  { %v1770_v11 = vmul.f32 0.5, %v1769_v7  ;;  %v1773_v53 = vadd.f32 1.0, %v1898_v44  ;;  %v1900_v6 = vpop.eup %1899 }
 0x78b   :  { %v1902_v10 = vpop.eup %1901 }
 0x78c   :  { %v1774_v26 = vmul.f32 0.5, %v1773_v53  ;;  %v1781_v19 = vmul.f32 %v1900_v6, %v1770_v11  ;;  %v1778_v5 = vadd.f32 1.0, %v1902_v10 }
 0x78e   :  { %v1780_v4 = vmul.f32 %v1774_v26, %v1611_v42  ;;  %v1779_v14 = vmul.f32 0.5, %v1778_v5 }
 0x790   :  { %v1782_v16 = vadd.f32 %v1781_v19, %v1780_v4 }
 0x792   :  { %1903 = vtanh.f32 %v1782_v16  ;;  %1788 = vst [vmem:[%s3473_s8] sm:$0xff] %v1782_v16 }
 0x79f   :  { %v1904_v13 = vpop.eup %1903 }
 0x7a0   :  { %v1784_v45 = vmul.f32 %v1904_v13, %v1779_v14 }
 0x7a2   :  { %1823 = vst [vmem:[%s3472_s6 + $0x38] sm:$0xff] %v1784_v45  ;;  %1787 = vst [vmem:[%s3474_s7] sm:$0xff] %v1784_v45 }

// kernel: _lambda_.3
= control target key start
LH: loop header
LB: loop body
LE: loop exit
PB: predicated region body
PF: predicated region fallthrough
CT: control target
= control target key end

     0   :  { %13 = vsyncpa [#allocation5], 0  ;;  %s6369_s0 = inlined_call_operand.vmem [shape: f32[64,32], index: 0, kind: input, shape index: {}]   ;;  %s6370_s1 = inlined_call_operand.vmem [shape: s32[8,1], index: 1, kind: input, shape index: {}]   ;;  %s6371_s2 = inlined_call_operand.vmem [shape: f32[32,1024], index: 2, kind: input, shape index: {}]   ;;  %s6372_s3 = inlined_call_operand.vmem [shape: f32[1,1024], index: 3, kind: input, shape index: {}]   ;;  %s6373_s4 = inlined_call_operand.hbm [shape: f32[128,512], index: 4, kind: input, shape index: {}]   ;;  %s6374_s5 = inlined_call_operand.hbm [shape: f32[128,512], index: 5, kind: input, shape index: {}]   ;;  %s6375_s6 = inlined_call_operand.vmem [shape: f32[2,8,128], index: 6, kind: output, shape index: {0}]   ;;  %s6376_s7 = inlined_call_operand.vmem [shape: f32[2,8,128], index: 7, kind: output, shape index: {1}]  }
   0x1   :  { %14 = vsyncpa [#allocation7], 0  ;;  %s3981_s24 = smov [#allocation4]  }
   0x2   :  { %s28_s25 = sshll.u32 %s3981_s24, 4  ;;  %s29_s25 = int_to_ptr.vmem [resolvable:$true] %s28_s25 }
   0x3   :  { %s3945_s26 = scalar_lea.vmem %s29_s25, 8192  ;;  %p3950_p1 = scmp.lt.s32.totalorder %s29_s25, %s29_s25 }
   0x4   :  { %p3946_p0 = scmp.ne.s32.totalorder %s29_s25, %s3945_s26  ;;  %p3951_p2 = scmp.lt.s32.totalorder %s3945_s26, %s3945_s26 }
   0x6   :  { %p3952_p3 = por %p3951_p2, %p3950_p1 }
   0x8   :  { %p3953_p4 = pnand %p3952_p3, %p3946_p0 }
   0xa   :  { %3956 = shalt.err (!%p3953_p4)
}
   0xb   :  { %s3982_s27 = smov 512   ;;  %s3983_s28 = smov 32  }
   0xc   :  { %34 = dma.hbm_to_vmem [thread:$0]  %s6373_s4, 8192, %s29_s25, [#allocation5], %s3982_s27, %s3982_s27, %s3983_s28  }
   0xd   :  { %s3984_s8 = smov [#allocation6]  }
   0xe   :  { %s40_s9 = sshll.u32 %s3984_s8, 4  ;;  %s41_s9 = int_to_ptr.vmem [resolvable:$true] %s40_s9 }
   0xf   :  { %s3965_s10 = scalar_lea.vmem %s41_s9, 8192  ;;  %p3970_p6 = scmp.lt.s32.totalorder %s41_s9, %s41_s9 }
  0x10   :  { %p3966_p5 = scmp.ne.s32.totalorder %s41_s9, %s3965_s10  ;;  %p3971_p7 = scmp.lt.s32.totalorder %s3965_s10, %s3965_s10 }
  0x12   :  { %p3972_p8 = por %p3971_p7, %p3970_p6 }
  0x14   :  { %p3973_p9 = pnand %p3972_p8, %p3966_p5 }
  0x16   :  { %3976 = shalt.err (!%p3973_p9)
}
  0x17   :  { %46 = dma.hbm_to_vmem [thread:$0]  %s6374_s5, 8192, %s41_s9, [#allocation7], %s3982_s27, %s3982_s27, %s3983_s28  }
  0x18   :  { %3977 = dma.done.wait [#allocation5], 8192  }
  0x19   :  { %3978 = vsyncadd [#allocation5], 4294959104 }
  0x1a   :  { %3979 = dma.done.wait [#allocation7], 8192  }
  0x1b   :  { %3980 = vsyncadd [#allocation7], 4294959104  ;;  %v6379_v0 = vmov 0.0   ;;  %v6377_v1 = vmov 0   ;;  %v86_v2 = vld [vmem:[%s6371_s2 + $0xc8] sm:$0xff]  ;;  %v88_v3 = vld [vmem:[%s6371_s2 + $0xd8] sm:$0xff] }
  0x1c   :  { %224 = vmatprep.mubr.f32.mxu0 %v6379_v0  ;;  %337 = vmatprep.mubr.f32.mxu1 %v6379_v0  ;;  %v85_v4 = vld [vmem:[%s6371_s2 + $0xc0] sm:$0xff]  ;;  %v87_v5 = vld [vmem:[%s6371_s2 + $0xd0] sm:$0xff]  ;;  %v78_v6 = vld [vmem:[%s6371_s2 + $0x88] sm:$0xff]  ;;  %vm135_vm0 = vcmask 261120  }
  0x1d   :  { %3647 = vset.pattern.permute.xlu0 %v6377_v1  ;;  %3648 = vset.pattern.permute.xlu1 %v6377_v1  ;;  %v80_v7 = vld [vmem:[%s6371_s2 + $0x98] sm:$0xff]  ;;  %v77_v8 = vld [vmem:[%s6371_s2 + $0x80] sm:$0xff]  ;;  %v79_v9 = vld [vmem:[%s6371_s2 + $0x90] sm:$0xff] }
  0x1e   :  { %184 = vmatprep.subr.mxu0 %v86_v2  ;;  %297 = vmatprep.subr.mxu1 %v88_v3  ;;  %v70_v10 = vld [vmem:[%s6371_s2 + $0x48] sm:$0xff]  ;;  %v72_v11 = vld [vmem:[%s6371_s2 + $0x58] sm:$0xff]  ;;  %v69_v12 = vld [vmem:[%s6371_s2 + $0x40] sm:$0xff] }
  0x1f   :  { %185 = vmatpush1.msra.mxu0 %v85_v4  ;;  %298 = vmatpush1.msra.mxu1 %v87_v5  ;;  %v71_v13 = vld [vmem:[%s6371_s2 + $0x50] sm:$0xff]  ;;  %v62_v14 = vld [vmem:[%s6371_s2 + $0x8] sm:$0xff]  ;;  %v64_v15 = vld [vmem:[%s6371_s2 + $0x18] sm:$0xff] }
  0x20   :  { %186 = vmatprep.subr.mxu0 %v78_v6  ;;  %299 = vmatprep.subr.mxu1 %v80_v7  ;;  %v61_v16 = vld [vmem:[%s6371_s2] sm:$0xff]  ;;  %v63_v17 = vld [vmem:[%s6371_s2 + $0x10] sm:$0xff]  ;;  %v90_v19 = vld [vmem:[%s6371_s2 + $0xe8] sm:$0xff] }
  0x21   :  { %187 = vmatpush1.msra.mxu0 %v77_v8  ;;  %300 = vmatpush1.msra.mxu1 %v79_v9  ;;  %v4088_v18 = vld [vmem:[%s6369_s0] sm:$0xff]  ;;  %v82_v21 = vld [vmem:[%s6371_s2 + $0xa8] sm:$0xff]  ;;  %v92_v22 = vld [vmem:[%s6371_s2 + $0xf8] sm:$0xff] }
  0x22   :  { %188 = vmatprep.subr.mxu0 %v70_v10  ;;  %301 = vmatprep.subr.mxu1 %v72_v11  ;;  %v89_v20 = vld [vmem:[%s6371_s2 + $0xe0] sm:$0xff]  ;;  %v4110_v23 = vld [vmem:[%s6369_s0 + $0x8] sm:$0xff]  ;;  %v91_v25 = vld [vmem:[%s6371_s2 + $0xf0] sm:$0xff] }
  0x23   :  { %189 = vmatpush1.msra.mxu0 %v69_v12  ;;  %302 = vmatpush1.msra.mxu1 %v71_v13  ;;  %v81_v24 = vld [vmem:[%s6371_s2 + $0xa0] sm:$0xff]  ;;  %v74_v26 = vld [vmem:[%s6371_s2 + $0x68] sm:$0xff]  ;;  %v84_v27 = vld [vmem:[%s6371_s2 + $0xb8] sm:$0xff] }
  0x24   :  { %190 = vmatprep.subr.mxu0 %v62_v14  ;;  %303 = vmatprep.subr.mxu1 %v64_v15  ;;  %v4134_v28 = vld [vmem:[%s6369_s0 + $0x10] sm:$0xff]  ;;  %v73_v29 = vld [vmem:[%s6371_s2 + $0x60] sm:$0xff]  ;;  %v66_v31 = vld [vmem:[%s6371_s2 + $0x28] sm:$0xff] }
  0x25   :  { %191 = vmatpush1.msra.mxu0 %v61_v16  ;;  %304 = vmatpush1.msra.mxu1 %v63_v17  ;;  %v83_v30 = vld [vmem:[%s6371_s2 + $0xb0] sm:$0xff]  ;;  %v76_v32 = vld [vmem:[%s6371_s2 + $0x78] sm:$0xff]  ;;  %v65_v34 = vld [vmem:[%s6371_s2 + $0x20] sm:$0xff] }
  0x26   :  { %3603 = vmatmul.mubr.msk.f32.vlgmr.msra.gmra.mxu0 %vm135_vm0, %v4088_v18  ;;  %3611 = vmatmul.mubr.msk.f32.vlgmr.msra.gmra.mxu1 %vm135_vm0, %v4088_v18  ;;  %v4157_v33 = vld [vmem:[%s6369_s0 + $0x18] sm:$0xff]  ;;  %v75_v35 = vld [vmem:[%s6371_s2 + $0x70] sm:$0xff]  ;;  %v4172_v37 = vld [vmem:[#allocation4 + $0x1e8] sm:$0xff] }
  0x27   :  { %410 = vmatprep.subr.mxu0 %v90_v19  ;;  %230 = vmatprep.mubr.f32.mxu0 %v6379_v0  ;;  %v68_v36 = vld [vmem:[%s6371_s2 + $0x38] sm:$0xff]  ;;  %v4179_v38 = vld [vmem:[%s6369_s0 + $0x20] sm:$0xff]  ;;  %v67_v39 = vld [vmem:[%s6371_s2 + $0x30] sm:$0xff] }
  0x28   :  { %411 = vmatpush1.msra.mxu0 %v89_v20  ;;  %343 = vmatprep.mubr.f32.mxu1 %v6379_v0  ;;  %v4189_v40 = vld [vmem:[#allocation4 + $0x1f8] sm:$0xff]  ;;  %v4196_v41 = vld [vmem:[%s6369_s0 + $0x28] sm:$0xff]  ;;  %v4208_v42 = vld [vmem:[%s6369_s0 + $0x30] sm:$0xff] }
  0x29   :  { %412 = vmatprep.subr.mxu0 %v82_v21  ;;  %523 = vmatprep.subr.mxu1 %v92_v22  ;;  %6592 = vst [vmem:[#allocation10_spill] sm:$0xff] %v4189_v40  ;;  %v4219_v43 = vld [vmem:[%s6369_s0 + $0x38] sm:$0xff]  ;;  %v4224_v44 = vld [vmem:[%s6370_s1] sm:$0xff]  ;;  %v4236_v47 = vld [vmem:[#allocation4 + $0x1f0] sm:$0xff] }
  0x2a   :  { %3604 = vmatmul.mubr.msk.f32.gmra.mxu0 %vm135_vm0, %v4110_v23  ;;  %3612 = vmatmul.mubr.msk.f32.gmra.mxu1 %vm135_vm0, %v4110_v23  ;;  %6593 = vst [vmem:[#allocation11_spill] sm:$0xff] %v4224_v44  ;;  %vm973_vm1 = vcmp.gt.s32.totalorder %v4224_v44, 0  ;;  %v4234_v46 = vld [vmem:[#allocation4 + $0x1e0] sm:$0xff]  ;;  %v4238_v48 = vld [vmem:[#allocation4 + $0x1c8] sm:$0xff]  ;;  %v4240_v49 = vld [vmem:[#allocation4 + $0x1d8] sm:$0xff]  ;;  %vm1150_vm2 = vcmp.gt.s32.totalorder %v4224_v44, 1 }
  0x2b   :  { %236 = vmatprep.mubr.f32.mxu0 %v6379_v0  ;;  %349 = vmatprep.mubr.f32.mxu1 %v6379_v0  ;;  %v974_v45 = vsel %vm973_vm1, 1, %v6377_v1  ;;  %v4248_v50 = vld [vmem:[#allocation4 + $0x1c0] sm:$0xff]  ;;  %v4250_v51 = vld [vmem:[#allocation4 + $0x1d0] sm:$0xff]  ;;  %v4256_v52 = vld [vmem:[#allocation4 + $0x1a8] sm:$0xff]  ;;  %vm1681_vm3 = vcmp.gt.s32.totalorder %v4224_v44, 4  ;;  %vm2035_vm4 = vcmp.gt.s32.totalorder %v4224_v44, 6 }
  0x2c   :  { %413 = vmatpush1.msra.mxu0 %v81_v24  ;;  %524 = vmatpush1.msra.mxu1 %v91_v25  ;;  %v4258_v53 = vld [vmem:[#allocation4 + $0x1b8] sm:$0xff]  ;;  %v4262_v54 = vld [vmem:[#allocation4 + $0x1a0] sm:$0xff]  ;;  %v4264_v55 = vld [vmem:[#allocation4 + $0x1b0] sm:$0xff] }
  0x2d   :  { %414 = vmatprep.subr.mxu0 %v74_v26  ;;  %525 = vmatprep.subr.mxu1 %v84_v27  ;;  %v4270_v56 = vld [vmem:[#allocation4 + $0x188] sm:$0xff]  ;;  %v4272_v57 = vld [vmem:[#allocation4 + $0x198] sm:$0xff]  ;;  %v4278_v58 = vld [vmem:[#allocation4 + $0x180] sm:$0xff] }
  0x2e   :  { %3605 = vmatmul.mubr.msk.f32.gmra.mxu0 %vm135_vm0, %v4134_v28  ;;  %3613 = vmatmul.mubr.msk.f32.gmra.mxu1 %vm135_vm0, %v4134_v28  ;;  %v4280_v59 = vld [vmem:[#allocation4 + $0x190] sm:$0xff]  ;;  %v4286_v60 = vld [vmem:[#allocation4 + $0x168] sm:$0xff]  ;;  %v4288_v61 = vld [vmem:[#allocation4 + $0x178] sm:$0xff] }
  0x2f   :  { %242 = vmatprep.mubr.f32.mxu0 %v6379_v0  ;;  %355 = vmatprep.mubr.f32.mxu1 %v6379_v0  ;;  %v4292_v62 = vld [vmem:[#allocation4 + $0x160] sm:$0xff]  ;;  %v4294_v63 = vld [vmem:[#allocation4 + $0x170] sm:$0xff]  ;;  %v4300_v2 = vld [vmem:[#allocation4 + $0x148] sm:$0xff] }
  0x30   :  { %415 = vmatpush1.msra.mxu0 %v73_v29  ;;  %526 = vmatpush1.msra.mxu1 %v83_v30  ;;  %v4302_v3 = vld [vmem:[#allocation4 + $0x158] sm:$0xff]  ;;  %v4308_v4 = vld [vmem:[#allocation4 + $0x140] sm:$0xff]  ;;  %v4310_v5 = vld [vmem:[#allocation4 + $0x150] sm:$0xff] }
  0x31   :  { %416 = vmatprep.subr.mxu0 %v66_v31  ;;  %527 = vmatprep.subr.mxu1 %v76_v32  ;;  %v4316_v6 = vld [vmem:[#allocation4 + $0x128] sm:$0xff]  ;;  %v4318_v7 = vld [vmem:[#allocation4 + $0x138] sm:$0xff]  ;;  %v4322_v8 = vld [vmem:[#allocation4 + $0x120] sm:$0xff] }
  0x32   :  { %3606 = vmatmul.mubr.msk.f32.gmra.mxu0 %vm135_vm0, %v4157_v33  ;;  %3614 = vmatmul.mubr.msk.f32.gmra.mxu1 %vm135_vm0, %v4157_v33  ;;  %v4324_v9 = vld [vmem:[#allocation4 + $0x130] sm:$0xff]  ;;  %v4330_v10 = vld [vmem:[#allocation4 + $0x108] sm:$0xff]  ;;  %v4332_v11 = vld [vmem:[#allocation4 + $0x118] sm:$0xff] }
  0x33   :  { %248 = vmatprep.mubr.f32.mxu0 %v6379_v0  ;;  %361 = vmatprep.mubr.f32.mxu1 %v6379_v0  ;;  %v4338_v12 = vld [vmem:[#allocation4 + $0x100] sm:$0xff]  ;;  %v4340_v13 = vld [vmem:[#allocation4 + $0x110] sm:$0xff]  ;;  %v4346_v14 = vld [vmem:[#allocation4 + $0xe8] sm:$0xff] }
  0x34   :  { %417 = vmatpush1.msra.mxu0 %v65_v34  ;;  %528 = vmatpush1.msra.mxu1 %v75_v35  ;;  %v4348_v15 = vld [vmem:[#allocation4 + $0xf8] sm:$0xff]  ;;  %v4352_v16 = vld [vmem:[#allocation4 + $0xe0] sm:$0xff]  ;;  %v4354_v17 = vld [vmem:[#allocation4 + $0xf0] sm:$0xff] }
  0x35   :  { %529 = vmatprep.subr.mxu1 %v68_v36  ;;  %809 = vmatprep.subr.mxu0 %v4172_v37  ;;  %v4362_v19 = vld [vmem:[#allocation4 + $0xd8] sm:$0xff]  ;;  %v4368_v20 = vld [vmem:[#allocation4 + $0xc0] sm:$0xff]  ;;  %v4370_v21 = vld [vmem:[#allocation4 + $0xd0] sm:$0xff] }
  0x36   :  { %3607 = vmatmul.mubr.msk.f32.gmra.mxu0 %vm135_vm0, %v4179_v38  ;;  %3615 = vmatmul.mubr.msk.f32.gmra.mxu1 %vm135_vm0, %v4179_v38  ;;  %v4376_v22 = vld [vmem:[#allocation4 + $0xa8] sm:$0xff]  ;;  %v4382_v24 = vld [vmem:[#allocation4 + $0xa0] sm:$0xff]  ;;  %v4384_v25 = vld [vmem:[#allocation4 + $0xb0] sm:$0xff] }
  0x37   :  { %254 = vmatprep.mubr.f32.mxu0 %v6379_v0  ;;  %367 = vmatprep.mubr.f32.mxu1 %v6379_v0  ;;  %6594 = vst [vmem:[#allocation12_spill] sm:$0xff] %v4382_v24  ;;  %6595 = vst [vmem:[#allocation13_spill] sm:$0xff] %v4384_v25  ;;  %v4390_v26 = vld [vmem:[#allocation4 + $0x88] sm:$0xff]  ;;  %v4392_v27 = vld [vmem:[#allocation4 + $0x98] sm:$0xff] }
  0x38   :  { %530 = vmatpush1.msra.mxu1 %v67_v39  ;;  %976 = vperm.xlu0 %3647, %v974_v45   ;;  %6596 = vst [vmem:[#allocation14_spill] sm:$0xff] %v4390_v26  ;;  %6597 = vst [vmem:[#allocation15_spill] sm:$0xff] %v4392_v27  ;;  %v4400_v29 = vld [vmem:[#allocation4 + $0x90] sm:$0xff]  ;;  %v4406_v30 = vld [vmem:[#allocation4 + $0x68] sm:$0xff] }
  0x39   :  { %880 = vmatprep.subr.mxu1 %v4189_v40  ;;  %6599 = vst [vmem:[#allocation17_spill] sm:$0xff] %v4400_v29  ;;  %6600 = vst [vmem:[#allocation18_spill] sm:$0xff] %v4406_v30  ;;  %v4408_v31 = vld [vmem:[#allocation4 + $0x78] sm:$0xff]  ;;  %v4412_v32 = vld [vmem:[#allocation4 + $0x60] sm:$0xff] }
  0x3a   :  { %3608 = vmatmul.mubr.msk.f32.gmra.mxu0 %vm135_vm0, %v4196_v41  ;;  %3616 = vmatmul.mubr.msk.f32.gmra.mxu1 %vm135_vm0, %v4196_v41  ;;  %6601 = vst [vmem:[#allocation19_spill] sm:$0xff] %v4408_v31  ;;  %6602 = vst [vmem:[#allocation20_spill] sm:$0xff] %v4412_v32  ;;  %v4420_v34 = vld [vmem:[#allocation4 + $0x48] sm:$0xff]  ;;  %v4422_v35 = vld [vmem:[#allocation4 + $0x58] sm:$0xff] }
  0x3b   :  { %260 = vmatprep.mubr.f32.mxu0 %v6379_v0  ;;  %373 = vmatprep.mubr.f32.mxu1 %v6379_v0  ;;  %6604 = vst [vmem:[#allocation22_spill] sm:$0xff] %v4420_v34  ;;  %6605 = vst [vmem:[#allocation23_spill] sm:$0xff] %v4422_v35  ;;  %v4428_v36 = vld [vmem:[#allocation4 + $0x40] sm:$0xff]  ;;  %v4436_v39 = vld [vmem:[#allocation4 + $0x28] sm:$0xff] }
  0x3c   :  { %6606 = vst [vmem:[#allocation24_spill] sm:$0xff] %v4428_v36  ;;  %6608 = vst [vmem:[#allocation26_spill] sm:$0xff] %v4436_v39  ;;  %v4444_v45 = vld [vmem:[#allocation4 + $0x30] sm:$0xff]  ;;  %v4450_v1 = vld [vmem:[#allocation4 + $0x8] sm:$0xff] }
  0x3d   :  { %6611 = vst [vmem:[#allocation29_spill] sm:$0xff] %v4444_v45  ;;  %6612 = vst [vmem:[#allocation30_spill] sm:$0xff] %v4450_v1 }
  0x3e   :  { %3609 = vmatmul.mubr.msk.f32.gmra.mxu0 %vm135_vm0, %v4208_v42  ;;  %3617 = vmatmul.mubr.msk.f32.gmra.mxu1 %vm135_vm0, %v4208_v42 }
  0x3f   :  { %266 = vmatprep.mubr.f32.mxu0 %v6379_v0  ;;  %379 = vmatprep.mubr.f32.mxu1 %v6379_v0 }
  0x42   :  { %3610 = vmatmul.mubr.msk.f32.gmra.mxu0 %vm135_vm0, %v4219_v43  ;;  %3618 = vmatmul.mubr.msk.f32.gmra.mxu1 %vm135_vm0, %v4219_v43 }
  0x43   :  { %450 = vmatprep.mubr.f32.mxu0 %v6379_v0  ;;  %563 = vmatprep.mubr.f32.mxu1 %v6379_v0 }
  0x46   :  { %3619 = vmatmul.mubr.msk.f32.vlgmr.msra.gmra.mxu0 %vm135_vm0, %v4088_v18  ;;  %3627 = vmatmul.mubr.msk.f32.vlgmr.msra.gmra.mxu1 %vm135_vm0, %v4088_v18  ;;  %v4360_v18 = vld [vmem:[#allocation4 + $0xc8] sm:$0xff] }
  0x47   :  { %810 = vmatpush1.msra.mxu0 %v4234_v46  ;;  %881 = vmatpush1.msra.mxu1 %v4236_v47 }
  0x48   :  { %811 = vmatprep.subr.mxu0 %v4238_v48  ;;  %882 = vmatprep.subr.mxu1 %v4240_v49 }
  0x49   :  { %456 = vmatprep.mubr.f32.mxu0 %v6379_v0  ;;  %569 = vmatprep.mubr.f32.mxu1 %v6379_v0 }
  0x4a   :  { %812 = vmatpush1.msra.mxu0 %v4248_v50  ;;  %883 = vmatpush1.msra.mxu1 %v4250_v51 }
  0x4b   :  { %3620 = vmatmul.mubr.msk.f32.gmra.mxu0 %vm135_vm0, %v4110_v23  ;;  %3628 = vmatmul.mubr.msk.f32.gmra.mxu1 %vm135_vm0, %v4110_v23  ;;  %v4378_v23 = vld [vmem:[#allocation4 + $0xb8] sm:$0xff] }
  0x4c   :  { %813 = vmatprep.subr.mxu0 %v4256_v52  ;;  %884 = vmatprep.subr.mxu1 %v4258_v53 }
  0x4d   :  { %814 = vmatpush1.msra.mxu0 %v4262_v54  ;;  %885 = vmatpush1.msra.mxu1 %v4264_v55 }
  0x4e   :  { %815 = vmatprep.subr.mxu0 %v4270_v56  ;;  %886 = vmatprep.subr.mxu1 %v4272_v57 }
  0x4f   :  { %462 = vmatprep.mubr.f32.mxu0 %v6379_v0  ;;  %575 = vmatprep.mubr.f32.mxu1 %v6379_v0 }
  0x50   :  { %816 = vmatpush1.msra.mxu0 %v4278_v58  ;;  %887 = vmatpush1.msra.mxu1 %v4280_v59 }
  0x51   :  { %3621 = vmatmul.mubr.msk.f32.gmra.mxu0 %vm135_vm0, %v4134_v28  ;;  %3629 = vmatmul.mubr.msk.f32.gmra.mxu1 %vm135_vm0, %v4134_v28  ;;  %v4398_v28 = vld [vmem:[#allocation4 + $0x80] sm:$0xff] }
  0x52   :  { %817 = vmatprep.subr.mxu0 %v4286_v60  ;;  %888 = vmatprep.subr.mxu1 %v4288_v61  ;;  %6598 = vst [vmem:[#allocation16_spill] sm:$0xff] %v4398_v28 }
  0x53   :  { %818 = vmatpush1.msra.mxu0 %v4292_v62  ;;  %889 = vmatpush1.msra.mxu1 %v4294_v63 }
  0x54   :  { %819 = vmatprep.subr.mxu0 %v4300_v2  ;;  %890 = vmatprep.subr.mxu1 %v4302_v3 }
  0x55   :  { %468 = vmatprep.mubr.f32.mxu0 %v6379_v0  ;;  %581 = vmatprep.mubr.f32.mxu1 %v6379_v0 }
  0x56   :  { %820 = vmatpush1.msra.mxu0 %v4308_v4  ;;  %891 = vmatpush1.msra.mxu1 %v4310_v5 }
  0x57   :  { %3622 = vmatmul.mubr.msk.f32.gmra.mxu0 %vm135_vm0, %v4157_v33  ;;  %3630 = vmatmul.mubr.msk.f32.gmra.mxu1 %vm135_vm0, %v4157_v33  ;;  %v4414_v33 = vld [vmem:[#allocation4 + $0x70] sm:$0xff] }
  0x58   :  { %821 = vmatprep.subr.mxu0 %v4316_v6  ;;  %892 = vmatprep.subr.mxu1 %v4318_v7  ;;  %6603 = vst [vmem:[#allocation21_spill] sm:$0xff] %v4414_v33 }
  0x59   :  { %822 = vmatpush1.msra.mxu0 %v4322_v8  ;;  %893 = vmatpush1.msra.mxu1 %v4324_v9 }
  0x5a   :  { %823 = vmatprep.subr.mxu0 %v4330_v10  ;;  %894 = vmatprep.subr.mxu1 %v4332_v11 }
  0x5b   :  { %474 = vmatprep.mubr.f32.mxu0 %v6379_v0  ;;  %587 = vmatprep.mubr.f32.mxu1 %v6379_v0 }
  0x5c   :  { %824 = vmatpush1.msra.mxu0 %v4338_v12  ;;  %895 = vmatpush1.msra.mxu1 %v4340_v13 }
  0x5d   :  { %3623 = vmatmul.mubr.msk.f32.gmra.mxu0 %vm135_vm0, %v4179_v38  ;;  %3631 = vmatmul.mubr.msk.f32.gmra.mxu1 %vm135_vm0, %v4179_v38  ;;  %v4430_v38 = vld [vmem:[#allocation4 + $0x50] sm:$0xff] }
  0x5e   :  { %825 = vmatprep.subr.mxu0 %v4346_v14  ;;  %896 = vmatprep.subr.mxu1 %v4348_v15  ;;  %6607 = vst [vmem:[#allocation25_spill] sm:$0xff] %v4430_v38 }
  0x5f   :  { %826 = vmatpush1.msra.mxu0 %v4352_v16  ;;  %897 = vmatpush1.msra.mxu1 %v4354_v17 }
  0x60   :  { %827 = vmatprep.subr.mxu0 %v4360_v18  ;;  %898 = vmatprep.subr.mxu1 %v4362_v19 }
  0x61   :  { %480 = vmatprep.mubr.f32.mxu0 %v6379_v0  ;;  %593 = vmatprep.mubr.f32.mxu1 %v6379_v0 }
  0x62   :  { %828 = vmatpush1.msra.mxu0 %v4368_v20  ;;  %899 = vmatpush1.msra.mxu1 %v4370_v21 }
  0x63   :  { %3624 = vmatmul.mubr.msk.f32.gmra.mxu0 %vm135_vm0, %v4196_v41  ;;  %3632 = vmatmul.mubr.msk.f32.gmra.mxu1 %vm135_vm0, %v4196_v41  ;;  %v4438_v41 = vld [vmem:[#allocation4 + $0x38] sm:$0xff] }
  0x64   :  { %829 = vmatprep.subr.mxu0 %v4376_v22  ;;  %900 = vmatprep.subr.mxu1 %v4378_v23  ;;  %6609 = vst [vmem:[#allocation27_spill] sm:$0xff] %v4438_v41 }
  0x65   :  { %830 = vmatpush1.msra.mxu0 %v4382_v24  ;;  %901 = vmatpush1.msra.mxu1 %v4384_v25 }
  0x66   :  { %831 = vmatprep.subr.mxu0 %v4390_v26  ;;  %902 = vmatprep.subr.mxu1 %v4392_v27 }
  0x67   :  { %486 = vmatprep.mubr.f32.mxu0 %v6379_v0  ;;  %599 = vmatprep.mubr.f32.mxu1 %v6379_v0 }
  0x68   :  { %832 = vmatpush1.msra.mxu0 %v4398_v28  ;;  %903 = vmatpush1.msra.mxu1 %v4400_v29 }
  0x69   :  { %3625 = vmatmul.mubr.msk.f32.gmra.mxu0 %vm135_vm0, %v4208_v42  ;;  %3633 = vmatmul.mubr.msk.f32.gmra.mxu1 %vm135_vm0, %v4208_v42  ;;  %v4442_v42 = vld [vmem:[#allocation4 + $0x20] sm:$0xff] }
  0x6a   :  { %833 = vmatprep.subr.mxu0 %v4406_v30  ;;  %904 = vmatprep.subr.mxu1 %v4408_v31  ;;  %6610 = vst [vmem:[#allocation28_spill] sm:$0xff] %v4442_v42 }
  0x6b   :  { %834 = vmatpush1.msra.mxu0 %v4412_v32  ;;  %905 = vmatpush1.msra.mxu1 %v4414_v33  ;;  %v6621_v44 = vld [vmem:[#allocation27_spill] sm:$0xff] }
  0x6c   :  { %835 = vmatprep.subr.mxu0 %v4420_v34  ;;  %906 = vmatprep.subr.mxu1 %v4422_v35 }
  0x6d   :  { %492 = vmatprep.mubr.f32.mxu0 %v6379_v0  ;;  %605 = vmatprep.mubr.f32.mxu1 %v6379_v0  ;;  %v4452_v0 = vld [vmem:[#allocation4 + $0x18] sm:$0xff] }
  0x6e   :  { %836 = vmatpush1.msra.mxu0 %v4428_v36  ;;  %907 = vmatpush1.msra.mxu1 %v4430_v38  ;;  %6613 = vst [vmem:[#allocation31_spill] sm:$0xff] %v4452_v0  ;;  %v4456_v36 = vld [vmem:[#allocation4] sm:$0xff]  ;;  %v4461_v38 = vld [vmem:[#allocation4 + $0x10] sm:$0xff] }
  0x6f   :  { %3626 = vmatmul.mubr.msk.f32.gmra.mxu0 %vm135_vm0, %v4219_v43  ;;  %3634 = vmatmul.mubr.msk.f32.gmra.mxu1 %vm135_vm0, %v4219_v43  ;;  %6614 = vst [vmem:[#allocation32_spill] sm:$0xff] %v4456_v36  ;;  %6615 = vst [vmem:[#allocation33_spill] sm:$0xff] %v4461_v38  ;;  %v6616_v43 = vmov 0.0  }
  0x70   :  { %837 = vmatprep.subr.mxu0 %v4436_v39  ;;  %908 = vmatprep.subr.mxu1 %v4438_v41  ;;  %v6617_v39 = vmov 0  }
  0x71   :  { %838 = vmatpush1.msra.mxu0 %v4442_v42  ;;  %909 = vmatpush1.msra.mxu1 %v4444_v45  ;;  %v1151_v41 = vsel %vm1150_vm2, 1, %v6617_v39 }
  0x72   :  { %839 = vmatprep.subr.mxu0 %v4450_v1  ;;  %910 = vmatprep.subr.mxu1 %v4452_v0  ;;  %v1682_v0 = vsel %vm1681_vm3, 1, %v6617_v39 }
  0x73   :  { %840 = vmatpush1.msra.mxu0 %v4456_v36  ;;  %873 = vmatprep.mubr.f32.mxu0 %v6616_v43 }
  0x74   :  { %911 = vmatpush1.msra.mxu1 %v4461_v38  ;;  %944 = vmatprep.mubr.f32.mxu1 %v6616_v43 }
  0x75   :  { %874 = vmatmul.mubr.f32.vlgmr.msra.gmra.mxu0 %v6616_v43  ;;  %945 = vmatmul.mubr.f32.vlgmr.msra.gmra.mxu1 %v6616_v43 }
  0x76   :  { %1153 = vperm.xlu0 %3647, %v1151_v41   ;;  %986 = vmatprep.subr.mxu0 %v4172_v37  ;;  %v2036_v41 = vsel %vm2035_vm4, 1, %v6617_v39  ;;  %v6620_v39 = vld [vmem:[#allocation26_spill] sm:$0xff] }
  0x77   :  { %1057 = vmatprep.subr.mxu1 %v4189_v40  ;;  %987 = vmatpush1.msra.mxu0 %v4234_v46 }
  0x78   :  { %1058 = vmatpush1.msra.mxu1 %v4236_v47  ;;  %988 = vmatprep.subr.mxu0 %v4238_v48 }
  0x79   :  { %1059 = vmatprep.subr.mxu1 %v4240_v49  ;;  %989 = vmatpush1.msra.mxu0 %v4248_v50 }
  0x7a   :  { %1684 = vperm.xlu0 %3647, %v1682_v0   ;;  %1060 = vmatpush1.msra.mxu1 %v4250_v51  ;;  %v6618_v0 = vld [vmem:[#allocation24_spill] sm:$0xff] }
  0x7b   :  { %990 = vmatprep.subr.mxu0 %v4256_v52  ;;  %1061 = vmatprep.subr.mxu1 %v4258_v53 }
  0x7c   :  { %991 = vmatpush1.msra.mxu0 %v4262_v54  ;;  %1062 = vmatpush1.msra.mxu1 %v4264_v55 }
  0x7d   :  { %992 = vmatprep.subr.mxu0 %v4270_v56  ;;  %1063 = vmatprep.subr.mxu1 %v4272_v57 }
  0x7e   :  { %2038 = vperm.xlu0 %3647, %v2036_v41   ;;  %993 = vmatpush1.msra.mxu0 %v4278_v58  ;;  %v6619_v41 = vld [vmem:[#allocation25_spill] sm:$0xff] }
  0x7f   :  { %1064 = vmatpush1.msra.mxu1 %v4280_v59  ;;  %994 = vmatprep.subr.mxu0 %v4286_v60 }
  0x80   :  { %1065 = vmatprep.subr.mxu1 %v4288_v61  ;;  %995 = vmatpush1.msra.mxu0 %v4292_v62 }
  0x81   :  { %1066 = vmatpush1.msra.mxu1 %v4294_v63  ;;  %996 = vmatprep.subr.mxu0 %v4300_v2 }
  0x82   :  { %1067 = vmatprep.subr.mxu1 %v4302_v3  ;;  %997 = vmatpush1.msra.mxu0 %v4308_v4 }
  0x83   :  { %1068 = vmatpush1.msra.mxu1 %v4310_v5  ;;  %998 = vmatprep.subr.mxu0 %v4316_v6 }
  0x84   :  { %1069 = vmatprep.subr.mxu1 %v4318_v7  ;;  %999 = vmatpush1.msra.mxu0 %v4322_v8 }
  0x85   :  { %1070 = vmatpush1.msra.mxu1 %v4324_v9  ;;  %1000 = vmatprep.subr.mxu0 %v4330_v10 }
  0x86   :  { %1071 = vmatprep.subr.mxu1 %v4332_v11  ;;  %1001 = vmatpush1.msra.mxu0 %v4338_v12 }
  0x87   :  { %1072 = vmatpush1.msra.mxu1 %v4340_v13  ;;  %1002 = vmatprep.subr.mxu0 %v4346_v14 }
  0x88   :  { %1073 = vmatprep.subr.mxu1 %v4348_v15  ;;  %1003 = vmatpush1.msra.mxu0 %v4352_v16 }
  0x89   :  { %1074 = vmatpush1.msra.mxu1 %v4354_v17  ;;  %1004 = vmatprep.subr.mxu0 %v4360_v18 }
  0x8a   :  { %1075 = vmatprep.subr.mxu1 %v4362_v19  ;;  %1005 = vmatpush1.msra.mxu0 %v4368_v20 }
  0x8b   :  { %1076 = vmatpush1.msra.mxu1 %v4370_v21  ;;  %1006 = vmatprep.subr.mxu0 %v4376_v22 }
  0x8c   :  { %1077 = vmatprep.subr.mxu1 %v4378_v23  ;;  %1007 = vmatpush1.msra.mxu0 %v4382_v24 }
  0x8d   :  { %1078 = vmatpush1.msra.mxu1 %v4384_v25  ;;  %1008 = vmatprep.subr.mxu0 %v4390_v26 }
  0x8e   :  { %1079 = vmatprep.subr.mxu1 %v4392_v27  ;;  %1009 = vmatpush1.msra.mxu0 %v4398_v28 }
  0x8f   :  { %1080 = vmatpush1.msra.mxu1 %v4400_v29  ;;  %1010 = vmatprep.subr.mxu0 %v4406_v30 }
  0x90   :  { %1081 = vmatprep.subr.mxu1 %v4408_v31  ;;  %1011 = vmatpush1.msra.mxu0 %v4412_v32  ;;  %v6622_v32 = vld [vmem:[#allocation31_spill] sm:$0xff] }
  0x91   :  { %1082 = vmatpush1.msra.mxu1 %v4414_v33  ;;  %1012 = vmatprep.subr.mxu0 %v4420_v34 }
  0x92   :  { %1083 = vmatprep.subr.mxu1 %v4422_v35  ;;  %1013 = vmatpush1.msra.mxu0 %v6618_v0 }
  0x93   :  { %1084 = vmatpush1.msra.mxu1 %v6619_v41  ;;  %1014 = vmatprep.subr.mxu0 %v6620_v39 }
  0x94   :  { %1085 = vmatprep.subr.mxu1 %v6621_v44  ;;  %1015 = vmatpush1.msra.mxu0 %v4442_v42  ;;  %v95_v44 = vlaneseq }
  0x95   :  { %1086 = vmatpush1.msra.mxu1 %v4444_v45  ;;  %1016 = vmatprep.subr.mxu0 %v4450_v1 }
  0x96   :  { %1087 = vmatprep.subr.mxu1 %v6622_v32  ;;  %1017 = vmatpush1.msra.mxu0 %v4456_v36  ;;  %v4544_v42 = vshrl.u32 %v95_v44, 7  ;;  %v4551_v36 = vld [vmem:[%s6372_s3] sm:$0xff] }
  0x97   :  { %1050 = vmatprep.mubr.f32.mxu0 %v6616_v43  ;;  %1088 = vmatpush1.msra.mxu1 %v4461_v38 }
  0x98   :  { %1121 = vmatprep.mubr.f32.mxu1 %v6616_v43  ;;  %1163 = vmatprep.subr.mxu0 %v4172_v37  ;;  %v97_v45 = vsub.s32 0, %v4544_v42  ;;  %v105_v1 = vsub.s32 2, %v4544_v42  ;;  %v101_v37 = vsub.s32 1, %v4544_v42 }
  0x99   :  { %1234 = vmatprep.subr.mxu1 %v4189_v40  ;;  %v109_v40 = vsub.s32 3, %v4544_v42 }
  0x9a   :  { %v4564_v39 = vrot.slane %v4551_v36, %v97_v45  ;;  %v4567_v41 = vrot.slane %v4551_v36, %v105_v1  ;;  %v4570_v34 = vrot.slane %v4551_v36, %v101_v37 }
  0x9b   :  { %v4573_v33 = vrot.slane %v4551_v36, %v109_v40 }
  0xe6   :  { %v4553_v32 = vpop.f32.mrf.mxu0  ;;  %v4555_v38 = vpop.f32.mrf.mxu1 }
  0xe8   :  { %v4559_v43 = vpop.f32.mrf.mxu0  ;;  %v4561_v44 = vpop.f32.mrf.mxu1 }
  0xea   :  { %v232_v0 = vpop.f32.mrf.mxu0  ;;  %v345_v35 = vpop.f32.mrf.mxu1 }
  0xeb   :  { %v4576_v31 = vadd.f32 %v232_v0, %v4564_v39  ;;  %v4579_v30 = vadd.f32 %v345_v35, %v4567_v41 }
  0xec   :  { %v234_v29 = vpop.f32.mrf.mxu0  ;;  %v347_v45 = vpop.f32.mrf.mxu1 }
  0xed   :  { %6623 = vst [vmem:[#allocation34_spill] sm:$0xff] %v4576_v31  ;;  %6624 = vst [vmem:[#allocation35_spill] sm:$0xff] %v4579_v30  ;;  %v4582_v28 = vadd.f32 %v234_v29, %v4570_v34  ;;  %v4585_v1 = vadd.f32 %v347_v45, %v4573_v33 }
  0xee   :  { %v238_v27 = vpop.f32.mrf.mxu0  ;;  %v351_v37 = vpop.f32.mrf.mxu1 }
  0xef   :  { %6625 = vst [vmem:[#allocation36_spill] sm:$0xff] %v4582_v28  ;;  %6626 = vst [vmem:[#allocation37_spill] sm:$0xff] %v4585_v1  ;;  %v4588_v26 = vadd.f32 %v238_v27, %v4564_v39  ;;  %v4591_v40 = vadd.f32 %v351_v37, %v4567_v41 }
  0xf0   :  { %v240_v0 = vpop.f32.mrf.mxu0  ;;  %v353_v31 = vpop.f32.mrf.mxu1 }
  0xf1   :  { %6627 = vst [vmem:[#allocation38_spill] sm:$0xff] %v4588_v26  ;;  %6628 = vst [vmem:[#allocation39_spill] sm:$0xff] %v4591_v40  ;;  %v4594_v35 = vadd.f32 %v240_v0, %v4570_v34  ;;  %v4597_v30 = vadd.f32 %v353_v31, %v4573_v33 }
  0xf2   :  { %v244_v29 = vpop.f32.mrf.mxu0  ;;  %v357_v28 = vpop.f32.mrf.mxu1 }
  0xf3   :  { %6629 = vst [vmem:[#allocation40_spill] sm:$0xff] %v4594_v35  ;;  %6630 = vst [vmem:[#allocation41_spill] sm:$0xff] %v4597_v30  ;;  %v4600_v45 = vadd.f32 %v244_v29, %v4564_v39  ;;  %v4603_v1 = vadd.f32 %v357_v28, %v4567_v41 }
  0xf4   :  { %v246_v27 = vpop.f32.mrf.mxu0  ;;  %v359_v26 = vpop.f32.mrf.mxu1 }
  0xf5   :  { %6631 = vst [vmem:[#allocation42_spill] sm:$0xff] %v4600_v45  ;;  %6632 = vst [vmem:[#allocation43_spill] sm:$0xff] %v4603_v1  ;;  %v4606_v37 = vadd.f32 %v246_v27, %v4570_v34  ;;  %v4609_v40 = vadd.f32 %v359_v26, %v4573_v33 }
  0xf6   :  { %v250_v0 = vpop.f32.mrf.mxu0  ;;  %v363_v35 = vpop.f32.mrf.mxu1 }
  0xf7   :  { %6633 = vst [vmem:[#allocation44_spill] sm:$0xff] %v4606_v37  ;;  %6634 = vst [vmem:[#allocation45_spill] sm:$0xff] %v4609_v40  ;;  %v4612_v31 = vadd.f32 %v250_v0, %v4564_v39  ;;  %v4615_v30 = vadd.f32 %v363_v35, %v4567_v41 }
  0xf8   :  { %v252_v29 = vpop.f32.mrf.mxu0  ;;  %v365_v45 = vpop.f32.mrf.mxu1 }
  0xf9   :  { %6635 = vst [vmem:[#allocation46_spill] sm:$0xff] %v4612_v31  ;;  %6636 = vst [vmem:[#allocation47_spill] sm:$0xff] %v4615_v30  ;;  %v4618_v28 = vadd.f32 %v252_v29, %v4570_v34  ;;  %v4621_v1 = vadd.f32 %v365_v45, %v4573_v33 }
  0xfa   :  { %v256_v27 = vpop.f32.mrf.mxu0  ;;  %v369_v37 = vpop.f32.mrf.mxu1 }
  0xfb   :  { %6637 = vst [vmem:[#allocation48_spill] sm:$0xff] %v4618_v28  ;;  %6638 = vst [vmem:[#allocation49_spill] sm:$0xff] %v4621_v1  ;;  %v4624_v26 = vadd.f32 %v256_v27, %v4564_v39  ;;  %v4627_v40 = vadd.f32 %v369_v37, %v4567_v41  ;;  %v113_v27 = vsub.s32 4, %v4544_v42  ;;  %v121_v37 = vsub.s32 6, %v4544_v42 }
  0xfc   :  { %v258_v0 = vpop.f32.mrf.mxu0  ;;  %v371_v31 = vpop.f32.mrf.mxu1 }
  0xfd   :  { %6639 = vst [vmem:[#allocation50_spill] sm:$0xff] %v4624_v26  ;;  %6640 = vst [vmem:[#allocation51_spill] sm:$0xff] %v4627_v40  ;;  %v4630_v35 = vadd.f32 %v258_v0, %v4570_v34  ;;  %v4633_v30 = vadd.f32 %v371_v31, %v4573_v33  ;;  %v4658_v25 = vrot.slane %v4551_v36, %v113_v27 }
  0xfe   :  { %v262_v29 = vpop.f32.mrf.mxu0  ;;  %v375_v28 = vpop.f32.mrf.mxu1 }
  0xff   :  { %6641 = vst [vmem:[#allocation52_spill] sm:$0xff] %v4630_v35  ;;  %6642 = vst [vmem:[#allocation53_spill] sm:$0xff] %v4633_v30  ;;  %v4636_v45 = vadd.f32 %v262_v29, %v4564_v39  ;;  %v4639_v1 = vadd.f32 %v375_v28, %v4567_v41  ;;  %v117_v30 = vsub.s32 5, %v4544_v42  ;;  %v125_v29 = vsub.s32 7, %v4544_v42 }
 0x100   :  { %v264_v40 = vpop.f32.mrf.mxu0  ;;  %v377_v26 = vpop.f32.mrf.mxu1  ;;  %6649 = vst [vmem:[#allocation60_spill] sm:$0xff] %v4658_v25 }
 0x101   :  { %6643 = vst [vmem:[#allocation54_spill] sm:$0xff] %v4636_v45  ;;  %6644 = vst [vmem:[#allocation55_spill] sm:$0xff] %v4639_v1  ;;  %v4644_v0 = vadd.f32 %v264_v40, %v4570_v34  ;;  %v4647_v31 = vadd.f32 %v377_v26, %v4573_v33  ;;  %v4661_v40 = vrot.slane %v4551_v36, %v121_v37 }
 0x102   :  { %v268_v45 = vpop.f32.mrf.mxu0  ;;  %v381_v35 = vpop.f32.mrf.mxu1 }
 0x103   :  { %6645 = vst [vmem:[#allocation56_spill] sm:$0xff] %v4644_v0  ;;  %6646 = vst [vmem:[#allocation57_spill] sm:$0xff] %v4647_v31  ;;  %v4652_v28 = vadd.f32 %v268_v45, %v4564_v39  ;;  %v4655_v1 = vadd.f32 %v381_v35, %v4567_v41  ;;  %v4670_v45 = vrot.slane %v4551_v36, %v117_v30 }
 0x104   :  { %6650 = vst [vmem:[#allocation61_spill] sm:$0xff] %v4661_v40  ;;  %v270_v26 = vpop.f32.mrf.mxu0  ;;  %v383_v31 = vpop.f32.mrf.mxu1  ;;  %v4673_v35 = vrot.slane %v4551_v36, %v125_v29 }
 0x105   :  { %6647 = vst [vmem:[#allocation58_spill] sm:$0xff] %v4652_v28  ;;  %6648 = vst [vmem:[#allocation59_spill] sm:$0xff] %v4655_v1  ;;  %v4664_v0 = vadd.f32 %v270_v26, %v4570_v34  ;;  %v4667_v42 = vadd.f32 %v383_v31, %v4573_v33 }
 0x106   :  { %6653 = vst [vmem:[#allocation64_spill] sm:$0xff] %v4670_v45  ;;  %6654 = vst [vmem:[#allocation65_spill] sm:$0xff] %v4673_v35  ;;  %v452_v1 = vpop.f32.mrf.mxu0  ;;  %v565_v27 = vpop.f32.mrf.mxu1 }
 0x107   :  { %6651 = vst [vmem:[#allocation62_spill] sm:$0xff] %v4664_v0  ;;  %6652 = vst [vmem:[#allocation63_spill] sm:$0xff] %v4667_v42  ;;  %v4676_v28 = vadd.f32 %v452_v1, %v4658_v25  ;;  %v4679_v37 = vadd.f32 %v565_v27, %v4661_v40 }
 0x108   :  { %v454_v24 = vpop.f32.mrf.mxu0  ;;  %v567_v26 = vpop.f32.mrf.mxu1 }
 0x109   :  { %6655 = vst [vmem:[#allocation66_spill] sm:$0xff] %v4676_v28  ;;  %6656 = vst [vmem:[#allocation67_spill] sm:$0xff] %v4679_v37  ;;  %v4682_v0 = vadd.f32 %v454_v24, %v4670_v45  ;;  %v4685_v31 = vadd.f32 %v567_v26, %v4673_v35 }
 0x10b   :  { %6657 = vst [vmem:[#allocation68_spill] sm:$0xff] %v4682_v0  ;;  %6658 = vst [vmem:[#allocation69_spill] sm:$0xff] %v4685_v31  ;;  %v458_v30 = vpop.f32.mrf.mxu0  ;;  %v571_v42 = vpop.f32.mrf.mxu1 }
 0x10c   :  { %v4688_v36 = vadd.f32 %v458_v30, %v4658_v25  ;;  %v4691_v29 = vadd.f32 %v571_v42, %v4661_v40 }
 0x10d   :  { %v460_v1 = vpop.f32.mrf.mxu0  ;;  %v573_v28 = vpop.f32.mrf.mxu1 }
 0x10e   :  { %6659 = vst [vmem:[#allocation70_spill] sm:$0xff] %v4688_v36  ;;  %6660 = vst [vmem:[#allocation71_spill] sm:$0xff] %v4691_v29  ;;  %v4694_v27 = vadd.f32 %v460_v1, %v4670_v45  ;;  %v4697_v37 = vadd.f32 %v573_v28, %v4673_v35 }
 0x110   :  { %6661 = vst [vmem:[#allocation72_spill] sm:$0xff] %v4694_v27  ;;  %6662 = vst [vmem:[#allocation73_spill] sm:$0xff] %v4697_v37 }
 0x111   :  { %v464_v24 = vpop.f32.mrf.mxu0  ;;  %v577_v0 = vpop.f32.mrf.mxu1 }
 0x112   :  { %v4700_v26 = vadd.f32 %v464_v24, %v4658_v25  ;;  %v4703_v31 = vadd.f32 %v577_v0, %v4661_v40 }
 0x113   :  { %v466_v30 = vpop.f32.mrf.mxu0  ;;  %v579_v36 = vpop.f32.mrf.mxu1 }
 0x114   :  { %6663 = vst [vmem:[#allocation74_spill] sm:$0xff] %v4700_v26  ;;  %6664 = vst [vmem:[#allocation75_spill] sm:$0xff] %v4703_v31  ;;  %v4706_v42 = vadd.f32 %v466_v30, %v4670_v45  ;;  %v4709_v29 = vadd.f32 %v579_v36, %v4673_v35 }
 0x116   :  { %6665 = vst [vmem:[#allocation76_spill] sm:$0xff] %v4706_v42  ;;  %6666 = vst [vmem:[#allocation77_spill] sm:$0xff] %v4709_v29 }
 0x117   :  { %v470_v1 = vpop.f32.mrf.mxu0  ;;  %v583_v27 = vpop.f32.mrf.mxu1 }
 0x118   :  { %v4712_v28 = vadd.f32 %v470_v1, %v4658_v25  ;;  %v4715_v37 = vadd.f32 %v583_v27, %v4661_v40 }
 0x119   :  { %v472_v24 = vpop.f32.mrf.mxu0  ;;  %v585_v26 = vpop.f32.mrf.mxu1 }
 0x11a   :  { %6667 = vst [vmem:[#allocation78_spill] sm:$0xff] %v4712_v28  ;;  %6668 = vst [vmem:[#allocation79_spill] sm:$0xff] %v4715_v37  ;;  %v4718_v0 = vadd.f32 %v472_v24, %v4670_v45  ;;  %v4721_v31 = vadd.f32 %v585_v26, %v4673_v35 }
 0x11c   :  { %6669 = vst [vmem:[#allocation80_spill] sm:$0xff] %v4718_v0  ;;  %6670 = vst [vmem:[#allocation81_spill] sm:$0xff] %v4721_v31 }
 0x11d   :  { %v476_v30 = vpop.f32.mrf.mxu0  ;;  %v589_v42 = vpop.f32.mrf.mxu1 }
 0x11e   :  { %v4724_v36 = vadd.f32 %v476_v30, %v4658_v25  ;;  %v4727_v29 = vadd.f32 %v589_v42, %v4661_v40 }
 0x11f   :  { %v478_v1 = vpop.f32.mrf.mxu0  ;;  %v591_v28 = vpop.f32.mrf.mxu1 }
 0x120   :  { %6671 = vst [vmem:[#allocation82_spill] sm:$0xff] %v4724_v36  ;;  %6672 = vst [vmem:[#allocation83_spill] sm:$0xff] %v4727_v29  ;;  %v4730_v27 = vadd.f32 %v478_v1, %v4670_v45  ;;  %v4733_v37 = vadd.f32 %v591_v28, %v4673_v35 }
 0x122   :  { %6673 = vst [vmem:[#allocation84_spill] sm:$0xff] %v4730_v27  ;;  %6674 = vst [vmem:[#allocation85_spill] sm:$0xff] %v4733_v37 }
 0x123   :  { %v482_v24 = vpop.f32.mrf.mxu0  ;;  %v595_v0 = vpop.f32.mrf.mxu1 }
 0x124   :  { %v4736_v26 = vadd.f32 %v482_v24, %v4658_v25  ;;  %v4739_v31 = vadd.f32 %v595_v0, %v4661_v40 }
 0x125   :  { %v484_v30 = vpop.f32.mrf.mxu0  ;;  %v597_v36 = vpop.f32.mrf.mxu1 }
 0x126   :  { %6675 = vst [vmem:[#allocation86_spill] sm:$0xff] %v4736_v26  ;;  %6676 = vst [vmem:[#allocation87_spill] sm:$0xff] %v4739_v31  ;;  %v4742_v42 = vadd.f32 %v484_v30, %v4670_v45  ;;  %v4745_v29 = vadd.f32 %v597_v36, %v4673_v35 }
 0x128   :  { %6677 = vst [vmem:[#allocation88_spill] sm:$0xff] %v4742_v42  ;;  %6678 = vst [vmem:[#allocation89_spill] sm:$0xff] %v4745_v29 }
 0x129   :  { %v488_v1 = vpop.f32.mrf.mxu0  ;;  %v601_v27 = vpop.f32.mrf.mxu1 }
 0x12a   :  { %v4748_v28 = vadd.f32 %v488_v1, %v4658_v25  ;;  %v4751_v37 = vadd.f32 %v601_v27, %v4661_v40  ;;  %v227_v1 = vadd.f32 %v4553_v32, %v4564_v39  ;;  %v342_v32 = vadd.f32 %v4561_v44, %v4573_v33  ;;  %v4778_v44 = vpop.permute.xlu0 %976 }
 0x12b   :  { %v490_v24 = vpop.f32.mrf.mxu0  ;;  %v603_v26 = vpop.f32.mrf.mxu1  ;;  %6687 = vst [vmem:[#allocation98_spill] sm:$0xff] %v4778_v44  ;;  %vm978_vm5 = vcmp.eq.s32.totalorder %v4778_v44, 1  ;;  %v5144_v44 = vld [vmem:[#allocation4 + $0x20] sm:$0xff] }
 0x12c   :  { %6679 = vst [vmem:[#allocation90_spill] sm:$0xff] %v4748_v28  ;;  %6680 = vst [vmem:[#allocation91_spill] sm:$0xff] %v4751_v37  ;;  %v4754_v0 = vadd.f32 %v490_v24, %v4670_v45  ;;  %v4757_v31 = vadd.f32 %v603_v26, %v4673_v35  ;;  %v229_v37 = vadd.f32 %v4559_v43, %v4570_v34 }
 0x12d   :  { %v340_v35 = vadd.f32 %v4555_v38, %v4567_v41 }
 0x12e   :  { %6681 = vst [vmem:[#allocation92_spill] sm:$0xff] %v4754_v0  ;;  %6682 = vst [vmem:[#allocation93_spill] sm:$0xff] %v4757_v31 }
 0x12f   :  { %v4759_v30 = vpop.f32.mrf.mxu0  ;;  %v4761_v36 = vpop.f32.mrf.mxu1 }
 0x130   :  { %6683 = vst [vmem:[#allocation94_spill] sm:$0xff] %v4759_v30  ;;  %6684 = vst [vmem:[#allocation95_spill] sm:$0xff] %v4761_v36 }
 0x131   :  { %v4763_v29 = vpop.f32.mrf.mxu0  ;;  %v4767_v42 = vpop.f32.mrf.mxu1 }
 0x132   :  { %6685 = vst [vmem:[#allocation96_spill] sm:$0xff] %v4763_v29  ;;  %6686 = vst [vmem:[#allocation97_spill] sm:$0xff] %v4767_v42 }
 0x135   :  { %v875_v27 = vpop.f32.mrf.mxu0  ;;  %v946_v31 = vpop.f32.mrf.mxu1 }
 0x136   :  { %v951_v24 = vadd.f32 %v875_v27, %v227_v1  ;;  %v953_v40 = vadd.f32 %v946_v31, %v340_v35 }
 0x137   :  { %v877_v0 = vpop.f32.mrf.mxu0  ;;  %v948_v29 = vpop.f32.mrf.mxu1 }
 0x138   :  { %v955_v28 = vmul.f32 0.5, %v951_v24  ;;  %v952_v26 = vadd.f32 %v877_v0, %v229_v37  ;;  %v954_v39 = vadd.f32 %v948_v29, %v342_v32  ;;  %v6705_v32 = vld [vmem:[#allocation29_spill] sm:$0xff] }
 0x13a   :  { %3649 = vtanh.f32 %v955_v28  ;;  %v959_v36 = vmul.f32 0.5, %v952_v26  ;;  %v964_v42 = vmul.f32 0.5, %v954_v39  ;;  %v6704_v26 = vld [vmem:[#allocation28_spill] sm:$0xff]  ;;  %v6706_v39 = vld [vmem:[#allocation30_spill] sm:$0xff] }
 0x13c   :  { %3651 = vtanh.f32 %v959_v36  ;;  %v6703_v36 = vld [vmem:[#allocation27_spill] sm:$0xff] }
 0x13d   :  { %3653 = vtanh.f32 %v953_v40 }
 0x13e   :  { %3655 = vtanh.f32 %v964_v42  ;;  %v6702_v42 = vld [vmem:[#allocation26_spill] sm:$0xff] }
 0x147   :  { %v3650_v34 = vpop.eup %3649 }
 0x148   :  { %v957_v43 = vadd.f32 1.0, %v3650_v34  ;;  %v6707_v34 = vld [vmem:[#allocation31_spill] sm:$0xff] }
 0x149   :  { %v3652_v1 = vpop.eup %3651 }
 0x14a   :  { %v958_v27 = vmul.f32 0.5, %v957_v43  ;;  %v961_v37 = vadd.f32 1.0, %v3652_v1  ;;  %v3654_v24 = vpop.eup %3653  ;;  %v6708_v43 = vld [vmem:[#allocation32_spill] sm:$0xff]  ;;  %v6709_v1 = vmov 0.0  }
 0x14b   :  { %v3656_v35 = vpop.eup %3655 }
 0x14c   :  { %v962_v0 = vmul.f32 0.5, %v961_v37  ;;  %v969_v41 = vmul.f32 %v3654_v24, %v958_v27  ;;  %v966_v31 = vadd.f32 1.0, %v3656_v35  ;;  %v6710_v27 = vld [vmem:[#allocation33_spill] sm:$0xff]  ;;  %v4853_v37 = vld [vmem:[#allocation4 + $0x1e8] sm:$0xff] }
 0x14d   :  { %v6713_v24 = vld [vmem:[#allocation11_spill] sm:$0xff] }
 0x14e   :  { %v968_v38 = vmul.f32 0.0, %v962_v0  ;;  %v967_v33 = vmul.f32 0.5, %v966_v31  ;;  %v6712_v0 = vld [vmem:[#allocation10_spill] sm:$0xff]  ;;  %vm1327_vm6 = vcmp.gt.s32.totalorder %v6713_v24, 2  ;;  %vm1504_vm7 = vcmp.gt.s32.totalorder %v6713_v24, 3 }
 0x14f   :  { %vm1858_vm8 = vcmp.gt.s32.totalorder %v6713_v24, 5  ;;  %vm2212_vm9 = vcmp.gt.s32.totalorder %v6713_v24, 7  ;;  %v6718_v24 = vld [vmem:[#allocation37_spill] sm:$0xff] }
 0x150   :  { %v4775_v28 = vadd.f32 %v969_v41, %v968_v38  ;;  %v6714_v38 = vmov 0  }
 0x151   :  { %v1328_v41 = vsel %vm1327_vm6, 1, %v6714_v38  ;;  %v1505_v35 = vsel %vm1504_vm7, 1, %v6714_v38  ;;  %v1859_v31 = vsel %vm1858_vm8, 1, %v6714_v38 }
 0x152   :  { %3657 = vtanh.f32 %v4775_v28  ;;  %1330 = vperm.xlu1 %3648, %v1328_v41   ;;  %v6716_v41 = vld [vmem:[#allocation36_spill] sm:$0xff] }
 0x153   :  { %6749 = vst [vmem:[#allocation36_spill] sm:$0xff] %v5144_v44 }
 0x156   :  { %1507 = vperm.xlu1 %3648, %v1505_v35  }
 0x15a   :  { %1861 = vperm.xlu1 %3648, %v1859_v31  }
 0x15f   :  { %v3658_v40 = vpop.eup %3657 }
 0x160   :  { %v4780_v29 = vmul.f32 %v3658_v40, %v967_v33  ;;  %v2213_v33 = vsel %vm2212_vm9, 1, %v6714_v38 }
 0x161   :  { %2215 = vperm.xlu1 %3648, %v2213_v33  }
 0x162   :  { %3635 = vmatmul.mubr.msk.f32.vlgmr.msra.gmra.mxu0 %vm978_vm5, %v4780_v29  ;;  %3636 = vmatmul.mubr.msk.f32.vlgmr.msra.gmra.mxu1 %vm978_vm5, %v4780_v29 }
 0x163   :  { %1164 = vmatpush1.msra.mxu0 %v4234_v46  ;;  %1235 = vmatpush1.msra.mxu1 %v4236_v47  ;;  %v6688_v46 = vld [vmem:[#allocation12_spill] sm:$0xff]  ;;  %v6689_v47 = vld [vmem:[#allocation13_spill] sm:$0xff] }
 0x164   :  { %1165 = vmatprep.subr.mxu0 %v4238_v48  ;;  %1236 = vmatprep.subr.mxu1 %v4240_v49  ;;  %v6690_v48 = vld [vmem:[#allocation14_spill] sm:$0xff]  ;;  %v6691_v49 = vld [vmem:[#allocation15_spill] sm:$0xff]  ;;  %6711 = vst [vmem:[#allocation12_spill] sm:$0xff] %v4853_v37 }
 0x165   :  { %1166 = vmatpush1.msra.mxu0 %v4248_v50  ;;  %1237 = vmatpush1.msra.mxu1 %v4250_v51  ;;  %v6692_v50 = vld [vmem:[#allocation16_spill] sm:$0xff]  ;;  %v6693_v51 = vld [vmem:[#allocation17_spill] sm:$0xff] }
 0x166   :  { %1167 = vmatprep.subr.mxu0 %v4256_v52  ;;  %1238 = vmatprep.subr.mxu1 %v4258_v53  ;;  %v6694_v52 = vld [vmem:[#allocation18_spill] sm:$0xff]  ;;  %v6695_v53 = vld [vmem:[#allocation19_spill] sm:$0xff] }
 0x167   :  { %1168 = vmatpush1.msra.mxu0 %v4262_v54  ;;  %1239 = vmatpush1.msra.mxu1 %v4264_v55  ;;  %v6696_v54 = vld [vmem:[#allocation20_spill] sm:$0xff]  ;;  %v6697_v55 = vld [vmem:[#allocation21_spill] sm:$0xff] }
 0x168   :  { %1169 = vmatprep.subr.mxu0 %v4270_v56  ;;  %1240 = vmatprep.subr.mxu1 %v4272_v57  ;;  %v6698_v56 = vld [vmem:[#allocation22_spill] sm:$0xff]  ;;  %v6699_v57 = vld [vmem:[#allocation23_spill] sm:$0xff] }
 0x169   :  { %1170 = vmatpush1.msra.mxu0 %v4278_v58  ;;  %1241 = vmatpush1.msra.mxu1 %v4280_v59  ;;  %v6700_v58 = vld [vmem:[#allocation24_spill] sm:$0xff]  ;;  %v6701_v59 = vld [vmem:[#allocation25_spill] sm:$0xff] }
 0x16a   :  { %1171 = vmatprep.subr.mxu0 %v4286_v60  ;;  %1242 = vmatprep.subr.mxu1 %v4288_v61 }
 0x16b   :  { %1172 = vmatpush1.msra.mxu0 %v4292_v62  ;;  %1243 = vmatpush1.msra.mxu1 %v4294_v63 }
 0x16c   :  { %1173 = vmatprep.subr.mxu0 %v4300_v2  ;;  %1244 = vmatprep.subr.mxu1 %v4302_v3 }
 0x16d   :  { %1174 = vmatpush1.msra.mxu0 %v4308_v4  ;;  %1245 = vmatpush1.msra.mxu1 %v4310_v5 }
 0x16e   :  { %1175 = vmatprep.subr.mxu0 %v4316_v6  ;;  %1246 = vmatprep.subr.mxu1 %v4318_v7 }
 0x16f   :  { %1176 = vmatpush1.msra.mxu0 %v4322_v8  ;;  %1247 = vmatpush1.msra.mxu1 %v4324_v9 }
 0x170   :  { %1177 = vmatprep.subr.mxu0 %v4330_v10  ;;  %1248 = vmatprep.subr.mxu1 %v4332_v11 }
 0x171   :  { %1178 = vmatpush1.msra.mxu0 %v4338_v12  ;;  %1249 = vmatpush1.msra.mxu1 %v4340_v13 }
 0x172   :  { %1179 = vmatprep.subr.mxu0 %v4346_v14  ;;  %1250 = vmatprep.subr.mxu1 %v4348_v15 }
 0x173   :  { %1180 = vmatpush1.msra.mxu0 %v4352_v16  ;;  %1251 = vmatpush1.msra.mxu1 %v4354_v17 }
 0x174   :  { %1181 = vmatprep.subr.mxu0 %v4360_v18  ;;  %1252 = vmatprep.subr.mxu1 %v4362_v19 }
 0x175   :  { %1182 = vmatpush1.msra.mxu0 %v4368_v20  ;;  %1253 = vmatpush1.msra.mxu1 %v4370_v21 }
 0x176   :  { %1183 = vmatprep.subr.mxu0 %v4376_v22  ;;  %1254 = vmatprep.subr.mxu1 %v4378_v23 }
 0x177   :  { %1184 = vmatpush1.msra.mxu0 %v6688_v46  ;;  %1255 = vmatpush1.msra.mxu1 %v6689_v47 }
 0x178   :  { %1185 = vmatprep.subr.mxu0 %v6690_v48  ;;  %1256 = vmatprep.subr.mxu1 %v6691_v49 }
 0x179   :  { %1186 = vmatpush1.msra.mxu0 %v6692_v50  ;;  %1257 = vmatpush1.msra.mxu1 %v6693_v51 }
 0x17a   :  { %1187 = vmatprep.subr.mxu0 %v6694_v52  ;;  %1258 = vmatprep.subr.mxu1 %v6695_v53 }
 0x17b   :  { %1188 = vmatpush1.msra.mxu0 %v6696_v54  ;;  %1259 = vmatpush1.msra.mxu1 %v6697_v55 }
 0x17c   :  { %1189 = vmatprep.subr.mxu0 %v6698_v56  ;;  %1260 = vmatprep.subr.mxu1 %v6699_v57 }
 0x17d   :  { %1190 = vmatpush1.msra.mxu0 %v6700_v58  ;;  %1261 = vmatpush1.msra.mxu1 %v6701_v59 }
 0x17e   :  { %1191 = vmatprep.subr.mxu0 %v6702_v42  ;;  %1262 = vmatprep.subr.mxu1 %v6703_v36 }
 0x17f   :  { %1192 = vmatpush1.msra.mxu0 %v6704_v26  ;;  %1263 = vmatpush1.msra.mxu1 %v6705_v32 }
 0x180   :  { %1193 = vmatprep.subr.mxu0 %v6706_v39  ;;  %1264 = vmatprep.subr.mxu1 %v6707_v34 }
 0x181   :  { %1194 = vmatpush1.msra.mxu0 %v6708_v43  ;;  %1227 = vmatprep.mubr.f32.mxu0 %v6709_v1 }
 0x182   :  { %1265 = vmatpush1.msra.mxu1 %v6710_v27  ;;  %1298 = vmatprep.mubr.f32.mxu1 %v6709_v1  ;;  %v6717_v1 = vld [vmem:[#allocation35_spill] sm:$0xff] }
 0x183   :  { %1340 = vmatprep.subr.mxu0 %v4853_v37  ;;  %1411 = vmatprep.subr.mxu1 %v6712_v0  ;;  %v6715_v0 = vld [vmem:[#allocation34_spill] sm:$0xff] }
 0x222   :  { %v1052_v40 = vpop.f32.mrf.mxu0  ;;  %v1123_v30 = vpop.f32.mrf.mxu1 }
 0x223   :  { %v1128_v45 = vadd.f32 %v1052_v40, %v6715_v0  ;;  %v1130_v43 = vadd.f32 %v1123_v30, %v6717_v1  ;;  %v4872_v1 = vpop.permute.xlu0 %1153 }
 0x224   :  { %v1054_v25 = vpop.f32.mrf.mxu0  ;;  %v1125_v34 = vpop.f32.mrf.mxu1  ;;  %6719 = vst [vmem:[#allocation13_spill] sm:$0xff] %v4872_v1  ;;  %vm1155_vm10 = vcmp.eq.s32.totalorder %v4872_v1, 1  ;;  %v5147_v1 = vld [vmem:[#allocation4 + $0x30] sm:$0xff] }
 0x225   :  { %v1132_v37 = vmul.f32 0.5, %v1128_v45  ;;  %v1129_v27 = vadd.f32 %v1054_v25, %v6716_v41  ;;  %v1131_v31 = vadd.f32 %v1125_v34, %v6718_v24  ;;  %v980_v25 = vsel %vm978_vm5, %v4775_v28, 0.0  ;;  %v4894_v24 = vld [vmem:[#allocation4 + $0x1c8] sm:$0xff]  ;;  %6750 = vst [vmem:[#allocation35_spill] sm:$0xff] %v5147_v1 }
 0x226   :  { %v979_v28 = vsel %vm978_vm5, %v4780_v29, 0.0  ;;  %v4897_v29 = vld [vmem:[#allocation4 + $0x1d8] sm:$0xff] }
 0x227   :  { %3659 = vtanh.f32 %v1132_v37  ;;  %v1136_v35 = vmul.f32 0.5, %v1129_v27  ;;  %v1141_v39 = vmul.f32 0.5, %v1131_v31  ;;  %v4900_v31 = vld [vmem:[#allocation4 + $0x1c0] sm:$0xff] }
 0x229   :  { %3661 = vtanh.f32 %v1136_v35  ;;  %v4891_v35 = vld [vmem:[#allocation4 + $0x1f0] sm:$0xff] }
 0x22a   :  { %3663 = vtanh.f32 %v1130_v43 }
 0x22b   :  { %3665 = vtanh.f32 %v1141_v39 }
 0x234   :  { %v3660_v38 = vpop.eup %3659 }
 0x235   :  { %v1134_v33 = vadd.f32 1.0, %v3660_v38  ;;  %v4903_v38 = vld [vmem:[#allocation4 + $0x1d0] sm:$0xff] }
 0x236   :  { %v3662_v32 = vpop.eup %3661 }
 0x237   :  { %v1135_v26 = vmul.f32 0.5, %v1134_v33  ;;  %v1138_v40 = vadd.f32 1.0, %v3662_v32  ;;  %v3664_v0 = vpop.eup %3663  ;;  %v4906_v33 = vld [vmem:[#allocation4 + $0x1a8] sm:$0xff] }
 0x238   :  { %v3666_v32 = vpop.eup %3665 }
 0x239   :  { %v1139_v45 = vmul.f32 0.5, %v1138_v40  ;;  %v1146_v36 = vmul.f32 %v3664_v0, %v1135_v26  ;;  %v1143_v39 = vadd.f32 1.0, %v3666_v32  ;;  %v4909_v40 = vld [vmem:[#allocation4 + $0x1b8] sm:$0xff]  ;;  %v4912_v0 = vld [vmem:[#allocation4 + $0x1a0] sm:$0xff]  ;;  %v4927_v32 = vld [vmem:[#allocation4 + $0x190] sm:$0xff] }
 0x23b   :  { %v1145_v30 = vmul.f32 %v1139_v45, %v980_v25  ;;  %v1144_v27 = vmul.f32 0.5, %v1143_v39  ;;  %v4915_v45 = vld [vmem:[#allocation4 + $0x1b0] sm:$0xff] }
 0x23d   :  { %v1147_v43 = vadd.f32 %v1146_v36, %v1145_v30  ;;  %v4888_v36 = vld [vmem:[#allocation4 + $0x1e0] sm:$0xff]  ;;  %v4921_v30 = vld [vmem:[#allocation4 + $0x198] sm:$0xff] }
 0x23f   :  { %3667 = vtanh.f32 %v1147_v43  ;;  %v4877_v34 = vsel %vm1155_vm10, %v1147_v43, %v980_v25  ;;  %v4918_v25 = vld [vmem:[#allocation4 + $0x188] sm:$0xff]  ;;  %v4924_v43 = vld [vmem:[#allocation4 + $0x180] sm:$0xff] }
 0x24c   :  { %v3668_v37 = vpop.eup %3667 }
 0x24d   :  { %v1149_v26 = vmul.f32 %v3668_v37, %v1144_v27  ;;  %v5021_v37 = vld [vmem:[#allocation4 + $0x178] sm:$0xff] }
 0x24f   :  { %v4884_v41 = vsel %vm1155_vm10, %v1149_v26, %v979_v28  ;;  %v5024_v26 = vld [vmem:[#allocation4 + $0x160] sm:$0xff]  ;;  %v5027_v28 = vld [vmem:[#allocation4 + $0x170] sm:$0xff] }
 0x250   :  { %1228 = vmatmul.mubr.f32.vlgmr.msra.gmra.mxu0 %v4884_v41  ;;  %1299 = vmatmul.mubr.f32.vlgmr.msra.gmra.mxu1 %v4884_v41 }
 0x251   :  { %1341 = vmatpush1.msra.mxu0 %v4888_v36  ;;  %1412 = vmatpush1.msra.mxu1 %v4891_v35 }
 0x252   :  { %1342 = vmatprep.subr.mxu0 %v4894_v24  ;;  %1413 = vmatprep.subr.mxu1 %v4897_v29 }
 0x253   :  { %1343 = vmatpush1.msra.mxu0 %v4900_v31  ;;  %1414 = vmatpush1.msra.mxu1 %v4903_v38 }
 0x254   :  { %1344 = vmatprep.subr.mxu0 %v4906_v33  ;;  %1415 = vmatprep.subr.mxu1 %v4909_v40 }
 0x255   :  { %1345 = vmatpush1.msra.mxu0 %v4912_v0  ;;  %1416 = vmatpush1.msra.mxu1 %v4915_v45 }
 0x256   :  { %1346 = vmatprep.subr.mxu0 %v4918_v25  ;;  %1417 = vmatprep.subr.mxu1 %v4921_v30 }
 0x257   :  { %1347 = vmatpush1.msra.mxu0 %v4924_v43  ;;  %1418 = vmatpush1.msra.mxu1 %v4927_v32 }
 0x258   :  { %1348 = vmatprep.subr.mxu0 %v4286_v60  ;;  %1419 = vmatprep.subr.mxu1 %v4288_v61  ;;  %v6720_v60 = vld [vmem:[#allocation27_spill] sm:$0xff]  ;;  %v6721_v61 = vld [vmem:[#allocation28_spill] sm:$0xff] }
 0x259   :  { %1349 = vmatpush1.msra.mxu0 %v4292_v62  ;;  %1420 = vmatpush1.msra.mxu1 %v4294_v63  ;;  %v6722_v62 = vld [vmem:[#allocation29_spill] sm:$0xff]  ;;  %v6723_v63 = vld [vmem:[#allocation30_spill] sm:$0xff] }
 0x25a   :  { %1350 = vmatprep.subr.mxu0 %v4300_v2  ;;  %1421 = vmatprep.subr.mxu1 %v4302_v3  ;;  %v6724_v2 = vld [vmem:[#allocation31_spill] sm:$0xff]  ;;  %v6725_v3 = vld [vmem:[#allocation32_spill] sm:$0xff] }
 0x25b   :  { %1351 = vmatpush1.msra.mxu0 %v4308_v4  ;;  %1422 = vmatpush1.msra.mxu1 %v4310_v5  ;;  %v6726_v4 = vmov 0.0   ;;  %v6727_v5 = vld [vmem:[#allocation33_spill] sm:$0xff] }
 0x25c   :  { %1352 = vmatprep.subr.mxu0 %v4316_v6  ;;  %1423 = vmatprep.subr.mxu1 %v4318_v7  ;;  %v6728_v6 = vld [vmem:[#allocation12_spill] sm:$0xff]  ;;  %v4981_v7 = vld [vmem:[#allocation4 + $0x1f8] sm:$0xff] }
 0x25d   :  { %1353 = vmatpush1.msra.mxu0 %v4322_v8  ;;  %1424 = vmatpush1.msra.mxu1 %v4324_v9  ;;  %6729 = vst [vmem:[#allocation14_spill] sm:$0xff] %v4981_v7  ;;  %v6730_v9 = vld [vmem:[#allocation38_spill] sm:$0xff] }
 0x25e   :  { %1354 = vmatprep.subr.mxu0 %v4330_v10  ;;  %1425 = vmatprep.subr.mxu1 %v4332_v11 }
 0x25f   :  { %1355 = vmatpush1.msra.mxu0 %v4338_v12  ;;  %1426 = vmatpush1.msra.mxu1 %v4340_v13 }
 0x260   :  { %1356 = vmatprep.subr.mxu0 %v4346_v14  ;;  %1427 = vmatprep.subr.mxu1 %v4348_v15  ;;  %v6731_v14 = vld [vmem:[#allocation40_spill] sm:$0xff] }
 0x261   :  { %1357 = vmatpush1.msra.mxu0 %v4352_v16  ;;  %1428 = vmatpush1.msra.mxu1 %v4354_v17  ;;  %v6732_v16 = vld [vmem:[#allocation39_spill] sm:$0xff] }
 0x262   :  { %1358 = vmatprep.subr.mxu0 %v4360_v18  ;;  %1429 = vmatprep.subr.mxu1 %v4362_v19 }
 0x263   :  { %1359 = vmatpush1.msra.mxu0 %v4368_v20  ;;  %1430 = vmatpush1.msra.mxu1 %v4370_v21  ;;  %v6733_v20 = vld [vmem:[#allocation41_spill] sm:$0xff] }
 0x264   :  { %1360 = vmatprep.subr.mxu0 %v4376_v22  ;;  %1431 = vmatprep.subr.mxu1 %v4378_v23 }
 0x265   :  { %1361 = vmatpush1.msra.mxu0 %v6688_v46  ;;  %1432 = vmatpush1.msra.mxu1 %v6689_v47 }
 0x266   :  { %1362 = vmatprep.subr.mxu0 %v6690_v48  ;;  %1433 = vmatprep.subr.mxu1 %v6691_v49 }
 0x267   :  { %1363 = vmatpush1.msra.mxu0 %v6692_v50  ;;  %1434 = vmatpush1.msra.mxu1 %v6693_v51 }
 0x268   :  { %1364 = vmatprep.subr.mxu0 %v6694_v52  ;;  %1435 = vmatprep.subr.mxu1 %v6695_v53  ;;  %v4988_v52 = vpop.permute.xlu1 %1330 }
 0x269   :  { %1365 = vmatpush1.msra.mxu0 %v6696_v54  ;;  %1436 = vmatpush1.msra.mxu1 %v6697_v55  ;;  %6734 = vst [vmem:[#allocation15_spill] sm:$0xff] %v4988_v52  ;;  %vm1332_vm11 = vcmp.eq.s32.totalorder %v4988_v52, 1  ;;  %v5150_v52 = vld [vmem:[#allocation4 + $0x8] sm:$0xff] }
 0x26a   :  { %1366 = vmatprep.subr.mxu0 %v6698_v56  ;;  %1437 = vmatprep.subr.mxu1 %v6699_v57  ;;  %6751 = vst [vmem:[#allocation37_spill] sm:$0xff] %v5150_v52 }
 0x26b   :  { %1367 = vmatpush1.msra.mxu0 %v6700_v58  ;;  %1438 = vmatpush1.msra.mxu1 %v6701_v59 }
 0x26c   :  { %1368 = vmatprep.subr.mxu0 %v6702_v42  ;;  %1439 = vmatprep.subr.mxu1 %v6720_v60  ;;  %v5033_v60 = vld [vmem:[#allocation4 + $0x158] sm:$0xff] }
 0x26d   :  { %1369 = vmatpush1.msra.mxu0 %v6721_v61  ;;  %1440 = vmatpush1.msra.mxu1 %v6722_v62  ;;  %v5036_v61 = vld [vmem:[#allocation4 + $0x140] sm:$0xff]  ;;  %v5039_v62 = vld [vmem:[#allocation4 + $0x150] sm:$0xff] }
 0x26e   :  { %1370 = vmatprep.subr.mxu0 %v6723_v63  ;;  %1441 = vmatprep.subr.mxu1 %v6724_v2  ;;  %v5042_v63 = vld [vmem:[#allocation4 + $0x128] sm:$0xff]  ;;  %v5045_v2 = vld [vmem:[#allocation4 + $0x138] sm:$0xff] }
 0x26f   :  { %1371 = vmatpush1.msra.mxu0 %v6725_v3  ;;  %1404 = vmatprep.mubr.f32.mxu0 %v6726_v4  ;;  %v5048_v3 = vld [vmem:[#allocation4 + $0x120] sm:$0xff] }
 0x270   :  { %1442 = vmatpush1.msra.mxu1 %v6727_v5  ;;  %1475 = vmatprep.mubr.f32.mxu1 %v6726_v4  ;;  %v5051_v5 = vld [vmem:[#allocation4 + $0x130] sm:$0xff] }
 0x271   :  { %1517 = vmatprep.subr.mxu0 %v6728_v6  ;;  %1588 = vmatprep.subr.mxu1 %v4981_v7 }
 0x310   :  { %v1229_v8 = vpop.f32.mrf.mxu0  ;;  %v1300_v11 = vpop.f32.mrf.mxu1 }
 0x311   :  { %v1305_v10 = vadd.f32 %v1229_v8, %v6730_v9  ;;  %v1307_v17 = vadd.f32 %v1300_v11, %v6732_v16  ;;  %v5054_v8 = vld [vmem:[#allocation4 + $0x108] sm:$0xff]  ;;  %v5057_v9 = vld [vmem:[#allocation4 + $0x118] sm:$0xff]  ;;  %v5063_v11 = vld [vmem:[#allocation4 + $0x110] sm:$0xff] }
 0x312   :  { %v1231_v12 = vpop.f32.mrf.mxu0  ;;  %v1302_v19 = vpop.f32.mrf.mxu1  ;;  %v5078_v16 = vld [vmem:[#allocation4 + $0xc8] sm:$0xff] }
 0x313   :  { %v1309_v13 = vmul.f32 0.5, %v1305_v10  ;;  %v1306_v15 = vadd.f32 %v1231_v12, %v6731_v14  ;;  %v1308_v21 = vadd.f32 %v1302_v19, %v6733_v20  ;;  %v5060_v10 = vld [vmem:[#allocation4 + $0x100] sm:$0xff]  ;;  %v5066_v12 = vld [vmem:[#allocation4 + $0xe8] sm:$0xff]  ;;  %v5087_v19 = vld [vmem:[#allocation4 + $0xd0] sm:$0xff] }
 0x314   :  { %v5072_v14 = vld [vmem:[#allocation4 + $0xe0] sm:$0xff]  ;;  %v5090_v20 = vld [vmem:[#allocation4 + $0xa8] sm:$0xff] }
 0x315   :  { %3669 = vtanh.f32 %v1309_v13  ;;  %v1313_v18 = vmul.f32 0.5, %v1306_v15  ;;  %v1318_v22 = vmul.f32 0.5, %v1308_v21  ;;  %v5069_v13 = vld [vmem:[#allocation4 + $0xf8] sm:$0xff]  ;;  %v5075_v15 = vld [vmem:[#allocation4 + $0xf0] sm:$0xff] }
 0x316   :  { %v5093_v21 = vld [vmem:[#allocation4 + $0xb8] sm:$0xff] }
 0x317   :  { %3671 = vtanh.f32 %v1313_v18  ;;  %v5084_v18 = vld [vmem:[#allocation4 + $0xc0] sm:$0xff] }
 0x318   :  { %3673 = vtanh.f32 %v1307_v17  ;;  %v5081_v17 = vld [vmem:[#allocation4 + $0xd8] sm:$0xff] }
 0x319   :  { %3675 = vtanh.f32 %v1318_v22  ;;  %v5096_v22 = vld [vmem:[#allocation4 + $0xa0] sm:$0xff] }
 0x322   :  { %v3670_v23 = vpop.eup %3669 }
 0x323   :  { %v1311_v46 = vadd.f32 1.0, %v3670_v23  ;;  %v5099_v23 = vld [vmem:[#allocation4 + $0xb0] sm:$0xff] }
 0x324   :  { %v3672_v47 = vpop.eup %3671 }
 0x325   :  { %v1312_v48 = vmul.f32 0.5, %v1311_v46  ;;  %v1315_v49 = vadd.f32 1.0, %v3672_v47  ;;  %v3674_v50 = vpop.eup %3673  ;;  %v5102_v46 = vld [vmem:[#allocation4 + $0x88] sm:$0xff]  ;;  %v5105_v47 = vld [vmem:[#allocation4 + $0x98] sm:$0xff] }
 0x326   :  { %v3676_v57 = vpop.eup %3675  ;;  %6735 = vst [vmem:[#allocation16_spill] sm:$0xff] %v5102_v46  ;;  %6736 = vst [vmem:[#allocation17_spill] sm:$0xff] %v5105_v47 }
 0x327   :  { %v1316_v51 = vmul.f32 0.5, %v1315_v49  ;;  %v1323_v53 = vmul.f32 %v3674_v50, %v1312_v48  ;;  %v1320_v58 = vadd.f32 1.0, %v3676_v57  ;;  %v5108_v48 = vld [vmem:[#allocation4 + $0x80] sm:$0xff]  ;;  %v5111_v49 = vld [vmem:[#allocation4 + $0x90] sm:$0xff]  ;;  %v5114_v50 = vld [vmem:[#allocation4 + $0x68] sm:$0xff] }
 0x328   :  { %6737 = vst [vmem:[#allocation18_spill] sm:$0xff] %v5108_v48  ;;  %6738 = vst [vmem:[#allocation19_spill] sm:$0xff] %v5111_v49  ;;  %v5129_v57 = vld [vmem:[#allocation4 + $0x58] sm:$0xff] }
 0x329   :  { %v1322_v54 = vmul.f32 %v1316_v51, %v4877_v34  ;;  %v1321_v59 = vmul.f32 0.5, %v1320_v58  ;;  %6739 = vst [vmem:[#allocation20_spill] sm:$0xff] %v5114_v50  ;;  %v5117_v51 = vld [vmem:[#allocation4 + $0x78] sm:$0xff]  ;;  %6744 = vst [vmem:[#allocation25_spill] sm:$0xff] %v5129_v57  ;;  %v5132_v58 = vld [vmem:[#allocation4 + $0x40] sm:$0xff] }
 0x32a   :  { %6740 = vst [vmem:[#allocation21_spill] sm:$0xff] %v5117_v51  ;;  %6745 = vst [vmem:[#allocation26_spill] sm:$0xff] %v5132_v58 }
 0x32b   :  { %v1324_v55 = vadd.f32 %v1323_v53, %v1322_v54  ;;  %v5120_v53 = vld [vmem:[#allocation4 + $0x60] sm:$0xff]  ;;  %v5123_v54 = vld [vmem:[#allocation4 + $0x70] sm:$0xff] }
 0x32c   :  { %6741 = vst [vmem:[#allocation22_spill] sm:$0xff] %v5120_v53  ;;  %6742 = vst [vmem:[#allocation23_spill] sm:$0xff] %v5123_v54 }
 0x32d   :  { %3677 = vtanh.f32 %v1324_v55  ;;  %v4995_v56 = vsel %vm1332_vm11, %v1324_v55, %v4877_v34  ;;  %v5018_v34 = vld [vmem:[#allocation4 + $0x168] sm:$0xff] }
 0x32e   :  { %v5126_v55 = vld [vmem:[#allocation4 + $0x48] sm:$0xff] }
 0x32f   :  { %6743 = vst [vmem:[#allocation24_spill] sm:$0xff] %v5126_v55 }
 0x33a   :  { %v3678_v42 = vpop.eup %3677 }
 0x33b   :  { %v1326_v39 = vmul.f32 %v3678_v42, %v1321_v59  ;;  %v5135_v59 = vld [vmem:[#allocation4 + $0x50] sm:$0xff]  ;;  %v5138_v42 = vld [vmem:[#allocation4 + $0x28] sm:$0xff] }
 0x33c   :  { %6746 = vst [vmem:[#allocation10_spill] sm:$0xff] %v5135_v59  ;;  %6747 = vst [vmem:[#allocation11_spill] sm:$0xff] %v5138_v42 }
 0x33d   :  { %v5000_v27 = vsel %vm1332_vm11, %v1326_v39, %v4884_v41  ;;  %v5030_v41 = vld [vmem:[#allocation4 + $0x148] sm:$0xff]  ;;  %v5141_v39 = vld [vmem:[#allocation4 + $0x38] sm:$0xff] }
 0x33e   :  { %1405 = vmatmul.mubr.f32.vlgmr.msra.gmra.mxu0 %v5000_v27  ;;  %1476 = vmatmul.mubr.f32.vlgmr.msra.gmra.mxu1 %v5000_v27  ;;  %6748 = vst [vmem:[#allocation34_spill] sm:$0xff] %v5141_v39 }
 0x33f   :  { %1518 = vmatpush1.msra.mxu0 %v4888_v36  ;;  %1589 = vmatpush1.msra.mxu1 %v4891_v35 }
 0x340   :  { %1519 = vmatprep.subr.mxu0 %v4894_v24  ;;  %1590 = vmatprep.subr.mxu1 %v4897_v29 }
 0x341   :  { %1520 = vmatpush1.msra.mxu0 %v4900_v31  ;;  %1591 = vmatpush1.msra.mxu1 %v4903_v38 }
 0x342   :  { %1521 = vmatprep.subr.mxu0 %v4906_v33  ;;  %1592 = vmatprep.subr.mxu1 %v4909_v40 }
 0x343   :  { %1522 = vmatpush1.msra.mxu0 %v4912_v0  ;;  %1593 = vmatpush1.msra.mxu1 %v4915_v45 }
 0x344   :  { %1523 = vmatprep.subr.mxu0 %v4918_v25  ;;  %1594 = vmatprep.subr.mxu1 %v4921_v30 }
 0x345   :  { %1524 = vmatpush1.msra.mxu0 %v4924_v43  ;;  %1595 = vmatpush1.msra.mxu1 %v4927_v32 }
 0x346   :  { %1525 = vmatprep.subr.mxu0 %v5018_v34  ;;  %1596 = vmatprep.subr.mxu1 %v5021_v37 }
 0x347   :  { %1526 = vmatpush1.msra.mxu0 %v5024_v26  ;;  %1597 = vmatpush1.msra.mxu1 %v5027_v28 }
 0x348   :  { %1527 = vmatprep.subr.mxu0 %v5030_v41  ;;  %1598 = vmatprep.subr.mxu1 %v5033_v60 }
 0x349   :  { %1528 = vmatpush1.msra.mxu0 %v5036_v61  ;;  %1599 = vmatpush1.msra.mxu1 %v5039_v62 }
 0x34a   :  { %1529 = vmatprep.subr.mxu0 %v5042_v63  ;;  %1600 = vmatprep.subr.mxu1 %v5045_v2 }
 0x34b   :  { %1530 = vmatpush1.msra.mxu0 %v5048_v3  ;;  %1601 = vmatpush1.msra.mxu1 %v5051_v5 }
 0x34c   :  { %1531 = vmatprep.subr.mxu0 %v5054_v8  ;;  %1602 = vmatprep.subr.mxu1 %v5057_v9 }
 0x34d   :  { %1532 = vmatpush1.msra.mxu0 %v5060_v10  ;;  %1603 = vmatpush1.msra.mxu1 %v5063_v11 }
 0x34e   :  { %1533 = vmatprep.subr.mxu0 %v5066_v12  ;;  %1604 = vmatprep.subr.mxu1 %v5069_v13 }
 0x34f   :  { %1534 = vmatpush1.msra.mxu0 %v5072_v14  ;;  %1605 = vmatpush1.msra.mxu1 %v5075_v15 }
 0x350   :  { %1535 = vmatprep.subr.mxu0 %v5078_v16  ;;  %1606 = vmatprep.subr.mxu1 %v5081_v17 }
 0x351   :  { %1536 = vmatpush1.msra.mxu0 %v5084_v18  ;;  %1607 = vmatpush1.msra.mxu1 %v5087_v19 }
 0x352   :  { %1537 = vmatprep.subr.mxu0 %v5090_v20  ;;  %1608 = vmatprep.subr.mxu1 %v5093_v21 }
 0x353   :  { %1538 = vmatpush1.msra.mxu0 %v5096_v22  ;;  %1609 = vmatpush1.msra.mxu1 %v5099_v23 }
 0x354   :  { %1539 = vmatprep.subr.mxu0 %v5102_v46  ;;  %1610 = vmatprep.subr.mxu1 %v5105_v47 }
 0x355   :  { %1540 = vmatpush1.msra.mxu0 %v5108_v48  ;;  %1611 = vmatpush1.msra.mxu1 %v5111_v49 }
 0x356   :  { %1541 = vmatprep.subr.mxu0 %v5114_v50  ;;  %1612 = vmatprep.subr.mxu1 %v5117_v51 }
 0x357   :  { %1542 = vmatpush1.msra.mxu0 %v5120_v53  ;;  %1613 = vmatpush1.msra.mxu1 %v5123_v54  ;;  %v6757_v54 = vld [vmem:[#allocation43_spill] sm:$0xff] }
 0x358   :  { %1543 = vmatprep.subr.mxu0 %v5126_v55  ;;  %1614 = vmatprep.subr.mxu1 %v5129_v57  ;;  %v6756_v55 = vld [vmem:[#allocation44_spill] sm:$0xff] }
 0x359   :  { %1544 = vmatpush1.msra.mxu0 %v5132_v58  ;;  %1615 = vmatpush1.msra.mxu1 %v5135_v59  ;;  %v5153_v59 = vld [vmem:[#allocation4 + $0x18] sm:$0xff] }
 0x35a   :  { %1545 = vmatprep.subr.mxu0 %v5138_v42  ;;  %1616 = vmatprep.subr.mxu1 %v5141_v39  ;;  %6752 = vst [vmem:[#allocation27_spill] sm:$0xff] %v5153_v59  ;;  %v5156_v42 = vld [vmem:[#allocation4] sm:$0xff]  ;;  %v5160_v39 = vld [vmem:[#allocation4 + $0x10] sm:$0xff] }
 0x35b   :  { %1546 = vmatpush1.msra.mxu0 %v5144_v44  ;;  %1617 = vmatpush1.msra.mxu1 %v5147_v1  ;;  %6753 = vst [vmem:[#allocation28_spill] sm:$0xff] %v5156_v42  ;;  %6754 = vst [vmem:[#allocation29_spill] sm:$0xff] %v5160_v39  ;;  %v6755_v1 = vld [vmem:[#allocation42_spill] sm:$0xff] }
 0x35c   :  { %1547 = vmatprep.subr.mxu0 %v5150_v52  ;;  %1618 = vmatprep.subr.mxu1 %v5153_v59 }
 0x35d   :  { %1548 = vmatpush1.msra.mxu0 %v5156_v42  ;;  %1581 = vmatprep.mubr.f32.mxu0 %v6726_v4 }
 0x35e   :  { %1619 = vmatpush1.msra.mxu1 %v5160_v39  ;;  %1652 = vmatprep.mubr.f32.mxu1 %v6726_v4  ;;  %v6758_v4 = vld [vmem:[#allocation45_spill] sm:$0xff] }
 0x35f   :  { %1694 = vmatprep.subr.mxu0 %v6728_v6  ;;  %1765 = vmatprep.subr.mxu1 %v4981_v7 }
 0x3fe   :  { %v1406_v52 = vpop.f32.mrf.mxu0  ;;  %v1477_v59 = vpop.f32.mrf.mxu1 }
 0x3ff   :  { %v1482_v44 = vadd.f32 %v1406_v52, %v6755_v1  ;;  %v1484_v53 = vadd.f32 %v1477_v59, %v6757_v54  ;;  %v6766_v59 = vld [vmem:[#allocation22_spill] sm:$0xff] }
 0x400   :  { %v1408_v58 = vpop.f32.mrf.mxu0  ;;  %v1479_v39 = vpop.f32.mrf.mxu1 }
 0x401   :  { %v1486_v57 = vmul.f32 0.5, %v1482_v44  ;;  %v1483_v42 = vadd.f32 %v1408_v58, %v6756_v55  ;;  %v1485_v50 = vadd.f32 %v1479_v39, %v6758_v4  ;;  %v6765_v58 = vld [vmem:[#allocation21_spill] sm:$0xff]  ;;  %v6768_v39 = vld [vmem:[#allocation24_spill] sm:$0xff] }
 0x403   :  { %3679 = vtanh.f32 %v1486_v57  ;;  %v1490_v51 = vmul.f32 0.5, %v1483_v42  ;;  %v1495_v6 = vmul.f32 0.5, %v1485_v50  ;;  %v5171_v57 = vpop.permute.xlu1 %1507  ;;  %v6767_v42 = vld [vmem:[#allocation23_spill] sm:$0xff] }
 0x404   :  { %6759 = vst [vmem:[#allocation30_spill] sm:$0xff] %v5171_v57  ;;  %vm1509_vm12 = vcmp.eq.s32.totalorder %v5171_v57, 1  ;;  %v6779_v57 = vmov 0.0  }
 0x405   :  { %3681 = vtanh.f32 %v1490_v51  ;;  %v6763_v51 = vld [vmem:[#allocation19_spill] sm:$0xff] }
 0x406   :  { %3683 = vtanh.f32 %v1484_v53  ;;  %v6764_v53 = vld [vmem:[#allocation20_spill] sm:$0xff] }
 0x407   :  { %3685 = vtanh.f32 %v1495_v6 }
 0x410   :  { %v3680_v49 = vpop.eup %3679 }
 0x411   :  { %v1488_v7 = vadd.f32 1.0, %v3680_v49 }
 0x412   :  { %v3682_v48 = vpop.eup %3681 }
 0x413   :  { %v1489_v47 = vmul.f32 0.5, %v1488_v7  ;;  %v1492_v1 = vadd.f32 1.0, %v3682_v48  ;;  %v3684_v52 = vpop.eup %3683 }
 0x414   :  { %v3686_v49 = vpop.eup %3685 }
 0x415   :  { %v1493_v44 = vmul.f32 0.5, %v1492_v1  ;;  %v1500_v46 = vmul.f32 %v3684_v52, %v1489_v47  ;;  %v1497_v7 = vadd.f32 1.0, %v3686_v49  ;;  %v6769_v1 = vld [vmem:[#allocation25_spill] sm:$0xff]  ;;  %v6770_v52 = vld [vmem:[#allocation26_spill] sm:$0xff]  ;;  %v6774_v49 = vld [vmem:[#allocation36_spill] sm:$0xff] }
 0x417   :  { %v1499_v55 = vmul.f32 %v1493_v44, %v4995_v56  ;;  %v1498_v48 = vmul.f32 0.5, %v1497_v7  ;;  %v6771_v44 = vld [vmem:[#allocation10_spill] sm:$0xff]  ;;  %v6775_v7 = vld [vmem:[#allocation35_spill] sm:$0xff] }
 0x419   :  { %v1501_v54 = vadd.f32 %v1500_v46, %v1499_v55  ;;  %v6762_v46 = vld [vmem:[#allocation18_spill] sm:$0xff]  ;;  %v6772_v55 = vld [vmem:[#allocation11_spill] sm:$0xff] }
 0x41b   :  { %3687 = vtanh.f32 %v1501_v54  ;;  %v5177_v4 = vsel %vm1509_vm12, %v1501_v54, %v4995_v56  ;;  %v6760_v56 = vld [vmem:[#allocation16_spill] sm:$0xff]  ;;  %v6773_v54 = vld [vmem:[#allocation34_spill] sm:$0xff] }
 0x428   :  { %v3688_v6 = vpop.eup %3687 }
 0x429   :  { %v1503_v50 = vmul.f32 %v3688_v6, %v1498_v48  ;;  %v6776_v48 = vld [vmem:[#allocation37_spill] sm:$0xff]  ;;  %v6777_v6 = vld [vmem:[#allocation27_spill] sm:$0xff] }
 0x42b   :  { %v5182_v47 = vsel %vm1509_vm12, %v1503_v50, %v5000_v27  ;;  %v6761_v27 = vld [vmem:[#allocation17_spill] sm:$0xff]  ;;  %v6778_v50 = vld [vmem:[#allocation28_spill] sm:$0xff] }
 0x42c   :  { %1582 = vmatmul.mubr.f32.vlgmr.msra.gmra.mxu0 %v5182_v47  ;;  %1653 = vmatmul.mubr.f32.vlgmr.msra.gmra.mxu1 %v5182_v47 }
 0x42d   :  { %1695 = vmatpush1.msra.mxu0 %v4888_v36  ;;  %1766 = vmatpush1.msra.mxu1 %v4891_v35 }
 0x42e   :  { %1696 = vmatprep.subr.mxu0 %v4894_v24  ;;  %1767 = vmatprep.subr.mxu1 %v4897_v29 }
 0x42f   :  { %1697 = vmatpush1.msra.mxu0 %v4900_v31  ;;  %1768 = vmatpush1.msra.mxu1 %v4903_v38 }
 0x430   :  { %1698 = vmatprep.subr.mxu0 %v4906_v33  ;;  %1769 = vmatprep.subr.mxu1 %v4909_v40 }
 0x431   :  { %1699 = vmatpush1.msra.mxu0 %v4912_v0  ;;  %1770 = vmatpush1.msra.mxu1 %v4915_v45 }
 0x432   :  { %1700 = vmatprep.subr.mxu0 %v4918_v25  ;;  %1771 = vmatprep.subr.mxu1 %v4921_v30 }
 0x433   :  { %1701 = vmatpush1.msra.mxu0 %v4924_v43  ;;  %1772 = vmatpush1.msra.mxu1 %v4927_v32 }
 0x434   :  { %1702 = vmatprep.subr.mxu0 %v5018_v34  ;;  %1773 = vmatprep.subr.mxu1 %v5021_v37 }
 0x435   :  { %1703 = vmatpush1.msra.mxu0 %v5024_v26  ;;  %1774 = vmatpush1.msra.mxu1 %v5027_v28 }
 0x436   :  { %1704 = vmatprep.subr.mxu0 %v5030_v41  ;;  %1775 = vmatprep.subr.mxu1 %v5033_v60 }
 0x437   :  { %1705 = vmatpush1.msra.mxu0 %v5036_v61  ;;  %1776 = vmatpush1.msra.mxu1 %v5039_v62 }
 0x438   :  { %1706 = vmatprep.subr.mxu0 %v5042_v63  ;;  %1777 = vmatprep.subr.mxu1 %v5045_v2 }
 0x439   :  { %1707 = vmatpush1.msra.mxu0 %v5048_v3  ;;  %1778 = vmatpush1.msra.mxu1 %v5051_v5 }
 0x43a   :  { %1708 = vmatprep.subr.mxu0 %v5054_v8  ;;  %1779 = vmatprep.subr.mxu1 %v5057_v9 }
 0x43b   :  { %1709 = vmatpush1.msra.mxu0 %v5060_v10  ;;  %1780 = vmatpush1.msra.mxu1 %v5063_v11 }
 0x43c   :  { %1710 = vmatprep.subr.mxu0 %v5066_v12  ;;  %1781 = vmatprep.subr.mxu1 %v5069_v13 }
 0x43d   :  { %1711 = vmatpush1.msra.mxu0 %v5072_v14  ;;  %1782 = vmatpush1.msra.mxu1 %v5075_v15 }
 0x43e   :  { %1712 = vmatprep.subr.mxu0 %v5078_v16  ;;  %1783 = vmatprep.subr.mxu1 %v5081_v17 }
 0x43f   :  { %1713 = vmatpush1.msra.mxu0 %v5084_v18  ;;  %1784 = vmatpush1.msra.mxu1 %v5087_v19 }
 0x440   :  { %1714 = vmatprep.subr.mxu0 %v5090_v20  ;;  %1785 = vmatprep.subr.mxu1 %v5093_v21 }
 0x441   :  { %1715 = vmatpush1.msra.mxu0 %v5096_v22  ;;  %1786 = vmatpush1.msra.mxu1 %v5099_v23 }
 0x442   :  { %1716 = vmatprep.subr.mxu0 %v6760_v56  ;;  %1787 = vmatprep.subr.mxu1 %v6761_v27 }
 0x443   :  { %1717 = vmatpush1.msra.mxu0 %v6762_v46  ;;  %1788 = vmatpush1.msra.mxu1 %v6763_v51 }
 0x444   :  { %1718 = vmatprep.subr.mxu0 %v6764_v53  ;;  %1789 = vmatprep.subr.mxu1 %v6765_v58 }
 0x445   :  { %1719 = vmatpush1.msra.mxu0 %v6766_v59  ;;  %1790 = vmatpush1.msra.mxu1 %v6767_v42  ;;  %v6784_v42 = vld [vmem:[#allocation48_spill] sm:$0xff] }
 0x446   :  { %1720 = vmatprep.subr.mxu0 %v6768_v39  ;;  %1791 = vmatprep.subr.mxu1 %v6769_v1  ;;  %v6780_v1 = vld [vmem:[#allocation29_spill] sm:$0xff] }
 0x447   :  { %1721 = vmatpush1.msra.mxu0 %v6770_v52  ;;  %1792 = vmatpush1.msra.mxu1 %v6771_v44  ;;  %v6781_v44 = vld [vmem:[#allocation12_spill] sm:$0xff] }
 0x448   :  { %1722 = vmatprep.subr.mxu0 %v6772_v55  ;;  %1793 = vmatprep.subr.mxu1 %v6773_v54  ;;  %v6782_v55 = vld [vmem:[#allocation14_spill] sm:$0xff] }
 0x449   :  { %1723 = vmatpush1.msra.mxu0 %v6774_v49  ;;  %1794 = vmatpush1.msra.mxu1 %v6775_v7  ;;  %v6783_v49 = vld [vmem:[#allocation46_spill] sm:$0xff] }
 0x44a   :  { %1724 = vmatprep.subr.mxu0 %v6776_v48  ;;  %1795 = vmatprep.subr.mxu1 %v6777_v6 }
 0x44b   :  { %1725 = vmatpush1.msra.mxu0 %v6778_v50  ;;  %1758 = vmatprep.mubr.f32.mxu0 %v6779_v57  ;;  %v6785_v50 = vld [vmem:[#allocation47_spill] sm:$0xff] }
 0x44c   :  { %1796 = vmatpush1.msra.mxu1 %v6780_v1  ;;  %1829 = vmatprep.mubr.f32.mxu1 %v6779_v57  ;;  %v6786_v57 = vld [vmem:[#allocation49_spill] sm:$0xff] }
 0x44d   :  { %1871 = vmatprep.subr.mxu0 %v6781_v44  ;;  %1942 = vmatprep.subr.mxu1 %v6782_v55 }
 0x4ec   :  { %v1583_v54 = vpop.f32.mrf.mxu0  ;;  %v1654_v7 = vpop.f32.mrf.mxu1 }
 0x4ed   :  { %v1659_v52 = vadd.f32 %v1583_v54, %v6783_v49  ;;  %v1661_v59 = vadd.f32 %v1654_v7, %v6785_v50  ;;  %v6796_v50 = vld [vmem:[#allocation24_spill] sm:$0xff] }
 0x4ee   :  { %v1585_v39 = vpop.f32.mrf.mxu0  ;;  %v1656_v1 = vpop.f32.mrf.mxu1 }
 0x4ef   :  { %v1663_v48 = vmul.f32 0.5, %v1659_v52  ;;  %v1660_v6 = vadd.f32 %v1585_v39, %v6784_v42  ;;  %v1662_v53 = vadd.f32 %v1656_v1, %v6786_v57  ;;  %v5257_v39 = vpop.permute.xlu0 %1684  ;;  %v6791_v1 = vld [vmem:[#allocation19_spill] sm:$0xff] }
 0x4f0   :  { %6787 = vst [vmem:[#allocation31_spill] sm:$0xff] %v5257_v39  ;;  %vm1686_vm13 = vcmp.eq.s32.totalorder %v5257_v39, 1  ;;  %v6807_v39 = vmov 0.0  }
 0x4f1   :  { %3689 = vtanh.f32 %v1663_v48  ;;  %v1667_v58 = vmul.f32 0.5, %v1660_v6  ;;  %v1672_v44 = vmul.f32 0.5, %v1662_v53  ;;  %v6794_v48 = vld [vmem:[#allocation22_spill] sm:$0xff]  ;;  %v6795_v6 = vld [vmem:[#allocation23_spill] sm:$0xff] }
 0x4f3   :  { %3691 = vtanh.f32 %v1667_v58 }
 0x4f4   :  { %3693 = vtanh.f32 %v1661_v59 }
 0x4f5   :  { %3695 = vtanh.f32 %v1672_v44  ;;  %v6792_v44 = vld [vmem:[#allocation20_spill] sm:$0xff] }
 0x4fe   :  { %v3690_v51 = vpop.eup %3689 }
 0x4ff   :  { %v1665_v55 = vadd.f32 1.0, %v3690_v51 }
 0x500   :  { %v3692_v46 = vpop.eup %3691 }
 0x501   :  { %v1666_v27 = vmul.f32 0.5, %v1665_v55  ;;  %v1669_v54 = vadd.f32 1.0, %v3692_v46  ;;  %v3694_v49 = vpop.eup %3693  ;;  %v6793_v55 = vld [vmem:[#allocation21_spill] sm:$0xff] }
 0x502   :  { %v3696_v51 = vpop.eup %3695 }
 0x503   :  { %v1670_v52 = vmul.f32 0.5, %v1669_v54  ;;  %v1677_v56 = vmul.f32 %v3694_v49, %v1666_v27  ;;  %v1674_v53 = vadd.f32 1.0, %v3696_v51  ;;  %v6797_v54 = vld [vmem:[#allocation25_spill] sm:$0xff]  ;;  %v6798_v49 = vld [vmem:[#allocation26_spill] sm:$0xff]  ;;  %v6802_v51 = vld [vmem:[#allocation36_spill] sm:$0xff] }
 0x505   :  { %v1676_v42 = vmul.f32 %v1670_v52, %v5177_v4  ;;  %v1675_v46 = vmul.f32 0.5, %v1674_v53  ;;  %v6799_v52 = vld [vmem:[#allocation10_spill] sm:$0xff]  ;;  %v6803_v53 = vld [vmem:[#allocation35_spill] sm:$0xff] }
 0x507   :  { %v1678_v7 = vadd.f32 %v1677_v56, %v1676_v42  ;;  %v6790_v56 = vld [vmem:[#allocation18_spill] sm:$0xff]  ;;  %v6800_v42 = vld [vmem:[#allocation11_spill] sm:$0xff] }
 0x509   :  { %3697 = vtanh.f32 %v1678_v7  ;;  %v5263_v57 = vsel %vm1686_vm13, %v1678_v7, %v5177_v4  ;;  %v6788_v4 = vld [vmem:[#allocation16_spill] sm:$0xff]  ;;  %v6801_v7 = vld [vmem:[#allocation34_spill] sm:$0xff] }
 0x516   :  { %v3698_v58 = vpop.eup %3697 }
 0x517   :  { %v1680_v59 = vmul.f32 %v3698_v58, %v1675_v46  ;;  %v6804_v46 = vld [vmem:[#allocation37_spill] sm:$0xff]  ;;  %v6805_v58 = vld [vmem:[#allocation27_spill] sm:$0xff] }
 0x519   :  { %v5268_v27 = vsel %vm1686_vm13, %v1680_v59, %v5182_v47  ;;  %v6789_v47 = vld [vmem:[#allocation17_spill] sm:$0xff]  ;;  %v6806_v59 = vld [vmem:[#allocation28_spill] sm:$0xff] }
 0x51a   :  { %1759 = vmatmul.mubr.f32.vlgmr.msra.gmra.mxu0 %v5268_v27  ;;  %1830 = vmatmul.mubr.f32.vlgmr.msra.gmra.mxu1 %v5268_v27 }
 0x51b   :  { %1872 = vmatpush1.msra.mxu0 %v4888_v36  ;;  %1943 = vmatpush1.msra.mxu1 %v4891_v35 }
 0x51c   :  { %1873 = vmatprep.subr.mxu0 %v4894_v24  ;;  %1944 = vmatprep.subr.mxu1 %v4897_v29 }
 0x51d   :  { %1874 = vmatpush1.msra.mxu0 %v4900_v31  ;;  %1945 = vmatpush1.msra.mxu1 %v4903_v38 }
 0x51e   :  { %1875 = vmatprep.subr.mxu0 %v4906_v33  ;;  %1946 = vmatprep.subr.mxu1 %v4909_v40 }
 0x51f   :  { %1876 = vmatpush1.msra.mxu0 %v4912_v0  ;;  %1947 = vmatpush1.msra.mxu1 %v4915_v45 }
 0x520   :  { %1877 = vmatprep.subr.mxu0 %v4918_v25  ;;  %1948 = vmatprep.subr.mxu1 %v4921_v30 }
 0x521   :  { %1878 = vmatpush1.msra.mxu0 %v4924_v43  ;;  %1949 = vmatpush1.msra.mxu1 %v4927_v32 }
 0x522   :  { %1879 = vmatprep.subr.mxu0 %v5018_v34  ;;  %1950 = vmatprep.subr.mxu1 %v5021_v37 }
 0x523   :  { %1880 = vmatpush1.msra.mxu0 %v5024_v26  ;;  %1951 = vmatpush1.msra.mxu1 %v5027_v28 }
 0x524   :  { %1881 = vmatprep.subr.mxu0 %v5030_v41  ;;  %1952 = vmatprep.subr.mxu1 %v5033_v60 }
 0x525   :  { %1882 = vmatpush1.msra.mxu0 %v5036_v61  ;;  %1953 = vmatpush1.msra.mxu1 %v5039_v62 }
 0x526   :  { %1883 = vmatprep.subr.mxu0 %v5042_v63  ;;  %1954 = vmatprep.subr.mxu1 %v5045_v2 }
 0x527   :  { %1884 = vmatpush1.msra.mxu0 %v5048_v3  ;;  %1955 = vmatpush1.msra.mxu1 %v5051_v5 }
 0x528   :  { %1885 = vmatprep.subr.mxu0 %v5054_v8  ;;  %1956 = vmatprep.subr.mxu1 %v5057_v9 }
 0x529   :  { %1886 = vmatpush1.msra.mxu0 %v5060_v10  ;;  %1957 = vmatpush1.msra.mxu1 %v5063_v11 }
 0x52a   :  { %1887 = vmatprep.subr.mxu0 %v5066_v12  ;;  %1958 = vmatprep.subr.mxu1 %v5069_v13 }
 0x52b   :  { %1888 = vmatpush1.msra.mxu0 %v5072_v14  ;;  %1959 = vmatpush1.msra.mxu1 %v5075_v15 }
 0x52c   :  { %1889 = vmatprep.subr.mxu0 %v5078_v16  ;;  %1960 = vmatprep.subr.mxu1 %v5081_v17 }
 0x52d   :  { %1890 = vmatpush1.msra.mxu0 %v5084_v18  ;;  %1961 = vmatpush1.msra.mxu1 %v5087_v19 }
 0x52e   :  { %1891 = vmatprep.subr.mxu0 %v5090_v20  ;;  %1962 = vmatprep.subr.mxu1 %v5093_v21 }
 0x52f   :  { %1892 = vmatpush1.msra.mxu0 %v5096_v22  ;;  %1963 = vmatpush1.msra.mxu1 %v5099_v23 }
 0x530   :  { %1893 = vmatprep.subr.mxu0 %v6788_v4  ;;  %1964 = vmatprep.subr.mxu1 %v6789_v47 }
 0x531   :  { %1894 = vmatpush1.msra.mxu0 %v6790_v56  ;;  %1965 = vmatpush1.msra.mxu1 %v6791_v1 }
 0x532   :  { %1895 = vmatprep.subr.mxu0 %v6792_v44  ;;  %1966 = vmatprep.subr.mxu1 %v6793_v55 }
 0x533   :  { %1896 = vmatpush1.msra.mxu0 %v6794_v48  ;;  %1967 = vmatpush1.msra.mxu1 %v6795_v6  ;;  %v6812_v6 = vld [vmem:[#allocation52_spill] sm:$0xff] }
 0x534   :  { %1897 = vmatprep.subr.mxu0 %v6796_v50  ;;  %1968 = vmatprep.subr.mxu1 %v6797_v54  ;;  %v6808_v54 = vld [vmem:[#allocation29_spill] sm:$0xff] }
 0x535   :  { %1898 = vmatpush1.msra.mxu0 %v6798_v49  ;;  %1969 = vmatpush1.msra.mxu1 %v6799_v52  ;;  %v6809_v52 = vld [vmem:[#allocation12_spill] sm:$0xff] }
 0x536   :  { %1899 = vmatprep.subr.mxu0 %v6800_v42  ;;  %1970 = vmatprep.subr.mxu1 %v6801_v7  ;;  %v6810_v42 = vld [vmem:[#allocation14_spill] sm:$0xff] }
 0x537   :  { %1900 = vmatpush1.msra.mxu0 %v6802_v51  ;;  %1971 = vmatpush1.msra.mxu1 %v6803_v53  ;;  %v6811_v51 = vld [vmem:[#allocation50_spill] sm:$0xff] }
 0x538   :  { %1901 = vmatprep.subr.mxu0 %v6804_v46  ;;  %1972 = vmatprep.subr.mxu1 %v6805_v58 }
 0x539   :  { %1902 = vmatpush1.msra.mxu0 %v6806_v59  ;;  %1935 = vmatprep.mubr.f32.mxu0 %v6807_v39  ;;  %v6813_v59 = vld [vmem:[#allocation51_spill] sm:$0xff] }
 0x53a   :  { %1973 = vmatpush1.msra.mxu1 %v6808_v54  ;;  %2006 = vmatprep.mubr.f32.mxu1 %v6807_v39  ;;  %v6814_v39 = vld [vmem:[#allocation53_spill] sm:$0xff] }
 0x53b   :  { %2048 = vmatprep.subr.mxu0 %v6809_v52  ;;  %2119 = vmatprep.subr.mxu1 %v6810_v42 }
 0x5da   :  { %v1760_v7 = vpop.f32.mrf.mxu0  ;;  %v1831_v53 = vpop.f32.mrf.mxu1 }
 0x5db   :  { %v1836_v49 = vadd.f32 %v1760_v7, %v6811_v51  ;;  %v1838_v48 = vadd.f32 %v1831_v53, %v6813_v59 }
 0x5dc   :  { %v1762_v50 = vpop.f32.mrf.mxu0  ;;  %v1833_v54 = vpop.f32.mrf.mxu1 }
 0x5dd   :  { %v1840_v46 = vmul.f32 0.5, %v1836_v49  ;;  %v1837_v58 = vadd.f32 %v1762_v50, %v6812_v6  ;;  %v1839_v44 = vadd.f32 %v1833_v54, %v6814_v39  ;;  %v5343_v50 = vpop.permute.xlu1 %1861 }
 0x5de   :  { %6815 = vst [vmem:[#allocation32_spill] sm:$0xff] %v5343_v50  ;;  %vm1863_vm14 = vcmp.eq.s32.totalorder %v5343_v50, 1  ;;  %v5614_v50 = vld [vmem:[#allocation6 + $0x30] sm:$0xff] }
 0x5df   :  { %3699 = vtanh.f32 %v1840_v46  ;;  %v1844_v55 = vmul.f32 0.5, %v1837_v58  ;;  %v1849_v52 = vmul.f32 0.5, %v1839_v44  ;;  %v5432_v46 = vpop.permute.xlu0 %2038 }
 0x5e0   :  { %6843 = vst [vmem:[#allocation40_spill] sm:$0xff] %v5432_v46  ;;  %vm2040_vm15 = vcmp.eq.s32.totalorder %v5432_v46, 1  ;;  %v5618_v46 = vld [vmem:[#allocation6 + $0x8] sm:$0xff] }
 0x5e1   :  { %3701 = vtanh.f32 %v1844_v55 }
 0x5e2   :  { %3703 = vtanh.f32 %v1838_v48 }
 0x5e3   :  { %3705 = vtanh.f32 %v1849_v52 }
 0x5ec   :  { %v3700_v1 = vpop.eup %3699 }
 0x5ed   :  { %v1842_v42 = vadd.f32 1.0, %v3700_v1 }
 0x5ee   :  { %v3702_v56 = vpop.eup %3701 }
 0x5ef   :  { %v1843_v47 = vmul.f32 0.5, %v1842_v42  ;;  %v1846_v7 = vadd.f32 1.0, %v3702_v56  ;;  %v3704_v51 = vpop.eup %3703 }
 0x5f0   :  { %v3706_v1 = vpop.eup %3705 }
 0x5f1   :  { %v1847_v49 = vmul.f32 0.5, %v1846_v7  ;;  %v1854_v4 = vmul.f32 %v3704_v51, %v1843_v47  ;;  %v1851_v44 = vadd.f32 1.0, %v3706_v1  ;;  %v5443_v1 = vld [vmem:[#allocation6 + $0x1f0] sm:$0xff] }
 0x5f3   :  { %v1853_v6 = vmul.f32 %v1847_v49, %v5263_v57  ;;  %v1852_v56 = vmul.f32 0.5, %v1851_v44 }
 0x5f5   :  { %v1855_v53 = vadd.f32 %v1854_v4, %v1853_v6 }
 0x5f7   :  { %3707 = vtanh.f32 %v1855_v53  ;;  %v5349_v39 = vsel %vm1863_vm14, %v1855_v53, %v5263_v57  ;;  %v5441_v53 = vld [vmem:[#allocation6 + $0x1e0] sm:$0xff] }
 0x604   :  { %v3708_v55 = vpop.eup %3707 }
 0x605   :  { %v1857_v48 = vmul.f32 %v3708_v55, %v1852_v56  ;;  %v5450_v56 = vld [vmem:[#allocation6 + $0x1c8] sm:$0xff]  ;;  %v5452_v55 = vld [vmem:[#allocation6 + $0x1d8] sm:$0xff] }
 0x607   :  { %v5354_v47 = vsel %vm1863_vm14, %v1857_v48, %v5268_v27  ;;  %v5458_v48 = vld [vmem:[#allocation6 + $0x1d0] sm:$0xff] }
 0x608   :  { %1936 = vmatmul.mubr.f32.vlgmr.msra.gmra.mxu0 %v5354_v47  ;;  %2007 = vmatmul.mubr.f32.vlgmr.msra.gmra.mxu1 %v5354_v47 }
 0x609   :  { %2049 = vmatpush1.msra.mxu0 %v4888_v36  ;;  %2120 = vmatpush1.msra.mxu1 %v4891_v35  ;;  %v6816_v36 = vld [vmem:[#allocation16_spill] sm:$0xff]  ;;  %v6817_v35 = vld [vmem:[#allocation17_spill] sm:$0xff] }
 0x60a   :  { %2050 = vmatprep.subr.mxu0 %v4894_v24  ;;  %2121 = vmatprep.subr.mxu1 %v4897_v29  ;;  %v6818_v24 = vld [vmem:[#allocation18_spill] sm:$0xff]  ;;  %v6819_v29 = vld [vmem:[#allocation19_spill] sm:$0xff] }
 0x60b   :  { %2051 = vmatpush1.msra.mxu0 %v4900_v31  ;;  %2122 = vmatpush1.msra.mxu1 %v4903_v38  ;;  %v6820_v31 = vld [vmem:[#allocation20_spill] sm:$0xff]  ;;  %v6821_v38 = vld [vmem:[#allocation21_spill] sm:$0xff]  ;;  %6862 = vst [vmem:[#allocation18_spill] sm:$0xff] %v5614_v50  ;;  %6863 = vst [vmem:[#allocation19_spill] sm:$0xff] %v5618_v46 }
 0x60c   :  { %2052 = vmatprep.subr.mxu0 %v4906_v33  ;;  %2123 = vmatprep.subr.mxu1 %v4909_v40  ;;  %v6822_v33 = vld [vmem:[#allocation22_spill] sm:$0xff]  ;;  %v6823_v40 = vld [vmem:[#allocation23_spill] sm:$0xff] }
 0x60d   :  { %2053 = vmatpush1.msra.mxu0 %v4912_v0  ;;  %2124 = vmatpush1.msra.mxu1 %v4915_v45  ;;  %v6824_v0 = vld [vmem:[#allocation24_spill] sm:$0xff]  ;;  %v6825_v45 = vld [vmem:[#allocation25_spill] sm:$0xff] }
 0x60e   :  { %2054 = vmatprep.subr.mxu0 %v4918_v25  ;;  %2125 = vmatprep.subr.mxu1 %v4921_v30  ;;  %v6826_v25 = vld [vmem:[#allocation26_spill] sm:$0xff] }
 0x60f   :  { %2055 = vmatpush1.msra.mxu0 %v4924_v43  ;;  %2126 = vmatpush1.msra.mxu1 %v4927_v32  ;;  %v6827_v30 = vld [vmem:[#allocation10_spill] sm:$0xff]  ;;  %v6828_v43 = vld [vmem:[#allocation11_spill] sm:$0xff] }
 0x610   :  { %2056 = vmatprep.subr.mxu0 %v5018_v34  ;;  %2127 = vmatprep.subr.mxu1 %v5021_v37  ;;  %v6829_v32 = vld [vmem:[#allocation34_spill] sm:$0xff]  ;;  %v6830_v34 = vld [vmem:[#allocation36_spill] sm:$0xff]  ;;  %v6831_v37 = vld [vmem:[#allocation35_spill] sm:$0xff] }
 0x611   :  { %2057 = vmatpush1.msra.mxu0 %v5024_v26  ;;  %2128 = vmatpush1.msra.mxu1 %v5027_v28  ;;  %v6832_v26 = vld [vmem:[#allocation37_spill] sm:$0xff]  ;;  %v6833_v28 = vld [vmem:[#allocation27_spill] sm:$0xff] }
 0x612   :  { %2058 = vmatprep.subr.mxu0 %v5030_v41  ;;  %2129 = vmatprep.subr.mxu1 %v5033_v60  ;;  %v6834_v41 = vld [vmem:[#allocation28_spill] sm:$0xff]  ;;  %v6835_v60 = vld [vmem:[#allocation29_spill] sm:$0xff] }
 0x613   :  { %2059 = vmatpush1.msra.mxu0 %v5036_v61  ;;  %2130 = vmatpush1.msra.mxu1 %v5039_v62  ;;  %v6836_v61 = vmov 0.0   ;;  %v5422_v62 = vld [vmem:[#allocation6 + $0x1e8] sm:$0xff] }
 0x614   :  { %2060 = vmatprep.subr.mxu0 %v5042_v63  ;;  %2131 = vmatprep.subr.mxu1 %v5045_v2  ;;  %6837 = vst [vmem:[#allocation33_spill] sm:$0xff] %v5422_v62  ;;  %v5424_v63 = vld [vmem:[#allocation6 + $0x1f8] sm:$0xff] }
 0x615   :  { %2061 = vmatpush1.msra.mxu0 %v5048_v3  ;;  %2132 = vmatpush1.msra.mxu1 %v5051_v5  ;;  %6838 = vst [vmem:[#allocation38_spill] sm:$0xff] %v5424_v63  ;;  %v6839_v3 = vld [vmem:[#allocation54_spill] sm:$0xff] }
 0x616   :  { %2062 = vmatprep.subr.mxu0 %v5054_v8  ;;  %2133 = vmatprep.subr.mxu1 %v5057_v9 }
 0x617   :  { %2063 = vmatpush1.msra.mxu0 %v5060_v10  ;;  %2134 = vmatpush1.msra.mxu1 %v5063_v11  ;;  %v6840_v11 = vld [vmem:[#allocation56_spill] sm:$0xff] }
 0x618   :  { %2064 = vmatprep.subr.mxu0 %v5066_v12  ;;  %2135 = vmatprep.subr.mxu1 %v5069_v13  ;;  %v6841_v13 = vld [vmem:[#allocation55_spill] sm:$0xff] }
 0x619   :  { %2065 = vmatpush1.msra.mxu0 %v5072_v14  ;;  %2136 = vmatpush1.msra.mxu1 %v5075_v15 }
 0x61a   :  { %2066 = vmatprep.subr.mxu0 %v5078_v16  ;;  %2137 = vmatprep.subr.mxu1 %v5081_v17  ;;  %v6842_v17 = vld [vmem:[#allocation57_spill] sm:$0xff] }
 0x61b   :  { %2067 = vmatpush1.msra.mxu0 %v5084_v18  ;;  %2138 = vmatpush1.msra.mxu1 %v5087_v19 }
 0x61c   :  { %2068 = vmatprep.subr.mxu0 %v5090_v20  ;;  %2139 = vmatprep.subr.mxu1 %v5093_v21 }
 0x61d   :  { %2069 = vmatpush1.msra.mxu0 %v5096_v22  ;;  %2140 = vmatpush1.msra.mxu1 %v5099_v23 }
 0x61e   :  { %2070 = vmatprep.subr.mxu0 %v6816_v36  ;;  %2141 = vmatprep.subr.mxu1 %v6817_v35  ;;  %v5462_v36 = vld [vmem:[#allocation6 + $0x1a8] sm:$0xff]  ;;  %v5468_v35 = vld [vmem:[#allocation6 + $0x1a0] sm:$0xff] }
 0x61f   :  { %2071 = vmatpush1.msra.mxu0 %v6818_v24  ;;  %2142 = vmatpush1.msra.mxu1 %v6819_v29  ;;  %v5470_v24 = vld [vmem:[#allocation6 + $0x1b0] sm:$0xff]  ;;  %v5474_v29 = vld [vmem:[#allocation6 + $0x188] sm:$0xff] }
 0x620   :  { %2072 = vmatprep.subr.mxu0 %v6820_v31  ;;  %2143 = vmatprep.subr.mxu1 %v6821_v38  ;;  %v5476_v31 = vld [vmem:[#allocation6 + $0x198] sm:$0xff]  ;;  %v5480_v38 = vld [vmem:[#allocation6 + $0x180] sm:$0xff] }
 0x621   :  { %2073 = vmatpush1.msra.mxu0 %v6822_v33  ;;  %2144 = vmatpush1.msra.mxu1 %v6823_v40  ;;  %v5482_v33 = vld [vmem:[#allocation6 + $0x190] sm:$0xff]  ;;  %v5486_v40 = vld [vmem:[#allocation6 + $0x168] sm:$0xff] }
 0x622   :  { %2074 = vmatprep.subr.mxu0 %v6824_v0  ;;  %2145 = vmatprep.subr.mxu1 %v6825_v45  ;;  %v5488_v0 = vld [vmem:[#allocation6 + $0x178] sm:$0xff]  ;;  %v5492_v45 = vld [vmem:[#allocation6 + $0x160] sm:$0xff] }
 0x623   :  { %2075 = vmatpush1.msra.mxu0 %v6826_v25  ;;  %2146 = vmatpush1.msra.mxu1 %v6827_v30  ;;  %v5494_v25 = vld [vmem:[#allocation6 + $0x170] sm:$0xff]  ;;  %v5498_v30 = vld [vmem:[#allocation6 + $0x148] sm:$0xff] }
 0x624   :  { %2076 = vmatprep.subr.mxu0 %v6828_v43  ;;  %2147 = vmatprep.subr.mxu1 %v6829_v32  ;;  %v5500_v43 = vld [vmem:[#allocation6 + $0x158] sm:$0xff]  ;;  %v5504_v32 = vld [vmem:[#allocation6 + $0x140] sm:$0xff] }
 0x625   :  { %2077 = vmatpush1.msra.mxu0 %v6830_v34  ;;  %2148 = vmatpush1.msra.mxu1 %v6831_v37  ;;  %v5506_v34 = vld [vmem:[#allocation6 + $0x150] sm:$0xff]  ;;  %v5510_v37 = vld [vmem:[#allocation6 + $0x128] sm:$0xff] }
 0x626   :  { %2078 = vmatprep.subr.mxu0 %v6832_v26  ;;  %2149 = vmatprep.subr.mxu1 %v6833_v28  ;;  %v5512_v26 = vld [vmem:[#allocation6 + $0x138] sm:$0xff]  ;;  %v5516_v28 = vld [vmem:[#allocation6 + $0x120] sm:$0xff] }
 0x627   :  { %2079 = vmatpush1.msra.mxu0 %v6834_v41  ;;  %2150 = vmatpush1.msra.mxu1 %v6835_v60  ;;  %v5518_v41 = vld [vmem:[#allocation6 + $0x130] sm:$0xff]  ;;  %v5522_v60 = vld [vmem:[#allocation6 + $0x108] sm:$0xff] }
 0x628   :  { %2112 = vmatprep.mubr.f32.mxu0 %v6836_v61  ;;  %2183 = vmatprep.mubr.f32.mxu1 %v6836_v61 }
 0x629   :  { %2225 = vmatprep.subr.mxu0 %v5422_v62  ;;  %2296 = vmatprep.subr.mxu1 %v5424_v63 }
 0x6c8   :  { %v1937_v2 = vpop.f32.mrf.mxu0  ;;  %v2008_v8 = vpop.f32.mrf.mxu1 }
 0x6c9   :  { %v2013_v5 = vadd.f32 %v1937_v2, %v6839_v3  ;;  %v2015_v14 = vadd.f32 %v2008_v8, %v6841_v13  ;;  %v5524_v2 = vld [vmem:[#allocation6 + $0x118] sm:$0xff]  ;;  %v5528_v3 = vld [vmem:[#allocation6 + $0x100] sm:$0xff]  ;;  %v5534_v8 = vld [vmem:[#allocation6 + $0xe8] sm:$0xff] }
 0x6ca   :  { %v1939_v9 = vpop.f32.mrf.mxu0  ;;  %v2010_v16 = vpop.f32.mrf.mxu1  ;;  %v5548_v13 = vld [vmem:[#allocation6 + $0xd8] sm:$0xff] }
 0x6cb   :  { %v2017_v10 = vmul.f32 0.5, %v2013_v5  ;;  %v2014_v12 = vadd.f32 %v1939_v9, %v6840_v11  ;;  %v2016_v18 = vadd.f32 %v2010_v16, %v6842_v17  ;;  %v5530_v5 = vld [vmem:[#allocation6 + $0x110] sm:$0xff]  ;;  %v5536_v9 = vld [vmem:[#allocation6 + $0xf8] sm:$0xff]  ;;  %v5558_v16 = vld [vmem:[#allocation6 + $0xa8] sm:$0xff] }
 0x6cc   :  { %v5542_v11 = vld [vmem:[#allocation6 + $0xf0] sm:$0xff]  ;;  %v5560_v17 = vld [vmem:[#allocation6 + $0xb8] sm:$0xff] }
 0x6cd   :  { %3709 = vtanh.f32 %v2017_v10  ;;  %v2021_v15 = vmul.f32 0.5, %v2014_v12  ;;  %v2026_v19 = vmul.f32 0.5, %v2016_v18  ;;  %v5540_v10 = vld [vmem:[#allocation6 + $0xe0] sm:$0xff]  ;;  %v5546_v12 = vld [vmem:[#allocation6 + $0xc8] sm:$0xff] }
 0x6ce   :  { %v5564_v18 = vld [vmem:[#allocation6 + $0xa0] sm:$0xff] }
 0x6cf   :  { %3711 = vtanh.f32 %v2021_v15  ;;  %v5554_v15 = vld [vmem:[#allocation6 + $0xd0] sm:$0xff]  ;;  %6846 = vst [vmem:[#allocation42_spill] sm:$0xff] %v5564_v18 }
 0x6d0   :  { %3713 = vtanh.f32 %v2015_v14  ;;  %v5552_v14 = vld [vmem:[#allocation6 + $0xc0] sm:$0xff] }
 0x6d1   :  { %3715 = vtanh.f32 %v2026_v19  ;;  %v5566_v19 = vld [vmem:[#allocation6 + $0xb0] sm:$0xff] }
 0x6da   :  { %v3710_v20 = vpop.eup %3709 }
 0x6db   :  { %v2019_v21 = vadd.f32 1.0, %v3710_v20  ;;  %v5570_v20 = vld [vmem:[#allocation6 + $0x88] sm:$0xff] }
 0x6dc   :  { %v3712_v22 = vpop.eup %3711  ;;  %6847 = vst [vmem:[#allocation44_spill] sm:$0xff] %v5570_v20 }
 0x6dd   :  { %v2020_v23 = vmul.f32 0.5, %v2019_v21  ;;  %v2023_v57 = vadd.f32 1.0, %v3712_v22  ;;  %v3714_v27 = vpop.eup %3713  ;;  %v5572_v21 = vld [vmem:[#allocation6 + $0x98] sm:$0xff]  ;;  %v5576_v22 = vld [vmem:[#allocation6 + $0x80] sm:$0xff] }
 0x6de   :  { %v3716_v42 = vpop.eup %3715  ;;  %6848 = vst [vmem:[#allocation43_spill] sm:$0xff] %v5572_v21  ;;  %6849 = vst [vmem:[#allocation45_spill] sm:$0xff] %v5576_v22 }
 0x6df   :  { %v2024_v4 = vmul.f32 0.5, %v2023_v57  ;;  %v2031_v54 = vmul.f32 %v3714_v27, %v2020_v23  ;;  %v2028_v7 = vadd.f32 1.0, %v3716_v42  ;;  %v5578_v23 = vld [vmem:[#allocation6 + $0x90] sm:$0xff]  ;;  %v5582_v57 = vld [vmem:[#allocation6 + $0x68] sm:$0xff]  ;;  %v5584_v27 = vld [vmem:[#allocation6 + $0x78] sm:$0xff] }
 0x6e0   :  { %6850 = vst [vmem:[#allocation46_spill] sm:$0xff] %v5578_v23  ;;  %6851 = vst [vmem:[#allocation48_spill] sm:$0xff] %v5582_v57  ;;  %v5600_v42 = vld [vmem:[#allocation6 + $0x40] sm:$0xff] }
 0x6e1   :  { %v2030_v58 = vmul.f32 %v2024_v4, %v5349_v39  ;;  %v2029_v51 = vmul.f32 0.5, %v2028_v7  ;;  %6852 = vst [vmem:[#allocation47_spill] sm:$0xff] %v5584_v27  ;;  %v5588_v4 = vld [vmem:[#allocation6 + $0x60] sm:$0xff]  ;;  %6857 = vst [vmem:[#allocation52_spill] sm:$0xff] %v5600_v42  ;;  %v5602_v7 = vld [vmem:[#allocation6 + $0x50] sm:$0xff] }
 0x6e2   :  { %6853 = vst [vmem:[#allocation49_spill] sm:$0xff] %v5588_v4  ;;  %6858 = vst [vmem:[#allocation51_spill] sm:$0xff] %v5602_v7 }
 0x6e3   :  { %v2032_v59 = vadd.f32 %v2031_v54, %v2030_v58  ;;  %v5590_v54 = vld [vmem:[#allocation6 + $0x70] sm:$0xff]  ;;  %v5594_v58 = vld [vmem:[#allocation6 + $0x48] sm:$0xff] }
 0x6e4   :  { %6854 = vst [vmem:[#allocation12_spill] sm:$0xff] %v5590_v54  ;;  %6855 = vst [vmem:[#allocation14_spill] sm:$0xff] %v5594_v58 }
 0x6e5   :  { %3717 = vtanh.f32 %v2032_v59  ;;  %v5439_v52 = vsel %vm2040_vm15, %v2032_v59, %v5349_v39  ;;  %v5456_v39 = vld [vmem:[#allocation6 + $0x1c0] sm:$0xff]  ;;  %v5596_v59 = vld [vmem:[#allocation6 + $0x58] sm:$0xff] }
 0x6e6   :  { %6844 = vst [vmem:[#allocation39_spill] sm:$0xff] %v5439_v52  ;;  %6856 = vst [vmem:[#allocation50_spill] sm:$0xff] %v5596_v59  ;;  %v5624_v52 = vld [vmem:[#allocation6] sm:$0xff] }
 0x6e7   :  { %6865 = vst [vmem:[#allocation21_spill] sm:$0xff] %v5624_v52 }
 0x6f2   :  { %v3718_v49 = vpop.eup %3717 }
 0x6f3   :  { %v2034_v6 = vmul.f32 %v3718_v49, %v2029_v51  ;;  %v5606_v51 = vld [vmem:[#allocation6 + $0x28] sm:$0xff]  ;;  %v5608_v49 = vld [vmem:[#allocation6 + $0x38] sm:$0xff] }
 0x6f4   :  { %6859 = vst [vmem:[#allocation53_spill] sm:$0xff] %v5606_v51  ;;  %6860 = vst [vmem:[#allocation16_spill] sm:$0xff] %v5608_v49 }
 0x6f5   :  { %v5448_v44 = vsel %vm2040_vm15, %v2034_v6, %v5354_v47  ;;  %v5464_v47 = vld [vmem:[#allocation6 + $0x1b8] sm:$0xff]  ;;  %v5612_v6 = vld [vmem:[#allocation6 + $0x20] sm:$0xff] }
 0x6f6   :  { %6845 = vst [vmem:[#allocation41_spill] sm:$0xff] %v5448_v44  ;;  %2113 = vmatmul.mubr.f32.vlgmr.msra.gmra.mxu0 %v5448_v44  ;;  %2184 = vmatmul.mubr.f32.vlgmr.msra.gmra.mxu1 %v5448_v44  ;;  %6861 = vst [vmem:[#allocation17_spill] sm:$0xff] %v5612_v6  ;;  %v5620_v44 = vld [vmem:[#allocation6 + $0x18] sm:$0xff] }
 0x6f7   :  { %2226 = vmatpush1.msra.mxu0 %v5441_v53  ;;  %2297 = vmatpush1.msra.mxu1 %v5443_v1  ;;  %6864 = vst [vmem:[#allocation20_spill] sm:$0xff] %v5620_v44 }
 0x6f8   :  { %2227 = vmatprep.subr.mxu0 %v5450_v56  ;;  %2298 = vmatprep.subr.mxu1 %v5452_v55 }
 0x6f9   :  { %2228 = vmatpush1.msra.mxu0 %v5456_v39  ;;  %2299 = vmatpush1.msra.mxu1 %v5458_v48 }
 0x6fa   :  { %2229 = vmatprep.subr.mxu0 %v5462_v36  ;;  %2300 = vmatprep.subr.mxu1 %v5464_v47 }
 0x6fb   :  { %2230 = vmatpush1.msra.mxu0 %v5468_v35  ;;  %2301 = vmatpush1.msra.mxu1 %v5470_v24 }
 0x6fc   :  { %2231 = vmatprep.subr.mxu0 %v5474_v29  ;;  %2302 = vmatprep.subr.mxu1 %v5476_v31 }
 0x6fd   :  { %2232 = vmatpush1.msra.mxu0 %v5480_v38  ;;  %2303 = vmatpush1.msra.mxu1 %v5482_v33 }
 0x6fe   :  { %2233 = vmatprep.subr.mxu0 %v5486_v40  ;;  %2304 = vmatprep.subr.mxu1 %v5488_v0 }
 0x6ff   :  { %2234 = vmatpush1.msra.mxu0 %v5492_v45  ;;  %2305 = vmatpush1.msra.mxu1 %v5494_v25 }
 0x700   :  { %2235 = vmatprep.subr.mxu0 %v5498_v30  ;;  %2306 = vmatprep.subr.mxu1 %v5500_v43 }
 0x701   :  { %2236 = vmatpush1.msra.mxu0 %v5504_v32  ;;  %2307 = vmatpush1.msra.mxu1 %v5506_v34 }
 0x702   :  { %2237 = vmatprep.subr.mxu0 %v5510_v37  ;;  %2308 = vmatprep.subr.mxu1 %v5512_v26 }
 0x703   :  { %2238 = vmatpush1.msra.mxu0 %v5516_v28  ;;  %2309 = vmatpush1.msra.mxu1 %v5518_v41 }
 0x704   :  { %2239 = vmatprep.subr.mxu0 %v5522_v60  ;;  %2310 = vmatprep.subr.mxu1 %v5524_v2 }
 0x705   :  { %2240 = vmatpush1.msra.mxu0 %v5528_v3  ;;  %2311 = vmatpush1.msra.mxu1 %v5530_v5 }
 0x706   :  { %2241 = vmatprep.subr.mxu0 %v5534_v8  ;;  %2312 = vmatprep.subr.mxu1 %v5536_v9 }
 0x707   :  { %2242 = vmatpush1.msra.mxu0 %v5540_v10  ;;  %2313 = vmatpush1.msra.mxu1 %v5542_v11 }
 0x708   :  { %2243 = vmatprep.subr.mxu0 %v5546_v12  ;;  %2314 = vmatprep.subr.mxu1 %v5548_v13 }
 0x709   :  { %2244 = vmatpush1.msra.mxu0 %v5552_v14  ;;  %2315 = vmatpush1.msra.mxu1 %v5554_v15 }
 0x70a   :  { %2245 = vmatprep.subr.mxu0 %v5558_v16  ;;  %2316 = vmatprep.subr.mxu1 %v5560_v17 }
 0x70b   :  { %2246 = vmatpush1.msra.mxu0 %v5564_v18  ;;  %2317 = vmatpush1.msra.mxu1 %v5566_v19 }
 0x70c   :  { %2247 = vmatprep.subr.mxu0 %v5570_v20  ;;  %2318 = vmatprep.subr.mxu1 %v5572_v21 }
 0x70d   :  { %2248 = vmatpush1.msra.mxu0 %v5576_v22  ;;  %2319 = vmatpush1.msra.mxu1 %v5578_v23 }
 0x70e   :  { %2249 = vmatprep.subr.mxu0 %v5582_v57  ;;  %2320 = vmatprep.subr.mxu1 %v5584_v27 }
 0x70f   :  { %2250 = vmatpush1.msra.mxu0 %v5588_v4  ;;  %2321 = vmatpush1.msra.mxu1 %v5590_v54 }
 0x710   :  { %2251 = vmatprep.subr.mxu0 %v5594_v58  ;;  %2322 = vmatprep.subr.mxu1 %v5596_v59  ;;  %v5628_v59 = vld [vmem:[#allocation6 + $0x10] sm:$0xff] }
 0x711   :  { %2252 = vmatpush1.msra.mxu0 %v5600_v42  ;;  %2323 = vmatpush1.msra.mxu1 %v5602_v7  ;;  %6866 = vst [vmem:[#allocation22_spill] sm:$0xff] %v5628_v59 }
 0x712   :  { %2253 = vmatprep.subr.mxu0 %v5606_v51  ;;  %2324 = vmatprep.subr.mxu1 %v5608_v49 }
 0x713   :  { %2254 = vmatpush1.msra.mxu0 %v5612_v6  ;;  %2325 = vmatpush1.msra.mxu1 %v5614_v50 }
 0x714   :  { %2255 = vmatprep.subr.mxu0 %v5618_v46  ;;  %2326 = vmatprep.subr.mxu1 %v5620_v44 }
 0x715   :  { %2256 = vmatpush1.msra.mxu0 %v5624_v52  ;;  %2289 = vmatprep.mubr.f32.mxu0 %v6836_v61 }
 0x716   :  { %2327 = vmatpush1.msra.mxu1 %v5628_v59  ;;  %2360 = vmatprep.mubr.f32.mxu1 %v6836_v61 }
 0x717   :  { %2290 = vmatmul.mubr.f32.vlgmr.msra.gmra.mxu0 %v6836_v61  ;;  %2361 = vmatmul.mubr.f32.vlgmr.msra.gmra.mxu1 %v6836_v61 }
 0x718   :  { %2396 = vmatprep.subr.mxu0 %v5422_v62  ;;  %2467 = vmatprep.subr.mxu1 %v5424_v63 }
 0x719   :  { %2397 = vmatpush1.msra.mxu0 %v5441_v53  ;;  %2468 = vmatpush1.msra.mxu1 %v5443_v1 }
 0x71a   :  { %2398 = vmatprep.subr.mxu0 %v5450_v56  ;;  %2469 = vmatprep.subr.mxu1 %v5452_v55 }
 0x71b   :  { %2399 = vmatpush1.msra.mxu0 %v5456_v39  ;;  %2470 = vmatpush1.msra.mxu1 %v5458_v48 }
 0x71c   :  { %2400 = vmatprep.subr.mxu0 %v5462_v36  ;;  %2471 = vmatprep.subr.mxu1 %v5464_v47 }
 0x71d   :  { %2401 = vmatpush1.msra.mxu0 %v5468_v35  ;;  %2472 = vmatpush1.msra.mxu1 %v5470_v24 }
 0x71e   :  { %2402 = vmatprep.subr.mxu0 %v5474_v29  ;;  %2473 = vmatprep.subr.mxu1 %v5476_v31 }
 0x71f   :  { %2403 = vmatpush1.msra.mxu0 %v5480_v38  ;;  %2474 = vmatpush1.msra.mxu1 %v5482_v33 }
 0x720   :  { %2404 = vmatprep.subr.mxu0 %v5486_v40  ;;  %2475 = vmatprep.subr.mxu1 %v5488_v0 }
 0x721   :  { %2405 = vmatpush1.msra.mxu0 %v5492_v45  ;;  %2476 = vmatpush1.msra.mxu1 %v5494_v25 }
 0x722   :  { %2406 = vmatprep.subr.mxu0 %v5498_v30  ;;  %2477 = vmatprep.subr.mxu1 %v5500_v43 }
 0x723   :  { %2407 = vmatpush1.msra.mxu0 %v5504_v32  ;;  %2478 = vmatpush1.msra.mxu1 %v5506_v34 }
 0x724   :  { %2408 = vmatprep.subr.mxu0 %v5510_v37  ;;  %2479 = vmatprep.subr.mxu1 %v5512_v26 }
 0x725   :  { %2409 = vmatpush1.msra.mxu0 %v5516_v28  ;;  %2480 = vmatpush1.msra.mxu1 %v5518_v41 }
 0x726   :  { %2410 = vmatprep.subr.mxu0 %v5522_v60  ;;  %2481 = vmatprep.subr.mxu1 %v5524_v2 }
 0x727   :  { %2411 = vmatpush1.msra.mxu0 %v5528_v3  ;;  %2482 = vmatpush1.msra.mxu1 %v5530_v5 }
 0x728   :  { %2412 = vmatprep.subr.mxu0 %v5534_v8  ;;  %2483 = vmatprep.subr.mxu1 %v5536_v9 }
 0x729   :  { %2413 = vmatpush1.msra.mxu0 %v5540_v10  ;;  %2484 = vmatpush1.msra.mxu1 %v5542_v11 }
 0x72a   :  { %2414 = vmatprep.subr.mxu0 %v5546_v12  ;;  %2485 = vmatprep.subr.mxu1 %v5548_v13 }
 0x72b   :  { %2415 = vmatpush1.msra.mxu0 %v5552_v14  ;;  %2486 = vmatpush1.msra.mxu1 %v5554_v15 }
 0x72c   :  { %2416 = vmatprep.subr.mxu0 %v5558_v16  ;;  %2487 = vmatprep.subr.mxu1 %v5560_v17 }
 0x72d   :  { %2417 = vmatpush1.msra.mxu0 %v5564_v18  ;;  %2488 = vmatpush1.msra.mxu1 %v5566_v19  ;;  %v6867_v18 = vld [vmem:[#allocation50_spill] sm:$0xff] }
 0x72e   :  { %2418 = vmatprep.subr.mxu0 %v5570_v20  ;;  %2489 = vmatprep.subr.mxu1 %v5572_v21  ;;  %v6879_v20 = vld [vmem:[#allocation65_spill] sm:$0xff] }
 0x72f   :  { %2419 = vmatpush1.msra.mxu0 %v5576_v22  ;;  %2490 = vmatpush1.msra.mxu1 %v5578_v23 }
 0x730   :  { %2420 = vmatprep.subr.mxu0 %v5582_v57  ;;  %2491 = vmatprep.subr.mxu1 %v5584_v27 }
 0x731   :  { %2421 = vmatpush1.msra.mxu0 %v5588_v4  ;;  %2492 = vmatpush1.msra.mxu1 %v5590_v54 }
 0x732   :  { %2422 = vmatprep.subr.mxu0 %v5594_v58  ;;  %2493 = vmatprep.subr.mxu1 %v6867_v18 }
 0x733   :  { %2423 = vmatpush1.msra.mxu0 %v5600_v42  ;;  %2494 = vmatpush1.msra.mxu1 %v5602_v7  ;;  %v6869_v42 = vld [vmem:[#allocation62_spill] sm:$0xff] }
 0x734   :  { %2424 = vmatprep.subr.mxu0 %v5606_v51  ;;  %2495 = vmatprep.subr.mxu1 %v5608_v49 }
 0x735   :  { %2425 = vmatpush1.msra.mxu0 %v5612_v6  ;;  %2496 = vmatpush1.msra.mxu1 %v5614_v50  ;;  %v6868_v6 = vld [vmem:[#allocation58_spill] sm:$0xff] }
 0x736   :  { %2426 = vmatprep.subr.mxu0 %v5618_v46  ;;  %2497 = vmatprep.subr.mxu1 %v5620_v44 }
 0x737   :  { %2427 = vmatpush1.msra.mxu0 %v5624_v52  ;;  %2460 = vmatprep.mubr.f32.mxu0 %v6836_v61  ;;  %v6870_v52 = vld [vmem:[#allocation59_spill] sm:$0xff] }
 0x738   :  { %2498 = vmatpush1.msra.mxu1 %v5628_v59  ;;  %2531 = vmatprep.mubr.f32.mxu1 %v6836_v61  ;;  %v6871_v61 = vld [vmem:[#allocation63_spill] sm:$0xff] }
 0x739   :  { %2567 = vmatprep.subr.mxu0 %v5422_v62  ;;  %2638 = vmatprep.subr.mxu1 %v5424_v63 }
 0x7b6   :  { %v2114_v49 = vpop.f32.mrf.mxu0  ;;  %v2185_v50 = vpop.f32.mrf.mxu1 }
 0x7b7   :  { %v2190_v51 = vadd.f32 %v2114_v49, %v6868_v6  ;;  %v2192_v18 = vadd.f32 %v2185_v50, %v6870_v52 }
 0x7b8   :  { %v2116_v7 = vpop.f32.mrf.mxu0  ;;  %v2187_v59 = vpop.f32.mrf.mxu1 }
 0x7b9   :  { %v2194_v46 = vmul.f32 0.5, %v2190_v51  ;;  %v2191_v44 = vadd.f32 %v2116_v7, %v6869_v42  ;;  %v2193_v54 = vadd.f32 %v2187_v59, %v6871_v61  ;;  %v2216_v42 = vpop.permute.xlu1 %2215  ;;  %v6873_v61 = vld [vmem:[#allocation60_spill] sm:$0xff]  ;;  %v6877_v59 = vld [vmem:[#allocation61_spill] sm:$0xff] }
 0x7ba   :  { %vm2217_vm0 = vcmp.eq.s32.totalorder %v2216_v42, 1  ;;  %v6882_v42 = vld [vmem:[#allocation42_spill] sm:$0xff] }
 0x7bb   :  { %3719 = vtanh.f32 %v2194_v46  ;;  %v2198_v58 = vmul.f32 0.5, %v2191_v44  ;;  %v2203_v62 = vmul.f32 0.5, %v2193_v54  ;;  %v6872_v46 = vld [vmem:[#allocation39_spill] sm:$0xff] }
 0x7bd   :  { %3721 = vtanh.f32 %v2198_v58 }
 0x7be   :  { %3723 = vtanh.f32 %v2192_v18 }
 0x7bf   :  { %3725 = vtanh.f32 %v2203_v62 }
 0x7c8   :  { %v3720_v4 = vpop.eup %3719 }
 0x7c9   :  { %v2196_v63 = vadd.f32 1.0, %v3720_v4 }
 0x7ca   :  { %v3722_v27 = vpop.eup %3721 }
 0x7cb   :  { %v2197_v57 = vmul.f32 0.5, %v2196_v63  ;;  %v2200_v49 = vadd.f32 1.0, %v3722_v27  ;;  %v3724_v6 = vpop.eup %3723  ;;  %v6874_v63 = vld [vmem:[#allocation94_spill] sm:$0xff]  ;;  %v6875_v27 = vld [vmem:[#allocation64_spill] sm:$0xff] }
 0x7cc   :  { %v495_v44 = vadd.f32 %v6874_v63, %v6873_v61  ;;  %v3726_v18 = vpop.eup %3725 }
 0x7cd   :  { %v2201_v51 = vmul.f32 0.5, %v2200_v49  ;;  %v2208_v23 = vmul.f32 %v3724_v6, %v2197_v57  ;;  %v6876_v57 = vld [vmem:[#allocation96_spill] sm:$0xff]  ;;  %v6878_v49 = vld [vmem:[#allocation95_spill] sm:$0xff] }
 0x7ce   :  { %v497_v4 = vadd.f32 %v6876_v57, %v6875_v27  ;;  %v608_v6 = vadd.f32 %v6878_v49, %v6877_v59  ;;  %v6880_v27 = vld [vmem:[#allocation97_spill] sm:$0xff] }
 0x7cf   :  { %v2207_v7 = vmul.f32 %v2201_v51, %v6872_v46 }
 0x7d1   :  { %v2209_v50 = vadd.f32 %v2208_v23, %v2207_v7  ;;  %v2205_v7 = vadd.f32 1.0, %v3726_v18 }
 0x7d3   :  { %3727 = vtanh.f32 %v2209_v50  ;;  %v2219_v52 = vsel %vm2217_vm0, %v2209_v50, %v6872_v46  ;;  %v2206_v22 = vmul.f32 0.5, %v2205_v7 }
 0x7d4   :  { %3590 = vst [vmem:[%s6376_s7] sm:$0xff] %v2219_v52 }
 0x7d7   :  { %v2291_v62 = vpop.f32.mrf.mxu0  ;;  %v2362_v58 = vpop.f32.mrf.mxu1 }
 0x7d8   :  { %v2367_v54 = vadd.f32 %v2291_v62, %v495_v44  ;;  %v2369_v50 = vadd.f32 %v2362_v58, %v608_v6  ;;  %v610_v44 = vadd.f32 %v6880_v27, %v6879_v20  ;;  %v6881_v62 = vld [vmem:[#allocation41_spill] sm:$0xff] }
 0x7d9   :  { %v2293_v23 = vpop.f32.mrf.mxu0  ;;  %v2364_v21 = vpop.f32.mrf.mxu1 }
 0x7da   :  { %v2371_v51 = vmul.f32 0.5, %v2367_v54  ;;  %v2368_v46 = vadd.f32 %v2293_v23, %v497_v4  ;;  %v2370_v18 = vadd.f32 %v2364_v21, %v610_v44  ;;  %v6883_v44 = vld [vmem:[#allocation44_spill] sm:$0xff] }
 0x7dc   :  { %3729 = vtanh.f32 %v2371_v51  ;;  %v2375_v52 = vmul.f32 0.5, %v2368_v46  ;;  %v2380_v4 = vmul.f32 0.5, %v2370_v18  ;;  %v6886_v18 = vld [vmem:[#allocation46_spill] sm:$0xff] }
 0x7de   :  { %3731 = vtanh.f32 %v2375_v52 }
 0x7df   :  { %3733 = vtanh.f32 %v2369_v50 }
 0x7e0   :  { %v3728_v61 = vpop.eup %3727  ;;  %3735 = vtanh.f32 %v2380_v4  ;;  %v6887_v4 = vld [vmem:[#allocation48_spill] sm:$0xff] }
 0x7e1   :  { %v2211_v63 = vmul.f32 %v3728_v61, %v2206_v22 }
 0x7e3   :  { %v2218_v57 = vsel %vm2217_vm0, %v2211_v63, %v6881_v62  ;;  %v6884_v62 = vld [vmem:[#allocation43_spill] sm:$0xff] }
 0x7e4   :  { %3587 = vst [vmem:[%s6375_s6] sm:$0xff] %v2218_v57  ;;  %v6885_v57 = vld [vmem:[#allocation45_spill] sm:$0xff] }
 0x7e9   :  { %v3730_v54 = vpop.eup %3729 }
 0x7ea   :  { %v2373_v58 = vadd.f32 1.0, %v3730_v54  ;;  %v6888_v54 = vld [vmem:[#allocation47_spill] sm:$0xff] }
 0x7eb   :  { %v3732_v23 = vpop.eup %3731 }
 0x7ec   :  { %v2374_v59 = vmul.f32 0.5, %v2373_v58  ;;  %v2377_v49 = vadd.f32 1.0, %v3732_v23  ;;  %v3734_v22 = vpop.eup %3733  ;;  %v6889_v58 = vld [vmem:[#allocation49_spill] sm:$0xff]  ;;  %v6890_v23 = vld [vmem:[#allocation12_spill] sm:$0xff] }
 0x7ed   :  { %v3736_v50 = vpop.eup %3735 }
 0x7ee   :  { %v2378_v6 = vmul.f32 0.5, %v2377_v49  ;;  %v2385_v51 = vmul.f32 %v3734_v22, %v2374_v59  ;;  %v2382_v52 = vadd.f32 1.0, %v3736_v50  ;;  %v6891_v59 = vld [vmem:[#allocation14_spill] sm:$0xff]  ;;  %v6893_v22 = vld [vmem:[#allocation52_spill] sm:$0xff] }
 0x7ef   :  { %v6892_v49 = vld [vmem:[#allocation50_spill] sm:$0xff] }
 0x7f0   :  { %v2384_v46 = vmul.f32 0.0, %v2378_v6  ;;  %v2383_v61 = vmul.f32 0.5, %v2382_v52  ;;  %v6894_v6 = vld [vmem:[#allocation51_spill] sm:$0xff]  ;;  %v6898_v50 = vld [vmem:[#allocation18_spill] sm:$0xff] }
 0x7f1   :  { %v6899_v52 = vld [vmem:[#allocation19_spill] sm:$0xff] }
 0x7f2   :  { %v2386_v20 = vadd.f32 %v2385_v51, %v2384_v46  ;;  %v6895_v51 = vld [vmem:[#allocation53_spill] sm:$0xff]  ;;  %v6896_v46 = vld [vmem:[#allocation16_spill] sm:$0xff] }
 0x7f4   :  { %3737 = vtanh.f32 %v2386_v20  ;;  %v5730_v7 = vsel %vm2217_vm0, %v2386_v20, 0.0  ;;  %v6897_v20 = vld [vmem:[#allocation17_spill] sm:$0xff] }
 0x801   :  { %v3738_v21 = vpop.eup %3737 }
 0x802   :  { %v2388_v63 = vmul.f32 %v3738_v21, %v2383_v61  ;;  %v6900_v61 = vld [vmem:[#allocation20_spill] sm:$0xff]  ;;  %v6901_v21 = vld [vmem:[#allocation21_spill] sm:$0xff] }
 0x804   :  { %3637 = vmatmul.mubr.msk.f32.vlgmr.msra.gmra.mxu0 %vm2217_vm0, %v2388_v63  ;;  %3638 = vmatmul.mubr.msk.f32.vlgmr.msra.gmra.mxu1 %vm2217_vm0, %v2388_v63  ;;  %v5735_v27 = vsel %vm2217_vm0, %v2388_v63, 0.0  ;;  %v6902_v63 = vmov 0.0  }
 0x805   :  { %2568 = vmatpush1.msra.mxu0 %v5441_v53  ;;  %2639 = vmatpush1.msra.mxu1 %v5443_v1 }
 0x806   :  { %2569 = vmatprep.subr.mxu0 %v5450_v56  ;;  %2640 = vmatprep.subr.mxu1 %v5452_v55 }
 0x807   :  { %2570 = vmatpush1.msra.mxu0 %v5456_v39  ;;  %2641 = vmatpush1.msra.mxu1 %v5458_v48 }
 0x808   :  { %2571 = vmatprep.subr.mxu0 %v5462_v36  ;;  %2642 = vmatprep.subr.mxu1 %v5464_v47 }
 0x809   :  { %2572 = vmatpush1.msra.mxu0 %v5468_v35  ;;  %2643 = vmatpush1.msra.mxu1 %v5470_v24 }
 0x80a   :  { %2573 = vmatprep.subr.mxu0 %v5474_v29  ;;  %2644 = vmatprep.subr.mxu1 %v5476_v31 }
 0x80b   :  { %2574 = vmatpush1.msra.mxu0 %v5480_v38  ;;  %2645 = vmatpush1.msra.mxu1 %v5482_v33 }
 0x80c   :  { %2575 = vmatprep.subr.mxu0 %v5486_v40  ;;  %2646 = vmatprep.subr.mxu1 %v5488_v0 }
 0x80d   :  { %2576 = vmatpush1.msra.mxu0 %v5492_v45  ;;  %2647 = vmatpush1.msra.mxu1 %v5494_v25 }
 0x80e   :  { %2577 = vmatprep.subr.mxu0 %v5498_v30  ;;  %2648 = vmatprep.subr.mxu1 %v5500_v43 }
 0x80f   :  { %2578 = vmatpush1.msra.mxu0 %v5504_v32  ;;  %2649 = vmatpush1.msra.mxu1 %v5506_v34 }
 0x810   :  { %2579 = vmatprep.subr.mxu0 %v5510_v37  ;;  %2650 = vmatprep.subr.mxu1 %v5512_v26 }
 0x811   :  { %2580 = vmatpush1.msra.mxu0 %v5516_v28  ;;  %2651 = vmatpush1.msra.mxu1 %v5518_v41 }
 0x812   :  { %2581 = vmatprep.subr.mxu0 %v5522_v60  ;;  %2652 = vmatprep.subr.mxu1 %v5524_v2 }
 0x813   :  { %2582 = vmatpush1.msra.mxu0 %v5528_v3  ;;  %2653 = vmatpush1.msra.mxu1 %v5530_v5 }
 0x814   :  { %2583 = vmatprep.subr.mxu0 %v5534_v8  ;;  %2654 = vmatprep.subr.mxu1 %v5536_v9 }
 0x815   :  { %2584 = vmatpush1.msra.mxu0 %v5540_v10  ;;  %2655 = vmatpush1.msra.mxu1 %v5542_v11 }
 0x816   :  { %2585 = vmatprep.subr.mxu0 %v5546_v12  ;;  %2656 = vmatprep.subr.mxu1 %v5548_v13 }
 0x817   :  { %2586 = vmatpush1.msra.mxu0 %v5552_v14  ;;  %2657 = vmatpush1.msra.mxu1 %v5554_v15 }
 0x818   :  { %2587 = vmatprep.subr.mxu0 %v5558_v16  ;;  %2658 = vmatprep.subr.mxu1 %v5560_v17 }
 0x819   :  { %2588 = vmatpush1.msra.mxu0 %v6882_v42  ;;  %2659 = vmatpush1.msra.mxu1 %v5566_v19 }
 0x81a   :  { %2589 = vmatprep.subr.mxu0 %v6883_v44  ;;  %2660 = vmatprep.subr.mxu1 %v6884_v62 }
 0x81b   :  { %2590 = vmatpush1.msra.mxu0 %v6885_v57  ;;  %2661 = vmatpush1.msra.mxu1 %v6886_v18 }
 0x81c   :  { %2591 = vmatprep.subr.mxu0 %v6887_v4  ;;  %2662 = vmatprep.subr.mxu1 %v6888_v54 }
 0x81d   :  { %2592 = vmatpush1.msra.mxu0 %v6889_v58  ;;  %2663 = vmatpush1.msra.mxu1 %v6890_v23  ;;  %v6907_v23 = vld [vmem:[#allocation92_spill] sm:$0xff] }
 0x81e   :  { %2593 = vmatprep.subr.mxu0 %v6891_v59  ;;  %2664 = vmatprep.subr.mxu1 %v6892_v49  ;;  %v6903_v49 = vld [vmem:[#allocation22_spill] sm:$0xff] }
 0x81f   :  { %2594 = vmatpush1.msra.mxu0 %v6893_v22  ;;  %2665 = vmatpush1.msra.mxu1 %v6894_v6  ;;  %v6904_v6 = vld [vmem:[#allocation33_spill] sm:$0xff] }
 0x820   :  { %2595 = vmatprep.subr.mxu0 %v6895_v51  ;;  %2666 = vmatprep.subr.mxu1 %v6896_v46  ;;  %v6905_v51 = vld [vmem:[#allocation38_spill] sm:$0xff] }
 0x821   :  { %2596 = vmatpush1.msra.mxu0 %v6897_v20  ;;  %2667 = vmatpush1.msra.mxu1 %v6898_v50  ;;  %v6906_v20 = vld [vmem:[#allocation90_spill] sm:$0xff] }
 0x822   :  { %2597 = vmatprep.subr.mxu0 %v6899_v52  ;;  %2668 = vmatprep.subr.mxu1 %v6900_v61 }
 0x823   :  { %2598 = vmatpush1.msra.mxu0 %v6901_v21  ;;  %2631 = vmatprep.mubr.f32.mxu0 %v6902_v63  ;;  %v6908_v21 = vld [vmem:[#allocation91_spill] sm:$0xff] }
 0x824   :  { %2669 = vmatpush1.msra.mxu1 %v6903_v49  ;;  %2702 = vmatprep.mubr.f32.mxu1 %v6902_v63  ;;  %v6909_v63 = vld [vmem:[#allocation93_spill] sm:$0xff] }
 0x825   :  { %2738 = vmatprep.subr.mxu0 %v6904_v6  ;;  %2809 = vmatprep.subr.mxu1 %v6905_v51 }
 0x8c4   :  { %v2462_v46 = vpop.f32.mrf.mxu0  ;;  %v2533_v50 = vpop.f32.mrf.mxu1 }
 0x8c5   :  { %v2538_v22 = vadd.f32 %v2462_v46, %v6906_v20  ;;  %v2540_v58 = vadd.f32 %v2533_v50, %v6908_v21  ;;  %v6918_v21 = vld [vmem:[#allocation12_spill] sm:$0xff] }
 0x8c6   :  { %v2464_v59 = vpop.f32.mrf.mxu0  ;;  %v2535_v49 = vpop.f32.mrf.mxu1 }
 0x8c7   :  { %v2542_v52 = vmul.f32 0.5, %v2538_v22  ;;  %v2539_v61 = vadd.f32 %v2464_v59, %v6907_v23  ;;  %v2541_v4 = vadd.f32 %v2535_v49, %v6909_v63  ;;  %v6919_v63 = vld [vmem:[#allocation14_spill] sm:$0xff] }
 0x8c9   :  { %3739 = vtanh.f32 %v2542_v52  ;;  %v2546_v54 = vmul.f32 0.5, %v2539_v61  ;;  %v2551_v6 = vmul.f32 0.5, %v2541_v4  ;;  %v6917_v61 = vld [vmem:[#allocation49_spill] sm:$0xff] }
 0x8cb   :  { %3741 = vtanh.f32 %v2546_v54  ;;  %v6925_v54 = vld [vmem:[#allocation17_spill] sm:$0xff] }
 0x8cc   :  { %3743 = vtanh.f32 %v2540_v58 }
 0x8cd   :  { %3745 = vtanh.f32 %v2551_v6  ;;  %v6915_v6 = vld [vmem:[#allocation48_spill] sm:$0xff] }
 0x8d6   :  { %v3740_v18 = vpop.eup %3739 }
 0x8d7   :  { %v2544_v51 = vadd.f32 1.0, %v3740_v18 }
 0x8d8   :  { %v3742_v57 = vpop.eup %3741 }
 0x8d9   :  { %v2545_v62 = vmul.f32 0.5, %v2544_v51  ;;  %v2548_v46 = vadd.f32 1.0, %v3742_v57  ;;  %v3744_v20 = vpop.eup %3743  ;;  %v6916_v51 = vld [vmem:[#allocation47_spill] sm:$0xff] }
 0x8da   :  { %v3746_v49 = vpop.eup %3745 }
 0x8db   :  { %v2549_v22 = vmul.f32 0.5, %v2548_v46  ;;  %v2556_v44 = vmul.f32 %v3744_v20, %v2545_v62  ;;  %v2553_v4 = vadd.f32 1.0, %v3746_v49  ;;  %v6914_v62 = vld [vmem:[#allocation46_spill] sm:$0xff]  ;;  %v6921_v20 = vld [vmem:[#allocation52_spill] sm:$0xff] }
 0x8dc   :  { %v6920_v46 = vld [vmem:[#allocation50_spill] sm:$0xff] }
 0x8dd   :  { %v2555_v23 = vmul.f32 %v2549_v22, %v5730_v7  ;;  %v2554_v50 = vmul.f32 0.5, %v2553_v4  ;;  %v6922_v22 = vld [vmem:[#allocation51_spill] sm:$0xff]  ;;  %v6926_v49 = vld [vmem:[#allocation18_spill] sm:$0xff] }
 0x8de   :  { %v6927_v4 = vld [vmem:[#allocation19_spill] sm:$0xff] }
 0x8df   :  { %v2557_v59 = vadd.f32 %v2556_v44, %v2555_v23  ;;  %v6913_v44 = vld [vmem:[#allocation45_spill] sm:$0xff] }
 0x8e0   :  { %v6923_v23 = vld [vmem:[#allocation53_spill] sm:$0xff] }
 0x8e1   :  { %3747 = vtanh.f32 %v2557_v59  ;;  %v5811_v58 = vsel %vm2040_vm15, %v2557_v59, %v5730_v7  ;;  %v6911_v7 = vld [vmem:[#allocation44_spill] sm:$0xff] }
 0x8e2   :  { %v6924_v59 = vld [vmem:[#allocation16_spill] sm:$0xff] }
 0x8ee   :  { %v3748_v18 = vpop.eup %3747 }
 0x8ef   :  { %v2559_v52 = vmul.f32 %v3748_v18, %v2554_v50  ;;  %v6928_v50 = vld [vmem:[#allocation20_spill] sm:$0xff]  ;;  %v6929_v18 = vld [vmem:[#allocation21_spill] sm:$0xff] }
 0x8f1   :  { %v5816_v57 = vsel %vm2040_vm15, %v2559_v52, %v5735_v27  ;;  %v6912_v27 = vld [vmem:[#allocation43_spill] sm:$0xff]  ;;  %v6930_v52 = vmov 0.0  }
 0x8f2   :  { %2632 = vmatmul.mubr.f32.vlgmr.msra.gmra.mxu0 %v5816_v57  ;;  %2703 = vmatmul.mubr.f32.vlgmr.msra.gmra.mxu1 %v5816_v57 }
 0x8f3   :  { %2739 = vmatpush1.msra.mxu0 %v5441_v53  ;;  %2810 = vmatpush1.msra.mxu1 %v5443_v1 }
 0x8f4   :  { %2740 = vmatprep.subr.mxu0 %v5450_v56  ;;  %2811 = vmatprep.subr.mxu1 %v5452_v55 }
 0x8f5   :  { %2741 = vmatpush1.msra.mxu0 %v5456_v39  ;;  %2812 = vmatpush1.msra.mxu1 %v5458_v48 }
 0x8f6   :  { %2742 = vmatprep.subr.mxu0 %v5462_v36  ;;  %2813 = vmatprep.subr.mxu1 %v5464_v47 }
 0x8f7   :  { %2743 = vmatpush1.msra.mxu0 %v5468_v35  ;;  %2814 = vmatpush1.msra.mxu1 %v5470_v24 }
 0x8f8   :  { %2744 = vmatprep.subr.mxu0 %v5474_v29  ;;  %2815 = vmatprep.subr.mxu1 %v5476_v31 }
 0x8f9   :  { %2745 = vmatpush1.msra.mxu0 %v5480_v38  ;;  %2816 = vmatpush1.msra.mxu1 %v5482_v33 }
 0x8fa   :  { %2746 = vmatprep.subr.mxu0 %v5486_v40  ;;  %2817 = vmatprep.subr.mxu1 %v5488_v0 }
 0x8fb   :  { %2747 = vmatpush1.msra.mxu0 %v5492_v45  ;;  %2818 = vmatpush1.msra.mxu1 %v5494_v25 }
 0x8fc   :  { %2748 = vmatprep.subr.mxu0 %v5498_v30  ;;  %2819 = vmatprep.subr.mxu1 %v5500_v43 }
 0x8fd   :  { %2749 = vmatpush1.msra.mxu0 %v5504_v32  ;;  %2820 = vmatpush1.msra.mxu1 %v5506_v34 }
 0x8fe   :  { %2750 = vmatprep.subr.mxu0 %v5510_v37  ;;  %2821 = vmatprep.subr.mxu1 %v5512_v26 }
 0x8ff   :  { %2751 = vmatpush1.msra.mxu0 %v5516_v28  ;;  %2822 = vmatpush1.msra.mxu1 %v5518_v41 }
 0x900   :  { %2752 = vmatprep.subr.mxu0 %v5522_v60  ;;  %2823 = vmatprep.subr.mxu1 %v5524_v2 }
 0x901   :  { %2753 = vmatpush1.msra.mxu0 %v5528_v3  ;;  %2824 = vmatpush1.msra.mxu1 %v5530_v5 }
 0x902   :  { %2754 = vmatprep.subr.mxu0 %v5534_v8  ;;  %2825 = vmatprep.subr.mxu1 %v5536_v9 }
 0x903   :  { %2755 = vmatpush1.msra.mxu0 %v5540_v10  ;;  %2826 = vmatpush1.msra.mxu1 %v5542_v11 }
 0x904   :  { %2756 = vmatprep.subr.mxu0 %v5546_v12  ;;  %2827 = vmatprep.subr.mxu1 %v5548_v13 }
 0x905   :  { %2757 = vmatpush1.msra.mxu0 %v5552_v14  ;;  %2828 = vmatpush1.msra.mxu1 %v5554_v15 }
 0x906   :  { %2758 = vmatprep.subr.mxu0 %v5558_v16  ;;  %2829 = vmatprep.subr.mxu1 %v5560_v17 }
 0x907   :  { %2759 = vmatpush1.msra.mxu0 %v6882_v42  ;;  %2830 = vmatpush1.msra.mxu1 %v5566_v19 }
 0x908   :  { %2760 = vmatprep.subr.mxu0 %v6911_v7  ;;  %2831 = vmatprep.subr.mxu1 %v6912_v27 }
 0x909   :  { %2761 = vmatpush1.msra.mxu0 %v6913_v44  ;;  %2832 = vmatpush1.msra.mxu1 %v6914_v62 }
 0x90a   :  { %2762 = vmatprep.subr.mxu0 %v6915_v6  ;;  %2833 = vmatprep.subr.mxu1 %v6916_v51 }
 0x90b   :  { %2763 = vmatpush1.msra.mxu0 %v6917_v61  ;;  %2834 = vmatpush1.msra.mxu1 %v6918_v21  ;;  %v6935_v21 = vld [vmem:[#allocation88_spill] sm:$0xff] }
 0x90c   :  { %2764 = vmatprep.subr.mxu0 %v6919_v63  ;;  %2835 = vmatprep.subr.mxu1 %v6920_v46  ;;  %v6931_v46 = vld [vmem:[#allocation22_spill] sm:$0xff] }
 0x90d   :  { %2765 = vmatpush1.msra.mxu0 %v6921_v20  ;;  %2836 = vmatpush1.msra.mxu1 %v6922_v22  ;;  %v6932_v22 = vld [vmem:[#allocation33_spill] sm:$0xff] }
 0x90e   :  { %2766 = vmatprep.subr.mxu0 %v6923_v23  ;;  %2837 = vmatprep.subr.mxu1 %v6924_v59  ;;  %v6933_v23 = vld [vmem:[#allocation38_spill] sm:$0xff] }
 0x90f   :  { %2767 = vmatpush1.msra.mxu0 %v6925_v54  ;;  %2838 = vmatpush1.msra.mxu1 %v6926_v49  ;;  %v6934_v54 = vld [vmem:[#allocation86_spill] sm:$0xff] }
 0x910   :  { %2768 = vmatprep.subr.mxu0 %v6927_v4  ;;  %2839 = vmatprep.subr.mxu1 %v6928_v50 }
 0x911   :  { %2769 = vmatpush1.msra.mxu0 %v6929_v18  ;;  %2802 = vmatprep.mubr.f32.mxu0 %v6930_v52  ;;  %v6936_v18 = vld [vmem:[#allocation87_spill] sm:$0xff] }
 0x912   :  { %2840 = vmatpush1.msra.mxu1 %v6931_v46  ;;  %2873 = vmatprep.mubr.f32.mxu1 %v6930_v52  ;;  %v6937_v52 = vld [vmem:[#allocation89_spill] sm:$0xff] }
 0x913   :  { %2909 = vmatprep.subr.mxu0 %v6932_v22  ;;  %2980 = vmatprep.subr.mxu1 %v6933_v23 }
 0x9b2   :  { %v2633_v59 = vpop.f32.mrf.mxu0  ;;  %v2704_v49 = vpop.f32.mrf.mxu1 }
 0x9b3   :  { %v2709_v20 = vadd.f32 %v2633_v59, %v6934_v54  ;;  %v2711_v61 = vadd.f32 %v2704_v49, %v6936_v18 }
 0x9b4   :  { %v2635_v63 = vpop.f32.mrf.mxu0  ;;  %v2706_v46 = vpop.f32.mrf.mxu1 }
 0x9b5   :  { %v2713_v4 = vmul.f32 0.5, %v2709_v20  ;;  %v2710_v50 = vadd.f32 %v2635_v63, %v6935_v21  ;;  %v2712_v6 = vadd.f32 %v2706_v46, %v6937_v52  ;;  %v6149_v52 = vld [vmem:[#allocation6 + $0x50] sm:$0xff] }
 0x9b6   :  { %6978 = vst [vmem:[#allocation54_spill] sm:$0xff] %v6149_v52 }
 0x9b7   :  { %3749 = vtanh.f32 %v2713_v4  ;;  %v2717_v51 = vmul.f32 0.5, %v2710_v50  ;;  %v2722_v22 = vmul.f32 0.5, %v2712_v6 }
 0x9b9   :  { %3751 = vtanh.f32 %v2717_v51  ;;  %v5990_v51 = vld [vmem:[#allocation6 + $0x1e0] sm:$0xff] }
 0x9ba   :  { %3753 = vtanh.f32 %v2711_v61 }
 0x9bb   :  { %3755 = vtanh.f32 %v2722_v22 }
 0x9c4   :  { %v3750_v62 = vpop.eup %3749 }
 0x9c5   :  { %v2715_v23 = vadd.f32 1.0, %v3750_v62 }
 0x9c6   :  { %v3752_v44 = vpop.eup %3751 }
 0x9c7   :  { %v2716_v27 = vmul.f32 0.5, %v2715_v23  ;;  %v2719_v59 = vadd.f32 1.0, %v3752_v44  ;;  %v3754_v54 = vpop.eup %3753 }
 0x9c8   :  { %v3756_v46 = vpop.eup %3755 }
 0x9c9   :  { %v2720_v20 = vmul.f32 0.5, %v2719_v59  ;;  %v2727_v7 = vmul.f32 %v3754_v54, %v2716_v27  ;;  %v2724_v6 = vadd.f32 1.0, %v3756_v46  ;;  %v5996_v46 = vld [vmem:[#allocation6 + $0x1c8] sm:$0xff] }
 0x9cb   :  { %v2726_v21 = vmul.f32 %v2720_v20, %v5811_v58  ;;  %v2725_v49 = vmul.f32 0.5, %v2724_v6  ;;  %v5999_v6 = vld [vmem:[#allocation6 + $0x1d8] sm:$0xff] }
 0x9cd   :  { %v2728_v63 = vadd.f32 %v2727_v7, %v2726_v21 }
 0x9cf   :  { %3757 = vtanh.f32 %v2728_v63  ;;  %v5894_v61 = vsel %vm1863_vm14, %v2728_v63, %v5811_v58 }
 0x9dc   :  { %v3758_v62 = vpop.eup %3757 }
 0x9dd   :  { %v2730_v4 = vmul.f32 %v3758_v62, %v2725_v49  ;;  %v6002_v49 = vld [vmem:[#allocation6 + $0x1c0] sm:$0xff]  ;;  %v6005_v62 = vld [vmem:[#allocation6 + $0x1d0] sm:$0xff] }
 0x9df   :  { %v5899_v44 = vsel %vm1863_vm14, %v2730_v4, %v5816_v57  ;;  %v6008_v4 = vld [vmem:[#allocation6 + $0x1a8] sm:$0xff] }
 0x9e0   :  { %2803 = vmatmul.mubr.f32.vlgmr.msra.gmra.mxu0 %v5899_v44  ;;  %2874 = vmatmul.mubr.f32.vlgmr.msra.gmra.mxu1 %v5899_v44 }
 0x9e1   :  { %2910 = vmatpush1.msra.mxu0 %v5441_v53  ;;  %2981 = vmatpush1.msra.mxu1 %v5443_v1  ;;  %v6939_v53 = vld [vmem:[#allocation44_spill] sm:$0xff]  ;;  %v6940_v1 = vld [vmem:[#allocation43_spill] sm:$0xff] }
 0x9e2   :  { %2911 = vmatprep.subr.mxu0 %v5450_v56  ;;  %2982 = vmatprep.subr.mxu1 %v5452_v55  ;;  %v6941_v56 = vld [vmem:[#allocation45_spill] sm:$0xff]  ;;  %v6942_v55 = vld [vmem:[#allocation46_spill] sm:$0xff] }
 0x9e3   :  { %2912 = vmatpush1.msra.mxu0 %v5456_v39  ;;  %2983 = vmatpush1.msra.mxu1 %v5458_v48  ;;  %v6943_v39 = vld [vmem:[#allocation48_spill] sm:$0xff]  ;;  %v6944_v48 = vld [vmem:[#allocation47_spill] sm:$0xff] }
 0x9e4   :  { %2913 = vmatprep.subr.mxu0 %v5462_v36  ;;  %2984 = vmatprep.subr.mxu1 %v5464_v47  ;;  %v6945_v36 = vld [vmem:[#allocation49_spill] sm:$0xff]  ;;  %v6946_v47 = vld [vmem:[#allocation12_spill] sm:$0xff] }
 0x9e5   :  { %2914 = vmatpush1.msra.mxu0 %v5468_v35  ;;  %2985 = vmatpush1.msra.mxu1 %v5470_v24  ;;  %v6947_v35 = vld [vmem:[#allocation14_spill] sm:$0xff] }
 0x9e6   :  { %2915 = vmatprep.subr.mxu0 %v5474_v29  ;;  %2986 = vmatprep.subr.mxu1 %v5476_v31  ;;  %v6948_v24 = vld [vmem:[#allocation50_spill] sm:$0xff]  ;;  %v6949_v29 = vld [vmem:[#allocation52_spill] sm:$0xff]  ;;  %v6950_v31 = vld [vmem:[#allocation51_spill] sm:$0xff] }
 0x9e7   :  { %2916 = vmatpush1.msra.mxu0 %v5480_v38  ;;  %2987 = vmatpush1.msra.mxu1 %v5482_v33  ;;  %v6951_v38 = vld [vmem:[#allocation53_spill] sm:$0xff]  ;;  %v6952_v33 = vld [vmem:[#allocation16_spill] sm:$0xff] }
 0x9e8   :  { %2917 = vmatprep.subr.mxu0 %v5486_v40  ;;  %2988 = vmatprep.subr.mxu1 %v5488_v0  ;;  %v6953_v40 = vld [vmem:[#allocation17_spill] sm:$0xff]  ;;  %v6954_v0 = vld [vmem:[#allocation18_spill] sm:$0xff] }
 0x9e9   :  { %2918 = vmatpush1.msra.mxu0 %v5492_v45  ;;  %2989 = vmatpush1.msra.mxu1 %v5494_v25  ;;  %v6955_v45 = vld [vmem:[#allocation19_spill] sm:$0xff]  ;;  %v6956_v25 = vld [vmem:[#allocation20_spill] sm:$0xff] }
 0x9ea   :  { %2919 = vmatprep.subr.mxu0 %v5498_v30  ;;  %2990 = vmatprep.subr.mxu1 %v5500_v43  ;;  %v6957_v30 = vld [vmem:[#allocation21_spill] sm:$0xff]  ;;  %v6958_v43 = vmov 0.0  }
 0x9eb   :  { %2920 = vmatpush1.msra.mxu0 %v5504_v32  ;;  %2991 = vmatpush1.msra.mxu1 %v5506_v34  ;;  %v6959_v32 = vld [vmem:[#allocation22_spill] sm:$0xff]  ;;  %v5967_v34 = vld [vmem:[#allocation6 + $0x1e8] sm:$0xff] }
 0x9ec   :  { %2921 = vmatprep.subr.mxu0 %v5510_v37  ;;  %2992 = vmatprep.subr.mxu1 %v5512_v26  ;;  %6960 = vst [vmem:[#allocation23_spill] sm:$0xff] %v5967_v34  ;;  %v5970_v37 = vld [vmem:[#allocation6 + $0x1f8] sm:$0xff] }
 0x9ed   :  { %2922 = vmatpush1.msra.mxu0 %v5516_v28  ;;  %2993 = vmatpush1.msra.mxu1 %v5518_v41  ;;  %6961 = vst [vmem:[#allocation24_spill] sm:$0xff] %v5970_v37  ;;  %v6962_v28 = vld [vmem:[#allocation82_spill] sm:$0xff] }
 0x9ee   :  { %2923 = vmatprep.subr.mxu0 %v5522_v60  ;;  %2994 = vmatprep.subr.mxu1 %v5524_v2 }
 0x9ef   :  { %2924 = vmatpush1.msra.mxu0 %v5528_v3  ;;  %2995 = vmatpush1.msra.mxu1 %v5530_v5  ;;  %v6963_v5 = vld [vmem:[#allocation84_spill] sm:$0xff] }
 0x9f0   :  { %2925 = vmatprep.subr.mxu0 %v5534_v8  ;;  %2996 = vmatprep.subr.mxu1 %v5536_v9  ;;  %v6964_v9 = vld [vmem:[#allocation83_spill] sm:$0xff] }
 0x9f1   :  { %2926 = vmatpush1.msra.mxu0 %v5540_v10  ;;  %2997 = vmatpush1.msra.mxu1 %v5542_v11 }
 0x9f2   :  { %2927 = vmatprep.subr.mxu0 %v5546_v12  ;;  %2998 = vmatprep.subr.mxu1 %v5548_v13  ;;  %v6965_v13 = vld [vmem:[#allocation85_spill] sm:$0xff] }
 0x9f3   :  { %2928 = vmatpush1.msra.mxu0 %v5552_v14  ;;  %2999 = vmatpush1.msra.mxu1 %v5554_v15 }
 0x9f4   :  { %2929 = vmatprep.subr.mxu0 %v5558_v16  ;;  %3000 = vmatprep.subr.mxu1 %v5560_v17 }
 0x9f5   :  { %2930 = vmatpush1.msra.mxu0 %v6882_v42  ;;  %3001 = vmatpush1.msra.mxu1 %v5566_v19 }
 0x9f6   :  { %2931 = vmatprep.subr.mxu0 %v6939_v53  ;;  %3002 = vmatprep.subr.mxu1 %v6940_v1  ;;  %v6014_v53 = vld [vmem:[#allocation6 + $0x1a0] sm:$0xff]  ;;  %v6017_v1 = vld [vmem:[#allocation6 + $0x1b0] sm:$0xff] }
 0x9f7   :  { %2932 = vmatpush1.msra.mxu0 %v6941_v56  ;;  %3003 = vmatpush1.msra.mxu1 %v6942_v55  ;;  %v6020_v56 = vld [vmem:[#allocation6 + $0x188] sm:$0xff]  ;;  %v6023_v55 = vld [vmem:[#allocation6 + $0x198] sm:$0xff] }
 0x9f8   :  { %2933 = vmatprep.subr.mxu0 %v6943_v39  ;;  %3004 = vmatprep.subr.mxu1 %v6944_v48  ;;  %v6026_v39 = vld [vmem:[#allocation6 + $0x180] sm:$0xff]  ;;  %v6029_v48 = vld [vmem:[#allocation6 + $0x190] sm:$0xff] }
 0x9f9   :  { %2934 = vmatpush1.msra.mxu0 %v6945_v36  ;;  %3005 = vmatpush1.msra.mxu1 %v6946_v47  ;;  %v6032_v36 = vld [vmem:[#allocation6 + $0x168] sm:$0xff]  ;;  %v6035_v47 = vld [vmem:[#allocation6 + $0x178] sm:$0xff] }
 0x9fa   :  { %2935 = vmatprep.subr.mxu0 %v6947_v35  ;;  %3006 = vmatprep.subr.mxu1 %v6948_v24  ;;  %v6038_v35 = vld [vmem:[#allocation6 + $0x160] sm:$0xff]  ;;  %v6041_v24 = vld [vmem:[#allocation6 + $0x170] sm:$0xff] }
 0x9fb   :  { %2936 = vmatpush1.msra.mxu0 %v6949_v29  ;;  %3007 = vmatpush1.msra.mxu1 %v6950_v31  ;;  %v6044_v29 = vld [vmem:[#allocation6 + $0x148] sm:$0xff]  ;;  %v6047_v31 = vld [vmem:[#allocation6 + $0x158] sm:$0xff] }
 0x9fc   :  { %2937 = vmatprep.subr.mxu0 %v6951_v38  ;;  %3008 = vmatprep.subr.mxu1 %v6952_v33  ;;  %v6050_v38 = vld [vmem:[#allocation6 + $0x140] sm:$0xff]  ;;  %v6053_v33 = vld [vmem:[#allocation6 + $0x150] sm:$0xff] }
 0x9fd   :  { %2938 = vmatpush1.msra.mxu0 %v6953_v40  ;;  %3009 = vmatpush1.msra.mxu1 %v6954_v0  ;;  %v6056_v40 = vld [vmem:[#allocation6 + $0x128] sm:$0xff]  ;;  %v6059_v0 = vld [vmem:[#allocation6 + $0x138] sm:$0xff] }
 0x9fe   :  { %2939 = vmatprep.subr.mxu0 %v6955_v45  ;;  %3010 = vmatprep.subr.mxu1 %v6956_v25  ;;  %v6062_v45 = vld [vmem:[#allocation6 + $0x120] sm:$0xff]  ;;  %v6065_v25 = vld [vmem:[#allocation6 + $0x130] sm:$0xff] }
 0x9ff   :  { %2940 = vmatpush1.msra.mxu0 %v6957_v30  ;;  %2973 = vmatprep.mubr.f32.mxu0 %v6958_v43  ;;  %v6068_v30 = vld [vmem:[#allocation6 + $0x108] sm:$0xff] }
 0xa00   :  { %3011 = vmatpush1.msra.mxu1 %v6959_v32  ;;  %3044 = vmatprep.mubr.f32.mxu1 %v6958_v43  ;;  %v6071_v32 = vld [vmem:[#allocation6 + $0x118] sm:$0xff] }
 0xa01   :  { %3080 = vmatprep.subr.mxu0 %v5967_v34  ;;  %3151 = vmatprep.subr.mxu1 %v5970_v37 }
 0xaa0   :  { %v2804_v26 = vpop.f32.mrf.mxu0  ;;  %v2875_v60 = vpop.f32.mrf.mxu1 }
 0xaa1   :  { %v2880_v41 = vadd.f32 %v2804_v26, %v6962_v28  ;;  %v2882_v10 = vadd.f32 %v2875_v60, %v6964_v9  ;;  %v6074_v26 = vld [vmem:[#allocation6 + $0x100] sm:$0xff]  ;;  %v6077_v28 = vld [vmem:[#allocation6 + $0x110] sm:$0xff]  ;;  %v6083_v60 = vld [vmem:[#allocation6 + $0xf8] sm:$0xff] }
 0xaa2   :  { %v2806_v2 = vpop.f32.mrf.mxu0  ;;  %v2877_v12 = vpop.f32.mrf.mxu1  ;;  %v6098_v9 = vld [vmem:[#allocation6 + $0xc0] sm:$0xff] }
 0xaa3   :  { %v2884_v3 = vmul.f32 0.5, %v2880_v41  ;;  %v2881_v8 = vadd.f32 %v2806_v2, %v6963_v5  ;;  %v2883_v14 = vadd.f32 %v2877_v12, %v6965_v13  ;;  %v6080_v41 = vld [vmem:[#allocation6 + $0xe8] sm:$0xff]  ;;  %v6086_v2 = vld [vmem:[#allocation6 + $0xe0] sm:$0xff]  ;;  %v6107_v12 = vld [vmem:[#allocation6 + $0xb8] sm:$0xff] }
 0xaa4   :  { %v6092_v5 = vld [vmem:[#allocation6 + $0xc8] sm:$0xff]  ;;  %v6110_v13 = vld [vmem:[#allocation6 + $0xa0] sm:$0xff] }
 0xaa5   :  { %3759 = vtanh.f32 %v2884_v3  ;;  %v2888_v11 = vmul.f32 0.5, %v2881_v8  ;;  %v2893_v15 = vmul.f32 0.5, %v2883_v14  ;;  %v6089_v3 = vld [vmem:[#allocation6 + $0xf0] sm:$0xff]  ;;  %v6095_v8 = vld [vmem:[#allocation6 + $0xd8] sm:$0xff] }
 0xaa6   :  { %v6113_v14 = vld [vmem:[#allocation6 + $0xb0] sm:$0xff] }
 0xaa7   :  { %3761 = vtanh.f32 %v2888_v11  ;;  %v6104_v11 = vld [vmem:[#allocation6 + $0xa8] sm:$0xff] }
 0xaa8   :  { %3763 = vtanh.f32 %v2882_v10  ;;  %v6101_v10 = vld [vmem:[#allocation6 + $0xd0] sm:$0xff] }
 0xaa9   :  { %3765 = vtanh.f32 %v2893_v15  ;;  %v6116_v15 = vld [vmem:[#allocation6 + $0x88] sm:$0xff] }
 0xaaa   :  { %6967 = vst [vmem:[#allocation25_spill] sm:$0xff] %v6116_v15 }
 0xab2   :  { %v3760_v16 = vpop.eup %3759 }
 0xab3   :  { %v2886_v17 = vadd.f32 1.0, %v3760_v16  ;;  %v6119_v16 = vld [vmem:[#allocation6 + $0x98] sm:$0xff] }
 0xab4   :  { %v3762_v19 = vpop.eup %3761  ;;  %6968 = vst [vmem:[#allocation26_spill] sm:$0xff] %v6119_v16 }
 0xab5   :  { %v2887_v42 = vmul.f32 0.5, %v2886_v17  ;;  %v2890_v58 = vadd.f32 1.0, %v3762_v19  ;;  %v3764_v57 = vpop.eup %3763  ;;  %v6122_v17 = vld [vmem:[#allocation6 + $0x80] sm:$0xff]  ;;  %v6125_v19 = vld [vmem:[#allocation6 + $0x90] sm:$0xff] }
 0xab6   :  { %v3766_v23 = vpop.eup %3765  ;;  %6969 = vst [vmem:[#allocation10_spill] sm:$0xff] %v6122_v17  ;;  %6970 = vst [vmem:[#allocation11_spill] sm:$0xff] %v6125_v19 }
 0xab7   :  { %v2891_v7 = vmul.f32 0.5, %v2890_v58  ;;  %v2898_v27 = vmul.f32 %v3764_v57, %v2887_v42  ;;  %v2895_v59 = vadd.f32 1.0, %v3766_v23  ;;  %v6128_v42 = vld [vmem:[#allocation6 + $0x68] sm:$0xff]  ;;  %v6131_v58 = vld [vmem:[#allocation6 + $0x78] sm:$0xff]  ;;  %v6134_v57 = vld [vmem:[#allocation6 + $0x60] sm:$0xff] }
 0xab8   :  { %6971 = vst [vmem:[#allocation34_spill] sm:$0xff] %v6128_v42  ;;  %6972 = vst [vmem:[#allocation36_spill] sm:$0xff] %v6131_v58  ;;  %v6152_v23 = vld [vmem:[#allocation6 + $0x28] sm:$0xff] }
 0xab9   :  { %v2897_v50 = vmul.f32 %v2891_v7, %v5894_v61  ;;  %v2896_v54 = vmul.f32 0.5, %v2895_v59  ;;  %6973 = vst [vmem:[#allocation35_spill] sm:$0xff] %v6134_v57  ;;  %v6137_v7 = vld [vmem:[#allocation6 + $0x70] sm:$0xff]  ;;  %6979 = vst [vmem:[#allocation56_spill] sm:$0xff] %v6152_v23  ;;  %v6155_v59 = vld [vmem:[#allocation6 + $0x38] sm:$0xff] }
 0xaba   :  { %6974 = vst [vmem:[#allocation37_spill] sm:$0xff] %v6137_v7  ;;  %6980 = vst [vmem:[#allocation55_spill] sm:$0xff] %v6155_v59 }
 0xabb   :  { %v2899_v18 = vadd.f32 %v2898_v27, %v2897_v50  ;;  %v6140_v27 = vld [vmem:[#allocation6 + $0x48] sm:$0xff]  ;;  %v6143_v50 = vld [vmem:[#allocation6 + $0x58] sm:$0xff] }
 0xabc   :  { %6975 = vst [vmem:[#allocation27_spill] sm:$0xff] %v6140_v27  ;;  %6976 = vst [vmem:[#allocation28_spill] sm:$0xff] %v6143_v50 }
 0xabd   :  { %3767 = vtanh.f32 %v2899_v18  ;;  %v5981_v22 = vsel %vm1686_vm13, %v2899_v18, %v5894_v61  ;;  %v5993_v61 = vld [vmem:[#allocation6 + $0x1f0] sm:$0xff]  ;;  %v6146_v18 = vld [vmem:[#allocation6 + $0x40] sm:$0xff] }
 0xabe   :  { %6977 = vst [vmem:[#allocation29_spill] sm:$0xff] %v6146_v18 }
 0xaca   :  { %v3768_v20 = vpop.eup %3767 }
 0xacb   :  { %v2901_v21 = vmul.f32 %v3768_v20, %v2896_v54  ;;  %v6158_v54 = vld [vmem:[#allocation6 + $0x20] sm:$0xff]  ;;  %v6161_v20 = vld [vmem:[#allocation6 + $0x30] sm:$0xff] }
 0xacc   :  { %6981 = vst [vmem:[#allocation57_spill] sm:$0xff] %v6158_v54  ;;  %6982 = vst [vmem:[#allocation58_spill] sm:$0xff] %v6161_v20 }
 0xacd   :  { %v5986_v63 = vsel %vm1686_vm13, %v2901_v21, %v5899_v44  ;;  %v6011_v44 = vld [vmem:[#allocation6 + $0x1b8] sm:$0xff]  ;;  %v6164_v21 = vld [vmem:[#allocation6 + $0x8] sm:$0xff] }
 0xace   :  { %2974 = vmatmul.mubr.f32.vlgmr.msra.gmra.mxu0 %v5986_v63  ;;  %3045 = vmatmul.mubr.f32.vlgmr.msra.gmra.mxu1 %v5986_v63  ;;  %6983 = vst [vmem:[#allocation62_spill] sm:$0xff] %v6164_v21 }
 0xacf   :  { %3081 = vmatpush1.msra.mxu0 %v5990_v51  ;;  %3152 = vmatpush1.msra.mxu1 %v5993_v61 }
 0xad0   :  { %3082 = vmatprep.subr.mxu0 %v5996_v46  ;;  %3153 = vmatprep.subr.mxu1 %v5999_v6 }
 0xad1   :  { %3083 = vmatpush1.msra.mxu0 %v6002_v49  ;;  %3154 = vmatpush1.msra.mxu1 %v6005_v62 }
 0xad2   :  { %3084 = vmatprep.subr.mxu0 %v6008_v4  ;;  %3155 = vmatprep.subr.mxu1 %v6011_v44 }
 0xad3   :  { %3085 = vmatpush1.msra.mxu0 %v6014_v53  ;;  %3156 = vmatpush1.msra.mxu1 %v6017_v1 }
 0xad4   :  { %3086 = vmatprep.subr.mxu0 %v6020_v56  ;;  %3157 = vmatprep.subr.mxu1 %v6023_v55 }
 0xad5   :  { %3087 = vmatpush1.msra.mxu0 %v6026_v39  ;;  %3158 = vmatpush1.msra.mxu1 %v6029_v48 }
 0xad6   :  { %3088 = vmatprep.subr.mxu0 %v6032_v36  ;;  %3159 = vmatprep.subr.mxu1 %v6035_v47 }
 0xad7   :  { %3089 = vmatpush1.msra.mxu0 %v6038_v35  ;;  %3160 = vmatpush1.msra.mxu1 %v6041_v24 }
 0xad8   :  { %3090 = vmatprep.subr.mxu0 %v6044_v29  ;;  %3161 = vmatprep.subr.mxu1 %v6047_v31 }
 0xad9   :  { %3091 = vmatpush1.msra.mxu0 %v6050_v38  ;;  %3162 = vmatpush1.msra.mxu1 %v6053_v33 }
 0xada   :  { %3092 = vmatprep.subr.mxu0 %v6056_v40  ;;  %3163 = vmatprep.subr.mxu1 %v6059_v0 }
 0xadb   :  { %3093 = vmatpush1.msra.mxu0 %v6062_v45  ;;  %3164 = vmatpush1.msra.mxu1 %v6065_v25 }
 0xadc   :  { %3094 = vmatprep.subr.mxu0 %v6068_v30  ;;  %3165 = vmatprep.subr.mxu1 %v6071_v32 }
 0xadd   :  { %3095 = vmatpush1.msra.mxu0 %v6074_v26  ;;  %3166 = vmatpush1.msra.mxu1 %v6077_v28 }
 0xade   :  { %3096 = vmatprep.subr.mxu0 %v6080_v41  ;;  %3167 = vmatprep.subr.mxu1 %v6083_v60 }
 0xadf   :  { %3097 = vmatpush1.msra.mxu0 %v6086_v2  ;;  %3168 = vmatpush1.msra.mxu1 %v6089_v3 }
 0xae0   :  { %3098 = vmatprep.subr.mxu0 %v6092_v5  ;;  %3169 = vmatprep.subr.mxu1 %v6095_v8 }
 0xae1   :  { %3099 = vmatpush1.msra.mxu0 %v6098_v9  ;;  %3170 = vmatpush1.msra.mxu1 %v6101_v10 }
 0xae2   :  { %3100 = vmatprep.subr.mxu0 %v6104_v11  ;;  %3171 = vmatprep.subr.mxu1 %v6107_v12 }
 0xae3   :  { %3101 = vmatpush1.msra.mxu0 %v6110_v13  ;;  %3172 = vmatpush1.msra.mxu1 %v6113_v14 }
 0xae4   :  { %3102 = vmatprep.subr.mxu0 %v6116_v15  ;;  %3173 = vmatprep.subr.mxu1 %v6119_v16 }
 0xae5   :  { %3103 = vmatpush1.msra.mxu0 %v6122_v17  ;;  %3174 = vmatpush1.msra.mxu1 %v6125_v19 }
 0xae6   :  { %3104 = vmatprep.subr.mxu0 %v6128_v42  ;;  %3175 = vmatprep.subr.mxu1 %v6131_v58 }
 0xae7   :  { %3105 = vmatpush1.msra.mxu0 %v6134_v57  ;;  %3176 = vmatpush1.msra.mxu1 %v6137_v7  ;;  %v6989_v7 = vld [vmem:[#allocation79_spill] sm:$0xff] }
 0xae8   :  { %3106 = vmatprep.subr.mxu0 %v6140_v27  ;;  %3177 = vmatprep.subr.mxu1 %v6143_v50  ;;  %v6988_v27 = vld [vmem:[#allocation80_spill] sm:$0xff] }
 0xae9   :  { %3107 = vmatpush1.msra.mxu0 %v6146_v18  ;;  %3178 = vmatpush1.msra.mxu1 %v6149_v52  ;;  %v6167_v52 = vld [vmem:[#allocation6 + $0x18] sm:$0xff] }
 0xaea   :  { %3108 = vmatprep.subr.mxu0 %v6152_v23  ;;  %3179 = vmatprep.subr.mxu1 %v6155_v59  ;;  %6984 = vst [vmem:[#allocation59_spill] sm:$0xff] %v6167_v52  ;;  %v6170_v23 = vld [vmem:[#allocation6] sm:$0xff]  ;;  %v6174_v59 = vld [vmem:[#allocation6 + $0x10] sm:$0xff] }
 0xaeb   :  { %3109 = vmatpush1.msra.mxu0 %v6158_v54  ;;  %3180 = vmatpush1.msra.mxu1 %v6161_v20  ;;  %6985 = vst [vmem:[#allocation63_spill] sm:$0xff] %v6170_v23  ;;  %6986 = vst [vmem:[#allocation39_spill] sm:$0xff] %v6174_v59  ;;  %v6987_v20 = vld [vmem:[#allocation78_spill] sm:$0xff] }
 0xaec   :  { %3110 = vmatprep.subr.mxu0 %v6164_v21  ;;  %3181 = vmatprep.subr.mxu1 %v6167_v52 }
 0xaed   :  { %3111 = vmatpush1.msra.mxu0 %v6170_v23  ;;  %3144 = vmatprep.mubr.f32.mxu0 %v6958_v43 }
 0xaee   :  { %3182 = vmatpush1.msra.mxu1 %v6174_v59  ;;  %3215 = vmatprep.mubr.f32.mxu1 %v6958_v43  ;;  %v6990_v43 = vld [vmem:[#allocation81_spill] sm:$0xff] }
 0xaef   :  { %3251 = vmatprep.subr.mxu0 %v5967_v34  ;;  %3322 = vmatprep.subr.mxu1 %v5970_v37 }
 0xb8e   :  { %v2975_v21 = vpop.f32.mrf.mxu0  ;;  %v3046_v52 = vpop.f32.mrf.mxu1 }
 0xb8f   :  { %v3051_v54 = vadd.f32 %v2975_v21, %v6987_v20  ;;  %v3053_v57 = vadd.f32 %v3046_v52, %v6989_v7  ;;  %v6998_v52 = vld [vmem:[#allocation35_spill] sm:$0xff] }
 0xb90   :  { %v2977_v18 = vpop.f32.mrf.mxu0  ;;  %v3048_v59 = vpop.f32.mrf.mxu1 }
 0xb91   :  { %v3055_v50 = vmul.f32 0.5, %v3051_v54  ;;  %v3052_v23 = vadd.f32 %v2977_v18, %v6988_v27  ;;  %v3054_v42 = vadd.f32 %v3048_v59, %v6990_v43  ;;  %v7000_v59 = vld [vmem:[#allocation27_spill] sm:$0xff] }
 0xb93   :  { %3769 = vtanh.f32 %v3055_v50  ;;  %v3059_v58 = vmul.f32 0.5, %v3052_v23  ;;  %v3064_v34 = vmul.f32 0.5, %v3054_v42  ;;  %v6999_v23 = vld [vmem:[#allocation37_spill] sm:$0xff] }
 0xb95   :  { %3771 = vtanh.f32 %v3059_v58  ;;  %v7006_v58 = vld [vmem:[#allocation57_spill] sm:$0xff] }
 0xb96   :  { %3773 = vtanh.f32 %v3053_v57 }
 0xb97   :  { %3775 = vtanh.f32 %v3064_v34 }
 0xba0   :  { %v3770_v19 = vpop.eup %3769 }
 0xba1   :  { %v3057_v37 = vadd.f32 1.0, %v3770_v19 }
 0xba2   :  { %v3772_v17 = vpop.eup %3771 }
 0xba3   :  { %v3058_v16 = vmul.f32 0.5, %v3057_v37  ;;  %v3061_v20 = vadd.f32 1.0, %v3772_v17  ;;  %v3774_v21 = vpop.eup %3773  ;;  %v6992_v37 = vld [vmem:[#allocation25_spill] sm:$0xff]  ;;  %v6997_v17 = vld [vmem:[#allocation36_spill] sm:$0xff] }
 0xba4   :  { %v3776_v43 = vpop.eup %3775 }
 0xba5   :  { %v3062_v54 = vmul.f32 0.5, %v3061_v20  ;;  %v3069_v15 = vmul.f32 %v3774_v21, %v3058_v16  ;;  %v3066_v42 = vadd.f32 1.0, %v3776_v43  ;;  %v6996_v16 = vld [vmem:[#allocation34_spill] sm:$0xff]  ;;  %v7001_v20 = vld [vmem:[#allocation28_spill] sm:$0xff]  ;;  %v7002_v21 = vld [vmem:[#allocation29_spill] sm:$0xff] }
 0xba6   :  { %v7007_v43 = vld [vmem:[#allocation58_spill] sm:$0xff] }
 0xba7   :  { %v3068_v27 = vmul.f32 %v3062_v54, %v5981_v22  ;;  %v3067_v7 = vmul.f32 0.5, %v3066_v42  ;;  %v7003_v54 = vld [vmem:[#allocation54_spill] sm:$0xff] }
 0xba8   :  { %v7008_v42 = vld [vmem:[#allocation62_spill] sm:$0xff] }
 0xba9   :  { %v3070_v50 = vadd.f32 %v3069_v15, %v3068_v27  ;;  %v6995_v15 = vld [vmem:[#allocation11_spill] sm:$0xff]  ;;  %v7004_v27 = vld [vmem:[#allocation56_spill] sm:$0xff] }
 0xbab   :  { %3777 = vtanh.f32 %v3070_v50  ;;  %v6188_v57 = vsel %vm1509_vm12, %v3070_v50, %v5981_v22  ;;  %v6993_v22 = vld [vmem:[#allocation26_spill] sm:$0xff]  ;;  %v7005_v50 = vld [vmem:[#allocation55_spill] sm:$0xff] }
 0xbb8   :  { %v3778_v19 = vpop.eup %3777 }
 0xbb9   :  { %v3072_v18 = vmul.f32 %v3778_v19, %v3067_v7  ;;  %v7009_v7 = vld [vmem:[#allocation59_spill] sm:$0xff] }
 0xbba   :  { %v7010_v19 = vld [vmem:[#allocation63_spill] sm:$0xff] }
 0xbbb   :  { %v6193_v34 = vsel %vm1509_vm12, %v3072_v18, %v5986_v63  ;;  %v6994_v63 = vld [vmem:[#allocation10_spill] sm:$0xff]  ;;  %v7011_v18 = vmov 0.0  }
 0xbbc   :  { %3145 = vmatmul.mubr.f32.vlgmr.msra.gmra.mxu0 %v6193_v34  ;;  %3216 = vmatmul.mubr.f32.vlgmr.msra.gmra.mxu1 %v6193_v34 }
 0xbbd   :  { %3252 = vmatpush1.msra.mxu0 %v5990_v51  ;;  %3323 = vmatpush1.msra.mxu1 %v5993_v61 }
 0xbbe   :  { %3253 = vmatprep.subr.mxu0 %v5996_v46  ;;  %3324 = vmatprep.subr.mxu1 %v5999_v6 }
 0xbbf   :  { %3254 = vmatpush1.msra.mxu0 %v6002_v49  ;;  %3325 = vmatpush1.msra.mxu1 %v6005_v62 }
 0xbc0   :  { %3255 = vmatprep.subr.mxu0 %v6008_v4  ;;  %3326 = vmatprep.subr.mxu1 %v6011_v44 }
 0xbc1   :  { %3256 = vmatpush1.msra.mxu0 %v6014_v53  ;;  %3327 = vmatpush1.msra.mxu1 %v6017_v1 }
 0xbc2   :  { %3257 = vmatprep.subr.mxu0 %v6020_v56  ;;  %3328 = vmatprep.subr.mxu1 %v6023_v55 }
 0xbc3   :  { %3258 = vmatpush1.msra.mxu0 %v6026_v39  ;;  %3329 = vmatpush1.msra.mxu1 %v6029_v48 }
 0xbc4   :  { %3259 = vmatprep.subr.mxu0 %v6032_v36  ;;  %3330 = vmatprep.subr.mxu1 %v6035_v47 }
 0xbc5   :  { %3260 = vmatpush1.msra.mxu0 %v6038_v35  ;;  %3331 = vmatpush1.msra.mxu1 %v6041_v24 }
 0xbc6   :  { %3261 = vmatprep.subr.mxu0 %v6044_v29  ;;  %3332 = vmatprep.subr.mxu1 %v6047_v31 }
 0xbc7   :  { %3262 = vmatpush1.msra.mxu0 %v6050_v38  ;;  %3333 = vmatpush1.msra.mxu1 %v6053_v33 }
 0xbc8   :  { %3263 = vmatprep.subr.mxu0 %v6056_v40  ;;  %3334 = vmatprep.subr.mxu1 %v6059_v0 }
 0xbc9   :  { %3264 = vmatpush1.msra.mxu0 %v6062_v45  ;;  %3335 = vmatpush1.msra.mxu1 %v6065_v25 }
 0xbca   :  { %3265 = vmatprep.subr.mxu0 %v6068_v30  ;;  %3336 = vmatprep.subr.mxu1 %v6071_v32 }
 0xbcb   :  { %3266 = vmatpush1.msra.mxu0 %v6074_v26  ;;  %3337 = vmatpush1.msra.mxu1 %v6077_v28 }
 0xbcc   :  { %3267 = vmatprep.subr.mxu0 %v6080_v41  ;;  %3338 = vmatprep.subr.mxu1 %v6083_v60 }
 0xbcd   :  { %3268 = vmatpush1.msra.mxu0 %v6086_v2  ;;  %3339 = vmatpush1.msra.mxu1 %v6089_v3 }
 0xbce   :  { %3269 = vmatprep.subr.mxu0 %v6092_v5  ;;  %3340 = vmatprep.subr.mxu1 %v6095_v8 }
 0xbcf   :  { %3270 = vmatpush1.msra.mxu0 %v6098_v9  ;;  %3341 = vmatpush1.msra.mxu1 %v6101_v10 }
 0xbd0   :  { %3271 = vmatprep.subr.mxu0 %v6104_v11  ;;  %3342 = vmatprep.subr.mxu1 %v6107_v12 }
 0xbd1   :  { %3272 = vmatpush1.msra.mxu0 %v6110_v13  ;;  %3343 = vmatpush1.msra.mxu1 %v6113_v14 }
 0xbd2   :  { %3273 = vmatprep.subr.mxu0 %v6992_v37  ;;  %3344 = vmatprep.subr.mxu1 %v6993_v22 }
 0xbd3   :  { %3274 = vmatpush1.msra.mxu0 %v6994_v63  ;;  %3345 = vmatpush1.msra.mxu1 %v6995_v15 }
 0xbd4   :  { %3275 = vmatprep.subr.mxu0 %v6996_v16  ;;  %3346 = vmatprep.subr.mxu1 %v6997_v17 }
 0xbd5   :  { %3276 = vmatpush1.msra.mxu0 %v6998_v52  ;;  %3347 = vmatpush1.msra.mxu1 %v6999_v23  ;;  %v7016_v23 = vld [vmem:[#allocation76_spill] sm:$0xff] }
 0xbd6   :  { %3277 = vmatprep.subr.mxu0 %v7000_v59  ;;  %3348 = vmatprep.subr.mxu1 %v7001_v20  ;;  %v7012_v20 = vld [vmem:[#allocation39_spill] sm:$0xff] }
 0xbd7   :  { %3278 = vmatpush1.msra.mxu0 %v7002_v21  ;;  %3349 = vmatpush1.msra.mxu1 %v7003_v54  ;;  %v7013_v54 = vld [vmem:[#allocation23_spill] sm:$0xff] }
 0xbd8   :  { %3279 = vmatprep.subr.mxu0 %v7004_v27  ;;  %3350 = vmatprep.subr.mxu1 %v7005_v50  ;;  %v7014_v27 = vld [vmem:[#allocation24_spill] sm:$0xff] }
 0xbd9   :  { %3280 = vmatpush1.msra.mxu0 %v7006_v58  ;;  %3351 = vmatpush1.msra.mxu1 %v7007_v43  ;;  %v7015_v58 = vld [vmem:[#allocation74_spill] sm:$0xff] }
 0xbda   :  { %3281 = vmatprep.subr.mxu0 %v7008_v42  ;;  %3352 = vmatprep.subr.mxu1 %v7009_v7 }
 0xbdb   :  { %3282 = vmatpush1.msra.mxu0 %v7010_v19  ;;  %3315 = vmatprep.mubr.f32.mxu0 %v7011_v18  ;;  %v7017_v19 = vld [vmem:[#allocation75_spill] sm:$0xff] }
 0xbdc   :  { %3353 = vmatpush1.msra.mxu1 %v7012_v20  ;;  %3386 = vmatprep.mubr.f32.mxu1 %v7011_v18  ;;  %v7018_v18 = vld [vmem:[#allocation77_spill] sm:$0xff] }
 0xbdd   :  { %3421 = vmatprep.subr.mxu0 %v7013_v54  ;;  %3492 = vmatprep.subr.mxu1 %v7014_v27 }
 0xc7c   :  { %v3146_v50 = vpop.f32.mrf.mxu0  ;;  %v3217_v43 = vpop.f32.mrf.mxu1 }
 0xc7d   :  { %v3222_v21 = vadd.f32 %v3146_v50, %v7015_v58  ;;  %v3224_v52 = vadd.f32 %v3217_v43, %v7017_v19 }
 0xc7e   :  { %v3148_v59 = vpop.f32.mrf.mxu0  ;;  %v3219_v20 = vpop.f32.mrf.mxu1 }
 0xc7f   :  { %v3226_v42 = vmul.f32 0.5, %v3222_v21  ;;  %v3223_v7 = vadd.f32 %v3148_v59, %v7016_v23  ;;  %v3225_v16 = vadd.f32 %v3219_v20, %v7018_v18 }
 0xc81   :  { %3779 = vtanh.f32 %v3226_v42  ;;  %v3230_v17 = vmul.f32 0.5, %v3223_v7  ;;  %v3235_v54 = vmul.f32 0.5, %v3225_v16 }
 0xc83   :  { %3781 = vtanh.f32 %v3230_v17 }
 0xc84   :  { %3783 = vtanh.f32 %v3224_v52 }
 0xc85   :  { %3785 = vtanh.f32 %v3235_v54 }
 0xc8e   :  { %v3780_v15 = vpop.eup %3779 }
 0xc8f   :  { %v3228_v27 = vadd.f32 1.0, %v3780_v15 }
 0xc90   :  { %v3782_v63 = vpop.eup %3781 }
 0xc91   :  { %v3229_v22 = vmul.f32 0.5, %v3228_v27  ;;  %v3232_v50 = vadd.f32 1.0, %v3782_v63  ;;  %v3784_v58 = vpop.eup %3783 }
 0xc92   :  { %v3786_v20 = vpop.eup %3785 }
 0xc93   :  { %v3233_v21 = vmul.f32 0.5, %v3232_v50  ;;  %v3240_v37 = vmul.f32 %v3784_v58, %v3229_v22  ;;  %v3237_v16 = vadd.f32 1.0, %v3786_v20 }
 0xc95   :  { %v3239_v23 = vmul.f32 %v3233_v21, %v6188_v57  ;;  %v3238_v43 = vmul.f32 0.5, %v3237_v16 }
 0xc97   :  { %v3241_v59 = vadd.f32 %v3240_v37, %v3239_v23 }
 0xc99   :  { %3787 = vtanh.f32 %v3241_v59  ;;  %v6271_v52 = vsel %vm1332_vm11, %v3241_v59, %v6188_v57  ;;  %v7046_v59 = vld [vmem:[#allocation66_spill] sm:$0xff] }
 0xca6   :  { %v3788_v15 = vpop.eup %3787 }
 0xca7   :  { %v3243_v42 = vmul.f32 %v3788_v15, %v3238_v43  ;;  %v7047_v15 = vld [vmem:[#allocation68_spill] sm:$0xff] }
 0xca9   :  { %v6276_v63 = vsel %vm1332_vm11, %v3243_v42, %v6193_v34 }
 0xcaa   :  { %3316 = vmatmul.mubr.f32.vlgmr.msra.gmra.mxu0 %v6276_v63  ;;  %3387 = vmatmul.mubr.f32.vlgmr.msra.gmra.mxu1 %v6276_v63 }
 0xcab   :  { %3422 = vmatpush1.msra.mxu0 %v5990_v51  ;;  %3493 = vmatpush1.msra.mxu1 %v5993_v61  ;;  %v7020_v51 = vld [vmem:[#allocation25_spill] sm:$0xff]  ;;  %v7021_v61 = vld [vmem:[#allocation26_spill] sm:$0xff] }
 0xcac   :  { %3423 = vmatprep.subr.mxu0 %v5996_v46  ;;  %3494 = vmatprep.subr.mxu1 %v5999_v6  ;;  %v7022_v46 = vld [vmem:[#allocation10_spill] sm:$0xff]  ;;  %v7023_v6 = vld [vmem:[#allocation11_spill] sm:$0xff] }
 0xcad   :  { %3424 = vmatpush1.msra.mxu0 %v6002_v49  ;;  %3495 = vmatpush1.msra.mxu1 %v6005_v62  ;;  %v7024_v49 = vld [vmem:[#allocation34_spill] sm:$0xff]  ;;  %v7025_v62 = vld [vmem:[#allocation36_spill] sm:$0xff] }
 0xcae   :  { %3425 = vmatprep.subr.mxu0 %v6008_v4  ;;  %3496 = vmatprep.subr.mxu1 %v6011_v44  ;;  %v7026_v4 = vld [vmem:[#allocation35_spill] sm:$0xff]  ;;  %v7027_v44 = vld [vmem:[#allocation37_spill] sm:$0xff] }
 0xcaf   :  { %3426 = vmatpush1.msra.mxu0 %v6014_v53  ;;  %3497 = vmatpush1.msra.mxu1 %v6017_v1  ;;  %v7028_v53 = vld [vmem:[#allocation27_spill] sm:$0xff]  ;;  %v7029_v1 = vld [vmem:[#allocation28_spill] sm:$0xff] }
 0xcb0   :  { %3427 = vmatprep.subr.mxu0 %v6020_v56  ;;  %3498 = vmatprep.subr.mxu1 %v6023_v55  ;;  %v7030_v56 = vld [vmem:[#allocation29_spill] sm:$0xff]  ;;  %v7031_v55 = vld [vmem:[#allocation54_spill] sm:$0xff] }
 0xcb1   :  { %3428 = vmatpush1.msra.mxu0 %v6026_v39  ;;  %3499 = vmatpush1.msra.mxu1 %v6029_v48  ;;  %v7032_v39 = vld [vmem:[#allocation56_spill] sm:$0xff]  ;;  %v7033_v48 = vld [vmem:[#allocation55_spill] sm:$0xff] }
 0xcb2   :  { %3429 = vmatprep.subr.mxu0 %v6032_v36  ;;  %3500 = vmatprep.subr.mxu1 %v6035_v47  ;;  %v7034_v36 = vld [vmem:[#allocation57_spill] sm:$0xff]  ;;  %v7035_v47 = vld [vmem:[#allocation58_spill] sm:$0xff] }
 0xcb3   :  { %3430 = vmatpush1.msra.mxu0 %v6038_v35  ;;  %3501 = vmatpush1.msra.mxu1 %v6041_v24  ;;  %v7036_v35 = vld [vmem:[#allocation62_spill] sm:$0xff]  ;;  %v7037_v24 = vld [vmem:[#allocation59_spill] sm:$0xff] }
 0xcb4   :  { %3431 = vmatprep.subr.mxu0 %v6044_v29  ;;  %3502 = vmatprep.subr.mxu1 %v6047_v31  ;;  %v7038_v29 = vld [vmem:[#allocation63_spill] sm:$0xff]  ;;  %v7039_v31 = vmov 0.0  }
 0xcb5   :  { %3432 = vmatpush1.msra.mxu0 %v6050_v38  ;;  %3503 = vmatpush1.msra.mxu1 %v6053_v33  ;;  %v7040_v38 = vld [vmem:[#allocation39_spill] sm:$0xff] }
 0xcb6   :  { %3433 = vmatprep.subr.mxu0 %v6056_v40  ;;  %3504 = vmatprep.subr.mxu1 %v6059_v0  ;;  %v7041_v40 = vld [vmem:[#allocation70_spill] sm:$0xff] }
 0xcb7   :  { %3434 = vmatpush1.msra.mxu0 %v6062_v45  ;;  %3505 = vmatpush1.msra.mxu1 %v6065_v25 }
 0xcb8   :  { %3435 = vmatprep.subr.mxu0 %v6068_v30  ;;  %3506 = vmatprep.subr.mxu1 %v6071_v32  ;;  %v7042_v32 = vld [vmem:[#allocation72_spill] sm:$0xff] }
 0xcb9   :  { %3436 = vmatpush1.msra.mxu0 %v6074_v26  ;;  %3507 = vmatpush1.msra.mxu1 %v6077_v28  ;;  %v7043_v28 = vld [vmem:[#allocation71_spill] sm:$0xff] }
 0xcba   :  { %3437 = vmatprep.subr.mxu0 %v6080_v41  ;;  %3508 = vmatprep.subr.mxu1 %v6083_v60 }
 0xcbb   :  { %3438 = vmatpush1.msra.mxu0 %v6086_v2  ;;  %3509 = vmatpush1.msra.mxu1 %v6089_v3  ;;  %v7044_v3 = vld [vmem:[#allocation73_spill] sm:$0xff] }
 0xcbc   :  { %3439 = vmatprep.subr.mxu0 %v6092_v5  ;;  %3510 = vmatprep.subr.mxu1 %v6095_v8 }
 0xcbd   :  { %3440 = vmatpush1.msra.mxu0 %v6098_v9  ;;  %3511 = vmatpush1.msra.mxu1 %v6101_v10 }
 0xcbe   :  { %3441 = vmatprep.subr.mxu0 %v6104_v11  ;;  %3512 = vmatprep.subr.mxu1 %v6107_v12 }
 0xcbf   :  { %3442 = vmatpush1.msra.mxu0 %v6110_v13  ;;  %3513 = vmatpush1.msra.mxu1 %v6113_v14 }
 0xcc0   :  { %3443 = vmatprep.subr.mxu0 %v7020_v51  ;;  %3514 = vmatprep.subr.mxu1 %v7021_v61 }
 0xcc1   :  { %3444 = vmatpush1.msra.mxu0 %v7022_v46  ;;  %3515 = vmatpush1.msra.mxu1 %v7023_v6  ;;  %v7049_v6 = vld [vmem:[#allocation69_spill] sm:$0xff] }
 0xcc2   :  { %3445 = vmatprep.subr.mxu0 %v7024_v49  ;;  %3516 = vmatprep.subr.mxu1 %v7025_v62 }
 0xcc3   :  { %3446 = vmatpush1.msra.mxu0 %v7026_v4  ;;  %3517 = vmatpush1.msra.mxu1 %v7027_v44 }
 0xcc4   :  { %3447 = vmatprep.subr.mxu0 %v7028_v53  ;;  %3518 = vmatprep.subr.mxu1 %v7029_v1 }
 0xcc5   :  { %3448 = vmatpush1.msra.mxu0 %v7030_v56  ;;  %3519 = vmatpush1.msra.mxu1 %v7031_v55 }
 0xcc6   :  { %3449 = vmatprep.subr.mxu0 %v7032_v39  ;;  %3520 = vmatprep.subr.mxu1 %v7033_v48 }
 0xcc7   :  { %3450 = vmatpush1.msra.mxu0 %v7034_v36  ;;  %3521 = vmatpush1.msra.mxu1 %v7035_v47 }
 0xcc8   :  { %3451 = vmatprep.subr.mxu0 %v7036_v35  ;;  %3522 = vmatprep.subr.mxu1 %v7037_v24 }
 0xcc9   :  { %3452 = vmatpush1.msra.mxu0 %v7038_v29  ;;  %3485 = vmatprep.mubr.f32.mxu0 %v7039_v31 }
 0xcca   :  { %3523 = vmatpush1.msra.mxu1 %v7040_v38  ;;  %3556 = vmatprep.mubr.f32.mxu1 %v7039_v31 }
 0xd6a   :  { %v3317_v33 = vpop.f32.mrf.mxu0  ;;  %v3388_v45 = vpop.f32.mrf.mxu1 }
 0xd6b   :  { %v3393_v0 = vadd.f32 %v3317_v33, %v7041_v40  ;;  %v3395_v41 = vadd.f32 %v3388_v45, %v7043_v28 }
 0xd6c   :  { %v3319_v25 = vpop.f32.mrf.mxu0  ;;  %v3390_v2 = vpop.f32.mrf.mxu1 }
 0xd6d   :  { %v3397_v30 = vmul.f32 0.5, %v3393_v0  ;;  %v3394_v26 = vadd.f32 %v3319_v25, %v7042_v32  ;;  %v3396_v5 = vadd.f32 %v3390_v2, %v7044_v3 }
 0xd6f   :  { %3789 = vtanh.f32 %v3397_v30  ;;  %v3401_v60 = vmul.f32 0.5, %v3394_v26  ;;  %v3406_v8 = vmul.f32 0.5, %v3396_v5 }
 0xd71   :  { %3791 = vtanh.f32 %v3401_v60 }
 0xd72   :  { %3793 = vtanh.f32 %v3395_v41 }
 0xd73   :  { %3795 = vtanh.f32 %v3406_v8 }
 0xd7c   :  { %v3790_v9 = vpop.eup %3789 }
 0xd7d   :  { %v3399_v10 = vadd.f32 1.0, %v3790_v9 }
 0xd7e   :  { %v3792_v11 = vpop.eup %3791 }
 0xd7f   :  { %v3400_v12 = vmul.f32 0.5, %v3399_v10  ;;  %v3403_v13 = vadd.f32 1.0, %v3792_v11  ;;  %v3794_v14 = vpop.eup %3793 }
 0xd80   :  { %v3796_v18 = vpop.eup %3795 }
 0xd81   :  { %v3404_v57 = vmul.f32 0.5, %v3403_v13  ;;  %v3411_v34 = vmul.f32 %v3794_v14, %v3400_v12  ;;  %v3408_v54 = vadd.f32 1.0, %v3796_v18 }
 0xd83   :  { %v3410_v37 = vmul.f32 %v3404_v57, %v6271_v52  ;;  %v3409_v27 = vmul.f32 0.5, %v3408_v54 }
 0xd85   :  { %v3412_v22 = vadd.f32 %v3411_v34, %v3410_v37 }
 0xd87   :  { %3797 = vtanh.f32 %v3412_v22  ;;  %v3416_v19 = vsel %vm1155_vm10, %v3412_v22, %v6271_v52  ;;  %v7048_v52 = vld [vmem:[#allocation67_spill] sm:$0xff] }
 0xd94   :  { %v3798_v50 = vpop.eup %3797 }
 0xd95   :  { %v3414_v58 = vmul.f32 %v3798_v50, %v3409_v27 }
 0xd97   :  { %v3415_v21 = vsel %vm1155_vm10, %v3414_v58, %v6276_v63 }
 0xd98   :  { %3486 = vmatmul.mubr.f32.vlgmr.msra.gmra.mxu0 %v3415_v21  ;;  %3557 = vmatmul.mubr.f32.vlgmr.msra.gmra.mxu1 %v3415_v21 }
 0xe58   :  { %v3487_v23 = vpop.f32.mrf.mxu0  ;;  %v3558_v20 = vpop.f32.mrf.mxu1 }
 0xe59   :  { %v3563_v17 = vadd.f32 %v3487_v23, %v7046_v59  ;;  %v3565_v51 = vadd.f32 %v3558_v20, %v7048_v52 }
 0xe5a   :  { %v3489_v16 = vpop.f32.mrf.mxu0  ;;  %v3560_v46 = vpop.f32.mrf.mxu1 }
 0xe5b   :  { %v3567_v43 = vmul.f32 0.5, %v3563_v17  ;;  %v3564_v42 = vadd.f32 %v3489_v16, %v7047_v15  ;;  %v3566_v49 = vadd.f32 %v3560_v46, %v7049_v6 }
 0xe5d   :  { %3799 = vtanh.f32 %v3567_v43  ;;  %v3571_v61 = vmul.f32 0.5, %v3564_v42  ;;  %v3576_v63 = vmul.f32 0.5, %v3566_v49 }
 0xe5f   :  { %3801 = vtanh.f32 %v3571_v61 }
 0xe60   :  { %3803 = vtanh.f32 %v3565_v51 }
 0xe61   :  { %3805 = vtanh.f32 %v3576_v63 }
 0xe6a   :  { %v3800_v62 = vpop.eup %3799 }
 0xe6b   :  { %v3569_v4 = vadd.f32 1.0, %v3800_v62 }
 0xe6c   :  { %v3802_v44 = vpop.eup %3801 }
 0xe6d   :  { %v3570_v53 = vmul.f32 0.5, %v3569_v4  ;;  %v3573_v1 = vadd.f32 1.0, %v3802_v44  ;;  %v3804_v56 = vpop.eup %3803 }
 0xe6e   :  { %v3806_v24 = vpop.eup %3805 }
 0xe6f   :  { %v3574_v55 = vmul.f32 0.5, %v3573_v1  ;;  %v3581_v39 = vmul.f32 %v3804_v56, %v3570_v53  ;;  %v3578_v29 = vadd.f32 1.0, %v3806_v24 }
 0xe71   :  { %v3580_v48 = vmul.f32 %v3574_v55, %v3416_v19  ;;  %v3579_v31 = vmul.f32 0.5, %v3578_v29 }
 0xe73   :  { %v3582_v36 = vadd.f32 %v3581_v39, %v3580_v48 }
 0xe75   :  { %3807 = vtanh.f32 %v3582_v36  ;;  %v3586_v35 = vsel %vm978_vm5, %v3582_v36, %v3416_v19 }
 0xe76   :  { %3640 = vst [vmem:[%s6376_s7 + $0x8] sm:$0xff] %v3586_v35 }
 0xe82   :  { %v3808_v38 = vpop.eup %3807 }
 0xe83   :  { %v3584_v33 = vmul.f32 %v3808_v38, %v3579_v31 }
 0xe85   :  { %v3585_v40 = vsel %vm978_vm5, %v3584_v33, %v3415_v21 }
 0xe86   :  { %3639 = vst [vmem:[%s6375_s6 + $0x8] sm:$0xff] %v3585_v40 }
 0xe87   :  { %3601 = vsyncpa [#allocation5], 1 }
 0xe88   :  { %3602 = vsyncpa [#allocation7], 1 }

</bundles_post_ra>
